<compile_context>
chip_gen: v5e
topology: v5e:2x2
jax: 0.10.0
libtpu: 0.0.40
codegen_flags: <defaults>
</compile_context>

<pallas_src>
import functools

import numpy as np
import jax
import jax.numpy as jnp
from jax import lax
from jax.experimental import pallas as pl
from jax.experimental.pallas import tpu as pltpu


def _round_up(x, m):
    return (x + m - 1) // m * m


def _interp_matrix(n_in, n_out):
    """align_corners=True linear interpolation matrix of shape (n_out, n_in)."""
    m = np.zeros((n_out, n_in), np.float64)
    if n_out == 1:
        src = np.zeros((1,), np.float64)
    else:
        src = np.arange(n_out, dtype=np.float64) * (n_in - 1) / (n_out - 1)
    lo = np.minimum(np.floor(src).astype(np.int64), n_in - 1)
    hi = np.minimum(lo + 1, n_in - 1)
    f = src - lo
    m[np.arange(n_out), lo] += 1.0 - f
    m[np.arange(n_out), hi] += f
    return m


def _upsample_pad_matrix(h, w, H, W, R):
    """Constant (R, h*w) matrix P such that  P @ x1.reshape(h*w, C)  is the
    bilinear x2 (align_corners=True) upsample of x1, F.pad-ed (or cropped for
    negative diffs) to (H, W), written into the row-flattened zero-padded
    (H+2, W+2) conv canvas.  Pad / slack rows of P are zero."""
    Ho, Wo = 2 * h, 2 * w
    A = _interp_matrix(h, Ho)           # (Ho, h)
    Bm = _interp_matrix(w, Wo)          # (Wo, w)
    dy, dx = H - Ho, W - Wo
    top, left = dy // 2, dx // 2        # F.pad([left, ., top, .]) offsets
    Wp = W + 2
    P = np.zeros((R, h * w), np.float32)
    for hh in range(H):
        ho = hh - top
        if not 0 <= ho < Ho:
            continue
        for ww in range(W):
            wo = ww - left
            if not 0 <= wo < Wo:
                continue
            P[(hh + 1) * Wp + (ww + 1)] = np.outer(A[ho], Bm[wo]).reshape(-1)
    return P


# ---------------------------------------------------------------------------
# Fused kernel: upsample -> pad -> concat -> (conv3x3 -> BN -> PReLU) x 2
# ---------------------------------------------------------------------------

def _up_fused_kernel(x1_ref, x2p_ref, pp_ref, mask_ref,
                     w1_ref, s1_ref, b1_ref, a1_ref,
                     w2_ref, s2_ref, b2_ref, a2_ref,
                     o_ref, xin_ref, xh_ref, acc_ref, *, H, W):
    Wp = W + 2
    M = H * Wp
    C2 = x2p_ref.shape[2]
    R = xin_ref.shape[0]

    # Bilinear x2 upsample of x1 + F.pad + conv zero-padding as ONE matmul whose
    # output rows are already in row-flattened padded-canvas order.
    up = jnp.dot(pp_ref[...], x1_ref[0], preferred_element_type=jnp.float32)

    # torch.cat([x2, x1], dim=1): two bulk channel-block stores into the padded
    # conv-1 input buffer (x2 arrives pre-padded & row-flattened; `up` already
    # contains the pad zeros) -> no per-row fills, no explicit zeroing.
    xin_ref[:, 0:C2] = x2p_ref[0]
    xin_ref[:, C2:] = up.astype(xin_ref.dtype)

    def conv3x3_bn_prelu(src_ref, w_ref, s_ref, b_ref, a_ref):
        # 3x3 conv (stride 1, pad 1) as 9 shifted (M, Cin) @ (Cin, Cout) MXU
        # matmuls over the row-flattened zero-padded image; f32 accumulation in
        # a VMEM scratch to bound vreg pressure.
        for kh in range(3):
            for kw in range(3):
                off = kh * Wp + kw
                part = jnp.dot(src_ref[off:off + M, :], w_ref[kh * 3 + kw],
                               preferred_element_type=jnp.float32)
                if kh == 0 and kw == 0:
                    acc_ref[...] = part
                else:
                    acc_ref[...] += part
        y = acc_ref[...] * s_ref[...] + b_ref[...]       # folded BatchNorm
        return jnp.where(y >= 0.0, y, a_ref[...] * y)    # PReLU

    # conv1 -> BN -> PReLU, staged into the padded conv-2 input buffer with one
    # masked bulk store (mask zeroes the 2 junk padded-width columns per row,
    # which land exactly on pad positions); only the pad border is zero-filled.
    y1 = conv3x3_bn_prelu(xin_ref, w1_ref, s1_ref, b1_ref, a1_ref)
    xh_ref[0:Wp + 1, :] = jnp.zeros((Wp + 1, xh_ref.shape[1]), xh_ref.dtype)
    xh_ref[Wp + 1 + M:, :] = jnp.zeros((R - (Wp + 1 + M), xh_ref.shape[1]),
                                       xh_ref.dtype)
    xh_ref[Wp + 1:Wp + 1 + M, :] = (y1 * mask_ref[...]).astype(xh_ref.dtype)

    # conv2 -> BN -> PReLU, single output store (junk columns are dropped by a
    # free reshape/slice in the wrapper).
    y2 = conv3x3_bn_prelu(xh_ref, w2_ref, s2_ref, b2_ref, a2_ref)
    o_ref[0] = y2.astype(o_ref.dtype)


def up_forward_nhwc(x1, x2, p):
    """NHWC entry point: x1 (B, h, w, C1) low-res, x2 (B, H, W, C2) skip.
    Returns NHWC float32 (B, H, W, Cout)."""
    B, h, w, C1 = x1.shape
    _, H, W, C2 = x2.shape
    Cout = int(p['w1'].shape[-1])
    assert p['w1'].shape == (3, 3, C1 + C2, Cout)
    assert p['w2'].shape == (3, 3, Cout, Cout)

    Hp, Wp = H + 2, W + 2
    M = H * Wp
    R = _round_up(2 * Wp + 2 + M, 16)   # padded rows incl. slack for tap reads

    # Host-built constants (embedded once under jit).
    pp = jnp.asarray(_upsample_pad_matrix(h, w, H, W, R), jnp.bfloat16)
    mask = jnp.asarray(((np.arange(M) % Wp) < W).astype(np.float32)
                       .reshape(M, 1), jnp.float32)

    # Pre-pad + row-flatten x2 into the conv canvas; this fuses with the bf16
    # cast into a single XLA pass and removes all in-kernel per-row fills.
    x2p = jnp.pad(x2.astype(jnp.bfloat16), ((0, 0), (1, 1), (1, 1), (0, 0)))
    x2p = x2p.reshape(B, Hp * Wp, C2)
    x2p = jnp.pad(x2p, ((0, 0), (0, R - Hp * Wp), (0, 0)))
    x1f = x1.astype(jnp.bfloat16).reshape(B, h * w, C1)

    args = [
        x1f, x2p, pp, mask,
        p['w1'].reshape(9, C1 + C2, Cout).astype(jnp.bfloat16),
        p['scale1'].reshape(1, Cout).astype(jnp.float32),
        p['bias1'].reshape(1, Cout).astype(jnp.float32),
        p['alpha1'].reshape(1, Cout).astype(jnp.float32),
        p['w2'].reshape(9, Cout, Cout).astype(jnp.bfloat16),
        p['scale2'].reshape(1, Cout).astype(jnp.float32),
        p['bias2'].reshape(1, Cout).astype(jnp.float32),
        p['alpha2'].reshape(1, Cout).astype(jnp.float32),
    ]
    in_specs = [
        pl.BlockSpec((1, h * w, C1), lambda b: (b, 0, 0)),
        pl.BlockSpec((1, R, C2), lambda b: (b, 0, 0)),
        pl.BlockSpec((R, h * w), lambda b: (0, 0)),
        pl.BlockSpec((M, 1), lambda b: (0, 0)),
        pl.BlockSpec((9, C1 + C2, Cout), lambda b: (0, 0, 0)),
        pl.BlockSpec((1, Cout), lambda b: (0, 0)),
        pl.BlockSpec((1, Cout), lambda b: (0, 0)),
        pl.BlockSpec((1, Cout), lambda b: (0, 0)),
        pl.BlockSpec((9, Cout, Cout), lambda b: (0, 0, 0)),
        pl.BlockSpec((1, Cout), lambda b: (0, 0)),
        pl.BlockSpec((1, Cout), lambda b: (0, 0)),
        pl.BlockSpec((1, Cout), lambda b: (0, 0)),
    ]

    y_flat = pl.pallas_call(
        functools.partial(_up_fused_kernel, H=H, W=W),
        out_shape=jax.ShapeDtypeStruct((B, M, Cout), jnp.float32),
        grid=(B,),
        in_specs=in_specs,
        out_specs=pl.BlockSpec((1, M, Cout), lambda b: (b, 0, 0)),
        scratch_shapes=[
            pltpu.VMEM((R, C1 + C2), jnp.bfloat16),   # padded conv-1 input
            pltpu.VMEM((R, Cout), jnp.bfloat16),      # padded conv-2 input
            pltpu.VMEM((M, Cout), jnp.float32),       # f32 conv accumulator
        ],
        compiler_params=pltpu.CompilerParams(dimension_semantics=("parallel",)),
    )(*args)

    # Drop the 2 junk padded-width columns per row (cheap XLA reshape + slice).
    return y_flat.reshape(B, H, Wp, Cout)[:, :, :W, :]


def up_forward(x1_nchw, x2_nchw, p):
    """up(in_ch, out_ch, bilinear=True).forward(x1, x2) with NCHW interface
    (matching the PyTorch module).  If the surrounding model is NHWC, call
    up_forward_nhwc directly and these transposes disappear."""
    x1 = jnp.transpose(x1_nchw, (0, 2, 3, 1))
    x2 = jnp.transpose(x2_nchw, (0, 2, 3, 1))
    y = up_forward_nhwc(x1, x2, p)
    return jnp.transpose(y, (0, 3, 1, 2)).astype(jnp.float32)


# ---------------------------------------------------------------------------
# Parameters (HWIO conv weights; BN folded; PReLU alpha=0.25)
# ---------------------------------------------------------------------------

def init_params(in_ch=64, out_ch=32, seed=0):
    # NOTE: weights are generated directly in HWIO; PyTorch OIHW checkpoints
    # must be permuted (2, 3, 1, 0) before use.
    keys = jax.random.split(jax.random.PRNGKey(seed), 4)
    s = np.float32(1.0 / np.sqrt(1.0 + 1e-5))   # BN fold: mean=0, var=1, eps=1e-5

    def nrm(key, shape, scale=0.1):
        return jax.random.normal(key, shape, jnp.float32) * scale

    w1, b1 = nrm(keys[0], (3, 3, in_ch, out_ch)), nrm(keys[1], (out_ch,))
    w2, b2 = nrm(keys[2], (3, 3, out_ch, out_ch)), nrm(keys[3], (out_ch,))
    return dict(
        w1=w1, scale1=jnp.full((out_ch,), s, jnp.float32), bias1=b1 * s,
        alpha1=jnp.full((out_ch,), 0.25, jnp.float32),
        w2=w2, scale2=jnp.full((out_ch,), s, jnp.float32), bias2=b2 * s,
        alpha2=jnp.full((out_ch,), 0.25, jnp.float32),
    )


# ---------------------------------------------------------------------------
# Pure-JAX f32 reference (for tolerance check only)
# ---------------------------------------------------------------------------

def _reference(x1_nchw, x2_nchw, p):
    B, C1, h, w = x1_nchw.shape
    H, W = x2_nchw.shape[2], x2_nchw.shape[3]
    A = jnp.asarray(_interp_matrix(h, 2 * h), jnp.float32)
    Bm = jnp.asarray(_interp_matrix(w, 2 * w), jnp.float32)
    x1u = jnp.einsum('oi,bciw->bcow', A, x1_nchw)
    x1u = jnp.einsum('pj,bcoj->bcop', Bm, x1u)
    dy, dx = H - x1u.shape[2], W - x1u.shape[3]
    x1u = jnp.pad(x1u, ((0, 0), (0, 0),
                        (dy // 2, dy - dy // 2), (dx // 2, dx - dx // 2)))
    x = jnp.concatenate([x2_nchw, x1u], axis=1)

    def conv_bn_prelu(x, w_hwio, scale, bias, alpha):
        y = lax.conv_general_dilated(
            x, w_hwio, (1, 1), 'SAME',
            dimension_numbers=('NCHW', 'HWIO', 'NCHW'))
        y = y * scale[None, :, None, None] + bias[None, :, None, None]
        return jnp.where(y >= 0, y, alpha[None, :, None, None] * y)

    hmid = conv_bn_prelu(x, p['w1'], p['scale1'], p['bias1'], p['alpha1'])
    return conv_bn_prelu(hmid, p['w2'], p['scale2'], p['bias2'], p['alpha2'])


if __name__ == "__main__":
    in_ch, out_ch = 64, 32
    B, H, W = 2, 16, 16
    params = init_params(in_ch, out_ch, seed=0)

    k1, k2 = jax.random.split(jax.random.PRNGKey(0))
    x1 = jax.random.normal(k1, (B, in_ch // 2, H // 2, W // 2), jnp.float32)
    x2 = jax.random.normal(k2, (B, in_ch - in_ch // 2, H, W), jnp.float32)

    fwd = jax.jit(up_forward)
    y = fwd(x1, x2, params)
    jax.block_until_ready(y)

    assert y.shape == (B, out_ch, H, W), y.shape
    assert bool(jnp.all(jnp.isfinite(y)))

    # bf16 kernel vs f32 reference: loose relative tolerance.
    y_ref = _reference(x1, x2, params)
    err = float(jnp.max(jnp.abs(y - y_ref))) / (float(jnp.max(jnp.abs(y_ref))) + 1e-6)
    assert err < 0.1, err

    print("KERNEL_OK")
</pallas_src>

<mosaic_0001>
module attributes {stable_mosaic.version = 11 : i64} {
  func.func @_up_fused_kernel(%arg0: i32, %arg1: memref<1x64x32xbf16, #tpu.memory_space<vmem>>, %arg2: memref<1x336x32xbf16, #tpu.memory_space<vmem>>, %arg3: memref<336x64xbf16, #tpu.memory_space<vmem>>, %arg4: memref<288x1xf32, #tpu.memory_space<vmem>>, %arg5: memref<9x64x32xbf16, #tpu.memory_space<vmem>>, %arg6: memref<1x32xf32, #tpu.memory_space<vmem>>, %arg7: memref<1x32xf32, #tpu.memory_space<vmem>>, %arg8: memref<1x32xf32, #tpu.memory_space<vmem>>, %arg9: memref<9x32x32xbf16, #tpu.memory_space<vmem>>, %arg10: memref<1x32xf32, #tpu.memory_space<vmem>>, %arg11: memref<1x32xf32, #tpu.memory_space<vmem>>, %arg12: memref<1x32xf32, #tpu.memory_space<vmem>>, %arg13: memref<1x288x32xf32, #tpu.memory_space<vmem>>, %arg14: memref<336x64xbf16, #tpu.memory_space<vmem>>, %arg15: memref<336x32xbf16, #tpu.memory_space<vmem>>, %arg16: memref<288x32xf32, #tpu.memory_space<vmem>>) attributes {dimension_semantics = [#tpu.dimension_semantics<parallel>], iteration_bounds = array<i64: 2>, scalar_prefetch = 0 : i64, scratch_operands = 3 : i64, tpu.core_type = #tpu.core_type<tc>, window_params = [{transform_indices = @transform_0, window_bounds = array<i64: 1, 64, 32>}, {transform_indices = @transform_1, window_bounds = array<i64: 1, 336, 32>}, {pipeline_mode = #tpu.pipeline_mode<synchronous>, transform_indices = @transform_2, window_bounds = array<i64: 336, 64>}, {pipeline_mode = #tpu.pipeline_mode<synchronous>, transform_indices = @transform_3, window_bounds = array<i64: 288, 1>}, {pipeline_mode = #tpu.pipeline_mode<synchronous>, transform_indices = @transform_4, window_bounds = array<i64: 9, 64, 32>}, {pipeline_mode = #tpu.pipeline_mode<synchronous>, transform_indices = @transform_5, window_bounds = array<i64: 1, 32>}, {pipeline_mode = #tpu.pipeline_mode<synchronous>, transform_indices = @transform_6, window_bounds = array<i64: 1, 32>}, {pipeline_mode = #tpu.pipeline_mode<synchronous>, transform_indices = @transform_7, window_bounds = array<i64: 1, 32>}, {pipeline_mode = #tpu.pipeline_mode<synchronous>, transform_indices = @transform_8, window_bounds = array<i64: 9, 32, 32>}, {pipeline_mode = #tpu.pipeline_mode<synchronous>, transform_indices = @transform_9, window_bounds = array<i64: 1, 32>}, {pipeline_mode = #tpu.pipeline_mode<synchronous>, transform_indices = @transform_10, window_bounds = array<i64: 1, 32>}, {pipeline_mode = #tpu.pipeline_mode<synchronous>, transform_indices = @transform_11, window_bounds = array<i64: 1, 32>}, {transform_indices = @transform_12, window_bounds = array<i64: 1, 288, 32>}]} {
    %c0 = arith.constant 0 : index
    %c0_0 = arith.constant 0 : index
    %0 = vector.load %arg3[%c0, %c0_0] : memref<336x64xbf16, #tpu.memory_space<vmem>>, vector<336x64xbf16>
    %c0_1 = arith.constant 0 : index
    %c0_2 = arith.constant 0 : index
    %c0_3 = arith.constant 0 : index
    %1 = vector.load %arg1[%c0_1, %c0_2, %c0_3] : memref<1x64x32xbf16, #tpu.memory_space<vmem>>, vector<1x64x32xbf16>
    %2 = vector.shape_cast %1 : vector<1x64x32xbf16> to vector<64x32xbf16>
    %cst = arith.constant dense<0.000000e+00> : vector<336x32xf32>
    %3 = tpu.matmul %0, %2, %cst {dimension_numbers = #tpu.dot_dimension_numbers<[1], [0], [0], [1], [0, 0, 1, 1], [], []>} : vector<336x64xbf16>, vector<64x32xbf16>, vector<336x32xf32> -> vector<336x32xf32>
    %c0_4 = arith.constant 0 : index
    %c0_5 = arith.constant 0 : index
    %c0_6 = arith.constant 0 : index
    %4 = vector.load %arg2[%c0_4, %c0_5, %c0_6] : memref<1x336x32xbf16, #tpu.memory_space<vmem>>, vector<1x336x32xbf16>
    %5 = vector.shape_cast %4 : vector<1x336x32xbf16> to vector<336x32xbf16>
    %c0_7 = arith.constant 0 : index
    %c0_8 = arith.constant 0 : index
    %6 = vector.load %arg14[%c0_7, %c0_8] : memref<336x64xbf16, #tpu.memory_space<vmem>>, vector<336x32xbf16>
    tpu.vector_store %arg14[%c0_7, %c0_8], %5 {strides = array<i32>} : memref<336x64xbf16, #tpu.memory_space<vmem>>, vector<336x32xbf16>,
    %7 = arith.truncf %3 : vector<336x32xf32> to vector<336x32xbf16>
    %c0_9 = arith.constant 0 : index
    %c32 = arith.constant 32 : index
    %8 = vector.load %arg14[%c0_9, %c32] : memref<336x64xbf16, #tpu.memory_space<vmem>>, vector<336x32xbf16>
    tpu.vector_store %arg14[%c0_9, %c32], %7 {strides = array<i32>} : memref<336x64xbf16, #tpu.memory_space<vmem>>, vector<336x32xbf16>,
    %c0_10 = arith.constant 0 : index
    %c0_11 = arith.constant 0 : index
    %9 = vector.load %arg14[%c0_10, %c0_11] : memref<336x64xbf16, #tpu.memory_space<vmem>>, vector<288x64xbf16>
    %c0_12 = arith.constant 0 : index
    %c0_13 = arith.constant 0 : index
    %c0_14 = arith.constant 0 : index
    %10 = vector.load %arg5[%c0_12, %c0_13, %c0_14] : memref<9x64x32xbf16, #tpu.memory_space<vmem>>, vector<1x64x32xbf16>
    %11 = vector.shape_cast %10 : vector<1x64x32xbf16> to vector<64x32xbf16>
    %cst_15 = arith.constant dense<0.000000e+00> : vector<288x32xf32>
    %12 = tpu.matmul %9, %11, %cst_15 {dimension_numbers = #tpu.dot_dimension_numbers<[1], [0], [0], [1], [0, 0, 1, 1], [], []>} : vector<288x64xbf16>, vector<64x32xbf16>, vector<288x32xf32> -> vector<288x32xf32>
    %c0_16 = arith.constant 0 : index
    %c0_17 = arith.constant 0 : index
    %13 = vector.load %arg16[%c0_16, %c0_17] : memref<288x32xf32, #tpu.memory_space<vmem>>, vector<288x32xf32>
    tpu.vector_store %arg16[%c0_16, %c0_17], %12 {strides = array<i32>} : memref<288x32xf32, #tpu.memory_space<vmem>>, vector<288x32xf32>,
    %c1 = arith.constant 1 : index
    %c0_18 = arith.constant 0 : index
    %14 = vector.load %arg14[%c1, %c0_18] : memref<336x64xbf16, #tpu.memory_space<vmem>>, vector<288x64xbf16>
    %c1_19 = arith.constant 1 : index
    %c0_20 = arith.constant 0 : index
    %c0_21 = arith.constant 0 : index
    %15 = vector.load %arg5[%c1_19, %c0_20, %c0_21] : memref<9x64x32xbf16, #tpu.memory_space<vmem>>, vector<1x64x32xbf16>
    %16 = vector.shape_cast %15 : vector<1x64x32xbf16> to vector<64x32xbf16>
    %cst_22 = arith.constant dense<0.000000e+00> : vector<288x32xf32>
    %17 = tpu.matmul %14, %16, %cst_22 {dimension_numbers = #tpu.dot_dimension_numbers<[1], [0], [0], [1], [0, 0, 1, 1], [], []>} : vector<288x64xbf16>, vector<64x32xbf16>, vector<288x32xf32> -> vector<288x32xf32>
    %c0_23 = arith.constant 0 : index
    %c0_24 = arith.constant 0 : index
    %18 = vector.load %arg16[%c0_23, %c0_24] : memref<288x32xf32, #tpu.memory_space<vmem>>, vector<288x32xf32>
    %19 = arith.addf %18, %17 : vector<288x32xf32>
    %c0_25 = arith.constant 0 : index
    %c0_26 = arith.constant 0 : index
    %20 = vector.load %arg16[%c0_25, %c0_26] : memref<288x32xf32, #tpu.memory_space<vmem>>, vector<288x32xf32>
    tpu.vector_store %arg16[%c0_25, %c0_26], %19 {strides = array<i32>} : memref<288x32xf32, #tpu.memory_space<vmem>>, vector<288x32xf32>,
    %c2 = arith.constant 2 : index
    %c0_27 = arith.constant 0 : index
    %21 = vector.load %arg14[%c2, %c0_27] : memref<336x64xbf16, #tpu.memory_space<vmem>>, vector<288x64xbf16>
    %c2_28 = arith.constant 2 : index
    %c0_29 = arith.constant 0 : index
    %c0_30 = arith.constant 0 : index
    %22 = vector.load %arg5[%c2_28, %c0_29, %c0_30] : memref<9x64x32xbf16, #tpu.memory_space<vmem>>, vector<1x64x32xbf16>
    %23 = vector.shape_cast %22 : vector<1x64x32xbf16> to vector<64x32xbf16>
    %cst_31 = arith.constant dense<0.000000e+00> : vector<288x32xf32>
    %24 = tpu.matmul %21, %23, %cst_31 {dimension_numbers = #tpu.dot_dimension_numbers<[1], [0], [0], [1], [0, 0, 1, 1], [], []>} : vector<288x64xbf16>, vector<64x32xbf16>, vector<288x32xf32> -> vector<288x32xf32>
    %c0_32 = arith.constant 0 : index
    %c0_33 = arith.constant 0 : index
    %25 = vector.load %arg16[%c0_32, %c0_33] : memref<288x32xf32, #tpu.memory_space<vmem>>, vector<288x32xf32>
    %26 = arith.addf %25, %24 : vector<288x32xf32>
    %c0_34 = arith.constant 0 : index
    %c0_35 = arith.constant 0 : index
    %27 = vector.load %arg16[%c0_34, %c0_35] : memref<288x32xf32, #tpu.memory_space<vmem>>, vector<288x32xf32>
    tpu.vector_store %arg16[%c0_34, %c0_35], %26 {strides = array<i32>} : memref<288x32xf32, #tpu.memory_space<vmem>>, vector<288x32xf32>,
    %c18 = arith.constant 18 : index
    %c0_36 = arith.constant 0 : index
    %28 = vector.load %arg14[%c18, %c0_36] : memref<336x64xbf16, #tpu.memory_space<vmem>>, vector<288x64xbf16>
    %c3 = arith.constant 3 : index
    %c0_37 = arith.constant 0 : index
    %c0_38 = arith.constant 0 : index
    %29 = vector.load %arg5[%c3, %c0_37, %c0_38] : memref<9x64x32xbf16, #tpu.memory_space<vmem>>, vector<1x64x32xbf16>
    %30 = vector.shape_cast %29 : vector<1x64x32xbf16> to vector<64x32xbf16>
    %cst_39 = arith.constant dense<0.000000e+00> : vector<288x32xf32>
    %31 = tpu.matmul %28, %30, %cst_39 {dimension_numbers = #tpu.dot_dimension_numbers<[1], [0], [0], [1], [0, 0, 1, 1], [], []>} : vector<288x64xbf16>, vector<64x32xbf16>, vector<288x32xf32> -> vector<288x32xf32>
    %c0_40 = arith.constant 0 : index
    %c0_41 = arith.constant 0 : index
    %32 = vector.load %arg16[%c0_40, %c0_41] : memref<288x32xf32, #tpu.memory_space<vmem>>, vector<288x32xf32>
    %33 = arith.addf %32, %31 : vector<288x32xf32>
    %c0_42 = arith.constant 0 : index
    %c0_43 = arith.constant 0 : index
    %34 = vector.load %arg16[%c0_42, %c0_43] : memref<288x32xf32, #tpu.memory_space<vmem>>, vector<288x32xf32>
    tpu.vector_store %arg16[%c0_42, %c0_43], %33 {strides = array<i32>} : memref<288x32xf32, #tpu.memory_space<vmem>>, vector<288x32xf32>,
    %c19 = arith.constant 19 : index
    %c0_44 = arith.constant 0 : index
    %35 = vector.load %arg14[%c19, %c0_44] : memref<336x64xbf16, #tpu.memory_space<vmem>>, vector<288x64xbf16>
    %c4 = arith.constant 4 : index
    %c0_45 = arith.constant 0 : index
    %c0_46 = arith.constant 0 : index
    %36 = vector.load %arg5[%c4, %c0_45, %c0_46] : memref<9x64x32xbf16, #tpu.memory_space<vmem>>, vector<1x64x32xbf16>
    %37 = vector.shape_cast %36 : vector<1x64x32xbf16> to vector<64x32xbf16>
    %cst_47 = arith.constant dense<0.000000e+00> : vector<288x32xf32>
    %38 = tpu.matmul %35, %37, %cst_47 {dimension_numbers = #tpu.dot_dimension_numbers<[1], [0], [0], [1], [0, 0, 1, 1], [], []>} : vector<288x64xbf16>, vector<64x32xbf16>, vector<288x32xf32> -> vector<288x32xf32>
    %c0_48 = arith.constant 0 : index
    %c0_49 = arith.constant 0 : index
    %39 = vector.load %arg16[%c0_48, %c0_49] : memref<288x32xf32, #tpu.memory_space<vmem>>, vector<288x32xf32>
    %40 = arith.addf %39, %38 : vector<288x32xf32>
    %c0_50 = arith.constant 0 : index
    %c0_51 = arith.constant 0 : index
    %41 = vector.load %arg16[%c0_50, %c0_51] : memref<288x32xf32, #tpu.memory_space<vmem>>, vector<288x32xf32>
    tpu.vector_store %arg16[%c0_50, %c0_51], %40 {strides = array<i32>} : memref<288x32xf32, #tpu.memory_space<vmem>>, vector<288x32xf32>,
    %c20 = arith.constant 20 : index
    %c0_52 = arith.constant 0 : index
    %42 = vector.load %arg14[%c20, %c0_52] : memref<336x64xbf16, #tpu.memory_space<vmem>>, vector<288x64xbf16>
    %c5 = arith.constant 5 : index
    %c0_53 = arith.constant 0 : index
    %c0_54 = arith.constant 0 : index
    %43 = vector.load %arg5[%c5, %c0_53, %c0_54] : memref<9x64x32xbf16, #tpu.memory_space<vmem>>, vector<1x64x32xbf16>
    %44 = vector.shape_cast %43 : vector<1x64x32xbf16> to vector<64x32xbf16>
    %cst_55 = arith.constant dense<0.000000e+00> : vector<288x32xf32>
    %45 = tpu.matmul %42, %44, %cst_55 {dimension_numbers = #tpu.dot_dimension_numbers<[1], [0], [0], [1], [0, 0, 1, 1], [], []>} : vector<288x64xbf16>, vector<64x32xbf16>, vector<288x32xf32> -> vector<288x32xf32>
    %c0_56 = arith.constant 0 : index
    %c0_57 = arith.constant 0 : index
    %46 = vector.load %arg16[%c0_56, %c0_57] : memref<288x32xf32, #tpu.memory_space<vmem>>, vector<288x32xf32>
    %47 = arith.addf %46, %45 : vector<288x32xf32>
    %c0_58 = arith.constant 0 : index
    %c0_59 = arith.constant 0 : index
    %48 = vector.load %arg16[%c0_58, %c0_59] : memref<288x32xf32, #tpu.memory_space<vmem>>, vector<288x32xf32>
    tpu.vector_store %arg16[%c0_58, %c0_59], %47 {strides = array<i32>} : memref<288x32xf32, #tpu.memory_space<vmem>>, vector<288x32xf32>,
    %c36 = arith.constant 36 : index
    %c0_60 = arith.constant 0 : index
    %49 = vector.load %arg14[%c36, %c0_60] : memref<336x64xbf16, #tpu.memory_space<vmem>>, vector<288x64xbf16>
    %c6 = arith.constant 6 : index
    %c0_61 = arith.constant 0 : index
    %c0_62 = arith.constant 0 : index
    %50 = vector.load %arg5[%c6, %c0_61, %c0_62] : memref<9x64x32xbf16, #tpu.memory_space<vmem>>, vector<1x64x32xbf16>
    %51 = vector.shape_cast %50 : vector<1x64x32xbf16> to vector<64x32xbf16>
    %cst_63 = arith.constant dense<0.000000e+00> : vector<288x32xf32>
    %52 = tpu.matmul %49, %51, %cst_63 {dimension_numbers = #tpu.dot_dimension_numbers<[1], [0], [0], [1], [0, 0, 1, 1], [], []>} : vector<288x64xbf16>, vector<64x32xbf16>, vector<288x32xf32> -> vector<288x32xf32>
    %c0_64 = arith.constant 0 : index
    %c0_65 = arith.constant 0 : index
    %53 = vector.load %arg16[%c0_64, %c0_65] : memref<288x32xf32, #tpu.memory_space<vmem>>, vector<288x32xf32>
    %54 = arith.addf %53, %52 : vector<288x32xf32>
    %c0_66 = arith.constant 0 : index
    %c0_67 = arith.constant 0 : index
    %55 = vector.load %arg16[%c0_66, %c0_67] : memref<288x32xf32, #tpu.memory_space<vmem>>, vector<288x32xf32>
    tpu.vector_store %arg16[%c0_66, %c0_67], %54 {strides = array<i32>} : memref<288x32xf32, #tpu.memory_space<vmem>>, vector<288x32xf32>,
    %c37 = arith.constant 37 : index
    %c0_68 = arith.constant 0 : index
    %56 = vector.load %arg14[%c37, %c0_68] : memref<336x64xbf16, #tpu.memory_space<vmem>>, vector<288x64xbf16>
    %c7 = arith.constant 7 : index
    %c0_69 = arith.constant 0 : index
    %c0_70 = arith.constant 0 : index
    %57 = vector.load %arg5[%c7, %c0_69, %c0_70] : memref<9x64x32xbf16, #tpu.memory_space<vmem>>, vector<1x64x32xbf16>
    %58 = vector.shape_cast %57 : vector<1x64x32xbf16> to vector<64x32xbf16>
    %cst_71 = arith.constant dense<0.000000e+00> : vector<288x32xf32>
    %59 = tpu.matmul %56, %58, %cst_71 {dimension_numbers = #tpu.dot_dimension_numbers<[1], [0], [0], [1], [0, 0, 1, 1], [], []>} : vector<288x64xbf16>, vector<64x32xbf16>, vector<288x32xf32> -> vector<288x32xf32>
    %c0_72 = arith.constant 0 : index
    %c0_73 = arith.constant 0 : index
    %60 = vector.load %arg16[%c0_72, %c0_73] : memref<288x32xf32, #tpu.memory_space<vmem>>, vector<288x32xf32>
    %61 = arith.addf %60, %59 : vector<288x32xf32>
    %c0_74 = arith.constant 0 : index
    %c0_75 = arith.constant 0 : index
    %62 = vector.load %arg16[%c0_74, %c0_75] : memref<288x32xf32, #tpu.memory_space<vmem>>, vector<288x32xf32>
    tpu.vector_store %arg16[%c0_74, %c0_75], %61 {strides = array<i32>} : memref<288x32xf32, #tpu.memory_space<vmem>>, vector<288x32xf32>,
    %c38 = arith.constant 38 : index
    %c0_76 = arith.constant 0 : index
    %63 = vector.load %arg14[%c38, %c0_76] : memref<336x64xbf16, #tpu.memory_space<vmem>>, vector<288x64xbf16>
    %c8 = arith.constant 8 : index
    %c0_77 = arith.constant 0 : index
    %c0_78 = arith.constant 0 : index
    %64 = vector.load %arg5[%c8, %c0_77, %c0_78] : memref<9x64x32xbf16, #tpu.memory_space<vmem>>, vector<1x64x32xbf16>
    %65 = vector.shape_cast %64 : vector<1x64x32xbf16> to vector<64x32xbf16>
    %cst_79 = arith.constant dense<0.000000e+00> : vector<288x32xf32>
    %66 = tpu.matmul %63, %65, %cst_79 {dimension_numbers = #tpu.dot_dimension_numbers<[1], [0], [0], [1], [0, 0, 1, 1], [], []>} : vector<288x64xbf16>, vector<64x32xbf16>, vector<288x32xf32> -> vector<288x32xf32>
    %c0_80 = arith.constant 0 : index
    %c0_81 = arith.constant 0 : index
    %67 = vector.load %arg16[%c0_80, %c0_81] : memref<288x32xf32, #tpu.memory_space<vmem>>, vector<288x32xf32>
    %68 = arith.addf %67, %66 : vector<288x32xf32>
    %c0_82 = arith.constant 0 : index
    %c0_83 = arith.constant 0 : index
    %69 = vector.load %arg16[%c0_82, %c0_83] : memref<288x32xf32, #tpu.memory_space<vmem>>, vector<288x32xf32>
    tpu.vector_store %arg16[%c0_82, %c0_83], %68 {strides = array<i32>} : memref<288x32xf32, #tpu.memory_space<vmem>>, vector<288x32xf32>,
    %c0_84 = arith.constant 0 : index
    %c0_85 = arith.constant 0 : index
    %70 = vector.load %arg16[%c0_84, %c0_85] : memref<288x32xf32, #tpu.memory_space<vmem>>, vector<288x32xf32>
    %c0_86 = arith.constant 0 : index
    %c0_87 = arith.constant 0 : index
    %71 = vector.load %arg6[%c0_86, %c0_87] : memref<1x32xf32, #tpu.memory_space<vmem>>, vector<1x32xf32>
    %72 = vector.broadcast %71 : vector<1x32xf32> to vector<288x32xf32>
    %73 = arith.mulf %70, %72 : vector<288x32xf32>
    %c0_88 = arith.constant 0 : index
    %c0_89 = arith.constant 0 : index
    %74 = vector.load %arg7[%c0_88, %c0_89] : memref<1x32xf32, #tpu.memory_space<vmem>>, vector<1x32xf32>
    %75 = vector.broadcast %74 : vector<1x32xf32> to vector<288x32xf32>
    %76 = arith.addf %73, %75 : vector<288x32xf32>
    %cst_90 = arith.constant 0.000000e+00 : f32
    %77 = vector.broadcast %cst_90 : f32 to vector<288x32xf32>
    %78 = arith.cmpf oge, %76, %77 : vector<288x32xf32>
    %c0_91 = arith.constant 0 : index
    %c0_92 = arith.constant 0 : index
    %79 = vector.load %arg8[%c0_91, %c0_92] : memref<1x32xf32, #tpu.memory_space<vmem>>, vector<1x32xf32>
    %80 = vector.broadcast %79 : vector<1x32xf32> to vector<288x32xf32>
    %81 = arith.mulf %80, %76 : vector<288x32xf32>
    %82 = arith.select %78, %76, %81 : vector<288x32xi1>, vector<288x32xf32>
    %cst_93 = arith.constant 0.000000e+00 : bf16
    %83 = vector.broadcast %cst_93 : bf16 to vector<19x32xbf16>
    %c0_94 = arith.constant 0 : index
    %c0_95 = arith.constant 0 : index
    %84 = vector.load %arg15[%c0_94, %c0_95] : memref<336x32xbf16, #tpu.memory_space<vmem>>, vector<19x32xbf16>
    tpu.vector_store %arg15[%c0_94, %c0_95], %83 {strides = array<i32>} : memref<336x32xbf16, #tpu.memory_space<vmem>>, vector<19x32xbf16>,
    %cst_96 = arith.constant 0.000000e+00 : bf16
    %85 = vector.broadcast %cst_96 : bf16 to vector<29x32xbf16>
    %c307 = arith.constant 307 : index
    %c0_97 = arith.constant 0 : index
    %86 = vector.load %arg15[%c307, %c0_97] : memref<336x32xbf16, #tpu.memory_space<vmem>>, vector<29x32xbf16>
    tpu.vector_store %arg15[%c307, %c0_97], %85 {strides = array<i32>} : memref<336x32xbf16, #tpu.memory_space<vmem>>, vector<29x32xbf16>,
    %c0_98 = arith.constant 0 : index
    %c0_99 = arith.constant 0 : index
    %87 = vector.load %arg4[%c0_98, %c0_99] : memref<288x1xf32, #tpu.memory_space<vmem>>, vector<288x1xf32>
    %88 = vector.broadcast %87 : vector<288x1xf32> to vector<288x32xf32>
    %89 = arith.mulf %82, %88 : vector<288x32xf32>
    %90 = arith.truncf %89 : vector<288x32xf32> to vector<288x32xbf16>
    %c19_100 = arith.constant 19 : index
    %c0_101 = arith.constant 0 : index
    %91 = vector.load %arg15[%c19_100, %c0_101] : memref<336x32xbf16, #tpu.memory_space<vmem>>, vector<288x32xbf16>
    tpu.vector_store %arg15[%c19_100, %c0_101], %90 {strides = array<i32>} : memref<336x32xbf16, #tpu.memory_space<vmem>>, vector<288x32xbf16>,
    %c0_102 = arith.constant 0 : index
    %c0_103 = arith.constant 0 : index
    %92 = vector.load %arg15[%c0_102, %c0_103] : memref<336x32xbf16, #tpu.memory_space<vmem>>, vector<288x32xbf16>
    %c0_104 = arith.constant 0 : index
    %c0_105 = arith.constant 0 : index
    %c0_106 = arith.constant 0 : index
    %93 = vector.load %arg9[%c0_104, %c0_105, %c0_106] : memref<9x32x32xbf16, #tpu.memory_space<vmem>>, vector<1x32x32xbf16>
    %94 = vector.shape_cast %93 : vector<1x32x32xbf16> to vector<32x32xbf16>
    %cst_107 = arith.constant dense<0.000000e+00> : vector<288x32xf32>
    %95 = tpu.matmul %92, %94, %cst_107 {dimension_numbers = #tpu.dot_dimension_numbers<[1], [0], [0], [1], [0, 0, 1, 1], [], []>} : vector<288x32xbf16>, vector<32x32xbf16>, vector<288x32xf32> -> vector<288x32xf32>
    %c0_108 = arith.constant 0 : index
    %c0_109 = arith.constant 0 : index
    %96 = vector.load %arg16[%c0_108, %c0_109] : memref<288x32xf32, #tpu.memory_space<vmem>>, vector<288x32xf32>
    tpu.vector_store %arg16[%c0_108, %c0_109], %95 {strides = array<i32>} : memref<288x32xf32, #tpu.memory_space<vmem>>, vector<288x32xf32>,
    %c1_110 = arith.constant 1 : index
    %c0_111 = arith.constant 0 : index
    %97 = vector.load %arg15[%c1_110, %c0_111] : memref<336x32xbf16, #tpu.memory_space<vmem>>, vector<288x32xbf16>
    %c1_112 = arith.constant 1 : index
    %c0_113 = arith.constant 0 : index
    %c0_114 = arith.constant 0 : index
    %98 = vector.load %arg9[%c1_112, %c0_113, %c0_114] : memref<9x32x32xbf16, #tpu.memory_space<vmem>>, vector<1x32x32xbf16>
    %99 = vector.shape_cast %98 : vector<1x32x32xbf16> to vector<32x32xbf16>
    %cst_115 = arith.constant dense<0.000000e+00> : vector<288x32xf32>
    %100 = tpu.matmul %97, %99, %cst_115 {dimension_numbers = #tpu.dot_dimension_numbers<[1], [0], [0], [1], [0, 0, 1, 1], [], []>} : vector<288x32xbf16>, vector<32x32xbf16>, vector<288x32xf32> -> vector<288x32xf32>
    %c0_116 = arith.constant 0 : index
    %c0_117 = arith.constant 0 : index
    %101 = vector.load %arg16[%c0_116, %c0_117] : memref<288x32xf32, #tpu.memory_space<vmem>>, vector<288x32xf32>
    %102 = arith.addf %101, %100 : vector<288x32xf32>
    %c0_118 = arith.constant 0 : index
    %c0_119 = arith.constant 0 : index
    %103 = vector.load %arg16[%c0_118, %c0_119] : memref<288x32xf32, #tpu.memory_space<vmem>>, vector<288x32xf32>
    tpu.vector_store %arg16[%c0_118, %c0_119], %102 {strides = array<i32>} : memref<288x32xf32, #tpu.memory_space<vmem>>, vector<288x32xf32>,
    %c2_120 = arith.constant 2 : index
    %c0_121 = arith.constant 0 : index
    %104 = vector.load %arg15[%c2_120, %c0_121] : memref<336x32xbf16, #tpu.memory_space<vmem>>, vector<288x32xbf16>
    %c2_122 = arith.constant 2 : index
    %c0_123 = arith.constant 0 : index
    %c0_124 = arith.constant 0 : index
    %105 = vector.load %arg9[%c2_122, %c0_123, %c0_124] : memref<9x32x32xbf16, #tpu.memory_space<vmem>>, vector<1x32x32xbf16>
    %106 = vector.shape_cast %105 : vector<1x32x32xbf16> to vector<32x32xbf16>
    %cst_125 = arith.constant dense<0.000000e+00> : vector<288x32xf32>
    %107 = tpu.matmul %104, %106, %cst_125 {dimension_numbers = #tpu.dot_dimension_numbers<[1], [0], [0], [1], [0, 0, 1, 1], [], []>} : vector<288x32xbf16>, vector<32x32xbf16>, vector<288x32xf32> -> vector<288x32xf32>
    %c0_126 = arith.constant 0 : index
    %c0_127 = arith.constant 0 : index
    %108 = vector.load %arg16[%c0_126, %c0_127] : memref<288x32xf32, #tpu.memory_space<vmem>>, vector<288x32xf32>
    %109 = arith.addf %108, %107 : vector<288x32xf32>
    %c0_128 = arith.constant 0 : index
    %c0_129 = arith.constant 0 : index
    %110 = vector.load %arg16[%c0_128, %c0_129] : memref<288x32xf32, #tpu.memory_space<vmem>>, vector<288x32xf32>
    tpu.vector_store %arg16[%c0_128, %c0_129], %109 {strides = array<i32>} : memref<288x32xf32, #tpu.memory_space<vmem>>, vector<288x32xf32>,
    %c18_130 = arith.constant 18 : index
    %c0_131 = arith.constant 0 : index
    %111 = vector.load %arg15[%c18_130, %c0_131] : memref<336x32xbf16, #tpu.memory_space<vmem>>, vector<288x32xbf16>
    %c3_132 = arith.constant 3 : index
    %c0_133 = arith.constant 0 : index
    %c0_134 = arith.constant 0 : index
    %112 = vector.load %arg9[%c3_132, %c0_133, %c0_134] : memref<9x32x32xbf16, #tpu.memory_space<vmem>>, vector<1x32x32xbf16>
    %113 = vector.shape_cast %112 : vector<1x32x32xbf16> to vector<32x32xbf16>
    %cst_135 = arith.constant dense<0.000000e+00> : vector<288x32xf32>
    %114 = tpu.matmul %111, %113, %cst_135 {dimension_numbers = #tpu.dot_dimension_numbers<[1], [0], [0], [1], [0, 0, 1, 1], [], []>} : vector<288x32xbf16>, vector<32x32xbf16>, vector<288x32xf32> -> vector<288x32xf32>
    %c0_136 = arith.constant 0 : index
    %c0_137 = arith.constant 0 : index
    %115 = vector.load %arg16[%c0_136, %c0_137] : memref<288x32xf32, #tpu.memory_space<vmem>>, vector<288x32xf32>
    %116 = arith.addf %115, %114 : vector<288x32xf32>
    %c0_138 = arith.constant 0 : index
    %c0_139 = arith.constant 0 : index
    %117 = vector.load %arg16[%c0_138, %c0_139] : memref<288x32xf32, #tpu.memory_space<vmem>>, vector<288x32xf32>
    tpu.vector_store %arg16[%c0_138, %c0_139], %116 {strides = array<i32>} : memref<288x32xf32, #tpu.memory_space<vmem>>, vector<288x32xf32>,
    %c19_140 = arith.constant 19 : index
    %c0_141 = arith.constant 0 : index
    %118 = vector.load %arg15[%c19_140, %c0_141] : memref<336x32xbf16, #tpu.memory_space<vmem>>, vector<288x32xbf16>
    %c4_142 = arith.constant 4 : index
    %c0_143 = arith.constant 0 : index
    %c0_144 = arith.constant 0 : index
    %119 = vector.load %arg9[%c4_142, %c0_143, %c0_144] : memref<9x32x32xbf16, #tpu.memory_space<vmem>>, vector<1x32x32xbf16>
    %120 = vector.shape_cast %119 : vector<1x32x32xbf16> to vector<32x32xbf16>
    %cst_145 = arith.constant dense<0.000000e+00> : vector<288x32xf32>
    %121 = tpu.matmul %118, %120, %cst_145 {dimension_numbers = #tpu.dot_dimension_numbers<[1], [0], [0], [1], [0, 0, 1, 1], [], []>} : vector<288x32xbf16>, vector<32x32xbf16>, vector<288x32xf32> -> vector<288x32xf32>
    %c0_146 = arith.constant 0 : index
    %c0_147 = arith.constant 0 : index
    %122 = vector.load %arg16[%c0_146, %c0_147] : memref<288x32xf32, #tpu.memory_space<vmem>>, vector<288x32xf32>
    %123 = arith.addf %122, %121 : vector<288x32xf32>
    %c0_148 = arith.constant 0 : index
    %c0_149 = arith.constant 0 : index
    %124 = vector.load %arg16[%c0_148, %c0_149] : memref<288x32xf32, #tpu.memory_space<vmem>>, vector<288x32xf32>
    tpu.vector_store %arg16[%c0_148, %c0_149], %123 {strides = array<i32>} : memref<288x32xf32, #tpu.memory_space<vmem>>, vector<288x32xf32>,
    %c20_150 = arith.constant 20 : index
    %c0_151 = arith.constant 0 : index
    %125 = vector.load %arg15[%c20_150, %c0_151] : memref<336x32xbf16, #tpu.memory_space<vmem>>, vector<288x32xbf16>
    %c5_152 = arith.constant 5 : index
    %c0_153 = arith.constant 0 : index
    %c0_154 = arith.constant 0 : index
    %126 = vector.load %arg9[%c5_152, %c0_153, %c0_154] : memref<9x32x32xbf16, #tpu.memory_space<vmem>>, vector<1x32x32xbf16>
    %127 = vector.shape_cast %126 : vector<1x32x32xbf16> to vector<32x32xbf16>
    %cst_155 = arith.constant dense<0.000000e+00> : vector<288x32xf32>
    %128 = tpu.matmul %125, %127, %cst_155 {dimension_numbers = #tpu.dot_dimension_numbers<[1], [0], [0], [1], [0, 0, 1, 1], [], []>} : vector<288x32xbf16>, vector<32x32xbf16>, vector<288x32xf32> -> vector<288x32xf32>
    %c0_156 = arith.constant 0 : index
    %c0_157 = arith.constant 0 : index
    %129 = vector.load %arg16[%c0_156, %c0_157] : memref<288x32xf32, #tpu.memory_space<vmem>>, vector<288x32xf32>
    %130 = arith.addf %129, %128 : vector<288x32xf32>
    %c0_158 = arith.constant 0 : index
    %c0_159 = arith.constant 0 : index
    %131 = vector.load %arg16[%c0_158, %c0_159] : memref<288x32xf32, #tpu.memory_space<vmem>>, vector<288x32xf32>
    tpu.vector_store %arg16[%c0_158, %c0_159], %130 {strides = array<i32>} : memref<288x32xf32, #tpu.memory_space<vmem>>, vector<288x32xf32>,
    %c36_160 = arith.constant 36 : index
    %c0_161 = arith.constant 0 : index
    %132 = vector.load %arg15[%c36_160, %c0_161] : memref<336x32xbf16, #tpu.memory_space<vmem>>, vector<288x32xbf16>
    %c6_162 = arith.constant 6 : index
    %c0_163 = arith.constant 0 : index
    %c0_164 = arith.constant 0 : index
    %133 = vector.load %arg9[%c6_162, %c0_163, %c0_164] : memref<9x32x32xbf16, #tpu.memory_space<vmem>>, vector<1x32x32xbf16>
    %134 = vector.shape_cast %133 : vector<1x32x32xbf16> to vector<32x32xbf16>
    %cst_165 = arith.constant dense<0.000000e+00> : vector<288x32xf32>
    %135 = tpu.matmul %132, %134, %cst_165 {dimension_numbers = #tpu.dot_dimension_numbers<[1], [0], [0], [1], [0, 0, 1, 1], [], []>} : vector<288x32xbf16>, vector<32x32xbf16>, vector<288x32xf32> -> vector<288x32xf32>
    %c0_166 = arith.constant 0 : index
    %c0_167 = arith.constant 0 : index
    %136 = vector.load %arg16[%c0_166, %c0_167] : memref<288x32xf32, #tpu.memory_space<vmem>>, vector<288x32xf32>
    %137 = arith.addf %136, %135 : vector<288x32xf32>
    %c0_168 = arith.constant 0 : index
    %c0_169 = arith.constant 0 : index
    %138 = vector.load %arg16[%c0_168, %c0_169] : memref<288x32xf32, #tpu.memory_space<vmem>>, vector<288x32xf32>
    tpu.vector_store %arg16[%c0_168, %c0_169], %137 {strides = array<i32>} : memref<288x32xf32, #tpu.memory_space<vmem>>, vector<288x32xf32>,
    %c37_170 = arith.constant 37 : index
    %c0_171 = arith.constant 0 : index
    %139 = vector.load %arg15[%c37_170, %c0_171] : memref<336x32xbf16, #tpu.memory_space<vmem>>, vector<288x32xbf16>
    %c7_172 = arith.constant 7 : index
    %c0_173 = arith.constant 0 : index
    %c0_174 = arith.constant 0 : index
    %140 = vector.load %arg9[%c7_172, %c0_173, %c0_174] : memref<9x32x32xbf16, #tpu.memory_space<vmem>>, vector<1x32x32xbf16>
    %141 = vector.shape_cast %140 : vector<1x32x32xbf16> to vector<32x32xbf16>
    %cst_175 = arith.constant dense<0.000000e+00> : vector<288x32xf32>
    %142 = tpu.matmul %139, %141, %cst_175 {dimension_numbers = #tpu.dot_dimension_numbers<[1], [0], [0], [1], [0, 0, 1, 1], [], []>} : vector<288x32xbf16>, vector<32x32xbf16>, vector<288x32xf32> -> vector<288x32xf32>
    %c0_176 = arith.constant 0 : index
    %c0_177 = arith.constant 0 : index
    %143 = vector.load %arg16[%c0_176, %c0_177] : memref<288x32xf32, #tpu.memory_space<vmem>>, vector<288x32xf32>
    %144 = arith.addf %143, %142 : vector<288x32xf32>
    %c0_178 = arith.constant 0 : index
    %c0_179 = arith.constant 0 : index
    %145 = vector.load %arg16[%c0_178, %c0_179] : memref<288x32xf32, #tpu.memory_space<vmem>>, vector<288x32xf32>
    tpu.vector_store %arg16[%c0_178, %c0_179], %144 {strides = array<i32>} : memref<288x32xf32, #tpu.memory_space<vmem>>, vector<288x32xf32>,
    %c38_180 = arith.constant 38 : index
    %c0_181 = arith.constant 0 : index
    %146 = vector.load %arg15[%c38_180, %c0_181] : memref<336x32xbf16, #tpu.memory_space<vmem>>, vector<288x32xbf16>
    %c8_182 = arith.constant 8 : index
    %c0_183 = arith.constant 0 : index
    %c0_184 = arith.constant 0 : index
    %147 = vector.load %arg9[%c8_182, %c0_183, %c0_184] : memref<9x32x32xbf16, #tpu.memory_space<vmem>>, vector<1x32x32xbf16>
    %148 = vector.shape_cast %147 : vector<1x32x32xbf16> to vector<32x32xbf16>
    %cst_185 = arith.constant dense<0.000000e+00> : vector<288x32xf32>
    %149 = tpu.matmul %146, %148, %cst_185 {dimension_numbers = #tpu.dot_dimension_numbers<[1], [0], [0], [1], [0, 0, 1, 1], [], []>} : vector<288x32xbf16>, vector<32x32xbf16>, vector<288x32xf32> -> vector<288x32xf32>
    %c0_186 = arith.constant 0 : index
    %c0_187 = arith.constant 0 : index
    %150 = vector.load %arg16[%c0_186, %c0_187] : memref<288x32xf32, #tpu.memory_space<vmem>>, vector<288x32xf32>
    %151 = arith.addf %150, %149 : vector<288x32xf32>
    %c0_188 = arith.constant 0 : index
    %c0_189 = arith.constant 0 : index
    %152 = vector.load %arg16[%c0_188, %c0_189] : memref<288x32xf32, #tpu.memory_space<vmem>>, vector<288x32xf32>
    tpu.vector_store %arg16[%c0_188, %c0_189], %151 {strides = array<i32>} : memref<288x32xf32, #tpu.memory_space<vmem>>, vector<288x32xf32>,
    %c0_190 = arith.constant 0 : index
    %c0_191 = arith.constant 0 : index
    %153 = vector.load %arg16[%c0_190, %c0_191] : memref<288x32xf32, #tpu.memory_space<vmem>>, vector<288x32xf32>
    %c0_192 = arith.constant 0 : index
    %c0_193 = arith.constant 0 : index
    %154 = vector.load %arg10[%c0_192, %c0_193] : memref<1x32xf32, #tpu.memory_space<vmem>>, vector<1x32xf32>
    %155 = vector.broadcast %154 : vector<1x32xf32> to vector<288x32xf32>
    %156 = arith.mulf %153, %155 : vector<288x32xf32>
    %c0_194 = arith.constant 0 : index
    %c0_195 = arith.constant 0 : index
    %157 = vector.load %arg11[%c0_194, %c0_195] : memref<1x32xf32, #tpu.memory_space<vmem>>, vector<1x32xf32>
    %158 = vector.broadcast %157 : vector<1x32xf32> to vector<288x32xf32>
    %159 = arith.addf %156, %158 : vector<288x32xf32>
    %cst_196 = arith.constant 0.000000e+00 : f32
    %160 = vector.broadcast %cst_196 : f32 to vector<288x32xf32>
    %161 = arith.cmpf oge, %159, %160 : vector<288x32xf32>
    %c0_197 = arith.constant 0 : index
    %c0_198 = arith.constant 0 : index
    %162 = vector.load %arg12[%c0_197, %c0_198] : memref<1x32xf32, #tpu.memory_space<vmem>>, vector<1x32xf32>
    %163 = vector.broadcast %162 : vector<1x32xf32> to vector<288x32xf32>
    %164 = arith.mulf %163, %159 : vector<288x32xf32>
    %165 = arith.select %161, %159, %164 : vector<288x32xi1>, vector<288x32xf32>
    %c0_199 = arith.constant 0 : index
    %c0_200 = arith.constant 0 : index
    %c0_201 = arith.constant 0 : index
    %166 = vector.load %arg13[%c0_199, %c0_200, %c0_201] : memref<1x288x32xf32, #tpu.memory_space<vmem>>, vector<1x288x32xf32>
    %167 = vector.shape_cast %166 : vector<1x288x32xf32> to vector<288x32xf32>
    %168 = vector.shape_cast %165 : vector<288x32xf32> to vector<1x288x32xf32>
    tpu.vector_store %arg13[%c0_199, %c0_200, %c0_201], %168 {strides = array<i32>} : memref<1x288x32xf32, #tpu.memory_space<vmem>>, vector<1x288x32xf32>,
    return
  }
  func.func @transform_0(%arg0: i32) -> (i32, i32, i32) {
    %c0_i32 = arith.constant 0 : i32
    %c0_i32_0 = arith.constant 0 : i32
    %c0_i32_1 = arith.constant 0 : i32
    return %arg0, %c0_i32, %c0_i32_0 : i32, i32, i32
  }
  func.func @transform_1(%arg0: i32) -> (i32, i32, i32) {
    %c0_i32 = arith.constant 0 : i32
    %c0_i32_0 = arith.constant 0 : i32
    %c0_i32_1 = arith.constant 0 : i32
    return %arg0, %c0_i32, %c0_i32_0 : i32, i32, i32
  }
  func.func @transform_2(%arg0: i32) -> (i32, i32) {
    %c0_i32 = arith.constant 0 : i32
    %c0_i32_0 = arith.constant 0 : i32
    %c0_i32_1 = arith.constant 0 : i32
    return %c0_i32, %c0_i32_0 : i32, i32
  }
  func.func @transform_3(%arg0: i32) -> (i32, i32) {
    %c0_i32 = arith.constant 0 : i32
    %c0_i32_0 = arith.constant 0 : i32
    %c0_i32_1 = arith.constant 0 : i32
    return %c0_i32, %c0_i32_0 : i32, i32
  }
  func.func @transform_4(%arg0: i32) -> (i32, i32, i32) {
    %c0_i32 = arith.constant 0 : i32
    %c0_i32_0 = arith.constant 0 : i32
    %c0_i32_1 = arith.constant 0 : i32
    %c0_i32_2 = arith.constant 0 : i32
    return %c0_i32, %c0_i32_0, %c0_i32_1 : i32, i32, i32
  }
  func.func @transform_5(%arg0: i32) -> (i32, i32) {
    %c0_i32 = arith.constant 0 : i32
    %c0_i32_0 = arith.constant 0 : i32
    %c0_i32_1 = arith.constant 0 : i32
    return %c0_i32, %c0_i32_0 : i32, i32
  }
  func.func @transform_6(%arg0: i32) -> (i32, i32) {
    %c0_i32 = arith.constant 0 : i32
    %c0_i32_0 = arith.constant 0 : i32
    %c0_i32_1 = arith.constant 0 : i32
    return %c0_i32, %c0_i32_0 : i32, i32
  }
  func.func @transform_7(%arg0: i32) -> (i32, i32) {
    %c0_i32 = arith.constant 0 : i32
    %c0_i32_0 = arith.constant 0 : i32
    %c0_i32_1 = arith.constant 0 : i32
    return %c0_i32, %c0_i32_0 : i32, i32
  }
  func.func @transform_8(%arg0: i32) -> (i32, i32, i32) {
    %c0_i32 = arith.constant 0 : i32
    %c0_i32_0 = arith.constant 0 : i32
    %c0_i32_1 = arith.constant 0 : i32
    %c0_i32_2 = arith.constant 0 : i32
    return %c0_i32, %c0_i32_0, %c0_i32_1 : i32, i32, i32
  }
  func.func @transform_9(%arg0: i32) -> (i32, i32) {
    %c0_i32 = arith.constant 0 : i32
    %c0_i32_0 = arith.constant 0 : i32
    %c0_i32_1 = arith.constant 0 : i32
    return %c0_i32, %c0_i32_0 : i32, i32
  }
  func.func @transform_10(%arg0: i32) -> (i32, i32) {
    %c0_i32 = arith.constant 0 : i32
    %c0_i32_0 = arith.constant 0 : i32
    %c0_i32_1 = arith.constant 0 : i32
    return %c0_i32, %c0_i32_0 : i32, i32
  }
  func.func @transform_11(%arg0: i32) -> (i32, i32) {
    %c0_i32 = arith.constant 0 : i32
    %c0_i32_0 = arith.constant 0 : i32
    %c0_i32_1 = arith.constant 0 : i32
    return %c0_i32, %c0_i32_0 : i32, i32
  }
  func.func @transform_12(%arg0: i32) -> (i32, i32, i32) {
    %c0_i32 = arith.constant 0 : i32
    %c0_i32_0 = arith.constant 0 : i32
    %c0_i32_1 = arith.constant 0 : i32
    return %arg0, %c0_i32, %c0_i32_0 : i32, i32, i32
  }
}

</mosaic_0001>

<bundles_post_ra>
// kernel: up_forward.1
= control target key start
LH: loop header
LB: loop body
LE: loop exit
PB: predicated region body
PF: predicated region fallthrough
CT: control target
= control target key end

     0   :  { %s13709_s21 = smov 0   ;;  %s17455_s0 = inlined_call_operand.vmem [shape: bf16[2,64,32], index: 0, kind: input, shape index: {}]   ;;  %s17456_s1 = inlined_call_operand.vmem [shape: bf16[2,336,32], index: 1, kind: input, shape index: {}]   ;;  %s17457_s2 = inlined_call_operand.vmem [shape: bf16[336,64], index: 2, kind: input, shape index: {}]   ;;  %s17458_s3 = inlined_call_operand.vmem [shape: f32[288,1], index: 3, kind: input, shape index: {}]   ;;  %s17459_s4 = inlined_call_operand.vmem [shape: bf16[9,64,32], index: 4, kind: input, shape index: {}]   ;;  %s17460_s5 = inlined_call_operand.vmem [shape: f32[1,32], index: 5, kind: input, shape index: {}]   ;;  %s17461_s6 = inlined_call_operand.vmem [shape: f32[1,32], index: 6, kind: input, shape index: {}]   ;;  %s17462_s7 = inlined_call_operand.vmem [shape: f32[1,32], index: 7, kind: input, shape index: {}]   ;;  %s17463_s8 = inlined_call_operand.vmem [shape: bf16[9,32,32], index: 8, kind: input, shape index: {}]   ;;  %s17464_s9 = inlined_call_operand.vmem [shape: f32[1,32], index: 9, kind: input, shape index: {}]   ;;  %s17465_s10 = inlined_call_operand.vmem [shape: f32[1,32], index: 10, kind: input, shape index: {}]   ;;  %s17466_s11 = inlined_call_operand.vmem [shape: f32[1,32], index: 11, kind: input, shape index: {}]   ;;  %s17467_s12 = inlined_call_operand.vmem [shape: f32[2,288,32], index: 12, kind: output, shape index: {}]  }
   0x1 LB: > { %s11120_s22 = sadd.s32 4294967295, %s13640_s21   ;;  %p11124_p0 = scmp.ge.s32.totalorder %s13640_s21, 1  ;;  %s13640_s21 = sphi %s13709_s21, %s22_s21  }
   0x2   : > { %p372_p1 = scmp.lt.s32.totalorder %s13640_s21, 3 }
   0x4   : > { %p373_p2 = pnand %p11124_p0, %p372_p1 }
   0x5   : > { %p419_p3 = scmp.lt.s32.totalorder (!%p373_p2), %s11120_s22, 1  ;;  %s13642_s17 = smov (!%p373_p2), 32  }
   0x6   : > { %376 = sbr.rel (%p373_p2) target bundleno = 2056 (0x808), region = 68 }
   0xb   : > { %s17475_s22 = smov (!%p419_p3, %s11120_s22), 1  ;;  %v13185_v4 = vld [vmem:[%s17457_s2] sm:$0xff]  ;;  %vm614_vm0 = vcmask 523264   ;;  %v13186_v5 = vld [vmem:[%s17457_s2 + $0x8] sm:$0xff]  ;;  %v13187_v6 = vld [vmem:[%s17457_s2 + $0x10] sm:$0xff]  ;;  %vm834_vm1 = vcmask 257024  }
   0xc   : > { %s13184_s23 = sshll.u32 %s17475_s22, 5  ;;  %v13188_v7 = vld [vmem:[%s17457_s2 + $0x18] sm:$0xff]  ;;  %v13189_v8 = vld [vmem:[%s17457_s2 + $0x20] sm:$0xff]  ;;  %v13190_v9 = vld [vmem:[%s17457_s2 + $0x28] sm:$0xff]  ;;  %s13600_s28 = smul.u32 168, %s17475_s22  ;;  %vm1087_vm2 = vcmask 519424  }
   0xd   : > { %s423_s26 = scalar_lea.vmem %s17455_s0, %s13184_s23  ;;  %v13191_v10 = vld [vmem:[%s17457_s2 + $0x30] sm:$0xff]  ;;  %v13192_v11 = vld [vmem:[%s17457_s2 + $0x38] sm:$0xff]  ;;  %v13193_v12 = vld [vmem:[%s17457_s2 + $0x40] sm:$0xff]  ;;  %vm2190_vm3 = vcmask 1046528   ;;  %vm1617_vm4 = vsmask.f32 7424 }
   0xe   : > { %v13209_v0 = vld [vmem:[%s423_s26 + $0x18] sm:$0xff]  ;;  %v13208_v1 = vld [vmem:[%s423_s26 + $0x10] sm:$0xff]  ;;  %v13207_v2 = vld [vmem:[%s423_s26 + $0x8] sm:$0xff]  ;;  %s13816_s15 = scalar_lea.vmem %s17456_s1, %s13600_s28  ;;  %vm1441_vm5 = vcmask 261120   ;;  %vm3708_vm6 = vcmask 1045504   ;;  %vm5226_vm9 = vcmask 1044480  }
   0xf   : > { %682 = vmatpush.bf16.msra.mxu0 %v13209_v0  ;;  %v13206_v3 = vld [vmem:[%s423_s26] sm:$0xff]  ;;  %v13194_v15 = vld [vmem:[%s17457_s2 + $0x48] sm:$0xff]  ;;  %v13195_v18 = vld [vmem:[%s17457_s2 + $0x50] sm:$0xff]  ;;  %vm3113_vm7 = vsmask.f32 6400  ;;  %vm5779_vm10 = vcmask 254976  }
  0x10   : > { %v13196_v21 = vld [vmem:[%s17457_s2 + $0x58] sm:$0xff]  ;;  %v13197_v26 = vld [vmem:[%s17457_s2 + $0x60] sm:$0xff]  ;;  %v13198_v31 = vld [vmem:[%s17457_s2 + $0x68] sm:$0xff]  ;;  %vm4631_vm8 = vsmask.f32 5376  ;;  %vm5785_vm14 = vcmask 257025  }
  0x11   : > { %v13199_v36 = vld [vmem:[%s17457_s2 + $0x70] sm:$0xff]  ;;  %v13200_v41 = vld [vmem:[%s17457_s2 + $0x78] sm:$0xff]  ;;  %v13201_v46 = vld [vmem:[%s17457_s2 + $0x80] sm:$0xff]  ;;  %vm5780_vm11 = vsmask.f32 1280 }
  0x12   : > { %v798_v49 = vld [vmem:[%s13816_s15 + $0x18] sm:$0xf]  ;;  %v13230_v53 = vld [vmem:[%s17459_s4 + $0x10] sm:$0xff]  ;;  %v799_v54 = vld [vmem:[%s13816_s15 + $0x1c] sm:$0xf] }
  0x13   : > { %683 = vmatpush.bf16.msra.mxu0 %v13208_v1  ;;  %841 = vst.msk [vmem:[#allocation2 + $0x18] sm:$0xf] %vm834_vm1, %v798_v49  ;;  %v13231_v50 = vld [vmem:[%s17459_s4 + $0x18] sm:$0xff]  ;;  %v802_v55 = vld [vmem:[%s13816_s15 + $0x28] sm:$0xf]  ;;  %v13228_v60 = vld [vmem:[%s17459_s4] sm:$0xff] }
  0x14   : > { %13588 = vmatpush.bf16.msra.mxu1 %v13231_v50  ;;  %842 = vst.msk [vmem:[#allocation2 + $0x1c] sm:$0xf] %vm834_vm1, %v799_v54  ;;  %v13202_v56 = vld [vmem:[%s17457_s2 + $0x88] sm:$0xff]  ;;  %v800_v61 = vld [vmem:[%s13816_s15 + $0x20] sm:$0xf]  ;;  %v13275_v1 = vld [vmem:[%s17459_s4 + $0x58] sm:$0xff] }
  0x15   : > { %845 = vst.msk [vmem:[#allocation2 + $0x28] sm:$0xf] %vm834_vm1, %v802_v55  ;;  %v13229_v57 = vld [vmem:[%s17459_s4 + $0x8] sm:$0xff]  ;;  %13596 = vmatpush.bf16.msra.mxu3 %v13275_v1  ;;  %vm15288_vm12 = vmand %vm5779_vm10, %vm5780_vm11  ;;  %vm5786_vm15 = vsmask.f32 7942 }
  0x16   : > { %843 = vst.msk [vmem:[#allocation2 + $0x20] sm:$0xf] %vm834_vm1, %v800_v61  ;;  %v803_v62 = vld [vmem:[%s13816_s15 + $0x2c] sm:$0xf]  ;;  %vm15359_vm10 = vmand %vm5785_vm14, %vm5786_vm15 }
  0x17   : > { %684 = vmatpush.bf16.msra.mxu0 %v13207_v2  ;;  %846 = vst.msk [vmem:[#allocation2 + $0x2c] sm:$0xf] %vm834_vm1, %v803_v62  ;;  %v801_v2 = vld [vmem:[%s13816_s15 + $0x24] sm:$0xf] }
  0x18   : > { %13589 = vmatpush.bf16.msra.mxu1 %v13230_v53  ;;  %844 = vst.msk [vmem:[#allocation2 + $0x24] sm:$0xf] %vm834_vm1, %v801_v2 }
  0x1b   : > { %685 = vmatpush.bf16.msra.mxu0 %v13206_v3  ;;  %v13253_v3 = vld [vmem:[%s17459_s4 + $0x38] sm:$0xff] }
  0x1c   : > { %13590 = vmatpush.bf16.msra.mxu1 %v13229_v57  ;;  %13592 = vmatpush.bf16.msra.mxu2 %v13253_v3 }
  0x1e   : > { %11229 = vmatmul.msk.bf16.vlgmr.msra.gmra.mxu0 %vm614_vm0, %v13185_v4  ;;  %v13274_v4 = vld [vmem:[%s17459_s4 + $0x50] sm:$0xff] }
  0x1f   : > { %1346 = vmatpush.bf16.msrb.mxu0 %v13231_v50  ;;  %13597 = vmatpush.bf16.msra.mxu3 %v13274_v4 }
  0x20   : > { %13591 = vmatpush.bf16.msra.mxu1 %v13228_v60 }
  0x23   : > { %1347 = vmatpush.bf16.msrb.mxu0 %v13230_v53 }
  0x27   : > { %1348 = vmatpush.bf16.msrb.mxu0 %v13229_v57 }
  0x2b   : > { %1349 = vmatpush.bf16.msrb.mxu0 %v13228_v60 }
  0x2e   : > { %11230 = vmatmul.msk.bf16.gmra.mxu0 %vm614_vm0, %v13186_v5  ;;  %v13203_v5 = vld [vmem:[%s17457_s2 + $0x90] sm:$0xff] }
  0x2f   : > { %1848 = vmatpush.bf16.msra.mxu0 %v13253_v3 }
  0x3e   : > { %11231 = vmatmul.msk.bf16.gmra.mxu0 %vm614_vm0, %v13187_v6 }
  0x4e   : > { %11232 = vmatmul.msk.bf16.gmra.mxu0 %vm614_vm0, %v13188_v7  ;;  %v13252_v7 = vld [vmem:[%s17459_s4 + $0x30] sm:$0xff] }
  0x4f   : > { %13593 = vmatpush.bf16.msra.mxu2 %v13252_v7  ;;  %1849 = vmatpush.bf16.msra.mxu0 %v13252_v7 }
  0x5e   : > { %11233 = vmatmul.msk.bf16.gmra.mxu0 %vm614_vm0, %v13189_v8 }
  0x6e   : > { %11234 = vmatmul.msk.bf16.gmra.mxu0 %vm614_vm0, %v13190_v9  ;;  %v13273_v9 = vld [vmem:[%s17459_s4 + $0x48] sm:$0xff] }
  0x6f   : > { %13598 = vmatpush.bf16.msra.mxu3 %v13273_v9 }
  0x7e   : > { %11235 = vmatmul.msk.bf16.gmra.mxu0 %vm614_vm0, %v13191_v10  ;;  %v13251_v10 = vld [vmem:[%s17459_s4 + $0x28] sm:$0xff] }
  0x7f   : > { %13594 = vmatpush.bf16.msra.mxu2 %v13251_v10  ;;  %1850 = vmatpush.bf16.msra.mxu0 %v13251_v10 }
  0x8e   : > { %11236 = vmatmul.msk.bf16.gmra.mxu0 %vm614_vm0, %v13192_v11 }
  0x9b   : > { %v13758_v13 = vpop.f32.mrf.mxu0 }
  0x9e   : > { %11237 = vmatmul.msk.bf16.gmra.mxu0 %vm614_vm0, %v13193_v12  ;;  %v13272_v12 = vld [vmem:[%s17459_s4 + $0x40] sm:$0xff] }
  0x9f   : > { %13599 = vmatpush.bf16.msra.mxu3 %v13272_v12  ;;  %v812_v12 = vld [vmem:[%s13816_s15 + $0x50] sm:$0xf] }
  0xa0   : > { %855 = vst.msk [vmem:[#allocation2 + $0x50] sm:$0xf] %vm834_vm1, %v812_v12 }
  0xa3   : > { %v13761_v14 = vpop.f32.mrf.mxu0 }
  0xab   : > { %v13766_v16 = vpop.f32.mrf.mxu0 }
  0xae   : > { %11238 = vmatmul.msk.bf16.gmra.mxu0 %vm614_vm0, %v13194_v15 }
  0xb3   : > { %v13769_v17 = vpop.f32.mrf.mxu0 }
  0xbb   : > { %v13774_v19 = vpop.f32.mrf.mxu0 }
  0xbe   : > { %11239 = vmatmul.msk.bf16.gmra.mxu0 %vm614_vm0, %v13195_v18  ;;  %v13250_v18 = vld [vmem:[%s17459_s4 + $0x20] sm:$0xff] }
  0xbf   : > { %13595 = vmatpush.bf16.msra.mxu2 %v13250_v18  ;;  %1851 = vmatpush.bf16.msra.mxu0 %v13250_v18 }
  0xc3   : > { %v13777_v20 = vpop.f32.mrf.mxu0 }
  0xcb   : > { %v702_v22 = vpop.f32.mrf.mxu0 }
  0xcc   : > { %v883_v23 = vpack.c.bf16 %v702_v22, %v702_v22  ;;  %v13297_v22 = vld [vmem:[%s17459_s4 + $0x78] sm:$0xff] }
  0xcd   : > { %2771 = vmatpush.bf16.msrb.mxu1 %v13297_v22  ;;  %v13296_v22 = vld [vmem:[%s17459_s4 + $0x70] sm:$0xff] }
  0xce   : > { %11240 = vmatmul.msk.bf16.gmra.mxu0 %vm614_vm0, %v13196_v21  ;;  %973 = vrot.lane.b32.xlu0 %v883_v23, %s13642_s17  ;;  %v13319_v23 = vld [vmem:[%s17459_s4 + $0x98] sm:$0xff] }
  0xcf   : > { %3366 = vmatpush.bf16.msrb.mxu2 %v13319_v23  ;;  %v810_v23 = vld [vmem:[%s13816_s15 + $0x48] sm:$0xf] }
  0xd0   : > { %853 = vst.msk [vmem:[#allocation2 + $0x48] sm:$0xf] %vm834_vm1, %v810_v23 }
  0xd1   : > { %2772 = vmatpush.bf16.msrb.mxu1 %v13296_v22 }
  0xd3   : > { %v704_v24 = vpop.f32.mrf.mxu0 }
  0xd4   : > { %v884_v25 = vpack.c.bf16 %v704_v24, %v704_v24  ;;  %v806_v24 = vld [vmem:[%s13816_s15 + $0x38] sm:$0xf] }
  0xd5   : > { %849 = vst.msk [vmem:[#allocation2 + $0x38] sm:$0xf] %vm834_vm1, %v806_v24 }
  0xd6   : > { %975 = vrot.lane.b32.xlu0 %v884_v25, %s13642_s17 }
  0xdb   : > { %v707_v27 = vpop.f32.mrf.mxu0 }
  0xdc   : > { %v885_v28 = vpack.c.bf16 %v707_v27, %v707_v27  ;;  %v13204_v27 = vld [vmem:[%s17457_s2 + $0x98] sm:$0xff] }
  0xde   : > { %11241 = vmatmul.msk.bf16.gmra.mxu0 %vm614_vm0, %v13197_v26  ;;  %977 = vrot.lane.b32.xlu1 %v885_v28, %s13642_s17 }
  0xe3   : > { %v709_v29 = vpop.f32.mrf.mxu0 }
  0xe4   : > { %v886_v30 = vpack.c.bf16 %v709_v29, %v709_v29 }
  0xe6   : > { %979 = vrot.lane.b32.xlu1 %v886_v30, %s13642_s17  ;;  %v804_v30 = vld [vmem:[%s13816_s15 + $0x30] sm:$0xf] }
  0xe7   : > { %847 = vst.msk [vmem:[#allocation2 + $0x30] sm:$0xf] %vm834_vm1, %v804_v30 }
  0xeb   : > { %v712_v32 = vpop.f32.mrf.mxu0 }
  0xec   : > { %v887_v33 = vpack.c.bf16 %v712_v32, %v712_v32 }
  0xee   : > { %11242 = vmatmul.msk.bf16.gmra.mxu0 %vm614_vm0, %v13198_v31  ;;  %981 = vrot.lane.b32.xlu2 %v887_v33, %s13642_s17 }
  0xf3   : > { %v714_v34 = vpop.f32.mrf.mxu0 }
  0xf4   : > { %v888_v35 = vpack.c.bf16 %v714_v34, %v714_v34 }
  0xf6   : > { %983 = vrot.lane.b32.xlu2 %v888_v35, %s13642_s17 }
  0xfb   : > { %v717_v37 = vpop.f32.mrf.mxu0 }
  0xfc   : > { %v889_v38 = vpack.c.bf16 %v717_v37, %v717_v37 }
  0xfe   : > { %11243 = vmatmul.msk.bf16.gmra.mxu0 %vm614_vm0, %v13199_v36  ;;  %985 = vrot.lane.b32.xlu0 %v889_v38, %s13642_s17  ;;  %v805_v36 = vld [vmem:[%s13816_s15 + $0x34] sm:$0xf] }
  0xff   : > { %848 = vst.msk [vmem:[#allocation2 + $0x34] sm:$0xf] %vm834_vm1, %v805_v36  ;;  %v13318_v36 = vld [vmem:[%s17459_s4 + $0x90] sm:$0xff] }
 0x100   : > { %3367 = vmatpush.bf16.msrb.mxu2 %v13318_v36 }
 0x103   : > { %v719_v39 = vpop.f32.mrf.mxu0 }
 0x104   : > { %v890_v40 = vpack.c.bf16 %v719_v39, %v719_v39 }
 0x106   : > { %987 = vrot.lane.b32.xlu1 %v890_v40, %s13642_s17 }
 0x10b   : > { %v722_v42 = vpop.f32.mrf.mxu0 }
 0x10c   : > { %v891_v43 = vpack.c.bf16 %v722_v42, %v722_v42 }
 0x10e   : > { %11244 = vmatmul.msk.bf16.gmra.mxu0 %vm614_vm0, %v13200_v41  ;;  %989 = vrot.lane.b32.xlu2 %v891_v43, %s13642_s17  ;;  %v809_v43 = vld [vmem:[%s13816_s15 + $0x44] sm:$0xf] }
 0x10f   : > { %852 = vst.msk [vmem:[#allocation2 + $0x44] sm:$0xf] %vm834_vm1, %v809_v43  ;;  %v815_v43 = vld [vmem:[%s13816_s15 + $0x5c] sm:$0xf] }
 0x110   : > { %858 = vst.msk [vmem:[#allocation2 + $0x5c] sm:$0xf] %vm834_vm1, %v815_v43  ;;  %v880_v43 = vpack.c.bf16 %v13769_v17, %v13769_v17  ;;  %v13317_v17 = vld [vmem:[%s17459_s4 + $0x88] sm:$0xff] }
 0x111   : > { %3368 = vmatpush.bf16.msrb.mxu2 %v13317_v17 }
 0x113   : > { %v724_v44 = vpop.f32.mrf.mxu0 }
 0x114   : > { %v892_v45 = vpack.c.bf16 %v724_v44, %v724_v44 }
 0x116   : > { %991 = vrot.lane.b32.xlu0 %v892_v45, %s13642_s17 }
 0x11b   : > { %v727_v47 = vpop.f32.mrf.mxu0 }
 0x11c   : > { %v893_v48 = vpack.c.bf16 %v727_v47, %v727_v47 }
 0x11e   : > { %11245 = vmatmul.msk.bf16.gmra.mxu0 %vm614_vm0, %v13201_v46  ;;  %993 = vrot.lane.b32.xlu1 %v893_v48, %s13642_s17 }
 0x123   : > { %v729_v51 = vpop.f32.mrf.mxu0 }
 0x124   : > { %v894_v52 = vpack.c.bf16 %v729_v51, %v729_v51 }
 0x126   : > { %995 = vrot.lane.b32.xlu2 %v894_v52, %s13642_s17 }
 0x12b   : > { %v732_v58 = vpop.f32.mrf.mxu0 }
 0x12c   : > { %v895_v59 = vpack.c.bf16 %v732_v58, %v732_v58  ;;  %v807_v58 = vld [vmem:[%s13816_s15 + $0x3c] sm:$0xf] }
 0x12d   : > { %850 = vst.msk [vmem:[#allocation2 + $0x3c] sm:$0xf] %vm834_vm1, %v807_v58 }
 0x12e   : > { %11246 = vmatmul.msk.bf16.gmra.mxu0 %vm614_vm0, %v13202_v56  ;;  %997 = vrot.lane.b32.xlu0 %v895_v59, %s13642_s17 }
 0x133   : > { %v734_v63 = vpop.f32.mrf.mxu0 }
 0x134   : > { %v896_v0 = vpack.c.bf16 %v734_v63, %v734_v63 }
 0x136   : > { %999 = vrot.lane.b32.xlu1 %v896_v0, %s13642_s17  ;;  %v808_v0 = vld [vmem:[%s13816_s15 + $0x40] sm:$0xf] }
 0x137   : > { %851 = vst.msk [vmem:[#allocation2 + $0x40] sm:$0xf] %vm834_vm1, %v808_v0 }
 0x13b   : > { %v737_v6 = vpop.f32.mrf.mxu0 }
 0x13c   : > { %v897_v8 = vpack.c.bf16 %v737_v6, %v737_v6 }
 0x13e   : > { %11247 = vmatmul.msk.bf16.gmra.mxu0 %vm614_vm0, %v13203_v5  ;;  %1001 = vrot.lane.b32.xlu2 %v897_v8, %s13642_s17 }
 0x140   : > { %v974_v11 = vpop.permute.xlu0 %973 }
 0x141   : > { %1094 = vst.msk [vmem:[#allocation2 + $0x18] sm:$0xf] %vm1087_vm2, %v974_v11 }
 0x143   : > { %v739_v15 = vpop.f32.mrf.mxu0 }
 0x144   : > { %v898_v21 = vpack.c.bf16 %v739_v15, %v739_v15 }
 0x146   : > { %1003 = vrot.lane.b32.xlu0 %v898_v21, %s13642_s17 }
 0x148   : > { %v976_v25 = vpop.permute.xlu0 %975  ;;  %v982_v26 = vpop.permute.xlu2 %981 }
 0x149   : > { %1095 = vst.msk [vmem:[#allocation2 + $0x1c] sm:$0xf] %vm1087_vm2, %v976_v25 }
 0x14a   : > { %1098 = vst.msk [vmem:[#allocation2 + $0x28] sm:$0xf] %vm1087_vm2, %v982_v26 }
 0x14b   : > { %v742_v28 = vpop.f32.mrf.mxu0 }
 0x14c   : > { %v899_v29 = vpack.c.bf16 %v742_v28, %v742_v28 }
 0x14e   : > { %11248 = vmatmul.msk.bf16.gmra.mxu0 %vm614_vm0, %v13204_v27  ;;  %1005 = vrot.lane.b32.xlu1 %v899_v29, %s13642_s17 }
 0x150   : > { %v978_v31 = vpop.permute.xlu1 %977  ;;  %v984_v32 = vpop.permute.xlu2 %983  ;;  %v13213_v33 = vld [vmem:[#allocation2 + $0x18] sm:$0xff] }
 0x151   : > { %1096 = vst.msk [vmem:[#allocation2 + $0x20] sm:$0xf] %vm1087_vm2, %v978_v31  ;;  %11341 = vmatmul.msk.bf16.vlgmr.msra.gmra.mxu1 %vm614_vm0, %v13213_v33  ;;  %v13235_v38 = vld [vmem:[#allocation2 + $0x18] sm:$0xff] }
 0x152   : > { %1099 = vst.msk [vmem:[#allocation2 + $0x2c] sm:$0xf] %vm1087_vm2, %v984_v32  ;;  %v1642_v41 = vshll.u32 %v13235_v38, 16  ;;  %v13907_v42 = vld [vmem:[#allocation2 + $0x18] sm:$0xff]  ;;  %v1646_v50 = vshrl.u32 %v13235_v38, 16 }
 0x153   : > { %v744_v34 = vpop.f32.mrf.mxu0  ;;  %v2196_v48 = vrot.slane %v13907_v42, 1  ;;  %v811_v38 = vld [vmem:[%s13816_s15 + $0x4c] sm:$0xf]  ;;  %v5821_v42 = vld [vmem:[%s17458_s3 + $0xd8] sm:$0xff] }
 0x154   : > { %v900_v35 = vpack.c.bf16 %v744_v34, %v744_v34  ;;  %v13911_v47 = vrot.slane %v1642_v41, 1  ;;  %854 = vst.msk [vmem:[#allocation2 + $0x4c] sm:$0xf] %vm834_vm1, %v811_v38 }
 0x156   : > { %1007 = vrot.lane.b32.xlu2 %v900_v35, %s13642_s17  ;;  %v1648_v55 = vor.u32 %v1646_v50, %v13911_v47 }
 0x158   : > { %v980_v37 = vpop.permute.xlu1 %979 }
 0x159   : > { %1097 = vst.msk [vmem:[#allocation2 + $0x24] sm:$0xf] %vm1087_vm2, %v980_v37  ;;  %v13237_v62 = vld [vmem:[#allocation2 + $0x28] sm:$0xff] }
 0x15a   : > { %v13259_v63 = vld [vmem:[#allocation2 + $0x28] sm:$0xff]  ;;  %v1658_v4 = vshll.u32 %v13237_v62, 16  ;;  %v1662_v29 = vshrl.u32 %v13237_v62, 16 }
 0x15b   : > { %v747_v39 = vpop.f32.mrf.mxu0  ;;  %v13215_v2 = vld [vmem:[#allocation2 + $0x28] sm:$0xff]  ;;  %v2200_v5 = vrot.slane %v13259_v63, 1 }
 0x15c   : > { %v901_v40 = vpack.c.bf16 %v747_v39, %v747_v39  ;;  %v1660_v10 = vrot.slane %v1658_v4, 1 }
 0x15e   : > { %1009 = vrot.lane.b32.xlu0 %v901_v40, %s13642_s17  ;;  %v1664_v34 = vor.u32 %v1662_v29, %v1660_v10 }
 0x160   : > { %v13214_v44 = vld [vmem:[#allocation2 + $0x20] sm:$0xff] }
 0x161   : > { %v13258_v45 = vld [vmem:[#allocation2 + $0x20] sm:$0xff]  ;;  %11342 = vmatmul.msk.bf16.gmra.mxu1 %vm614_vm0, %v13214_v44 }
 0x162   : > { %v13236_v46 = vld [vmem:[#allocation2 + $0x20] sm:$0xff]  ;;  %v2198_v49 = vrot.slane %v13258_v45, 1 }
 0x163   : > { %v1650_v51 = vshll.u32 %v13236_v46, 16  ;;  %v749_v52 = vpop.f32.mrf.mxu0  ;;  %v1654_v3 = vshrl.u32 %v13236_v46, 16 }
 0x164   : > { %v902_v53 = vpack.c.bf16 %v749_v52, %v749_v52  ;;  %v2199_v54 = vsel %vm2190_vm3, %v2196_v48, %v2198_v49  ;;  %v2201_v9 = vsel %vm2190_vm3, %v2198_v49, %v2200_v5 }
 0x165   : > { %v1652_v56 = vrot.slane %v1650_v51, 1  ;;  %11569 = vmatmul.msk.bf16.vlgmr.msra.gmra.mxu3 %vm614_vm0, %v2199_v54 }
 0x166   : > { %1011 = vrot.lane.b32.xlu1 %v902_v53, %s13642_s17 }
 0x167   : > { %v1653_v57 = vsel %vm1617_vm4, %v1648_v55, %v1652_v56  ;;  %v1656_v6 = vor.u32 %v1654_v3, %v1652_v56 }
 0x168   : > { %11455 = vmatmul.msk.bf16.vlgmr.msra.gmra.mxu2 %vm614_vm0, %v1653_v57  ;;  %v990_v59 = vpop.permute.xlu2 %989 }
 0x169   : > { %1102 = vst.msk [vmem:[#allocation2 + $0x38] sm:$0xf] %vm1087_vm2, %v990_v59  ;;  %v1661_v11 = vsel %vm1617_vm4, %v1656_v6, %v1660_v10  ;;  %v813_v59 = vld [vmem:[%s13816_s15 + $0x54] sm:$0xf] }
 0x16a   : > { %856 = vst.msk [vmem:[#allocation2 + $0x54] sm:$0xf] %vm834_vm1, %v813_v59 }
 0x16b   : > { %v752_v60 = vpop.f32.mrf.mxu0 }
 0x16c   : > { %v903_v61 = vpack.c.bf16 %v752_v60, %v752_v60 }
 0x16e   : > { %1013 = vrot.lane.b32.xlu2 %v903_v61, %s13642_s17 }
 0x170   : > { %v986_v1 = vpop.permute.xlu0 %985 }
 0x171   : > { %1100 = vst.msk [vmem:[#allocation2 + $0x30] sm:$0xf] %vm1087_vm2, %v986_v1  ;;  %11343 = vmatmul.msk.bf16.gmra.mxu1 %vm614_vm0, %v13215_v2  ;;  %v814_v2 = vld [vmem:[%s13816_s15 + $0x58] sm:$0xf] }
 0x172   : > { %857 = vst.msk [vmem:[#allocation2 + $0x58] sm:$0xf] %vm834_vm1, %v814_v2 }
 0x173   : > { %v754_v7 = vpop.f32.mrf.mxu0 }
 0x174   : > { %v904_v8 = vpack.c.bf16 %v754_v7, %v754_v7 }
 0x175   : > { %11570 = vmatmul.msk.bf16.gmra.mxu3 %vm614_vm0, %v2201_v9 }
 0x176   : > { %1015 = vrot.lane.b32.xlu0 %v904_v8, %s13642_s17 }
 0x178   : > { %11456 = vmatmul.msk.bf16.gmra.mxu2 %vm614_vm0, %v1661_v11  ;;  %v988_v15 = vpop.permute.xlu1 %987 }
 0x179   : > { %1101 = vst.msk [vmem:[#allocation2 + $0x34] sm:$0xf] %vm1087_vm2, %v988_v15  ;;  %v818_v15 = vld [vmem:[%s13816_s15 + $0x68] sm:$0xf] }
 0x17a   : > { %861 = vst.msk [vmem:[#allocation2 + $0x68] sm:$0xf] %vm834_vm1, %v818_v15 }
 0x17b   : > { %v757_v18 = vpop.f32.mrf.mxu0 }
 0x17c   : > { %v905_v21 = vpack.c.bf16 %v757_v18, %v757_v18 }
 0x17e   : > { %1017 = vrot.lane.b32.xlu1 %v905_v21, %s13642_s17 }
 0x180   : > { %v996_v24 = vpop.permute.xlu2 %995  ;;  %v13216_v25 = vld [vmem:[#allocation2 + $0x30] sm:$0xff] }
 0x181   : > { %v13260_v26 = vld [vmem:[#allocation2 + $0x30] sm:$0xff]  ;;  %1105 = vst.msk [vmem:[#allocation2 + $0x44] sm:$0xf] %vm1087_vm2, %v996_v24  ;;  %11344 = vmatmul.msk.bf16.gmra.mxu1 %vm614_vm0, %v13216_v25 }
 0x182   : > { %v13238_v27 = vld [vmem:[#allocation2 + $0x30] sm:$0xff]  ;;  %v2202_v28 = vrot.slane %v13260_v26, 1 }
 0x183   : > { %v1666_v30 = vshll.u32 %v13238_v27, 16  ;;  %v759_v31 = vpop.f32.mrf.mxu0  ;;  %v1670_v51 = vshrl.u32 %v13238_v27, 16  ;;  %v816_v27 = vld [vmem:[%s13816_s15 + $0x60] sm:$0xf] }
 0x184   : > { %v906_v32 = vpack.c.bf16 %v759_v31, %v759_v31  ;;  %v2203_v33 = vsel %vm2190_vm3, %v2200_v5, %v2202_v28  ;;  %859 = vst.msk [vmem:[#allocation2 + $0x60] sm:$0xf] %vm834_vm1, %v816_v27  ;;  %v879_v31 = vpack.c.bf16 %v13766_v16, %v13766_v16 }
 0x185   : > { %v1668_v35 = vrot.slane %v1666_v30, 1  ;;  %11571 = vmatmul.msk.bf16.gmra.mxu3 %vm614_vm0, %v2203_v33  ;;  %v13643_v33 = vmov 0  }
 0x186   : > { %1019 = vrot.lane.b32.xlu2 %v906_v32, %s13642_s17  ;;  %5777 = vst.msk [vmem:[#allocation3] sm:$0xf] %vm834_vm1, %v13643_v33  ;;  %13612 = vset.pattern.permute.xlu0 %v13643_v33 }
 0x187   : > { %v1669_v37 = vsel %vm1617_vm4, %v1664_v34, %v1668_v35  ;;  %v1672_v56 = vor.u32 %v1670_v51, %v1668_v35  ;;  %13614 = vset.pattern.permute.xlu2 %v13643_v33  ;;  %5778 = vst.msk [vmem:[#allocation3 + $0x4] sm:$0xf] %vm834_vm1, %v13643_v33  ;;  %13613 = vset.pattern.permute.xlu1 %v13643_v33 }
 0x188   : > { %11457 = vmatmul.msk.bf16.gmra.mxu2 %vm614_vm0, %v1669_v37  ;;  %v992_v39 = vpop.permute.xlu0 %991  ;;  %5791 = vst.msk [vmem:[#allocation3 + $0x9c] sm:$0xf] %vm834_vm1, %v13643_v33 }
 0x189   : > { %1103 = vst.msk [vmem:[#allocation2 + $0x3c] sm:$0xf] %vm1087_vm2, %v992_v39  ;;  %v817_v39 = vld [vmem:[%s13816_s15 + $0x64] sm:$0xf] }
 0x18a   : > { %5792 = vst.msk [vmem:[#allocation3 + $0xa0] sm:$0xf] %vm834_vm1, %v13643_v33 }
 0x18b   : > { %v762_v40 = vpop.f32.mrf.mxu0  ;;  %860 = vst.msk [vmem:[#allocation2 + $0x64] sm:$0xf] %vm834_vm1, %v817_v39 }
 0x18c   : > { %v907_v41 = vpack.c.bf16 %v762_v40, %v762_v40  ;;  %v13295_v40 = vld [vmem:[%s17459_s4 + $0x68] sm:$0xff] }
 0x18d   : > { %2773 = vmatpush.bf16.msrb.mxu1 %v13295_v40 }
 0x18e   : > { %1021 = vrot.lane.b32.xlu0 %v907_v41, %s13642_s17 }
 0x190   : > { %v994_v44 = vpop.permute.xlu1 %993  ;;  %v13217_v45 = vld [vmem:[#allocation2 + $0x38] sm:$0xff] }
 0x191   : > { %v13261_v46 = vld [vmem:[#allocation2 + $0x38] sm:$0xff]  ;;  %1104 = vst.msk [vmem:[#allocation2 + $0x40] sm:$0xf] %vm1087_vm2, %v994_v44  ;;  %11345 = vmatmul.msk.bf16.gmra.mxu1 %vm614_vm0, %v13217_v45  ;;  %v882_v44 = vpack.c.bf16 %v13777_v20, %v13777_v20 }
 0x192   : > { %v13239_v49 = vld [vmem:[#allocation2 + $0x38] sm:$0xff]  ;;  %v2204_v50 = vrot.slane %v13261_v46, 1 }
 0x193   : > { %v1674_v52 = vshll.u32 %v13239_v49, 16  ;;  %v764_v53 = vpop.f32.mrf.mxu0  ;;  %v1678_v6 = vshrl.u32 %v13239_v49, 16 }
 0x194   : > { %v908_v54 = vpack.c.bf16 %v764_v53, %v764_v53  ;;  %v2205_v55 = vsel %vm2190_vm3, %v2202_v28, %v2204_v50 }
 0x195   : > { %v1676_v57 = vrot.slane %v1674_v52, 1  ;;  %11572 = vmatmul.msk.bf16.gmra.mxu3 %vm614_vm0, %v2205_v55  ;;  %v821_v52 = vld [vmem:[%s13816_s15 + $0x74] sm:$0xf]  ;;  %v877_v55 = vpack.c.bf16 %v13758_v13, %v13758_v13 }
 0x196   : > { %1023 = vrot.lane.b32.xlu1 %v908_v54, %s13642_s17  ;;  %864 = vst.msk [vmem:[#allocation2 + $0x74] sm:$0xf] %vm834_vm1, %v821_v52 }
 0x197   : > { %v1677_v58 = vsel %vm1617_vm4, %v1672_v56, %v1676_v57  ;;  %v1680_v11 = vor.u32 %v1678_v6, %v1676_v57 }
 0x198   : > { %11458 = vmatmul.msk.bf16.gmra.mxu2 %vm614_vm0, %v1677_v58  ;;  %v1002_v60 = vpop.permute.xlu2 %1001  ;;  %v13240_v61 = vld [vmem:[#allocation2 + $0x40] sm:$0xff] }
 0x199   : > { %1108 = vst.msk [vmem:[#allocation2 + $0x50] sm:$0xf] %vm1087_vm2, %v1002_v60  ;;  %v13262_v0 = vld [vmem:[#allocation2 + $0x40] sm:$0xff]  ;;  %v1682_v1 = vshll.u32 %v13240_v61, 16  ;;  %v1686_v29 = vshrl.u32 %v13240_v61, 16  ;;  %v881_v61 = vpack.c.bf16 %v13774_v19, %v13774_v19 }
 0x19a   : > { %v13218_v4 = vld [vmem:[#allocation2 + $0x40] sm:$0xff]  ;;  %v2206_v5 = vrot.slane %v13262_v0, 1 }
 0x19b   : > { %v767_v62 = vpop.f32.mrf.mxu0  ;;  %v1684_v7 = vrot.slane %v1682_v1, 1 }
 0x19c   : > { %v909_v63 = vpack.c.bf16 %v767_v62, %v767_v62  ;;  %v2207_v10 = vsel %vm2190_vm3, %v2204_v50, %v2206_v5 }
 0x19d   : > { %v1685_v12 = vsel %vm1617_vm4, %v1680_v11, %v1684_v7  ;;  %v1688_v36 = vor.u32 %v1686_v29, %v1684_v7  ;;  %v5796_v11 = vld [vmem:[%s17458_s3 + $0x10] sm:$0xff] }
 0x19e   : > { %1025 = vrot.lane.b32.xlu2 %v909_v63, %s13642_s17  ;;  %v819_v63 = vld [vmem:[%s13816_s15 + $0x6c] sm:$0xf] }
 0x19f   : > { %862 = vst.msk [vmem:[#allocation2 + $0x6c] sm:$0xf] %vm834_vm1, %v819_v63 }
 0x1a0   : > { %v998_v3 = vpop.permute.xlu0 %997 }
 0x1a1   : > { %1106 = vst.msk [vmem:[#allocation2 + $0x48] sm:$0xf] %vm1087_vm2, %v998_v3  ;;  %11346 = vmatmul.msk.bf16.gmra.mxu1 %vm614_vm0, %v13218_v4  ;;  %v878_v3 = vpack.c.bf16 %v13761_v14, %v13761_v14 }
 0x1a3   : > { %v769_v8 = vpop.f32.mrf.mxu0 }
 0x1a4   : > { %v910_v9 = vpack.c.bf16 %v769_v8, %v769_v8 }
 0x1a5   : > { %11573 = vmatmul.msk.bf16.gmra.mxu3 %vm614_vm0, %v2207_v10 }
 0x1a6   : > { %1027 = vrot.lane.b32.xlu0 %v910_v9, %s13642_s17  ;;  %v820_v9 = vld [vmem:[%s13816_s15 + $0x70] sm:$0xf] }
 0x1a7   : > { %863 = vst.msk [vmem:[#allocation2 + $0x70] sm:$0xf] %vm834_vm1, %v820_v9 }
 0x1a8   : > { %11459 = vmatmul.msk.bf16.gmra.mxu2 %vm614_vm0, %v1685_v12  ;;  %v1000_v18 = vpop.permute.xlu1 %999 }
 0x1a9   : > { %1107 = vst.msk [vmem:[#allocation2 + $0x4c] sm:$0xf] %vm1087_vm2, %v1000_v18 }
 0x1ab   : > { %v772_v21 = vpop.f32.mrf.mxu0 }
 0x1ac   : > { %v911_v22 = vpack.c.bf16 %v772_v21, %v772_v21 }
 0x1ae   : > { %1029 = vrot.lane.b32.xlu1 %v911_v22, %s13642_s17 }
 0x1b0   : > { %v1008_v23 = vpop.permute.xlu2 %1007  ;;  %v13219_v24 = vld [vmem:[#allocation2 + $0x48] sm:$0xff] }
 0x1b1   : > { %v13263_v25 = vld [vmem:[#allocation2 + $0x48] sm:$0xff]  ;;  %1111 = vst.msk [vmem:[#allocation2 + $0x5c] sm:$0xf] %vm1087_vm2, %v1008_v23  ;;  %11347 = vmatmul.msk.bf16.gmra.mxu1 %vm614_vm0, %v13219_v24  ;;  %v824_v23 = vld [vmem:[%s13816_s15 + $0x80] sm:$0xf] }
 0x1b2   : > { %v13241_v26 = vld [vmem:[#allocation2 + $0x48] sm:$0xff]  ;;  %v2208_v28 = vrot.slane %v13263_v25, 1  ;;  %867 = vst.msk [vmem:[#allocation2 + $0x80] sm:$0xf] %vm834_vm1, %v824_v23  ;;  %v5798_v24 = vld [vmem:[%s17458_s3 + $0x20] sm:$0xff] }
 0x1b3   : > { %v1690_v30 = vshll.u32 %v13241_v26, 16  ;;  %v774_v32 = vpop.f32.mrf.mxu0  ;;  %v1694_v53 = vshrl.u32 %v13241_v26, 16 }
 0x1b4   : > { %v912_v34 = vpack.c.bf16 %v774_v32, %v774_v32  ;;  %v2209_v35 = vsel %vm2190_vm3, %v2206_v5, %v2208_v28 }
 0x1b5   : > { %v1692_v37 = vrot.slane %v1690_v30, 1  ;;  %11574 = vmatmul.msk.bf16.gmra.mxu3 %vm614_vm0, %v2209_v35  ;;  %v822_v30 = vld [vmem:[%s13816_s15 + $0x78] sm:$0xf] }
 0x1b6   : > { %965 = vrot.lane.b32.xlu1 %v879_v31, %s13642_s17  ;;  %1031 = vrot.lane.b32.xlu2 %v912_v34, %s13642_s17  ;;  %865 = vst.msk [vmem:[#allocation2 + $0x78] sm:$0xf] %vm834_vm1, %v822_v30  ;;  %v5801_v34 = vld [vmem:[%s17458_s3 + $0x38] sm:$0xff] }
 0x1b7   : > { %v1693_v16 = vsel %vm1617_vm4, %v1688_v36, %v1692_v37  ;;  %v1696_v59 = vor.u32 %v1694_v53, %v1692_v37 }
 0x1b8   : > { %11460 = vmatmul.msk.bf16.gmra.mxu2 %vm614_vm0, %v1693_v16  ;;  %v1004_v38 = vpop.permute.xlu0 %1003 }
 0x1b9   : > { %1109 = vst.msk [vmem:[#allocation2 + $0x54] sm:$0xf] %vm1087_vm2, %v1004_v38 }
 0x1bb   : > { %v777_v41 = vpop.f32.mrf.mxu0 }
 0x1bc   : > { %v913_v45 = vpack.c.bf16 %v777_v41, %v777_v41 }
 0x1be   : > { %971 = vrot.lane.b32.xlu1 %v882_v44, %s13642_s17  ;;  %967 = vrot.lane.b32.xlu2 %v880_v43, %s13642_s17  ;;  %v823_v43 = vld [vmem:[%s13816_s15 + $0x7c] sm:$0xf] }
 0x1bf   : > { %1033 = vrot.lane.b32.xlu0 %v913_v45, %s13642_s17  ;;  %v13341_v44 = vld [vmem:[%s17459_s4 + $0xb8] sm:$0xff]  ;;  %866 = vst.msk [vmem:[#allocation2 + $0x7c] sm:$0xf] %vm834_vm1, %v823_v43 }
 0x1c0   : > { %v1006_v46 = vpop.permute.xlu1 %1005  ;;  %v13220_v49 = vld [vmem:[#allocation2 + $0x50] sm:$0xff]  ;;  %3828 = vmatpush.bf16.msrb.mxu3 %v13341_v44  ;;  %v830_v43 = vld [vmem:[%s13816_s15 + $0x98] sm:$0xf] }
 0x1c1   : > { %v13264_v50 = vld [vmem:[#allocation2 + $0x50] sm:$0xff]  ;;  %1110 = vst.msk [vmem:[#allocation2 + $0x58] sm:$0xf] %vm1087_vm2, %v1006_v46  ;;  %11348 = vmatmul.msk.bf16.gmra.mxu1 %vm614_vm0, %v13220_v49 }
 0x1c2   : > { %v13242_v51 = vld [vmem:[#allocation2 + $0x50] sm:$0xff]  ;;  %v2210_v20 = vrot.slane %v13264_v50, 1  ;;  %873 = vst.msk [vmem:[#allocation2 + $0x98] sm:$0xf] %vm834_vm1, %v830_v43 }
 0x1c3   : > { %v1698_v54 = vshll.u32 %v13242_v51, 16  ;;  %v779_v56 = vpop.f32.mrf.mxu0  ;;  %v1702_v10 = vshrl.u32 %v13242_v51, 16 }
 0x1c4   : > { %v914_v57 = vpack.c.bf16 %v779_v56, %v779_v56  ;;  %v2211_v58 = vsel %vm2190_vm3, %v2208_v28, %v2210_v20 }
 0x1c5   : > { %v1700_v60 = vrot.slane %v1698_v54, 1  ;;  %11575 = vmatmul.msk.bf16.gmra.mxu3 %vm614_vm0, %v2211_v58 }
 0x1c6   : > { %961 = vrot.lane.b32.xlu2 %v877_v55, %s13642_s17  ;;  %1035 = vrot.lane.b32.xlu1 %v914_v57, %s13642_s17  ;;  %v827_v55 = vld [vmem:[%s13816_s15 + $0x8c] sm:$0xf] }
 0x1c7   : > { %v1701_v62 = vsel %vm1617_vm4, %v1696_v59, %v1700_v60  ;;  %969 = vrot.lane.b32.xlu0 %v881_v61, %s13642_s17  ;;  %v1704_v15 = vor.u32 %v1702_v10, %v1700_v60  ;;  %870 = vst.msk [vmem:[#allocation2 + $0x8c] sm:$0xf] %vm834_vm1, %v827_v55  ;;  %v797_v55 = vld [vmem:[%s13816_s15 + $0x14] sm:$0xf] }
 0x1c8   : > { %11461 = vmatmul.msk.bf16.gmra.mxu2 %vm614_vm0, %v1701_v62  ;;  %v1014_v13 = vpop.permute.xlu2 %1013  ;;  %v13243_v0 = vld [vmem:[#allocation2 + $0x58] sm:$0xff]  ;;  %840 = vst.msk [vmem:[#allocation2 + $0x14] sm:$0xf] %vm834_vm1, %v797_v55 }
 0x1c9   : > { %1114 = vst.msk [vmem:[#allocation2 + $0x68] sm:$0xf] %vm1087_vm2, %v1014_v13  ;;  %v13265_v2 = vld [vmem:[#allocation2 + $0x58] sm:$0xff]  ;;  %v1706_v4 = vshll.u32 %v13243_v0, 16  ;;  %v1710_v32 = vshrl.u32 %v13243_v0, 16 }
 0x1ca   : > { %v13221_v7 = vld [vmem:[#allocation2 + $0x58] sm:$0xff]  ;;  %v2212_v8 = vrot.slane %v13265_v2, 1 }
 0x1cb   : > { %v782_v19 = vpop.f32.mrf.mxu0  ;;  %v1708_v14 = vrot.slane %v1706_v4, 1 }
 0x1cc   : > { %v915_v1 = vpack.c.bf16 %v782_v19, %v782_v19  ;;  %v2213_v12 = vsel %vm2190_vm3, %v2210_v20, %v2212_v8 }
 0x1cd   : > { %v1709_v18 = vsel %vm1617_vm4, %v1704_v15, %v1708_v14  ;;  %v1712_v36 = vor.u32 %v1710_v32, %v1708_v14  ;;  %v795_v14 = vld [vmem:[%s13816_s15 + $0xc] sm:$0xf]  ;;  %v13316_v15 = vld [vmem:[%s17459_s4 + $0x80] sm:$0xff] }
 0x1ce   : > { %1037 = vrot.lane.b32.xlu2 %v915_v1, %s13642_s17  ;;  %v1366_v5 = vpop.f32.mrf.mxu1  ;;  %838 = vst.msk [vmem:[#allocation2 + $0xc] sm:$0xf] %vm834_vm1, %v795_v14  ;;  %3369 = vmatpush.bf16.msrb.mxu2 %v13316_v15 }
 0x1cf   : > { %963 = vrot.lane.b32.xlu0 %v878_v3, %s13642_s17  ;;  %1448 = vst.msk [vmem:[#allocation4 + $0x30] sm:$0xff] %vm1441_vm5, %v1366_v5  ;;  %v13294_v5 = vld [vmem:[%s17459_s4 + $0x60] sm:$0xff] }
 0x1d0   : > { %v1010_v6 = vpop.permute.xlu0 %1009  ;;  %2774 = vmatpush.bf16.msrb.mxu1 %v13294_v5 }
 0x1d1   : > { %1112 = vst.msk [vmem:[#allocation2 + $0x60] sm:$0xf] %vm1087_vm2, %v1010_v6  ;;  %11349 = vmatmul.msk.bf16.gmra.mxu1 %vm614_vm0, %v13221_v7  ;;  %v825_v6 = vld [vmem:[%s13816_s15 + $0x84] sm:$0xf] }
 0x1d2   : > { %868 = vst.msk [vmem:[#allocation2 + $0x84] sm:$0xf] %vm834_vm1, %v825_v6  ;;  %v796_v6 = vld [vmem:[%s13816_s15 + $0x10] sm:$0xf] }
 0x1d3   : > { %v784_v39 = vpop.f32.mrf.mxu0  ;;  %839 = vst.msk [vmem:[#allocation2 + $0x10] sm:$0xf] %vm834_vm1, %v796_v6 }
 0x1d4   : > { %v916_v45 = vpack.c.bf16 %v784_v39, %v784_v39 }
 0x1d5   : > { %11576 = vmatmul.msk.bf16.gmra.mxu3 %vm614_vm0, %v2213_v12 }
 0x1d6   : > { %5842 = vperm.xlu2 %13614, %v5796_v11   ;;  %v1368_v21 = vpop.f32.mrf.mxu1  ;;  %v1949_v49 = vld [vmem:[#allocation4 + $0x30] sm:$0xff] }
 0x1d7   : > { %1449 = vst.msk [vmem:[#allocation4 + $0x38] sm:$0xff] %vm1441_vm5, %v1368_v21 }
 0x1d8   : > { %11462 = vmatmul.msk.bf16.gmra.mxu2 %vm614_vm0, %v1709_v18  ;;  %v1012_v22 = vpop.permute.xlu1 %1011 }
 0x1d9   : > { %1113 = vst.msk [vmem:[#allocation2 + $0x64] sm:$0xf] %vm1087_vm2, %v1012_v22 }
 0x1de   : > { %5852 = vperm.xlu2 %13614, %v5798_v24   ;;  %v1371_v25 = vpop.f32.mrf.mxu1  ;;  %v1950_v57 = vld [vmem:[#allocation4 + $0x38] sm:$0xff] }
 0x1df   : > { %1450 = vst.msk [vmem:[#allocation4 + $0x40] sm:$0xff] %vm1441_vm5, %v1371_v25 }
 0x1e0   : > { %v1020_v26 = vpop.permute.xlu2 %1019  ;;  %v13222_v27 = vld [vmem:[#allocation2 + $0x60] sm:$0xff] }
 0x1e1   : > { %v13266_v28 = vld [vmem:[#allocation2 + $0x60] sm:$0xff]  ;;  %1117 = vst.msk [vmem:[#allocation2 + $0x74] sm:$0xf] %vm1087_vm2, %v1020_v26  ;;  %11350 = vmatmul.msk.bf16.gmra.mxu1 %vm614_vm0, %v13222_v27  ;;  %v826_v27 = vld [vmem:[%s13816_s15 + $0x88] sm:$0xf] }
 0x1e2   : > { %v13244_v29 = vld [vmem:[#allocation2 + $0x60] sm:$0xff]  ;;  %v2214_v31 = vrot.slane %v13266_v28, 1  ;;  %869 = vst.msk [vmem:[#allocation2 + $0x88] sm:$0xf] %vm834_vm1, %v826_v27 }
 0x1e3   : > { %v1714_v33 = vshll.u32 %v13244_v29, 16  ;;  %v1718_v59 = vshrl.u32 %v13244_v29, 16  ;;  %v792_v28 = vld [vmem:[%s13816_s15] sm:$0xf]  ;;  %v793_v27 = vld [vmem:[%s13816_s15 + $0x4] sm:$0xf] }
 0x1e4   : > { %v2215_v35 = vsel %vm2190_vm3, %v2212_v8, %v2214_v31  ;;  %835 = vst.msk [vmem:[#allocation2] sm:$0xf] %vm834_vm1, %v792_v28 }
 0x1e5   : > { %v1716_v37 = vrot.slane %v1714_v33, 1  ;;  %11577 = vmatmul.msk.bf16.gmra.mxu3 %vm614_vm0, %v2215_v35  ;;  %836 = vst.msk [vmem:[#allocation2 + $0x4] sm:$0xf] %vm834_vm1, %v793_v27 }
 0x1e6   : > { %5867 = vperm.xlu2 %13614, %v5801_v34   ;;  %v1373_v38 = vpop.f32.mrf.mxu1  ;;  %v1951_v8 = vld [vmem:[#allocation4 + $0x40] sm:$0xff] }
 0x1e7   : > { %v1717_v16 = vsel %vm1617_vm4, %v1712_v36, %v1716_v37  ;;  %1451 = vst.msk [vmem:[#allocation4 + $0x48] sm:$0xff] %vm1441_vm5, %v1373_v38  ;;  %v1720_v13 = vor.u32 %v1718_v59, %v1716_v37 }
 0x1e8   : > { %11463 = vmatmul.msk.bf16.gmra.mxu2 %vm614_vm0, %v1717_v16  ;;  %v1016_v40 = vpop.permute.xlu0 %1015  ;;  %v2330_v41 = vpop.f32.mrf.mxu3 }
 0x1e9   : > { %1115 = vst.msk [vmem:[#allocation2 + $0x6c] sm:$0xf] %vm1087_vm2, %v1016_v40 }
 0x1eb   : > { %v1868_v46 = vpop.f32.mrf.mxu2 }
 0x1ec   : > { %v1985_v50 = vadd.f32 %v1949_v49, %v1868_v46 }
 0x1ee   : > { %2021 = vst.msk [vmem:[#allocation4 + $0x30] sm:$0xff] %vm1441_vm5, %v1985_v50  ;;  %1039 = vrot.lane.b32.xlu2 %v916_v45, %s13642_s17  ;;  %v1376_v51 = vpop.f32.mrf.mxu1  ;;  %v1952_v30 = vld [vmem:[#allocation4 + $0x48] sm:$0xff] }
 0x1ef   : > { %1452 = vst.msk [vmem:[#allocation4 + $0x50] sm:$0xff] %vm1441_vm5, %v1376_v51 }
 0x1f0   : > { %v1018_v17 = vpop.permute.xlu1 %1017  ;;  %v2332_v52 = vpop.f32.mrf.mxu3  ;;  %v13223_v20 = vld [vmem:[#allocation2 + $0x68] sm:$0xff] }
 0x1f1   : > { %v14080_v53 = vld [vmem:[#allocation2 + $0x68] sm:$0xff]  ;;  %1116 = vst.msk [vmem:[#allocation2 + $0x70] sm:$0xf] %vm1087_vm2, %v1018_v17  ;;  %11351 = vmatmul.msk.bf16.gmra.mxu1 %vm614_vm0, %v13223_v20 }
 0x1f2   : > { %v14082_v54 = vld [vmem:[#allocation2 + $0x68] sm:$0xff]  ;;  %v2216_v58 = vrot.slane %v14080_v53, 1 }
 0x1f3   : > { %v1870_v56 = vpop.f32.mrf.mxu2  ;;  %v1722_v60 = vshll.u32 %v14082_v54, 16 }
 0x1f4   : > { %v1986_v61 = vadd.f32 %v1950_v57, %v1870_v56  ;;  %v2217_v62 = vsel %vm2190_vm3, %v2214_v31, %v2216_v58  ;;  %v1726_v31 = vshrl.u32 %v14082_v54, 16  ;;  %v828_v56 = vld [vmem:[%s13816_s15 + $0x90] sm:$0xf] }
 0x1f5   : > { %v1724_v63 = vrot.slane %v1722_v60, 1  ;;  %v2411_v0 = vld [vmem:[#allocation4 + $0x30] sm:$0xff]  ;;  %11578 = vmatmul.msk.bf16.gmra.mxu3 %vm614_vm0, %v2217_v62  ;;  %871 = vst.msk [vmem:[#allocation2 + $0x90] sm:$0xf] %vm834_vm1, %v828_v56 }
 0x1f6   : > { %2022 = vst.msk [vmem:[#allocation4 + $0x38] sm:$0xff] %vm1441_vm5, %v1986_v61  ;;  %v2447_v19 = vadd.f32 %v2411_v0, %v2330_v41  ;;  %v1378_v2 = vpop.f32.mrf.mxu1  ;;  %v794_v41 = vld [vmem:[%s13816_s15 + $0x8] sm:$0xf]  ;;  %v1953_v45 = vld [vmem:[#allocation4 + $0x50] sm:$0xff] }
 0x1f7   : > { %v1725_v1 = vsel %vm1617_vm4, %v1720_v13, %v1724_v63  ;;  %1453 = vst.msk [vmem:[#allocation4 + $0x58] sm:$0xff] %vm1441_vm5, %v1378_v2  ;;  %v1728_v35 = vor.u32 %v1726_v31, %v1724_v63 }
 0x1f8   : > { %11464 = vmatmul.msk.bf16.gmra.mxu2 %vm614_vm0, %v1725_v1  ;;  %2483 = vst.msk [vmem:[#allocation4 + $0x30] sm:$0xff] %vm1441_vm5, %v2447_v19  ;;  %v1026_v3 = vpop.permute.xlu2 %1025  ;;  %v2335_v4 = vpop.f32.mrf.mxu3  ;;  %v14102_v9 = vld [vmem:[#allocation2 + $0x70] sm:$0xff] }
 0x1f9   : > { %1120 = vst.msk [vmem:[#allocation2 + $0x80] sm:$0xf] %vm1087_vm2, %v1026_v3  ;;  %v14106_v11 = vld [vmem:[#allocation2 + $0x70] sm:$0xff]  ;;  %v1730_v21 = vshll.u32 %v14102_v9, 16  ;;  %v1734_v60 = vshrl.u32 %v14102_v9, 16  ;;  %v13205_v9 = vld [vmem:[%s17457_s2 + $0xa0] sm:$0xff] }
 0x1fa   : > { %v13224_v23 = vld [vmem:[#allocation2 + $0x70] sm:$0xff]  ;;  %v2218_v26 = vrot.slane %v14106_v11, 1  ;;  %837 = vst.msk [vmem:[#allocation2 + $0x8] sm:$0xf] %vm834_vm1, %v794_v41  ;;  %11249 = vmatmul.msk.bf16.gmra.mxu0 %vm614_vm0, %v13205_v9 }
 0x1fb   : > { %v1873_v7 = vpop.f32.mrf.mxu2  ;;  %v1732_v32 = vrot.slane %v1730_v21, 1 }
 0x1fc   : > { %v1987_v10 = vadd.f32 %v1951_v8, %v1873_v7  ;;  %v2219_v34 = vsel %vm2190_vm3, %v2216_v58, %v2218_v26  ;;  %v829_v8 = vld [vmem:[%s13816_s15 + $0x94] sm:$0xf] }
 0x1fd   : > { %v2412_v12 = vld [vmem:[#allocation4 + $0x38] sm:$0xff]  ;;  %v1733_v16 = vsel %vm1617_vm4, %v1728_v35, %v1732_v32  ;;  %v1736_v63 = vor.u32 %v1734_v60, %v1732_v32  ;;  %872 = vst.msk [vmem:[#allocation2 + $0x94] sm:$0xf] %vm834_vm1, %v829_v8 }
 0x1fe   : > { %2023 = vst.msk [vmem:[#allocation4 + $0x40] sm:$0xff] %vm1441_vm5, %v1987_v10  ;;  %v2448_v18 = vadd.f32 %v2412_v12, %v2332_v52  ;;  %v1381_v22 = vpop.f32.mrf.mxu1  ;;  %v1954_v58 = vld [vmem:[#allocation4 + $0x58] sm:$0xff] }
 0x1ff   : > { %1454 = vst.msk [vmem:[#allocation4 + $0x60] sm:$0xff] %vm1441_vm5, %v1381_v22 }
 0x200   : > { %2484 = vst.msk [vmem:[#allocation4 + $0x38] sm:$0xff] %vm1441_vm5, %v2448_v18  ;;  %v1022_v24 = vpop.permute.xlu0 %1021  ;;  %v2337_v25 = vpop.f32.mrf.mxu3 }
 0x201   : > { %1118 = vst.msk [vmem:[#allocation2 + $0x78] sm:$0xf] %vm1087_vm2, %v1022_v24  ;;  %11352 = vmatmul.msk.bf16.gmra.mxu1 %vm614_vm0, %v13224_v23 }
 0x203   : > { %v1875_v29 = vpop.f32.mrf.mxu2 }
 0x204   : > { %v1988_v33 = vadd.f32 %v1952_v30, %v1875_v29 }
 0x205   : > { %v2413_v36 = vld [vmem:[#allocation4 + $0x40] sm:$0xff]  ;;  %11579 = vmatmul.msk.bf16.gmra.mxu3 %vm614_vm0, %v2219_v34 }
 0x206   : > { %2024 = vst.msk [vmem:[#allocation4 + $0x48] sm:$0xff] %vm1441_vm5, %v1988_v33  ;;  %v2449_v37 = vadd.f32 %v2413_v36, %v2335_v4  ;;  %v1383_v38 = vpop.f32.mrf.mxu1  ;;  %v1955_v14 = vld [vmem:[#allocation4 + $0x60] sm:$0xff] }
 0x207   : > { %1455 = vst.msk [vmem:[#allocation4 + $0x68] sm:$0xff] %vm1441_vm5, %v1383_v38 }
 0x208   : > { %11465 = vmatmul.msk.bf16.gmra.mxu2 %vm614_vm0, %v1733_v16  ;;  %2485 = vst.msk [vmem:[#allocation4 + $0x40] sm:$0xff] %vm1441_vm5, %v2449_v37  ;;  %v1024_v39 = vpop.permute.xlu1 %1023  ;;  %v2340_v40 = vpop.f32.mrf.mxu3 }
 0x209   : > { %1119 = vst.msk [vmem:[#allocation2 + $0x7c] sm:$0xf] %vm1087_vm2, %v1024_v39  ;;  %v13340_v39 = vld [vmem:[%s17459_s4 + $0xb0] sm:$0xff] }
 0x20a   : > { %3829 = vmatpush.bf16.msrb.mxu3 %v13340_v39 }
 0x20b   : > { %v1878_v44 = vpop.f32.mrf.mxu2 }
 0x20c   : > { %v1989_v46 = vadd.f32 %v1953_v45, %v1878_v44  ;;  %v831_v45 = vld [vmem:[%s13816_s15 + $0x9c] sm:$0xf] }
 0x20d   : > { %v2414_v49 = vld [vmem:[#allocation4 + $0x48] sm:$0xff]  ;;  %874 = vst.msk [vmem:[#allocation2 + $0x9c] sm:$0xf] %vm834_vm1, %v831_v45 }
 0x20e   : > { %2025 = vst.msk [vmem:[#allocation4 + $0x50] sm:$0xff] %vm1441_vm5, %v1989_v46  ;;  %v2450_v50 = vadd.f32 %v2414_v49, %v2337_v25  ;;  %v1386_v51 = vpop.f32.mrf.mxu1  ;;  %v1956_v29 = vld [vmem:[#allocation4 + $0x68] sm:$0xff] }
 0x20f   : > { %1456 = vst.msk [vmem:[#allocation4 + $0x70] sm:$0xff] %vm1441_vm5, %v1386_v51 }
 0x210   : > { %2486 = vst.msk [vmem:[#allocation4 + $0x48] sm:$0xff] %vm1441_vm5, %v2450_v50  ;;  %v1032_v17 = vpop.permute.xlu2 %1031  ;;  %v2342_v52 = vpop.f32.mrf.mxu3  ;;  %v13225_v20 = vld [vmem:[#allocation2 + $0x78] sm:$0xff] }
 0x211   : > { %v14139_v53 = vld [vmem:[#allocation2 + $0x78] sm:$0xff]  ;;  %1123 = vst.msk [vmem:[#allocation2 + $0x8c] sm:$0xf] %vm1087_vm2, %v1032_v17  ;;  %11353 = vmatmul.msk.bf16.gmra.mxu1 %vm614_vm0, %v13225_v20  ;;  %v13339_v20 = vld [vmem:[%s17459_s4 + $0xa8] sm:$0xff] }
 0x212   : > { %v14141_v54 = vld [vmem:[#allocation2 + $0x78] sm:$0xff]  ;;  %v2220_v59 = vrot.slane %v14139_v53, 1  ;;  %3830 = vmatpush.bf16.msrb.mxu3 %v13339_v20 }
 0x213   : > { %v1880_v57 = vpop.f32.mrf.mxu2  ;;  %v1738_v61 = vshll.u32 %v14141_v54, 16  ;;  %v1742_v31 = vshrl.u32 %v14141_v54, 16 }
 0x214   : > { %v1990_v62 = vadd.f32 %v1954_v58, %v1880_v57  ;;  %v2221_v13 = vsel %vm2190_vm3, %v2218_v26, %v2220_v59 }
 0x215   : > { %v1740_v0 = vrot.slane %v1738_v61, 1  ;;  %v2415_v19 = vld [vmem:[#allocation4 + $0x50] sm:$0xff]  ;;  %11580 = vmatmul.msk.bf16.gmra.mxu3 %vm614_vm0, %v2221_v13 }
 0x216   : > { %2026 = vst.msk [vmem:[#allocation4 + $0x58] sm:$0xff] %vm1441_vm5, %v1990_v62  ;;  %v2451_v1 = vadd.f32 %v2415_v19, %v2340_v40  ;;  %v1388_v3 = vpop.f32.mrf.mxu1  ;;  %v1957_v49 = vld [vmem:[#allocation4 + $0x70] sm:$0xff] }
 0x217   : > { %v1741_v2 = vsel %vm1617_vm4, %v1736_v63, %v1740_v0  ;;  %1457 = vst.msk [vmem:[#allocation4 + $0x78] sm:$0xff] %vm1441_vm5, %v1388_v3  ;;  %v1744_v35 = vor.u32 %v1742_v31, %v1740_v0  ;;  %v13338_v62 = vld [vmem:[%s17459_s4 + $0xa0] sm:$0xff] }
 0x218   : > { %11466 = vmatmul.msk.bf16.gmra.mxu2 %vm614_vm0, %v1741_v2  ;;  %2487 = vst.msk [vmem:[#allocation4 + $0x50] sm:$0xff] %vm1441_vm5, %v2451_v1  ;;  %v1028_v4 = vpop.permute.xlu0 %1027  ;;  %v968_v5 = vpop.permute.xlu2 %967  ;;  %3831 = vmatpush.bf16.msrb.mxu3 %v13338_v62 }
 0x219   : > { %1121 = vst.msk [vmem:[#allocation2 + $0x84] sm:$0xf] %vm1087_vm2, %v1028_v4  ;;  %v2345_v7 = vpop.f32.mrf.mxu3 }
 0x21a   : > { %1091 = vst.msk [vmem:[#allocation2 + $0xc] sm:$0xf] %vm1087_vm2, %v968_v5  ;;  %v13385_v5 = vld [vmem:[%s17459_s4 + $0xf8] sm:$0xff] }
 0x21b   : > { %v1883_v10 = vpop.f32.mrf.mxu2  ;;  %4884 = vmatpush.bf16.msra.mxu1 %v13385_v5  ;;  %v13621_v5 = vld [vmem:[%s17459_s4 + $0x58] sm:$0xff] }
 0x21c   : > { %v1991_v11 = vadd.f32 %v1955_v14, %v1883_v10  ;;  %v13407_v14 = vld [vmem:[%s17459_s4 + $0x118] sm:$0xff] }
 0x21d   : > { %v2416_v12 = vld [vmem:[#allocation4 + $0x58] sm:$0xff]  ;;  %5346 = vmatpush.bf16.msra.mxu2 %v13407_v14 }
 0x21e   : > { %2027 = vst.msk [vmem:[#allocation4 + $0x60] sm:$0xff] %vm1441_vm5, %v1991_v11  ;;  %v2452_v15 = vadd.f32 %v2416_v12, %v2342_v52  ;;  %v1391_v18 = vpop.f32.mrf.mxu1  ;;  %v1958_v63 = vld [vmem:[#allocation4 + $0x78] sm:$0xff] }
 0x21f   : > { %1458 = vst.msk [vmem:[#allocation4 + $0x80] sm:$0xff] %vm1441_vm5, %v1391_v18 }
 0x220   : > { %2488 = vst.msk [vmem:[#allocation4 + $0x58] sm:$0xff] %vm1441_vm5, %v2452_v15  ;;  %v1030_v21 = vpop.permute.xlu1 %1029  ;;  %v962_v22 = vpop.permute.xlu2 %961  ;;  %v13226_v23 = vld [vmem:[#allocation2 + $0x80] sm:$0xff] }
 0x221   : > { %v14172_v24 = vld [vmem:[#allocation2 + $0x80] sm:$0xff]  ;;  %1122 = vst.msk [vmem:[#allocation2 + $0x88] sm:$0xf] %vm1087_vm2, %v1030_v21  ;;  %v2347_v26 = vpop.f32.mrf.mxu3  ;;  %11354 = vmatmul.msk.bf16.gmra.mxu1 %vm614_vm0, %v13226_v23  ;;  %v13276_v31 = vld [vmem:[#allocation2 + $0x8] sm:$0xf0] }
 0x222   : > { %v14174_v25 = vld [vmem:[#allocation2 + $0x80] sm:$0xff]  ;;  %1088 = vst.msk [vmem:[#allocation2] sm:$0xf] %vm1087_vm2, %v962_v22  ;;  %v2222_v30 = vrot.slane %v14172_v24, 1 }
 0x223   : > { %v1885_v28 = vpop.f32.mrf.mxu2  ;;  %v1746_v32 = vshll.u32 %v14174_v25, 16  ;;  %v1750_v0 = vshrl.u32 %v14174_v25, 16 }
 0x224   : > { %v1992_v33 = vadd.f32 %v1956_v29, %v1885_v28  ;;  %v2223_v34 = vsel %vm2190_vm3, %v2220_v59, %v2222_v30 }
 0x225   : > { %v1748_v36 = vrot.slane %v1746_v32, 1  ;;  %v2417_v37 = vld [vmem:[#allocation4 + $0x60] sm:$0xff]  ;;  %11581 = vmatmul.msk.bf16.gmra.mxu3 %vm614_vm0, %v2223_v34 }
 0x226   : > { %2028 = vst.msk [vmem:[#allocation4 + $0x68] sm:$0xff] %vm1441_vm5, %v1992_v33  ;;  %v2453_v16 = vadd.f32 %v2417_v37, %v2345_v7  ;;  %v1393_v40 = vpop.f32.mrf.mxu1  ;;  %v1959_v22 = vld [vmem:[#allocation4 + $0x80] sm:$0xff] }
 0x227   : > { %v1749_v38 = vsel %vm1617_vm4, %v1744_v35, %v1748_v36  ;;  %1459 = vst.msk [vmem:[#allocation4 + $0x88] sm:$0xff] %vm1441_vm5, %v1393_v40  ;;  %v1752_v3 = vor.u32 %v1750_v0, %v1748_v36 }
 0x228   : > { %11467 = vmatmul.msk.bf16.gmra.mxu2 %vm614_vm0, %v1749_v38  ;;  %2489 = vst.msk [vmem:[#allocation4 + $0x60] sm:$0xff] %vm1441_vm5, %v2453_v16  ;;  %v966_v41 = vpop.permute.xlu1 %965  ;;  %v1038_v43 = vpop.permute.xlu2 %1037  ;;  %v14197_v50 = vld [vmem:[#allocation2 + $0x88] sm:$0xff] }
 0x229   : > { %1090 = vst.msk [vmem:[#allocation2 + $0x8] sm:$0xf] %vm1087_vm2, %v966_v41  ;;  %v2350_v44 = vpop.f32.mrf.mxu3  ;;  %v14200_v17 = vld [vmem:[#allocation2 + $0x88] sm:$0xff]  ;;  %v1754_v54 = vshll.u32 %v14197_v50, 16  ;;  %v1758_v41 = vshrl.u32 %v14197_v50, 16 }
 0x22a   : > { %1126 = vst.msk [vmem:[#allocation2 + $0x98] sm:$0xf] %vm1087_vm2, %v1038_v43  ;;  %v13227_v58 = vld [vmem:[#allocation2 + $0x88] sm:$0xff]  ;;  %v2224_v59 = vrot.slane %v14200_v17, 1 }
 0x22b   : > { %v1888_v46 = vpop.f32.mrf.mxu2  ;;  %v1756_v19 = vrot.slane %v1754_v54, 1  ;;  %v13298_v17 = vld [vmem:[#allocation2 + $0x8] sm:$0xf0] }
 0x22c   : > { %v1993_v51 = vadd.f32 %v1957_v49, %v1888_v46  ;;  %v2225_v2 = vsel %vm2190_vm3, %v2222_v30, %v2224_v59 }
 0x22d   : > { %v2418_v52 = vld [vmem:[#allocation4 + $0x68] sm:$0xff]  ;;  %v1757_v7 = vsel %vm1617_vm4, %v1752_v3, %v1756_v19 }
 0x22e   : > { %2029 = vst.msk [vmem:[#allocation4 + $0x70] sm:$0xff] %vm1441_vm5, %v1993_v51  ;;  %v2454_v53 = vadd.f32 %v2418_v52, %v2347_v26  ;;  %v1396_v55 = vpop.f32.mrf.mxu1  ;;  %v1960_v40 = vld [vmem:[#allocation4 + $0x88] sm:$0xff]  ;;  %v1760_v51 = vor.u32 %v1758_v41, %v1756_v19 }
 0x22f   : > { %1460 = vst.msk [vmem:[#allocation4 + $0x90] sm:$0xff] %vm1441_vm5, %v1396_v55 }
 0x230   : > { %2490 = vst.msk [vmem:[#allocation4 + $0x68] sm:$0xff] %vm1441_vm5, %v2454_v53  ;;  %v972_v56 = vpop.permute.xlu1 %971  ;;  %v14209_v57 = vpop.permute.xlu2 %5842  ;;  %v11594_v27 = vld [vmem:[#allocation2 + $0x8] sm:$0xe] }
 0x231   : > { %1093 = vst.msk [vmem:[#allocation2 + $0x14] sm:$0xf] %vm1087_vm2, %v972_v56  ;;  %v1034_v60 = vpop.permute.xlu0 %1033  ;;  %v2352_v61 = vpop.f32.mrf.mxu3  ;;  %11355 = vmatmul.msk.bf16.gmra.mxu1 %vm614_vm0, %v13227_v58  ;;  %v11595_v34 = vor.u32 %v13276_v31, %v11594_v27  ;;  %v11708_v50 = vld [vmem:[#allocation2 + $0x8] sm:$0xe] }
 0x232   : > { %1124 = vst.msk [vmem:[#allocation2 + $0x90] sm:$0xf] %vm1087_vm2, %v1034_v60 }
 0x233   : > { %v1890_v13 = vpop.f32.mrf.mxu2  ;;  %v2652_v45 = vrot.slane %v11595_v34, 1 }
 0x234   : > { %v1994_v1 = vadd.f32 %v1958_v63, %v1890_v13 }
 0x235   : > { %v2419_v4 = vld [vmem:[#allocation4 + $0x70] sm:$0xff]  ;;  %11582 = vmatmul.msk.bf16.gmra.mxu3 %vm614_vm0, %v2225_v2 }
 0x236   : > { %2030 = vst.msk [vmem:[#allocation4 + $0x78] sm:$0xff] %vm1441_vm5, %v1994_v1  ;;  %v2455_v6 = vadd.f32 %v2419_v4, %v2350_v44  ;;  %v1398_v8 = vpop.f32.mrf.mxu1  ;;  %v1961_v13 = vld [vmem:[#allocation4 + $0x90] sm:$0xff]  ;;  %v11822_v1 = vld [vmem:[#allocation2 + $0x8] sm:$0xc] }
 0x237   : > { %1461 = vst.msk [vmem:[#allocation4 + $0x98] sm:$0xff] %vm1441_vm5, %v1398_v8 }
 0x238   : > { %11468 = vmatmul.msk.bf16.gmra.mxu2 %vm614_vm0, %v1757_v7  ;;  %2491 = vst.msk [vmem:[#allocation4 + $0x70] sm:$0xff] %vm1441_vm5, %v2455_v6  ;;  %v1036_v9 = vpop.permute.xlu1 %1035  ;;  %v14231_v10 = vpop.permute.xlu2 %5852  ;;  %v13320_v7 = vld [vmem:[#allocation2 + $0x8] sm:$0xf0] }
 0x239   : > { %v970_v11 = vpop.permute.xlu0 %969  ;;  %1125 = vst.msk [vmem:[#allocation2 + $0x94] sm:$0xf] %vm1087_vm2, %v1036_v9  ;;  %v2355_v12 = vpop.f32.mrf.mxu3  ;;  %v2087_v15 = vld [vmem:[#allocation2 + $0x90] sm:$0x1]  ;;  %v11823_v9 = vor.u32 %v13320_v7, %v11822_v1 }
 0x23a   : > { %v1514_v18 = vld [vmem:[#allocation2 + $0x90] sm:$0x1]  ;;  %1092 = vst.msk [vmem:[#allocation2 + $0x10] sm:$0xf] %vm1087_vm2, %v970_v11  ;;  %v2170_v23 = vunpack.c.l.b16 %v2087_v15  ;;  %v14269_v15 = vld [vmem:[#allocation2 + $0x18] sm:$0xff] }
 0x23b   : > { %v1893_v21 = vpop.f32.mrf.mxu2  ;;  %v1597_v24 = vunpack.c.l.b16 %v1514_v18  ;;  %v3709_v27 = vrot.slane %v11823_v9, 2 }
 0x23c   : > { %v1995_v25 = vadd.f32 %v1959_v22, %v1893_v21  ;;  %v2189_v26 = vpack.c.b16 %v2170_v23, %v2170_v23  ;;  %v13622_v23 = vld [vmem:[%s17459_s4 + $0x50] sm:$0xff] }
 0x23d   : > { %v1616_v28 = vpack.c.b16 %v1597_v24, %v1597_v24  ;;  %v2420_v29 = vld [vmem:[#allocation4 + $0x78] sm:$0xff] }
 0x23e   : > { %2031 = vst.msk [vmem:[#allocation4 + $0x80] sm:$0xff] %vm1441_vm5, %v1995_v25  ;;  %v2456_v30 = vadd.f32 %v2420_v29, %v2352_v61  ;;  %v1401_v33 = vpop.f32.mrf.mxu1  ;;  %v2226_v36 = vrot.slane %v2189_v26, 1  ;;  %v1962_v26 = vld [vmem:[#allocation4 + $0x98] sm:$0xff] }
 0x23f   : > { %v1762_v32 = vshll.u32 %v1616_v28, 16  ;;  %1462 = vst.msk [vmem:[#allocation4 + $0xa0] sm:$0xff] %vm1441_vm5, %v1401_v33  ;;  %v13623_v33 = vld [vmem:[%s17459_s4 + $0x48] sm:$0xff] }
 0x240   : > { %2492 = vst.msk [vmem:[#allocation4 + $0x78] sm:$0xff] %vm1441_vm5, %v2456_v30  ;;  %v14241_v35 = vpop.permute.xlu2 %5867  ;;  %v2227_v49 = vsel %vm2190_vm3, %v2224_v59, %v2226_v36  ;;  %v11709_v59 = vor.u32 %v13298_v17, %v11708_v50  ;;  %v2655_v30 = vrot.slane %v14269_v15, 1  ;;  %v14312_v15 = vld [vmem:[#allocation2 + $0x20] sm:$0xff] }
 0x241   : > { %v964_v37 = vpop.permute.xlu0 %963  ;;  %v2357_v16 = vpop.f32.mrf.mxu3  ;;  %v14243_v38 = vld [vmem:[#allocation2 + $0x10] sm:$0xff]  ;;  %v1764_v43 = vrot.slane %v1762_v32, 1 }
 0x242   : > { %1089 = vst.msk [vmem:[#allocation2 + $0x4] sm:$0xf] %vm1087_vm2, %v964_v37  ;;  %v2653_v46 = vrot.slane %v14243_v38, 1  ;;  %v13299_v54 = vld [vmem:[#allocation2 + $0x10] sm:$0xff]  ;;  %v3115_v3 = vshrl.u32 %v11709_v59, 16  ;;  %v3118_v4 = vshll.u32 %v11709_v59, 16 }
 0x243   : > { %v1895_v39 = vpop.f32.mrf.mxu2  ;;  %v1765_v53 = vsel %vm1617_vm4, %v1760_v51, %v1764_v43  ;;  %v3123_v63 = vshrl.u32 %v13299_v54, 16  ;;  %v3126_v0 = vshll.u32 %v13299_v54, 16  ;;  %v14263_v2 = vld [vmem:[#allocation2 + $0x10] sm:$0xff]  ;;  %v13624_v38 = vld [vmem:[%s17459_s4 + $0x40] sm:$0xff]  ;;  %v13211_v43 = vld [vmem:[#allocation2 + $0x8] sm:$0xff] }
 0x244   : > { %v1996_v44 = vadd.f32 %v1960_v40, %v1895_v39  ;;  %v2654_v20 = vsel %vm2190_vm3, %v2652_v45, %v2653_v46  ;;  %v3710_v18 = vrot.slane %v14263_v2, 2  ;;  %v3117_v21 = vrot.slane %v3115_v3, 1  ;;  %v13300_v40 = vld [vmem:[#allocation2 + $0x18] sm:$0xff]  ;;  %v13301_v3 = vld [vmem:[#allocation2 + $0x20] sm:$0xff] }
 0x245   : > { %v2421_v52 = vld [vmem:[#allocation4 + $0x80] sm:$0xff]  ;;  %11583 = vmatmul.msk.bf16.gmra.mxu3 %vm614_vm0, %v2227_v49  ;;  %11680 = vmatmul.msk.bf16.vlgmr.msrb.gmra.mxu1 %vm614_vm0, %v2654_v20  ;;  %v3125_v14 = vrot.slane %v3123_v63, 1  ;;  %v3128_v11 = vrot.slane %v3126_v0, 2  ;;  %v3120_v22 = vrot.slane %v3118_v4, 2  ;;  %v2656_v36 = vsel %vm2190_vm3, %v2653_v46, %v2655_v30  ;;  %v14297_v20 = vld [vmem:[#allocation2 + $0x20] sm:$0xff] }
 0x246   : > { %2032 = vst.msk [vmem:[#allocation4 + $0x88] sm:$0xff] %vm1441_vm5, %v1996_v44  ;;  %v1403_v55 = vpop.f32.mrf.mxu1  ;;  %v2457_v56 = vadd.f32 %v2421_v52, %v2355_v12  ;;  %v3711_v31 = vsel %vm3708_vm6, %v3709_v27, %v3710_v18  ;;  %v1963_v45 = vld [vmem:[#allocation4 + $0xa0] sm:$0xff]  ;;  %v3132_v49 = vshrl.u32 %v13300_v40, 16  ;;  %v3135_v51 = vshll.u32 %v13300_v40, 16 }
 0x247   : > { %1463 = vst.msk [vmem:[#allocation4 + $0xa8] sm:$0xff] %vm1441_vm5, %v1403_v55  ;;  %v3129_v28 = vor.u32 %v3128_v11, %v3125_v14  ;;  %v3121_v32 = vor.u32 %v3120_v22, %v3117_v21  ;;  %v3141_v9 = vshrl.u32 %v13301_v3, 16  ;;  %v3144_v14 = vshll.u32 %v13301_v3, 16 }
 0x248   : > { %11469 = vmatmul.msk.bf16.gmra.mxu2 %vm614_vm0, %v1765_v53  ;;  %v1040_v58 = vpop.permute.xlu2 %1039  ;;  %2493 = vst.msk [vmem:[#allocation4 + $0x80] sm:$0xff] %vm1441_vm5, %v2457_v56  ;;  %v13322_v53 = vld [vmem:[#allocation2 + $0x18] sm:$0xff]  ;;  %v3134_v55 = vrot.slane %v3132_v49, 1  ;;  %v3137_v17 = vrot.slane %v3135_v51, 2  ;;  %v3714_v27 = vrot.slane %v14312_v15, 2  ;;  %v13302_v49 = vld [vmem:[#allocation2 + $0x28] sm:$0xff] }
 0x249   : > { %1127 = vst.msk [vmem:[#allocation2 + $0x9c] sm:$0xf] %vm1087_vm2, %v1040_v58  ;;  %v2360_v60 = vpop.f32.mrf.mxu3  ;;  %v13210_v61 = vld [vmem:[#allocation2] sm:$0xff]  ;;  %v2657_v58 = vrot.slane %v14297_v20, 1  ;;  %v3143_v22 = vrot.slane %v3141_v9, 1 }
 0x24a   : > { %11338 = vmatmul.msk.bf16.vlgmr.msrb.gmra.mxu0 %vm614_vm0, %v13210_v61  ;;  %v3712_v61 = vrot.slane %v13322_v53, 2  ;;  %v3138_v63 = vor.u32 %v3137_v17, %v3134_v55  ;;  %v13232_v11 = vld [vmem:[#allocation2] sm:$0xff]  ;;  %v3153_v55 = vshll.u32 %v13302_v49, 16 }
 0x24b   : > { %v1898_v62 = vpop.f32.mrf.mxu2  ;;  %2310 = vmatpush.bf16.msrb.mxu0 %v13621_v5 }
 0x24c   : > { %v1997_v19 = vadd.f32 %v1961_v13, %v1898_v62  ;;  %v3713_v13 = vsel %vm3708_vm6, %v3710_v18, %v3712_v61  ;;  %v3139_v2 = vsel %vm3113_vm7, %v3129_v28, %v3138_v63 }
 0x24d   : > { %v2422_v6 = vld [vmem:[#allocation4 + $0x88] sm:$0xff] }
 0x24e   : > { %2033 = vst.msk [vmem:[#allocation4 + $0x90] sm:$0xff] %vm1441_vm5, %v1997_v19  ;;  %v2458_v8 = vadd.f32 %v2422_v6, %v2357_v16  ;;  %v1406_v12 = vpop.f32.mrf.mxu1  ;;  %v3130_v16 = vsel %vm3113_vm7, %v3121_v32, %v3129_v28  ;;  %v2658_v19 = vsel %vm2190_vm3, %v2655_v30, %v2657_v58  ;;  %v13212_v6 = vld [vmem:[#allocation2 + $0x10] sm:$0xff]  ;;  %v14320_v28 = vld [vmem:[#allocation2 + $0x8] sm:$0xff] }
 0x24f   : > { %1464 = vst.msk [vmem:[#allocation4 + $0xb0] sm:$0xff] %vm1441_vm5, %v1406_v12  ;;  %2311 = vmatpush.bf16.msrb.mxu0 %v13622_v23  ;;  %v3146_v23 = vrot.slane %v3144_v14, 2  ;;  %v1630_v15 = vshrl.u32 %v14320_v28, 16 }
 0x250   : > { %2494 = vst.msk [vmem:[#allocation4 + $0x88] sm:$0xff] %vm1441_vm5, %v2458_v8 }
 0x251   : > { %v2362_v24 = vpop.f32.mrf.mxu3  ;;  %v3147_v32 = vor.u32 %v3146_v23, %v3143_v22 }
 0x253   : > { %v1900_v25 = vpop.f32.mrf.mxu2  ;;  %2312 = vmatpush.bf16.msrb.mxu0 %v13623_v33 }
 0x254   : > { %v1998_v29 = vadd.f32 %v1962_v26, %v1900_v25  ;;  %v14315_v26 = vld [vmem:[#allocation2 + $0x28] sm:$0xff] }
 0x255   : > { %v2423_v34 = vld [vmem:[#allocation4 + $0x90] sm:$0xff]  ;;  %11908 = vmatmul.msk.bf16.vlgmr.msrb.gmra.mxu3 %vm614_vm0, %v3711_v31  ;;  %11681 = vmatmul.msk.bf16.gmra.mxu1 %vm614_vm0, %v2656_v36  ;;  %v2659_v36 = vrot.slane %v14315_v26, 1 }
 0x256   : > { %2034 = vst.msk [vmem:[#allocation4 + $0x98] sm:$0xff] %vm1441_vm5, %v1998_v29  ;;  %v2459_v37 = vadd.f32 %v2423_v34, %v2360_v60  ;;  %v1408_v39 = vpop.f32.mrf.mxu1  ;;  %v1964_v60 = vld [vmem:[#allocation4 + $0xa8] sm:$0xff]  ;;  %v1965_v8 = vld [vmem:[#allocation4 + $0xb0] sm:$0xff] }
 0x257   : > { %1465 = vst.msk [vmem:[#allocation4 + $0xb8] sm:$0xff] %vm1441_vm5, %v1408_v39  ;;  %2313 = vmatpush.bf16.msrb.mxu0 %v13624_v38  ;;  %v1626_v39 = vshll.u32 %v14320_v28, 16  ;;  %v2660_v38 = vsel %vm2190_vm3, %v2657_v58, %v2659_v36  ;;  %v13384_v58 = vld [vmem:[%s17459_s4 + $0xf0] sm:$0xff] }
 0x258   : > { %11794 = vmatmul.msk.bf16.vlgmr.msrb.gmra.mxu2 %vm614_vm0, %v3130_v16  ;;  %2495 = vst.msk [vmem:[#allocation4 + $0x90] sm:$0xff] %vm1441_vm5, %v2459_v37  ;;  %v3715_v37 = vsel %vm3708_vm6, %v3712_v61, %v3714_v27  ;;  %v1619_v16 = vshrl.u32 %v13232_v11, 16  ;;  %v14341_v61 = vld [vmem:[#allocation2 + $0x10] sm:$0xff]  ;;  %4885 = vmatpush.bf16.msra.mxu1 %v13384_v58 }
 0x259   : > { %v2365_v41 = vpop.f32.mrf.mxu3 }
 0x25a   : > { %11339 = vmatmul.msk.bf16.gmra.mxu0 %vm614_vm0, %v13211_v43  ;;  %v3148_v43 = vsel %vm3113_vm7, %v3138_v63, %v3147_v32  ;;  %v3155_v63 = vrot.slane %v3153_v55, 2 }
 0x25b   : > { %v1903_v44 = vpop.f32.mrf.mxu2 }
 0x25c   : > { %v1999_v46 = vadd.f32 %v1963_v45, %v1903_v44 }
 0x25d   : > { %v2424_v52 = vld [vmem:[#allocation4 + $0x98] sm:$0xff] }
 0x25e   : > { %2035 = vst.msk [vmem:[#allocation4 + $0xa0] sm:$0xff] %vm1441_vm5, %v1999_v46  ;;  %v2460_v50 = vadd.f32 %v2424_v52, %v2362_v24  ;;  %v1411_v54 = vpop.f32.mrf.mxu1  ;;  %v1621_v24 = vshll.u32 %v13232_v11, 16  ;;  %v1966_v31 = vld [vmem:[#allocation4 + $0xb8] sm:$0xff]  ;;  %v1628_v46 = vrot.slane %v1626_v39, 1 }
 0x25f   : > { %1466 = vst.msk [vmem:[#allocation4 + $0xc0] sm:$0xff] %vm1441_vm5, %v1411_v54  ;;  %v3150_v54 = vshrl.u32 %v13302_v49, 16  ;;  %v1638_v49 = vshrl.u32 %v14341_v61, 16 }
 0x260   : > { %2496 = vst.msk [vmem:[#allocation4 + $0x98] sm:$0xff] %vm1441_vm5, %v2460_v50  ;;  %v1623_v33 = vrot.slane %v1621_v24, 1  ;;  %v1632_v23 = vor.u32 %v1630_v15, %v1628_v46 }
 0x261   : > { %v2367_v56 = vpop.f32.mrf.mxu3 }
 0x262   : > { %v1624_v44 = vor.u32 %v1623_v33, %v1619_v16  ;;  %v14363_v33 = vld [vmem:[#allocation2 + $0x38] sm:$0xff] }
 0x263   : > { %v1905_v59 = vpop.f32.mrf.mxu2 }
 0x264   : > { %v2000_v62 = vadd.f32 %v1964_v60, %v1905_v59  ;;  %v1629_v52 = vsel %vm1617_vm4, %v1624_v44, %v1628_v46  ;;  %v13324_v60 = vld [vmem:[#allocation2 + $0x28] sm:$0xff] }
 0x265   : > { %v2425_v0 = vld [vmem:[#allocation4 + $0xa0] sm:$0xff]  ;;  %11909 = vmatmul.msk.bf16.gmra.mxu3 %vm614_vm0, %v3713_v13  ;;  %11682 = vmatmul.msk.bf16.gmra.mxu1 %vm614_vm0, %v2658_v19  ;;  %v3152_v13 = vrot.slane %v3150_v54, 1  ;;  %v13304_v54 = vld [vmem:[#allocation2 + $0x38] sm:$0xff] }
 0x266   : > { %2036 = vst.msk [vmem:[#allocation4 + $0xa8] sm:$0xff] %vm1441_vm5, %v2000_v62  ;;  %v2461_v1 = vadd.f32 %v2425_v0, %v2365_v41  ;;  %v1413_v4 = vpop.f32.mrf.mxu1  ;;  %v1967_v50 = vld [vmem:[#allocation4 + $0xc0] sm:$0xff] }
 0x267   : > { %1467 = vst.msk [vmem:[#allocation4 + $0xc8] sm:$0xff] %vm1441_vm5, %v1413_v4  ;;  %v13406_v0 = vld [vmem:[%s17459_s4 + $0x110] sm:$0xff]  ;;  %v3716_v4 = vrot.slane %v13324_v60, 2  ;;  %v3168_v60 = vshrl.u32 %v13304_v54, 16 }
 0x268   : > { %11795 = vmatmul.msk.bf16.gmra.mxu2 %vm614_vm0, %v3139_v2  ;;  %2497 = vst.msk [vmem:[#allocation4 + $0xa0] sm:$0xff] %vm1441_vm5, %v2461_v1 }
 0x269   : > { %v2370_v5 = vpop.f32.mrf.mxu3  ;;  %5347 = vmatpush.bf16.msra.mxu2 %v13406_v0  ;;  %v14384_v0 = vld [vmem:[#allocation2 + $0x40] sm:$0xff] }
 0x26a   : > { %11340 = vmatmul.msk.bf16.gmra.mxu0 %vm614_vm0, %v13212_v6 }
 0x26b   : > { %v1908_v7 = vpop.f32.mrf.mxu2 }
 0x26c   : > { %v2001_v12 = vadd.f32 %v1965_v8, %v1908_v7  ;;  %v3717_v7 = vsel %vm3708_vm6, %v3714_v27, %v3716_v4  ;;  %v3156_v8 = vor.u32 %v3155_v63, %v3152_v13  ;;  %v14381_v13 = vld [vmem:[#allocation2 + $0x38] sm:$0xff] }
 0x26d   : > { %v2426_v18 = vld [vmem:[#allocation4 + $0xa8] sm:$0xff] }
 0x26e   : > { %2037 = vst.msk [vmem:[#allocation4 + $0xb0] sm:$0xff] %vm1441_vm5, %v2001_v12  ;;  %v2462_v21 = vadd.f32 %v2426_v18, %v2367_v56  ;;  %v1416_v25 = vpop.f32.mrf.mxu1  ;;  %v14336_v56 = vld [vmem:[#allocation2 + $0x30] sm:$0xff]  ;;  %v1968_v3 = vld [vmem:[#allocation4 + $0xc8] sm:$0xff]  ;;  %v3157_v12 = vsel %vm3113_vm7, %v3147_v32, %v3156_v8 }
 0x26f   : > { %1468 = vst.msk [vmem:[#allocation4 + $0xd0] sm:$0xff] %vm1441_vm5, %v1416_v25  ;;  %v2661_v1 = vrot.slane %v14336_v56, 1 }
 0x270   : > { %2498 = vst.msk [vmem:[#allocation4 + $0xa8] sm:$0xff] %vm1441_vm5, %v2462_v21  ;;  %v13303_v21 = vld [vmem:[#allocation2 + $0x30] sm:$0xff] }
 0x271   : > { %v2372_v29 = vpop.f32.mrf.mxu3  ;;  %v2662_v14 = vsel %vm2190_vm3, %v2659_v36, %v2661_v1 }
 0x273   : > { %v1910_v30 = vpop.f32.mrf.mxu2 }
 0x274   : > { %v2002_v34 = vadd.f32 %v1966_v31, %v1910_v30  ;;  %v3162_v30 = vshll.u32 %v13303_v21, 16  ;;  %v13325_v31 = vld [vmem:[#allocation2 + $0x30] sm:$0xff] }
 0x275   : > { %v2427_v40 = vld [vmem:[#allocation4 + $0xb0] sm:$0xff]  ;;  %11910 = vmatmul.msk.bf16.gmra.mxu3 %vm614_vm0, %v3715_v37  ;;  %11683 = vmatmul.msk.bf16.gmra.mxu1 %vm614_vm0, %v2660_v38  ;;  %v3718_v39 = vrot.slane %v13325_v31, 2  ;;  %v2663_v38 = vrot.slane %v14363_v33, 1 }
 0x276   : > { %2038 = vst.msk [vmem:[#allocation4 + $0xb8] sm:$0xff] %vm1441_vm5, %v2002_v34  ;;  %v2463_v41 = vadd.f32 %v2427_v40, %v2370_v5  ;;  %v1418_v45 = vpop.f32.mrf.mxu1  ;;  %v1634_v5 = vshll.u32 %v14341_v61, 16  ;;  %v1969_v27 = vld [vmem:[#allocation4 + $0xd0] sm:$0xff]  ;;  %v3164_v37 = vrot.slane %v3162_v30, 2  ;;  %v3171_v61 = vshll.u32 %v13304_v54, 16 }
 0x277   : > { %1469 = vst.msk [vmem:[#allocation4 + $0xd8] sm:$0xff] %vm1441_vm5, %v1418_v45  ;;  %v3719_v46 = vsel %vm3708_vm6, %v3716_v4, %v3718_v39  ;;  %v13254_v4 = vld [vmem:[#allocation2] sm:$0xf0] }
 0x278   : > { %11796 = vmatmul.msk.bf16.gmra.mxu2 %vm614_vm0, %v3148_v43  ;;  %2499 = vst.msk [vmem:[#allocation4 + $0xb0] sm:$0xff] %vm1441_vm5, %v2463_v41  ;;  %v1636_v18 = vrot.slane %v1634_v5, 1 }
 0x279   : > { %v2375_v51 = vpop.f32.mrf.mxu3 }
 0x27a   : > { %11452 = vmatmul.msk.bf16.vlgmr.msra.gmra.mxu0 %vm614_vm0, %v1629_v52  ;;  %v1637_v25 = vsel %vm1617_vm4, %v1632_v23, %v1636_v18  ;;  %v2664_v52 = vsel %vm2190_vm3, %v2661_v1, %v2663_v38  ;;  %v3170_v1 = vrot.slane %v3168_v60, 1 }
 0x27b   : > { %v1913_v20 = vpop.f32.mrf.mxu2 }
 0x27c   : > { %v2003_v53 = vadd.f32 %v1967_v50, %v1913_v20 }
 0x27d   : > { %v2428_v17 = vld [vmem:[#allocation4 + $0xb8] sm:$0xff] }
 0x27e   : > { %2039 = vst.msk [vmem:[#allocation4 + $0xc0] sm:$0xff] %vm1441_vm5, %v2003_v53  ;;  %v2464_v59 = vadd.f32 %v2428_v17, %v2372_v29  ;;  %v1421_v62 = vpop.f32.mrf.mxu1  ;;  %v3159_v29 = vshrl.u32 %v13303_v21, 16  ;;  %v1970_v43 = vld [vmem:[#allocation4 + $0xd8] sm:$0xff]  ;;  %v1640_v53 = vor.u32 %v1638_v49, %v1636_v18 }
 0x27f   : > { %1470 = vst.msk [vmem:[#allocation4 + $0xe0] sm:$0xff] %vm1441_vm5, %v1421_v62  ;;  %v14393_v18 = vld [vmem:[#allocation2 + $0x8] sm:$0xff] }
 0x280   : > { %2500 = vst.msk [vmem:[#allocation4 + $0xb8] sm:$0xff] %vm1441_vm5, %v2464_v59  ;;  %v3161_v36 = vrot.slane %v3159_v29, 1  ;;  %v1645_v56 = vsel %vm1617_vm4, %v1640_v53, %v13911_v47  ;;  %v3720_v47 = vrot.slane %v14381_v13, 2  ;;  %v5806_v29 = vld [vmem:[%s17458_s3 + $0x60] sm:$0xff]  ;;  %v2192_v30 = vrot.slane %v14393_v18, 1 }
 0x281   : > { %v2377_v19 = vpop.f32.mrf.mxu3  ;;  %5892 = vperm.xlu2 %13614, %v5806_v29  }
 0x282   : > { %v3165_v44 = vor.u32 %v3164_v37, %v3161_v36  ;;  %v3721_v15 = vsel %vm3708_vm6, %v3718_v39, %v3720_v47  ;;  %v13363_v39 = vld [vmem:[%s17459_s4 + $0xd8] sm:$0xff] }
 0x283   : > { %v1915_v2 = vpop.f32.mrf.mxu2  ;;  %4289 = vmatpush.bf16.msra.mxu0 %v13363_v39  ;;  %v13405_v39 = vld [vmem:[%s17459_s4 + $0x108] sm:$0xff] }
 0x284   : > { %v2004_v6 = vadd.f32 %v1968_v3, %v1915_v2  ;;  %v3166_v50 = vsel %vm3113_vm7, %v3156_v8, %v3165_v44  ;;  %v3173_v2 = vrot.slane %v3171_v61, 2  ;;  %5348 = vmatpush.bf16.msra.mxu2 %v13405_v39 }
 0x285   : > { %v2429_v9 = vld [vmem:[#allocation4 + $0xc0] sm:$0xff]  ;;  %11911 = vmatmul.msk.bf16.gmra.mxu3 %vm614_vm0, %v3717_v7  ;;  %11684 = vmatmul.msk.bf16.gmra.mxu1 %vm614_vm0, %v2662_v14  ;;  %v11480_v7 = vld [vmem:[#allocation2] sm:$0xe] }
 0x286   : > { %2040 = vst.msk [vmem:[#allocation4 + $0xc8] sm:$0xff] %vm1441_vm5, %v2004_v6  ;;  %v2465_v11 = vadd.f32 %v2429_v9, %v2375_v51  ;;  %v1423_v22 = vpop.f32.mrf.mxu1  ;;  %v1971_v59 = vld [vmem:[#allocation4 + $0xe0] sm:$0xff]  ;;  %v2665_v6 = vrot.slane %v14384_v0, 1  ;;  %v14390_v14 = vor.u32 %v3173_v2, %v3170_v1  ;;  %v13360_v0 = vld [vmem:[%s17459_s4 + $0xc0] sm:$0xff] }
 0x287   : > { %1471 = vst.msk [vmem:[#allocation4 + $0xe8] sm:$0xff] %vm1441_vm5, %v1423_v22  ;;  %v5812_v2 = vld [vmem:[%s17458_s3 + $0x90] sm:$0xff] }
 0x288   : > { %11797 = vmatmul.msk.bf16.gmra.mxu2 %vm614_vm0, %v3157_v12  ;;  %2501 = vst.msk [vmem:[#allocation4 + $0xc0] sm:$0xff] %vm1441_vm5, %v2465_v11  ;;  %v11481_v11 = vor.u32 %v13254_v4, %v11480_v7  ;;  %v2666_v22 = vsel %vm2190_vm3, %v2663_v38, %v2665_v6  ;;  %v14418_v38 = vld [vmem:[#allocation2 + $0x48] sm:$0xff] }
 0x289   : > { %v2380_v24 = vpop.f32.mrf.mxu3 }
 0x28a   : > { %11453 = vmatmul.msk.bf16.gmra.mxu0 %vm614_vm0, %v1637_v25  ;;  %v2191_v25 = vrot.slane %v11481_v11, 1  ;;  %v14461_v11 = vld [vmem:[#allocation2 + $0x50] sm:$0xff] }
 0x28b   : > { %v1918_v26 = vpop.f32.mrf.mxu2 }
 0x28c   : > { %v2005_v28 = vadd.f32 %v1969_v27, %v1918_v26  ;;  %v13305_v26 = vld [vmem:[#allocation2 + $0x40] sm:$0xff]  ;;  %v2193_v33 = vsel %vm2190_vm3, %v2191_v25, %v2192_v30  ;;  %v2669_v25 = vrot.slane %v14461_v11, 1 }
 0x28d   : > { %v2430_v32 = vld [vmem:[#allocation4 + $0xc8] sm:$0xff]  ;;  %v3180_v36 = vshll.u32 %v13305_v26, 16 }
 0x28e   : > { %2041 = vst.msk [vmem:[#allocation4 + $0xd0] sm:$0xff] %vm1441_vm5, %v2005_v28  ;;  %v2466_v34 = vadd.f32 %v2430_v32, %v2377_v19  ;;  %v1426_v16 = vpop.f32.mrf.mxu1  ;;  %v1972_v9 = vld [vmem:[#allocation4 + $0xe8] sm:$0xff] }
 0x28f   : > { %1472 = vst.msk [vmem:[#allocation4 + $0xf0] sm:$0xff] %vm1441_vm5, %v1426_v16  ;;  %v14412_v16 = vld [vmem:[#allocation2 + $0x40] sm:$0xff] }
 0x290   : > { %2502 = vst.msk [vmem:[#allocation4 + $0xc8] sm:$0xff] %vm1441_vm5, %v2466_v34  ;;  %v3177_v34 = vshrl.u32 %v13305_v26, 16 }
 0x291   : > { %v2382_v40 = vpop.f32.mrf.mxu3 }
 0x293   : > { %v1920_v41 = vpop.f32.mrf.mxu2 }
 0x294   : > { %v2006_v45 = vadd.f32 %v1970_v43, %v1920_v41  ;;  %v5809_v41 = vld [vmem:[%s17458_s3 + $0x78] sm:$0xff] }
 0x295   : > { %v2431_v51 = vld [vmem:[#allocation4 + $0xd0] sm:$0xff]  ;;  %11912 = vmatmul.msk.bf16.gmra.mxu3 %vm614_vm0, %v3719_v46  ;;  %11685 = vmatmul.msk.bf16.gmra.mxu1 %vm614_vm0, %v2664_v52  ;;  %v13362_v46 = vld [vmem:[%s17459_s4 + $0xd0] sm:$0xff] }
 0x296   : > { %2042 = vst.msk [vmem:[#allocation4 + $0xd8] sm:$0xff] %vm1441_vm5, %v2006_v45  ;;  %v2467_v20 = vadd.f32 %v2431_v51, %v2380_v24  ;;  %v1428_v55 = vpop.f32.mrf.mxu1  ;;  %v3175_v24 = vsel %vm3113_vm7, %v3165_v44, %v14390_v14  ;;  %v1973_v32 = vld [vmem:[#allocation4 + $0xf0] sm:$0xff]  ;;  %v3179_v44 = vrot.slane %v3177_v34, 1  ;;  %v3182_v45 = vrot.slane %v3180_v36, 2  ;;  %5907 = vperm.xlu2 %13614, %v5809_v41   ;;  %4290 = vmatpush.bf16.msra.mxu0 %v13362_v46 }
 0x297   : > { %1473 = vst.msk [vmem:[#allocation4 + $0xf8] sm:$0xff] %vm1441_vm5, %v1428_v55  ;;  %v3722_v51 = vrot.slane %v14412_v16, 2  ;;  %v14430_v55 = vld [vmem:[#allocation2 + $0x10] sm:$0xff] }
 0x298   : > { %11798 = vmatmul.msk.bf16.gmra.mxu2 %vm614_vm0, %v3166_v50  ;;  %2503 = vst.msk [vmem:[#allocation4 + $0xd0] sm:$0xff] %vm1441_vm5, %v2467_v20  ;;  %v2667_v20 = vrot.slane %v14418_v38, 1  ;;  %v3183_v54 = vor.u32 %v3182_v45, %v3179_v44  ;;  %v13307_v16 = vld [vmem:[#allocation2 + $0x50] sm:$0xff] }
 0x299   : > { %v2385_v17 = vpop.f32.mrf.mxu3 }
 0x29a   : > { %11454 = vmatmul.msk.bf16.gmra.mxu0 %vm614_vm0, %v1645_v56  ;;  %v3723_v56 = vsel %vm3708_vm6, %v3720_v47, %v3722_v51  ;;  %v2668_v61 = vsel %vm2190_vm3, %v2665_v6, %v2667_v20  ;;  %v3184_v13 = vsel %vm3113_vm7, %v14390_v14, %v3183_v54  ;;  %v2670_v34 = vsel %vm2190_vm3, %v2667_v20, %v2669_v25 }
 0x29b   : > { %v1923_v58 = vpop.f32.mrf.mxu2 }
 0x29c   : > { %v2007_v62 = vadd.f32 %v1971_v59, %v1923_v58  ;;  %v14433_v58 = vpop.f32.mrf.mxu0  ;;  %v13361_v59 = vld [vmem:[%s17459_s4 + $0xc8] sm:$0xff] }
 0x29d   : > { %v2432_v63 = vld [vmem:[#allocation4 + $0xd8] sm:$0xff]  ;;  %4291 = vmatpush.bf16.msra.mxu0 %v13361_v59 }
 0x29e   : > { %2043 = vst.msk [vmem:[#allocation4 + $0xe0] sm:$0xff] %vm1441_vm5, %v2007_v62  ;;  %v2468_v19 = vadd.f32 %v2432_v63, %v2382_v40  ;;  %v1431_v3 = vpop.f32.mrf.mxu1  ;;  %v1974_v53 = vld [vmem:[#allocation4 + $0xf8] sm:$0xff]  ;;  %v2194_v63 = vrot.slane %v14430_v55, 1  ;;  %5922 = vperm.xlu2 %13614, %v5812_v2  }
 0x29f   : > { %1474 = vst.msk [vmem:[#allocation4 + $0x100] sm:$0xff] %vm1441_vm5, %v1431_v3 }
 0x2a0   : > { %2504 = vst.msk [vmem:[#allocation4 + $0xd8] sm:$0xff] %vm1441_vm5, %v2468_v19  ;;  %v13306_v19 = vld [vmem:[#allocation2 + $0x48] sm:$0xff]  ;;  %v2197_v46 = vsel %vm2190_vm3, %v2194_v63, %v2196_v48 }
 0x2a1   : > { %v2387_v5 = vpop.f32.mrf.mxu3  ;;  %v3186_v6 = vshrl.u32 %v13306_v19, 16  ;;  %v3189_v7 = vshll.u32 %v13306_v19, 16  ;;  %4292 = vmatpush.bf16.msra.mxu0 %v13360_v0 }
 0x2a3   : > { %v1925_v8 = vpop.f32.mrf.mxu2 }
 0x2a4   : > { %v2008_v12 = vadd.f32 %v1972_v9, %v1925_v8  ;;  %v14458_v9 = vld [vmem:[#allocation2 + $0x48] sm:$0xff]  ;;  %v14466_v18 = vpop.f32.mrf.mxu0 }
 0x2a5   : > { %v2433_v21 = vld [vmem:[#allocation4 + $0xe0] sm:$0xff]  ;;  %11913 = vmatmul.msk.bf16.gmra.mxu3 %vm614_vm0, %v3721_v15  ;;  %11686 = vmatmul.msk.bf16.gmra.mxu1 %vm614_vm0, %v2666_v22  ;;  %v3191_v22 = vrot.slane %v3189_v7, 2 }
 0x2a6   : > { %2044 = vst.msk [vmem:[#allocation4 + $0xe8] sm:$0xff] %vm1441_vm5, %v2008_v12  ;;  %v2469_v23 = vadd.f32 %v2433_v21, %v2385_v17  ;;  %v1433_v27 = vpop.f32.mrf.mxu1  ;;  %v1975_v47 = vld [vmem:[#allocation4 + $0x100] sm:$0xff]  ;;  %v5815_v12 = vld [vmem:[%s17458_s3 + $0xa8] sm:$0xff]  ;;  %v3188_v21 = vrot.slane %v3186_v6, 1  ;;  %v13343_v6 = vld [vmem:[#allocation2 + $0x18] sm:$0xff] }
 0x2a7   : > { %1475 = vst.msk [vmem:[#allocation4 + $0x108] sm:$0xff] %vm1441_vm5, %v1433_v27  ;;  %5937 = vperm.xlu2 %13614, %v5815_v12  }
 0x2a8   : > { %11799 = vmatmul.msk.bf16.gmra.mxu2 %vm614_vm0, %v3175_v24  ;;  %2505 = vst.msk [vmem:[#allocation4 + $0xe0] sm:$0xff] %vm1441_vm5, %v2469_v23  ;;  %v3724_v23 = vrot.slane %v14458_v9, 2  ;;  %v14471_v29 = vor.u32 %v3191_v22, %v3188_v21  ;;  %v13308_v9 = vld [vmem:[#allocation2 + $0x58] sm:$0xff]  ;;  %v4171_v21 = vrot.slane %v13343_v6, 2  ;;  %v5810_v6 = vld [vmem:[%s17458_s3 + $0x80] sm:$0xff] }
 0x2a9   : > { %v2390_v28 = vpop.f32.mrf.mxu3 }
 0x2aa   : > { %11566 = vmatmul.msk.bf16.vlgmr.msrb.gmra.mxu0 %vm614_vm0, %v2193_v33 }
 0x2ab   : > { %v1928_v31 = vpop.f32.mrf.mxu2 }
 0x2ac   : > { %v2009_v37 = vadd.f32 %v1973_v32, %v1928_v31  ;;  %v13383_v31 = vld [vmem:[%s17459_s4 + $0xe8] sm:$0xff]  ;;  %v3725_v32 = vsel %vm3708_vm6, %v3722_v51, %v3724_v23  ;;  %v3198_v51 = vshll.u32 %v13307_v16, 16 }
 0x2ad   : > { %v2434_v40 = vld [vmem:[#allocation4 + $0xe8] sm:$0xff]  ;;  %4886 = vmatpush.bf16.msra.mxu1 %v13383_v31 }
 0x2ae   : > { %2045 = vst.msk [vmem:[#allocation4 + $0xf0] sm:$0xff] %vm1441_vm5, %v2009_v37  ;;  %v2470_v43 = vadd.f32 %v2434_v40, %v2387_v5  ;;  %v1436_v49 = vpop.f32.mrf.mxu1  ;;  %v2195_v5 = vsel %vm2190_vm3, %v2192_v30, %v2194_v63  ;;  %v1976_v27 = vld [vmem:[#allocation4 + $0x108] sm:$0xff]  ;;  %v3193_v37 = vsel %vm3113_vm7, %v3183_v54, %v14471_v29  ;;  %v5818_v40 = vld [vmem:[%s17458_s3 + $0xc0] sm:$0xff]  ;;  %v5799_v63 = vld [vmem:[%s17458_s3 + $0x28] sm:$0xff] }
 0x2af   : > { %1476 = vst.msk [vmem:[#allocation4 + $0x110] sm:$0xff] %vm1441_vm5, %v1436_v49  ;;  %5952 = vperm.xlu2 %13614, %v5818_v40   ;;  %v3195_v49 = vshrl.u32 %v13307_v16, 16  ;;  %v14510_v54 = vld [vmem:[#allocation2 + $0x58] sm:$0xff] }
 0x2b0   : > { %2506 = vst.msk [vmem:[#allocation4 + $0xe8] sm:$0xff] %vm1441_vm5, %v2470_v43  ;;  %v5794_v43 = vld [vmem:[%s17458_s3] sm:$0xff] }
 0x2b1   : > { %v2392_v52 = vpop.f32.mrf.mxu3  ;;  %5832 = vperm.xlu0 %13612, %v5794_v43   ;;  %v3197_v55 = vrot.slane %v3195_v49, 1  ;;  %v13344_v43 = vld [vmem:[#allocation2 + $0x20] sm:$0xff] }
 0x2b3   : > { %v1930_v50 = vpop.f32.mrf.mxu2 }
 0x2b4   : > { %v2010_v17 = vadd.f32 %v1974_v53, %v1930_v50  ;;  %v14507_v50 = vld [vmem:[#allocation2 + $0x50] sm:$0xff] }
 0x2b5   : > { %v2435_v60 = vld [vmem:[#allocation4 + $0xf0] sm:$0xff]  ;;  %11914 = vmatmul.msk.bf16.gmra.mxu3 %vm614_vm0, %v3723_v56  ;;  %11687 = vmatmul.msk.bf16.gmra.mxu1 %vm614_vm0, %v2668_v61  ;;  %v11936_v56 = vld [vmem:[#allocation2 + $0x10] sm:$0xc] }
 0x2b6   : > { %2046 = vst.msk [vmem:[#allocation4 + $0xf8] sm:$0xff] %vm1441_vm5, %v2010_v17  ;;  %v2471_v62 = vadd.f32 %v2435_v60, %v2390_v28  ;;  %v1438_v1 = vpop.f32.mrf.mxu1  ;;  %v1977_v45 = vld [vmem:[#allocation4 + $0x110] sm:$0xff]  ;;  %v3200_v17 = vrot.slane %v3198_v51, 2  ;;  %v3726_v60 = vrot.slane %v14507_v50, 2 }
 0x2b7   : > { %1477 = vst.msk [vmem:[#allocation4 + $0x118] sm:$0xff] %vm1441_vm5, %v1438_v1  ;;  %5967 = vperm.xlu2 %13614, %v5821_v42   ;;  %v13309_v50 = vld [vmem:[#allocation2 + $0x60] sm:$0xff] }
 0x2b8   : > { %11800 = vmatmul.msk.bf16.gmra.mxu2 %vm614_vm0, %v3184_v13  ;;  %2507 = vst.msk [vmem:[#allocation4 + $0xf0] sm:$0xff] %vm1441_vm5, %v2471_v62  ;;  %v2671_v62 = vrot.slane %v14510_v54, 1  ;;  %v13342_v13 = vld [vmem:[#allocation2 + $0x10] sm:$0xf0]  ;;  %v3201_v0 = vor.u32 %v3200_v17, %v3197_v55  ;;  %v3213_v55 = vshrl.u32 %v13309_v50, 16  ;;  %v3216_v17 = vshll.u32 %v13309_v50, 16 }
 0x2b9   : > { %v2395_v3 = vpop.f32.mrf.mxu3  ;;  %v11937_v2 = vor.u32 %v13342_v13, %v11936_v56  ;;  %5857 = vperm.xlu0 %13612, %v5799_v63  }
 0x2ba   : > { %11567 = vmatmul.msk.bf16.gmra.mxu0 %vm614_vm0, %v2195_v5  ;;  %v3727_v5 = vsel %vm3708_vm6, %v3724_v23, %v3726_v60  ;;  %v3218_v13 = vrot.slane %v3216_v17, 2  ;;  %v2874_v17 = vld [vmem:[#allocation4 + $0x40] sm:$0xff] }
 0x2bb   : > { %v1933_v4 = vpop.f32.mrf.mxu2  ;;  %v4170_v12 = vrot.slane %v11937_v2, 2 }
 0x2bc   : > { %v2011_v8 = vadd.f32 %v1975_v47, %v1933_v4  ;;  %v917_v47 = vpack.c.bf16 %v14433_v58, %v14433_v58  ;;  %v3202_v58 = vsel %vm3113_vm7, %v14471_v29, %v3201_v0  ;;  %v5802_v29 = vld [vmem:[%s17458_s3 + $0x40] sm:$0xff] }
 0x2bd   : > { %v2436_v14 = vld [vmem:[#allocation4 + $0xf8] sm:$0xff]  ;;  %v4172_v23 = vsel %vm3708_vm6, %v4170_v12, %v4171_v21 }
 0x2be   : > { %2047 = vst.msk [vmem:[#allocation4 + $0x100] sm:$0xff] %vm1441_vm5, %v2011_v8  ;;  %v2472_v15 = vadd.f32 %v2436_v14, %v2392_v52  ;;  %v1978_v1 = vld [vmem:[#allocation4 + $0x118] sm:$0xff]  ;;  %v2672_v8 = vsel %vm2190_vm3, %v2669_v25, %v2671_v62  ;;  %v3207_v25 = vshll.u32 %v13308_v9, 16 }
 0x2bf   : > { %1041 = vrot.lane.b32.xlu2 %v917_v47, %s13642_s17 }
 0x2c0   : > { %2508 = vst.msk [vmem:[#allocation4 + $0xf8] sm:$0xff] %vm1441_vm5, %v2472_v15 }
 0x2c1   : > { %v2397_v24 = vpop.f32.mrf.mxu3  ;;  %5872 = vperm.xlu0 %13612, %v5802_v29  }
 0x2c2   : > { %v14473_v28 = vpop.f32.mrf.mxu1 }
 0x2c3   : > { %v1935_v26 = vpop.f32.mrf.mxu2 }
 0x2c4   : > { %v2012_v30 = vadd.f32 %v1976_v27, %v1935_v26  ;;  %v13427_v27 = vld [vmem:[%s17463_s8 + $0x8] sm:$0xff] }
 0x2c5   : > { %v2437_v33 = vld [vmem:[#allocation4 + $0x100] sm:$0xff]  ;;  %11915 = vmatmul.msk.bf16.gmra.mxu3 %vm614_vm0, %v3725_v32  ;;  %11688 = vmatmul.msk.bf16.gmra.mxu1 %vm614_vm0, %v2670_v34  ;;  %v13287_v32 = vld [vmem:[#allocation2 + $0x60] sm:$0xff] }
 0x2c6   : > { %2048 = vst.msk [vmem:[#allocation4 + $0x108] sm:$0xff] %vm1441_vm5, %v2012_v30  ;;  %v2473_v36 = vadd.f32 %v2437_v33, %v2395_v3  ;;  %v13330_v30 = vld [vmem:[#allocation2 + $0x58] sm:$0xff]  ;;  %6723 = vmatpush.bf16.msra.mxu3 %v13427_v27  ;;  %v2673_v40 = vrot.slane %v13287_v32, 1 }
 0x2c7   : > { %v1351_v38 = vpop.f32.mrf.mxu0  ;;  %v3728_v16 = vrot.slane %v13330_v30, 2 }
 0x2c8   : > { %11801 = vmatmul.msk.bf16.gmra.mxu2 %vm614_vm0, %v3193_v37  ;;  %2509 = vst.msk [vmem:[#allocation4 + $0x100] sm:$0xff] %vm1441_vm5, %v2473_v36  ;;  %v3209_v36 = vrot.slane %v3207_v25, 2  ;;  %v2674_v49 = vsel %vm2190_vm3, %v2671_v62, %v2673_v40  ;;  %v3215_v62 = vrot.slane %v3213_v55, 1 }
 0x2c9   : > { %1442 = vst.msk [vmem:[#allocation4] sm:$0xff] %vm1441_vm5, %v1351_v38  ;;  %v2400_v41 = vpop.f32.mrf.mxu3 }
 0x2ca   : > { %11568 = vmatmul.msk.bf16.gmra.mxu0 %vm614_vm0, %v2197_v46  ;;  %v14505_v20 = vpop.f32.mrf.mxu1  ;;  %v3729_v46 = vsel %vm3708_vm6, %v3726_v60, %v3728_v16  ;;  %v14584_v60 = vld [vmem:[#allocation2 + $0x60] sm:$0xff] }
 0x2cb   : > { %v1938_v44 = vpop.f32.mrf.mxu2 }
 0x2cc   : > { %v2013_v52 = vadd.f32 %v1977_v45, %v1938_v44  ;;  %v5804_v45 = vld [vmem:[%s17458_s3 + $0x50] sm:$0xff] }
 0x2cd   : > { %v2438_v53 = vld [vmem:[#allocation4 + $0x108] sm:$0xff]  ;;  %5882 = vperm.xlu0 %13612, %v5804_v45  }
 0x2ce   : > { %2049 = vst.msk [vmem:[#allocation4 + $0x110] sm:$0xff] %vm1441_vm5, %v2013_v52  ;;  %v2474_v48 = vadd.f32 %v2438_v53, %v2397_v24  ;;  %v3204_v24 = vshrl.u32 %v13308_v9, 16  ;;  %v4173_v52 = vrot.slane %v13344_v43, 2  ;;  %v13310_v9 = vld [vmem:[#allocation2 + $0x68] sm:$0xff] }
 0x2cf   : > { %v1353_v59 = vpop.f32.mrf.mxu0  ;;  %v3222_v30 = vshrl.u32 %v13310_v9, 16 }
 0x2d0   : > { %2510 = vst.msk [vmem:[#allocation4 + $0x108] sm:$0xff] %vm1441_vm5, %v2474_v48  ;;  %v3206_v34 = vrot.slane %v3204_v24, 1  ;;  %v4174_v48 = vsel %vm3708_vm6, %v4171_v21, %v4173_v52  ;;  %v1943_v21 = vld [vmem:[#allocation4] sm:$0xff] }
 0x2d1   : > { %1443 = vst.msk [vmem:[#allocation4 + $0x8] sm:$0xff] %vm1441_vm5, %v1353_v59  ;;  %v2402_v61 = vpop.f32.mrf.mxu3  ;;  %v5807_v59 = vld [vmem:[%s17458_s3 + $0x68] sm:$0xff] }
 0x2d2   : > { %v14522_v4 = vpop.f32.mrf.mxu1 }
 0x2d3   : > { %v1940_v19 = vpop.f32.mrf.mxu2 }
 0x2d4   : > { %v2014_v3 = vadd.f32 %v1978_v1, %v1940_v19  ;;  %v3730_v19 = vrot.slane %v14584_v60, 2 }
 0x2d5   : > { %v2439_v7 = vld [vmem:[#allocation4 + $0x110] sm:$0xff]  ;;  %11916 = vmatmul.msk.bf16.gmra.mxu3 %vm614_vm0, %v3727_v5  ;;  %11689 = vmatmul.msk.bf16.gmra.mxu1 %vm614_vm0, %v2672_v8 }
 0x2d6   : > { %2050 = vst.msk [vmem:[#allocation4 + $0x118] sm:$0xff] %vm1441_vm5, %v2014_v3  ;;  %v2475_v14 = vadd.f32 %v2439_v7, %v2400_v41  ;;  %v3210_v41 = vor.u32 %v3209_v36, %v3206_v34  ;;  %5897 = vperm.xlu0 %13612, %v5807_v59   ;;  %v3219_v3 = vor.u32 %v3218_v13, %v3215_v62  ;;  %v2872_v5 = vld [vmem:[#allocation4 + $0x30] sm:$0xff]  ;;  %v5813_v34 = vld [vmem:[%s17458_s3 + $0x98] sm:$0xff]  ;;  %v5816_v59 = vld [vmem:[%s17458_s3 + $0xb0] sm:$0xff] }
 0x2d7   : > { %v1356_v15 = vpop.f32.mrf.mxu0  ;;  %v3731_v8 = vsel %vm3708_vm6, %v3728_v16, %v3730_v19  ;;  %v14620_v16 = vld [vmem:[#allocation2 + $0x70] sm:$0xff] }
 0x2d8   : > { %11802 = vmatmul.msk.bf16.gmra.mxu2 %vm614_vm0, %v3202_v58  ;;  %2511 = vst.msk [vmem:[#allocation4 + $0x110] sm:$0xff] %vm1441_vm5, %v2475_v14  ;;  %v3211_v51 = vsel %vm3113_vm7, %v3201_v0, %v3210_v41  ;;  %v14599_v14 = vld [vmem:[#allocation2 + $0x28] sm:$0xff]  ;;  %v3220_v12 = vsel %vm3113_vm7, %v3210_v41, %v3219_v3  ;;  %v1944_v45 = vld [vmem:[#allocation4 + $0x8] sm:$0xff] }
 0x2d9   : > { %1444 = vst.msk [vmem:[#allocation4 + $0x10] sm:$0xff] %vm1441_vm5, %v1356_v15  ;;  %v14541_v11 = vpop.f32.mrf.mxu3 }
 0x2da   : > { %v14546_v26 = vpop.f32.mrf.mxu1  ;;  %12022 = vmatmul.msk.bf16.vlgmr.msra.gmra.mxu0 %vm614_vm0, %v4172_v23  ;;  %v4175_v23 = vrot.slane %v14599_v14, 2 }
 0x2db   : > { %v14543_v22 = vpop.f32.mrf.mxu2 }
 0x2dc   : > { %v4176_v29 = vsel %vm3708_vm6, %v4173_v52, %v4175_v23  ;;  %v2677_v52 = vrot.slane %v14620_v16, 1  ;;  %v13312_v16 = vld [vmem:[#allocation2 + $0x78] sm:$0xff] }
 0x2dd   : > { %v2440_v31 = vld [vmem:[#allocation4 + $0x118] sm:$0xff] }
 0x2de   : > { %v2476_v33 = vadd.f32 %v2440_v31, %v2402_v61  ;;  %v14586_v61 = vld [vmem:[#allocation2 + $0x68] sm:$0xff]  ;;  %5912 = vperm.xlu0 %13612, %v5810_v6   ;;  %v3225_v31 = vshll.u32 %v13310_v9, 16 }
 0x2df   : > { %v1358_v37 = vpop.f32.mrf.mxu0  ;;  %v2675_v0 = vrot.slane %v14586_v61, 1 }
 0x2e0   : > { %2512 = vst.msk [vmem:[#allocation4 + $0x118] sm:$0xff] %vm1441_vm5, %v2476_v33  ;;  %v2873_v33 = vld [vmem:[#allocation4 + $0x38] sm:$0xff]  ;;  %v3227_v41 = vrot.slane %v3225_v31, 2  ;;  %v1945_v6 = vld [vmem:[#allocation4 + $0x10] sm:$0xff] }
 0x2e1   : > { %1445 = vst.msk [vmem:[#allocation4 + $0x18] sm:$0xff] %vm1441_vm5, %v1358_v37  ;;  %v14557_v39 = vpop.f32.mrf.mxu3  ;;  %v2676_v58 = vsel %vm2190_vm3, %v2673_v40, %v2675_v0  ;;  %v14618_v37 = vld [vmem:[#allocation2 + $0x68] sm:$0xff]  ;;  %v3224_v40 = vrot.slane %v3222_v30, 1  ;;  %v2678_v62 = vsel %vm2190_vm3, %v2675_v0, %v2677_v52  ;;  %v14660_v30 = vld [vmem:[#allocation2 + $0x78] sm:$0xff] }
 0x2e2   : > { %v14561_v44 = vpop.f32.mrf.mxu1 }
 0x2e3   : > { %v14559_v38 = vpop.f32.mrf.mxu2 }
 0x2e5   : > { %11917 = vmatmul.msk.bf16.gmra.mxu3 %vm614_vm0, %v3729_v46  ;;  %11690 = vmatmul.msk.bf16.gmra.mxu1 %vm614_vm0, %v2674_v49  ;;  %v3732_v46 = vrot.slane %v14618_v37, 2 }
 0x2e6   : > { %5927 = vperm.xlu0 %13612, %v5813_v34  }
 0x2e7   : > { %v1361_v53 = vpop.f32.mrf.mxu0  ;;  %v3733_v61 = vsel %vm3708_vm6, %v3730_v19, %v3732_v46 }
 0x2e8   : > { %11803 = vmatmul.msk.bf16.gmra.mxu2 %vm614_vm0, %v3211_v51  ;;  %1446 = vst.msk [vmem:[#allocation4 + $0x20] sm:$0xff] %vm1441_vm5, %v1361_v53  ;;  %v14629_v53 = vor.u32 %v3227_v41, %v3224_v40 }
 0x2e9   : > { %v14573_v54 = vpop.f32.mrf.mxu3 }
 0x2ea   : > { %v14578_v56 = vpop.f32.mrf.mxu1  ;;  %12023 = vmatmul.msk.bf16.gmra.mxu0 %vm614_vm0, %v4174_v48  ;;  %v14631_v48 = vld [vmem:[#allocation2 + $0x30] sm:$0xff]  ;;  %v3229_v13 = vsel %vm3113_vm7, %v3219_v3, %v14629_v53 }
 0x2eb   : > { %v14575_v42 = vpop.f32.mrf.mxu2 }
 0x2ee   : > { %5942 = vperm.xlu0 %13612, %v5816_v59   ;;  %v14672_v59 = vld [vmem:[#allocation2 + $0x38] sm:$0xff] }
 0x2ef   : > { %v1363_v63 = vpop.f32.mrf.mxu0 }
 0x2f0   : > { %1447 = vst.msk [vmem:[#allocation4 + $0x28] sm:$0xff] %vm1441_vm5, %v1363_v63  ;;  %v4177_v63 = vrot.slane %v14631_v48, 2  ;;  %v13404_v48 = vld [vmem:[%s17459_s4 + $0x100] sm:$0xff] }
 0x2f1   : > { %v14590_v1 = vpop.f32.mrf.mxu3  ;;  %5349 = vmatpush.bf16.msra.mxu2 %v13404_v48 }
 0x2f2   : > { %v2791_v47 = vpop.f32.mrf.mxu1 }
 0x2f3   : > { %v14593_v2 = vpop.f32.mrf.mxu2  ;;  %v2908_v7 = vadd.f32 %v2872_v5, %v2791_v47  ;;  %v13311_v47 = vld [vmem:[#allocation2 + $0x70] sm:$0xff]  ;;  %v14649_v5 = vpop.permute.xlu2 %5892 }
 0x2f4   : > { %v3234_v9 = vshll.u32 %v13311_v47, 16 }
 0x2f5   : > { %11918 = vmatmul.msk.bf16.gmra.mxu3 %vm614_vm0, %v3731_v8  ;;  %2944 = vst.msk [vmem:[#allocation4 + $0x30] sm:$0xff] %vm1441_vm5, %v2908_v7  ;;  %11691 = vmatmul.msk.bf16.gmra.mxu1 %vm614_vm0, %v2676_v58  ;;  %v4178_v58 = vsel %vm3708_vm6, %v4175_v23, %v4177_v63 }
 0x2f6   : > { %v3236_v23 = vrot.slane %v3234_v9, 2 }
 0x2f7   : > { %v1853_v15 = vpop.f32.mrf.mxu0 }
 0x2f8   : > { %11804 = vmatmul.msk.bf16.gmra.mxu2 %vm614_vm0, %v3220_v12  ;;  %v1979_v24 = vadd.f32 %v1943_v21, %v1853_v15  ;;  %v3231_v12 = vshrl.u32 %v13311_v47, 16  ;;  %v2875_v15 = vld [vmem:[#allocation4 + $0x48] sm:$0xff] }
 0x2f9   : > { %v14608_v25 = vpop.f32.mrf.mxu3 }
 0x2fa   : > { %2015 = vst.msk [vmem:[#allocation4] sm:$0xff] %vm1441_vm5, %v1979_v24  ;;  %v2793_v32 = vpop.f32.mrf.mxu1  ;;  %12024 = vmatmul.msk.bf16.gmra.mxu0 %vm614_vm0, %v4176_v29  ;;  %v14657_v29 = vld [vmem:[#allocation2 + $0x70] sm:$0xff]  ;;  %v3233_v31 = vrot.slane %v3231_v12, 1 }
 0x2fb   : > { %v14610_v27 = vpop.f32.mrf.mxu2  ;;  %v2909_v36 = vadd.f32 %v2873_v33, %v2793_v32  ;;  %v1946_v33 = vld [vmem:[#allocation4 + $0x18] sm:$0xff]  ;;  %v3734_v34 = vrot.slane %v14657_v29, 2  ;;  %v14667_v40 = vpop.permute.xlu2 %5907 }
 0x2fc   : > { %v3467_v14 = vld [vmem:[#allocation4 + $0x30] sm:$0xff] }
 0x2fd   : > { %2945 = vst.msk [vmem:[#allocation4 + $0x38] sm:$0xff] %vm1441_vm5, %v2909_v36  ;;  %v5819_v36 = vld [vmem:[%s17458_s3 + $0xc8] sm:$0xff]  ;;  %v3735_v47 = vsel %vm3708_vm6, %v3732_v46, %v3734_v34  ;;  %v4179_v46 = vrot.slane %v14672_v59, 2 }
 0x2fe   : > { %5957 = vperm.xlu0 %13612, %v5819_v36   ;;  %v14710_v36 = vld [vmem:[#allocation2 + $0x78] sm:$0xff]  ;;  %v14772_v59 = vld [vmem:[#allocation2 + $0x88] sm:$0xff] }
 0x2ff   : > { %v1855_v43 = vpop.f32.mrf.mxu0 }
 0x300   : > { %v1980_v49 = vadd.f32 %v1944_v45, %v1855_v43  ;;  %v2679_v45 = vrot.slane %v14660_v30, 1 }
 0x301   : > { %v14624_v51 = vpop.f32.mrf.mxu3 }
 0x302   : > { %2016 = vst.msk [vmem:[#allocation4 + $0x8] sm:$0xff] %vm1441_vm5, %v1980_v49  ;;  %v2796_v55 = vpop.f32.mrf.mxu1 }
 0x303   : > { %v14627_v50 = vpop.f32.mrf.mxu2  ;;  %v2910_v60 = vadd.f32 %v2874_v17, %v2796_v55  ;;  %v14670_v17 = vor.u32 %v3236_v23, %v3233_v31  ;;  %v2877_v23 = vld [vmem:[#allocation4 + $0x58] sm:$0xff] }
 0x304   : > { %v3468_v55 = vld [vmem:[#allocation4 + $0x38] sm:$0xff] }
 0x305   : > { %11919 = vmatmul.msk.bf16.gmra.mxu3 %vm614_vm0, %v3733_v61  ;;  %2946 = vst.msk [vmem:[#allocation4 + $0x40] sm:$0xff] %vm1441_vm5, %v2910_v60  ;;  %11692 = vmatmul.msk.bf16.gmra.mxu1 %vm614_vm0, %v2678_v62  ;;  %v2876_v61 = vld [vmem:[#allocation4 + $0x50] sm:$0xff]  ;;  %v3238_v37 = vsel %vm3113_vm7, %v14629_v53, %v14670_v17 }
 0x307   : > { %v1858_v19 = vpop.f32.mrf.mxu0 }
 0x308   : > { %11805 = vmatmul.msk.bf16.gmra.mxu2 %vm614_vm0, %v3229_v13  ;;  %v1981_v7 = vadd.f32 %v1945_v6, %v1858_v19  ;;  %v2680_v6 = vsel %vm2190_vm3, %v2677_v52, %v2679_v45 }
 0x309   : > { %v3848_v0 = vpop.f32.mrf.mxu3 }
 0x30a   : > { %2017 = vst.msk [vmem:[#allocation4 + $0x10] sm:$0xff] %vm1441_vm5, %v1981_v7  ;;  %v2798_v3 = vpop.f32.mrf.mxu1  ;;  %12025 = vmatmul.msk.bf16.gmra.mxu0 %vm614_vm0, %v4178_v58  ;;  %v13382_v7 = vld [vmem:[%s17459_s4 + $0xe0] sm:$0xff]  ;;  %v14701_v58 = vpop.permute.xlu2 %5922 }
 0x30b   : > { %v3386_v8 = vpop.f32.mrf.mxu2  ;;  %v2911_v24 = vadd.f32 %v2875_v15, %v2798_v3  ;;  %4887 = vmatpush.bf16.msra.mxu1 %v13382_v7  ;;  %v4180_v15 = vsel %vm3708_vm6, %v4177_v63, %v4179_v46 }
 0x30c   : > { %v3503_v21 = vadd.f32 %v3467_v14, %v3386_v8  ;;  %v1947_v14 = vld [vmem:[#allocation4 + $0x20] sm:$0xff] }
 0x30d   : > { %2947 = vst.msk [vmem:[#allocation4 + $0x48] sm:$0xff] %vm1441_vm5, %v2911_v24  ;;  %v3469_v3 = vld [vmem:[#allocation4 + $0x40] sm:$0xff]  ;;  %v3243_v24 = vshll.u32 %v13312_v16, 16 }
 0x30e   : > { %3539 = vst.msk [vmem:[#allocation4 + $0x30] sm:$0xff] %vm1441_vm5, %v3503_v21  ;;  %v3240_v21 = vshrl.u32 %v13312_v16, 16 }
 0x30f   : > { %v1860_v32 = vpop.f32.mrf.mxu0 }
 0x310   : > { %v1982_v41 = vadd.f32 %v1946_v33, %v1860_v32 }
 0x311   : > { %v3850_v43 = vpop.f32.mrf.mxu3 }
 0x312   : > { %2018 = vst.msk [vmem:[#allocation4 + $0x18] sm:$0xff] %vm1441_vm5, %v1982_v41  ;;  %v2801_v60 = vpop.f32.mrf.mxu1 }
 0x313   : > { %v3388_v49 = vpop.f32.mrf.mxu2  ;;  %v2912_v13 = vadd.f32 %v2876_v61, %v2801_v60  ;;  %v3245_v60 = vrot.slane %v3243_v24, 2 }
 0x314   : > { %v3504_v62 = vadd.f32 %v3468_v55, %v3388_v49  ;;  %v14713_v49 = vld [vmem:[#allocation2 + $0x80] sm:$0xff]  ;;  %v3242_v55 = vrot.slane %v3240_v21, 1 }
 0x315   : > { %v3929_v19 = vld [vmem:[#allocation4 + $0x30] sm:$0xff]  ;;  %11920 = vmatmul.msk.bf16.gmra.mxu3 %vm614_vm0, %v3735_v47  ;;  %2948 = vst.msk [vmem:[#allocation4 + $0x50] sm:$0xff] %vm1441_vm5, %v2912_v13  ;;  %11693 = vmatmul.msk.bf16.gmra.mxu1 %vm614_vm0, %v2680_v6  ;;  %v3736_v13 = vrot.slane %v14710_v36, 2  ;;  %v5824_v47 = vld [vmem:[%s17458_s3 + $0xf0] sm:$0xff] }
 0x316   : > { %3540 = vst.msk [vmem:[#allocation4 + $0x38] sm:$0xff] %vm1441_vm5, %v3504_v62  ;;  %v3965_v8 = vadd.f32 %v3929_v19, %v3848_v0  ;;  %v5822_v0 = vld [vmem:[%s17458_s3 + $0xe0] sm:$0xff]  ;;  %v1948_v62 = vld [vmem:[#allocation4 + $0x28] sm:$0xff]  ;;  %v14724_v19 = vpop.permute.xlu2 %5937  ;;  %v14727_v16 = vor.u32 %v3245_v60, %v3242_v55 }
 0x317   : > { %v1863_v52 = vpop.f32.mrf.mxu0  ;;  %5972 = vperm.xlu0 %13612, %v5822_v0   ;;  %v2878_v0 = vld [vmem:[#allocation4 + $0x60] sm:$0xff] }
 0x318   : > { %11806 = vmatmul.msk.bf16.gmra.mxu2 %vm614_vm0, %v3238_v37  ;;  %4001 = vst.msk [vmem:[#allocation4 + $0x30] sm:$0xff] %vm1441_vm5, %v3965_v8  ;;  %v1983_v12 = vadd.f32 %v1947_v14, %v1863_v52  ;;  %v3470_v37 = vld [vmem:[#allocation4 + $0x48] sm:$0xff]  ;;  %v14729_v52 = vld [vmem:[#allocation2 + $0x40] sm:$0xff]  ;;  %v3247_v29 = vsel %vm3113_vm7, %v14670_v17, %v14727_v16 }
 0x319   : > { %v3853_v9 = vpop.f32.mrf.mxu3 }
 0x31a   : > { %2019 = vst.msk [vmem:[#allocation4 + $0x20] sm:$0xff] %vm1441_vm5, %v1983_v12  ;;  %v2803_v31 = vpop.f32.mrf.mxu1  ;;  %12026 = vmatmul.msk.bf16.gmra.mxu0 %vm614_vm0, %v4180_v15 }
 0x31b   : > { %v3391_v53 = vpop.f32.mrf.mxu2  ;;  %v2913_v33 = vadd.f32 %v2877_v23, %v2803_v31  ;;  %v13313_v31 = vld [vmem:[#allocation2 + $0x80] sm:$0xff]  ;;  %v5795_v23 = vld [vmem:[%s17458_s3 + $0x8] sm:$0xff] }
 0x31c   : > { %v3505_v32 = vadd.f32 %v3469_v3, %v3391_v53  ;;  %v3737_v3 = vsel %vm3708_vm6, %v3734_v34, %v3736_v13  ;;  %v4181_v34 = vrot.slane %v14729_v52, 2  ;;  %5837 = vperm.xlu1 %13613, %v5795_v23   ;;  %v3471_v48 = vld [vmem:[#allocation4 + $0x50] sm:$0xff]  ;;  %v3249_v55 = vshrl.u32 %v13313_v31, 16  ;;  %v14788_v23 = vld [vmem:[#allocation2 + $0x48] sm:$0xff]  ;;  %v14832_v52 = vld [vmem:[#allocation2 + $0x90] sm:$0xff] }
 0x31d   : > { %v3930_v41 = vld [vmem:[#allocation4 + $0x38] sm:$0xff]  ;;  %2949 = vst.msk [vmem:[#allocation4 + $0x58] sm:$0xff] %vm1441_vm5, %v2913_v33  ;;  %v3252_v60 = vshll.u32 %v13313_v31, 16 }
 0x31e   : > { %3541 = vst.msk [vmem:[#allocation4 + $0x40] sm:$0xff] %vm1441_vm5, %v3505_v32  ;;  %v3966_v63 = vadd.f32 %v3930_v41, %v3850_v43  ;;  %v2681_v43 = vrot.slane %v14713_v49, 1  ;;  %v14758_v32 = vpop.permute.xlu2 %5952  ;;  %v832_v49 = vld [vmem:[%s13816_s15 + $0xa0] sm:$0xf]  ;;  %s13601_s15 = smul.u32 288, %s17475_s22 }
 0x31f   : > { %v1865_v61 = vpop.f32.mrf.mxu0  ;;  %5982 = vperm.xlu0 %13612, %v5824_v47   ;;  %875 = vst.msk [vmem:[#allocation2 + $0xa0] sm:$0xf] %vm834_vm1, %v832_v49 }
 0x320   : > { %4002 = vst.msk [vmem:[#allocation4 + $0x38] sm:$0xff] %vm1441_vm5, %v3966_v63  ;;  %v1984_v6 = vadd.f32 %v1948_v62, %v1865_v61  ;;  %v2682_v21 = vsel %vm2190_vm3, %v2679_v45, %v2681_v43  ;;  %v2405_v45 = vld [vmem:[#allocation4] sm:$0xff]  ;;  %v4182_v63 = vsel %vm3708_vm6, %v4179_v46, %v4181_v34  ;;  %v2879_v62 = vld [vmem:[#allocation4 + $0x68] sm:$0xff]  ;;  %s17183_s16 = scalar_lea.vmem %s17467_s12, %s13601_s15 }
 0x321   : > { %v3855_v7 = vpop.f32.mrf.mxu3 }
 0x322   : > { %2020 = vst.msk [vmem:[#allocation4 + $0x28] sm:$0xff] %vm1441_vm5, %v1984_v6  ;;  %v2806_v14 = vpop.f32.mrf.mxu1 }
 0x323   : > { %v3393_v8 = vpop.f32.mrf.mxu2  ;;  %v2914_v53 = vadd.f32 %v2878_v0, %v2806_v14  ;;  %v918_v14 = vpack.c.bf16 %v14466_v18, %v14466_v18  ;;  %v3251_v0 = vrot.slane %v3249_v55, 1 }
 0x324   : > { %v3506_v12 = vadd.f32 %v3470_v37, %v3393_v8  ;;  %v14767_v8 = vld [vmem:[#allocation2 + $0x80] sm:$0xff] }
 0x325   : > { %v3931_v15 = vld [vmem:[#allocation4 + $0x40] sm:$0xff]  ;;  %11921 = vmatmul.msk.bf16.gmra.mxu3 %vm614_vm0, %v3737_v3  ;;  %2950 = vst.msk [vmem:[#allocation4 + $0x60] sm:$0xff] %vm1441_vm5, %v2914_v53  ;;  %11694 = vmatmul.msk.bf16.gmra.mxu1 %vm614_vm0, %v2682_v21  ;;  %v2406_v3 = vld [vmem:[#allocation4 + $0x8] sm:$0xff] }
 0x326   : > { %3542 = vst.msk [vmem:[#allocation4 + $0x48] sm:$0xff] %vm1441_vm5, %v3506_v12  ;;  %v3967_v24 = vadd.f32 %v3931_v15, %v3853_v9  ;;  %v5827_v9 = vld [vmem:[%s17458_s3 + $0x108] sm:$0xff]  ;;  %v3254_v12 = vrot.slane %v3252_v60, 2  ;;  %v3738_v15 = vrot.slane %v14767_v8, 2  ;;  %v5797_v21 = vld [vmem:[%s17458_s3 + $0x18] sm:$0xff]  ;;  %v14780_v18 = vpop.permute.xlu2 %5967 }
 0x327   : > { %v2315_v30 = vpop.f32.mrf.mxu0  ;;  %5997 = vperm.xlu0 %13612, %v5827_v9   ;;  %5847 = vperm.xlu1 %13613, %v5797_v21  }
 0x328   : > { %11807 = vmatmul.msk.bf16.gmra.mxu2 %vm614_vm0, %v3247_v29  ;;  %4003 = vst.msk [vmem:[#allocation4 + $0x40] sm:$0xff] %vm1441_vm5, %v3967_v24  ;;  %v2441_v17 = vadd.f32 %v2405_v45, %v2315_v30  ;;  %v3472_v45 = vld [vmem:[#allocation4 + $0x58] sm:$0xff]  ;;  %v14786_v9 = vor.u32 %v3254_v12, %v3251_v0  ;;  %v3739_v60 = vsel %vm3708_vm6, %v3736_v13, %v3738_v15  ;;  %v4183_v13 = vrot.slane %v14788_v23, 2 }
 0x329   : > { %v3858_v33 = vpop.f32.mrf.mxu3 }
 0x32a   : > { %2477 = vst.msk [vmem:[#allocation4] sm:$0xff] %vm1441_vm5, %v2441_v17  ;;  %v2808_v61 = vpop.f32.mrf.mxu1  ;;  %12027 = vmatmul.msk.bf16.gmra.mxu0 %vm614_vm0, %v4182_v63  ;;  %v3256_v36 = vsel %vm3113_vm7, %v14727_v16, %v14786_v9 }
 0x32b   : > { %v3396_v41 = vpop.f32.mrf.mxu2  ;;  %v2915_v6 = vadd.f32 %v2879_v62, %v2808_v61  ;;  %v13314_v62 = vld [vmem:[#allocation2 + $0x88] sm:$0xff] }
 0x32c   : > { %v3507_v47 = vadd.f32 %v3471_v48, %v3396_v41  ;;  %v2880_v48 = vld [vmem:[#allocation4 + $0x70] sm:$0xff]  ;;  %v3473_v12 = vld [vmem:[#allocation4 + $0x60] sm:$0xff]  ;;  %v3261_v21 = vshll.u32 %v13314_v62, 16 }
 0x32d   : > { %v3932_v37 = vld [vmem:[#allocation4 + $0x48] sm:$0xff]  ;;  %2951 = vst.msk [vmem:[#allocation4 + $0x68] sm:$0xff] %vm1441_vm5, %v2915_v6  ;;  %v2407_v6 = vld [vmem:[#allocation4 + $0x10] sm:$0xff] }
 0x32e   : > { %3543 = vst.msk [vmem:[#allocation4 + $0x50] sm:$0xff] %vm1441_vm5, %v3507_v47  ;;  %v3968_v46 = vadd.f32 %v3932_v37, %v3855_v7  ;;  %v2683_v7 = vrot.slane %v14772_v59, 1  ;;  %v5800_v37 = vld [vmem:[%s17458_s3 + $0x30] sm:$0xff]  ;;  %v5805_v59 = vld [vmem:[%s17458_s3 + $0x58] sm:$0xff] }
 0x32f   : > { %v2317_v53 = vpop.f32.mrf.mxu0  ;;  %1043 = vrot.lane.b32.xlu0 %v918_v14, %s13642_s17  ;;  %v1042_v14 = vpop.permute.xlu2 %1041  ;;  %5862 = vperm.xlu1 %13613, %v5800_v37  }
 0x330   : > { %4004 = vst.msk [vmem:[#allocation4 + $0x48] sm:$0xff] %vm1441_vm5, %v3968_v46  ;;  %v2442_v24 = vadd.f32 %v2406_v3, %v2317_v53  ;;  %v4184_v53 = vsel %vm3708_vm6, %v4181_v34, %v4183_v13  ;;  %v3258_v3 = vshrl.u32 %v13314_v62, 16  ;;  %v2408_v62 = vld [vmem:[#allocation4 + $0x18] sm:$0xff] }
 0x331   : > { %v14782_v29 = vpop.f32.mrf.mxu3  ;;  %v2866_v31 = vld [vmem:[#allocation4] sm:$0xff]  ;;  %1128 = vst.msk [vmem:[#allocation2 + $0xa0] sm:$0xf] %vm1087_vm2, %v1042_v14 }
 0x332   : > { %v2902_v17 = vadd.f32 %v2866_v31, %v14473_v28  ;;  %2478 = vst.msk [vmem:[#allocation4 + $0x8] sm:$0xff] %vm1441_vm5, %v2442_v24  ;;  %v2811_v41 = vpop.f32.mrf.mxu1  ;;  %v2684_v28 = vsel %vm2190_vm3, %v2681_v43, %v2683_v7 }
 0x333   : > { %v3398_v30 = vpop.f32.mrf.mxu2  ;;  %v2916_v55 = vadd.f32 %v2880_v48, %v2811_v41  ;;  %v14829_v41 = vld [vmem:[#allocation2 + $0x88] sm:$0xff] }
 0x334   : > { %v3508_v63 = vadd.f32 %v3472_v45, %v3398_v30  ;;  %2938 = vst.msk [vmem:[#allocation4] sm:$0xff] %vm1441_vm5, %v2902_v17  ;;  %v2881_v30 = vld [vmem:[#allocation4 + $0x78] sm:$0xff]  ;;  %v3474_v14 = vld [vmem:[#allocation4 + $0x68] sm:$0xff] }
 0x335   : > { %v3933_v61 = vld [vmem:[#allocation4 + $0x50] sm:$0xff]  ;;  %11922 = vmatmul.msk.bf16.gmra.mxu3 %vm614_vm0, %v3739_v60  ;;  %2952 = vst.msk [vmem:[#allocation4 + $0x70] sm:$0xff] %vm1441_vm5, %v2916_v55  ;;  %11695 = vmatmul.msk.bf16.gmra.mxu1 %vm614_vm0, %v2684_v28  ;;  %v5803_v55 = vld [vmem:[%s17458_s3 + $0x48] sm:$0xff] }
 0x336   : > { %v3969_v47 = vadd.f32 %v3933_v61, %v3858_v33  ;;  %3544 = vst.msk [vmem:[#allocation4 + $0x58] sm:$0xff] %vm1441_vm5, %v3508_v63  ;;  %v3263_v63 = vrot.slane %v3261_v21, 2  ;;  %v14840_v61 = vpop.permute.xlu0 %5832 }
 0x337   : > { %v2320_v43 = vpop.f32.mrf.mxu0  ;;  %5877 = vperm.xlu1 %13613, %v5803_v55  }
 0x338   : > { %11808 = vmatmul.msk.bf16.gmra.mxu2 %vm614_vm0, %v3256_v36  ;;  %v2443_v46 = vadd.f32 %v2407_v6, %v2320_v43  ;;  %4005 = vst.msk [vmem:[#allocation4 + $0x50] sm:$0xff] %vm1441_vm5, %v3969_v47  ;;  %v3740_v47 = vrot.slane %v14829_v41, 2  ;;  %v2685_v43 = vrot.slane %v14832_v52, 1  ;;  %v5811_v52 = vld [vmem:[%s17458_s3 + $0x88] sm:$0xff] }
 0x339   : > { %v14817_v16 = vpop.f32.mrf.mxu3  ;;  %v2867_v33 = vld [vmem:[#allocation4 + $0x8] sm:$0xff] }
 0x33a   : > { %v2903_v24 = vadd.f32 %v2867_v33, %v14505_v20  ;;  %2479 = vst.msk [vmem:[#allocation4 + $0x10] sm:$0xff] %vm1441_vm5, %v2443_v46  ;;  %v2813_v31 = vpop.f32.mrf.mxu1  ;;  %12028 = vmatmul.msk.bf16.gmra.mxu0 %vm614_vm0, %v4184_v53  ;;  %v3260_v20 = vrot.slane %v3258_v3, 1  ;;  %v3741_v21 = vsel %vm3708_vm6, %v3738_v15, %v3740_v47 }
 0x33b   : > { %v3401_v0 = vpop.f32.mrf.mxu2  ;;  %v2917_v17 = vadd.f32 %v2881_v30, %v2813_v31  ;;  %v3461_v48 = vld [vmem:[#allocation4] sm:$0xff]  ;;  %v2549_v31 = vld [vmem:[#allocation2 + $0x98] sm:$0x1] }
 0x33c   : > { %v3509_v45 = vadd.f32 %v3473_v12, %v3401_v0  ;;  %2939 = vst.msk [vmem:[#allocation4 + $0x8] sm:$0xff] %vm1441_vm5, %v2903_v24  ;;  %v3497_v34 = vadd.f32 %v3461_v48, %v14543_v22  ;;  %v14849_v46 = vor.u32 %v3263_v63, %v3260_v20  ;;  %v2882_v12 = vld [vmem:[#allocation4 + $0x80] sm:$0xff] }
 0x33d   : > { %2953 = vst.msk [vmem:[#allocation4 + $0x78] sm:$0xff] %vm1441_vm5, %v2917_v17  ;;  %v3934_v60 = vld [vmem:[#allocation4 + $0x58] sm:$0xff]  ;;  %v2409_v20 = vld [vmem:[#allocation4 + $0x20] sm:$0xff] }
 0x33e   : > { %3545 = vst.msk [vmem:[#allocation4 + $0x60] sm:$0xff] %vm1441_vm5, %v3509_v45  ;;  %v3970_v28 = vadd.f32 %v3934_v60, %v14782_v29  ;;  %v14851_v29 = vld [vmem:[#allocation2 + $0x50] sm:$0xff]  ;;  %v3265_v8 = vsel %vm3113_vm7, %v14786_v9, %v14849_v46  ;;  %v14879_v17 = vpop.permute.xlu0 %5857  ;;  %v2632_v60 = vunpack.c.l.b16 %v2549_v31  ;;  %v3010_v31 = vld [vmem:[#allocation2 + $0x98] sm:$0x3] }
 0x33f   : > { %v2322_v36 = vpop.f32.mrf.mxu0  ;;  %3533 = vst.msk [vmem:[#allocation4] sm:$0xff] %vm1441_vm5, %v3497_v34  ;;  %v4185_v15 = vrot.slane %v14851_v29, 2  ;;  %v13315_v45 = vld [vmem:[#allocation2 + $0x90] sm:$0xff]  ;;  %5887 = vperm.xlu1 %13613, %v5805_v59   ;;  %v2410_v59 = vld [vmem:[#allocation4 + $0x28] sm:$0xff] }
 0x340   : > { %v2444_v22 = vadd.f32 %v2408_v62, %v2322_v36  ;;  %4006 = vst.msk [vmem:[#allocation4 + $0x58] sm:$0xff] %vm1441_vm5, %v3970_v28  ;;  %v3475_v62 = vld [vmem:[#allocation4 + $0x70] sm:$0xff]  ;;  %v2651_v23 = vpack.c.b16 %v2632_v60, %v2632_v60 }
 0x341   : > { %v14845_v49 = vpop.f32.mrf.mxu3  ;;  %v2868_v6 = vld [vmem:[#allocation4 + $0x10] sm:$0xff] }
 0x342   : > { %v2904_v33 = vadd.f32 %v2868_v6, %v14522_v4  ;;  %2480 = vst.msk [vmem:[#allocation4 + $0x18] sm:$0xff] %vm1441_vm5, %v2444_v22  ;;  %v2816_v0 = vpop.f32.mrf.mxu1  ;;  %v2686_v4 = vsel %vm2190_vm3, %v2683_v7, %v2685_v43  ;;  %v3267_v22 = vshrl.u32 %v13315_v45, 16 }
 0x343   : > { %v3403_v37 = vpop.f32.mrf.mxu2  ;;  %v2918_v3 = vadd.f32 %v2882_v12, %v2816_v0  ;;  %v3462_v24 = vld [vmem:[#allocation4 + $0x8] sm:$0xff]  ;;  %v14896_v12 = vld [vmem:[#allocation2 + $0x90] sm:$0xff] }
 0x344   : > { %v3510_v53 = vadd.f32 %v3474_v14, %v3403_v37  ;;  %2940 = vst.msk [vmem:[#allocation4 + $0x10] sm:$0xff] %vm1441_vm5, %v2904_v33  ;;  %v3498_v30 = vadd.f32 %v3462_v24, %v14559_v38  ;;  %v2883_v14 = vld [vmem:[#allocation4 + $0x88] sm:$0xff] }
 0x345   : > { %11923 = vmatmul.msk.bf16.gmra.mxu3 %vm614_vm0, %v3741_v21  ;;  %2954 = vst.msk [vmem:[#allocation4 + $0x80] sm:$0xff] %vm1441_vm5, %v2918_v3  ;;  %11696 = vmatmul.msk.bf16.gmra.mxu1 %vm614_vm0, %v2686_v4  ;;  %v3935_v7 = vld [vmem:[#allocation4 + $0x60] sm:$0xff]  ;;  %v3269_v3 = vrot.slane %v3267_v22, 1 }
 0x346   : > { %3546 = vst.msk [vmem:[#allocation4 + $0x68] sm:$0xff] %vm1441_vm5, %v3510_v53  ;;  %v3923_v38 = vld [vmem:[#allocation4] sm:$0xff]  ;;  %v3971_v48 = vadd.f32 %v3935_v7, %v14817_v16  ;;  %v4186_v16 = vsel %vm3708_vm6, %v4183_v13, %v4185_v15 }
 0x347   : > { %v2325_v34 = vpop.f32.mrf.mxu0  ;;  %v3959_v9 = vadd.f32 %v3923_v38, %v14541_v11  ;;  %3534 = vst.msk [vmem:[#allocation4 + $0x8] sm:$0xff] %vm1441_vm5, %v3498_v30  ;;  %v3270_v11 = vshll.u32 %v13315_v45, 16  ;;  %v5808_v21 = vld [vmem:[%s17458_s3 + $0x70] sm:$0xff]  ;;  %v14905_v30 = vpop.permute.xlu0 %5872 }
 0x348   : > { %11809 = vmatmul.msk.bf16.gmra.mxu2 %vm614_vm0, %v3265_v8  ;;  %v2445_v63 = vadd.f32 %v2409_v20, %v2325_v34  ;;  %4007 = vst.msk [vmem:[#allocation4 + $0x60] sm:$0xff] %vm1441_vm5, %v3971_v48  ;;  %v2687_v34 = vrot.slane %v2651_v23, 1  ;;  %v14913_v20 = vld [vmem:[#allocation2 + $0x58] sm:$0xff]  ;;  %5902 = vperm.xlu1 %13613, %v5808_v21  }
 0x349   : > { %v14884_v55 = vpop.f32.mrf.mxu3  ;;  %v2869_v28 = vld [vmem:[#allocation4 + $0x18] sm:$0xff]  ;;  %3995 = vst.msk [vmem:[#allocation4] sm:$0xff] %vm1441_vm5, %v3959_v9 }
 0x34a   : > { %v2905_v6 = vadd.f32 %v2869_v28, %v14546_v26  ;;  %2481 = vst.msk [vmem:[#allocation4 + $0x20] sm:$0xff] %vm1441_vm5, %v2445_v63  ;;  %v2818_v37 = vpop.f32.mrf.mxu1  ;;  %12029 = vmatmul.msk.bf16.gmra.mxu0 %vm614_vm0, %v4186_v16  ;;  %v3272_v26 = vrot.slane %v3270_v11, 2  ;;  %v12050_v28 = vld [vmem:[#allocation2 + $0x10] sm:$0xc]  ;;  %v2884_v16 = vld [vmem:[#allocation4 + $0x90] sm:$0xff] }
 0x34b   : > { %v3406_v36 = vpop.f32.mrf.mxu2  ;;  %v2919_v0 = vadd.f32 %v2883_v14, %v2818_v37  ;;  %v3463_v53 = vld [vmem:[#allocation4 + $0x10] sm:$0xff]  ;;  %v13364_v37 = vld [vmem:[#allocation2 + $0x10] sm:$0xf0] }
 0x34c   : > { %v3511_v33 = vadd.f32 %v3475_v62, %v3406_v36  ;;  %2941 = vst.msk [vmem:[#allocation4 + $0x18] sm:$0xff] %vm1441_vm5, %v2905_v6  ;;  %v3499_v13 = vadd.f32 %v3463_v53, %v14575_v42  ;;  %v3742_v42 = vrot.slane %v14896_v12, 2  ;;  %v14916_v60 = vor.u32 %v3272_v26, %v3269_v3 }
 0x34d   : > { %2955 = vst.msk [vmem:[#allocation4 + $0x88] sm:$0xff] %vm1441_vm5, %v2919_v0  ;;  %v3936_v24 = vld [vmem:[#allocation4 + $0x68] sm:$0xff]  ;;  %v12051_v0 = vor.u32 %v13364_v37, %v12050_v28  ;;  %v2885_v28 = vld [vmem:[#allocation4 + $0x98] sm:$0xff] }
 0x34e   : > { %3547 = vst.msk [vmem:[#allocation4 + $0x70] sm:$0xff] %vm1441_vm5, %v3511_v33  ;;  %v3924_v4 = vld [vmem:[#allocation4 + $0x8] sm:$0xff]  ;;  %v3972_v8 = vadd.f32 %v3936_v24, %v14845_v49  ;;  %v3476_v49 = vld [vmem:[#allocation4 + $0x78] sm:$0xff]  ;;  %v3743_v6 = vsel %vm3708_vm6, %v3740_v47, %v3742_v42  ;;  %v3274_v41 = vsel %vm3113_vm7, %v14849_v46, %v14916_v60  ;;  %v4187_v47 = vrot.slane %v14913_v20, 2 }
 0x34f   : > { %v2327_v45 = vpop.f32.mrf.mxu0  ;;  %v3960_v7 = vadd.f32 %v3924_v4, %v14557_v39  ;;  %3535 = vst.msk [vmem:[#allocation4 + $0x10] sm:$0xff] %vm1441_vm5, %v3499_v13  ;;  %v3093_v39 = vunpack.c.l.b16 %v3010_v31  ;;  %v3605_v33 = vld [vmem:[#allocation2 + $0x98] sm:$0x3]  ;;  %v14943_v3 = vpop.permute.xlu0 %5882 }
 0x350   : > { %v2446_v38 = vadd.f32 %v2410_v59, %v2327_v45  ;;  %4008 = vst.msk [vmem:[#allocation4 + $0x68] sm:$0xff] %vm1441_vm5, %v3972_v8  ;;  %v4384_v46 = vld [vmem:[#allocation4] sm:$0xff]  ;;  %v3688_v24 = vunpack.c.l.b16 %v3605_v33  ;;  %v4633_v45 = vshrl.u32 %v12051_v0, 16  ;;  %v4636_v59 = vshll.u32 %v12051_v0, 16  ;;  %5917 = vperm.xlu1 %13613, %v5811_v52  }
 0x351   : > { %v14911_v48 = vpop.f32.mrf.mxu3  ;;  %v2870_v9 = vld [vmem:[#allocation4 + $0x20] sm:$0xff]  ;;  %3996 = vst.msk [vmem:[#allocation4 + $0x8] sm:$0xff] %vm1441_vm5, %v3960_v7  ;;  %v3112_v23 = vpack.c.b16 %v3093_v39, %v3093_v39 }
 0x352   : > { %v2906_v36 = vadd.f32 %v2870_v9, %v14561_v44  ;;  %2482 = vst.msk [vmem:[#allocation4 + $0x28] sm:$0xff] %vm1441_vm5, %v2446_v38  ;;  %v2821_v62 = vpop.f32.mrf.mxu1  ;;  %v2688_v44 = vsel %vm2190_vm3, %v2685_v43, %v2687_v34  ;;  %v3477_v34 = vld [vmem:[#allocation4 + $0x80] sm:$0xff] }
 0x353   : > { %v3408_v63 = vpop.f32.mrf.mxu2  ;;  %v2920_v11 = vadd.f32 %v2884_v16, %v2821_v62  ;;  %v3464_v14 = vld [vmem:[#allocation4 + $0x18] sm:$0xff]  ;;  %v3279_v9 = vshll.u32 %v3112_v23, 16 }
 0x354   : > { %v3512_v22 = vadd.f32 %v3476_v49, %v3408_v63  ;;  %2942 = vst.msk [vmem:[#allocation4 + $0x20] sm:$0xff] %vm1441_vm5, %v2906_v36  ;;  %v3500_v53 = vadd.f32 %v3464_v14, %v14593_v2  ;;  %v13365_v2 = vld [vmem:[#allocation2 + $0x18] sm:$0xff]  ;;  %v5814_v14 = vld [vmem:[%s17458_s3 + $0xa0] sm:$0xff] }
 0x355   : > { %11924 = vmatmul.msk.bf16.gmra.mxu3 %vm614_vm0, %v3743_v6  ;;  %2956 = vst.msk [vmem:[#allocation4 + $0x90] sm:$0xff] %vm1441_vm5, %v2920_v11  ;;  %11697 = vmatmul.msk.bf16.gmra.mxu1 %vm614_vm0, %v2688_v44  ;;  %v3937_v43 = vld [vmem:[#allocation4 + $0x70] sm:$0xff]  ;;  %v4641_v36 = vshrl.u32 %v13365_v2, 16  ;;  %v4644_v62 = vshll.u32 %v13365_v2, 16  ;;  %v4638_v11 = vrot.slane %v4636_v59, 3  ;;  %v3281_v37 = vrot.slane %v3279_v9, 2 }
 0x356   : > { %3548 = vst.msk [vmem:[#allocation4 + $0x78] sm:$0xff] %vm1441_vm5, %v3512_v22  ;;  %v3925_v13 = vld [vmem:[#allocation4 + $0x10] sm:$0xff]  ;;  %v3973_v26 = vadd.f32 %v3937_v43, %v14884_v55  ;;  %v4188_v55 = vsel %vm3708_vm6, %v4185_v15, %v4187_v47  ;;  %v3707_v22 = vpack.c.b16 %v3688_v24, %v3688_v24  ;;  %v4635_v15 = vrot.slane %v4633_v45, 2  ;;  %v3478_v24 = vld [vmem:[#allocation4 + $0x88] sm:$0xff]  ;;  %v2886_v45 = vld [vmem:[#allocation4 + $0xa0] sm:$0xff] }
 0x357   : > { %v4294_v21 = vpop.f32.mrf.mxu0  ;;  %v3961_v4 = vadd.f32 %v3925_v13, %v14573_v54  ;;  %3536 = vst.msk [vmem:[#allocation4 + $0x18] sm:$0xff] %vm1441_vm5, %v3500_v53  ;;  %v3276_v54 = vshrl.u32 %v3112_v23, 16  ;;  %v4643_v33 = vrot.slane %v4641_v36, 2  ;;  %v4646_v0 = vrot.slane %v4644_v62, 3 }
 0x358   : > { %11810 = vmatmul.msk.bf16.gmra.mxu2 %vm614_vm0, %v3274_v41  ;;  %v4420_v31 = vadd.f32 %v4384_v46, %v4294_v21  ;;  %4009 = vst.msk [vmem:[#allocation4 + $0x70] sm:$0xff] %vm1441_vm5, %v3973_v26  ;;  %v14967_v41 = vpop.permute.xlu0 %5897  ;;  %v3744_v43 = vrot.slane %v3707_v22, 2  ;;  %v4639_v21 = vor.u32 %v4638_v11, %v4635_v15  ;;  %5932 = vperm.xlu1 %13613, %v5814_v14   ;;  %v12164_v14 = vld [vmem:[#allocation2 + $0x10] sm:$0x8] }
 0x359   : > { %v14948_v8 = vpop.f32.mrf.mxu3  ;;  %v2871_v7 = vld [vmem:[#allocation4 + $0x28] sm:$0xff]  ;;  %3997 = vst.msk [vmem:[#allocation4 + $0x10] sm:$0xff] %vm1441_vm5, %v3961_v4  ;;  %v14977_v59 = vor.u32 %v4646_v0, %v4643_v33 }
 0x35a   : > { %v2907_v63 = vadd.f32 %v2871_v7, %v14578_v56  ;;  %4456 = vst.msk [vmem:[#allocation4] sm:$0xff] %vm1441_vm5, %v4420_v31  ;;  %v2823_v49 = vpop.f32.mrf.mxu1  ;;  %12030 = vmatmul.msk.bf16.gmra.mxu0 %vm614_vm0, %v4188_v55  ;;  %v3278_v56 = vrot.slane %v3276_v54, 1  ;;  %v14973_v31 = vld [vmem:[#allocation2 + $0x60] sm:$0xff] }
 0x35b   : > { %v3411_v38 = vpop.f32.mrf.mxu2  ;;  %v2921_v16 = vadd.f32 %v2885_v28, %v2823_v49  ;;  %v3465_v29 = vld [vmem:[#allocation4 + $0x20] sm:$0xff]  ;;  %v4648_v55 = vsel %vm4631_vm8, %v4639_v21, %v14977_v59  ;;  %v13366_v54 = vld [vmem:[#allocation2 + $0x20] sm:$0xff] }
 0x35c   : > { %v3513_v39 = vadd.f32 %v3477_v34, %v3411_v38  ;;  %2943 = vst.msk [vmem:[#allocation4 + $0x28] sm:$0xff] %vm1441_vm5, %v2907_v63  ;;  %v3501_v6 = vadd.f32 %v3465_v29, %v14610_v27  ;;  %v4385_v27 = vld [vmem:[#allocation4 + $0x8] sm:$0xff]  ;;  %v3282_v4 = vor.u32 %v3281_v37, %v3278_v56  ;;  %v3745_v38 = vsel %vm3708_vm6, %v3742_v42, %v3744_v43  ;;  %v5820_v43 = vld [vmem:[%s17458_s3 + $0xd0] sm:$0xff] }
 0x35d   : > { %2957 = vst.msk [vmem:[#allocation4 + $0x98] sm:$0xff] %vm1441_vm5, %v2921_v16  ;;  %v3938_v44 = vld [vmem:[#allocation4 + $0x78] sm:$0xff]  ;;  %v4189_v42 = vrot.slane %v14973_v31, 2  ;;  %v5817_v63 = vld [vmem:[%s17458_s3 + $0xb8] sm:$0xff]  ;;  %v4650_v29 = vshrl.u32 %v13366_v54, 16  ;;  %v4653_v15 = vshll.u32 %v13366_v54, 16 }
 0x35e   : > { %3549 = vst.msk [vmem:[#allocation4 + $0x80] sm:$0xff] %vm1441_vm5, %v3513_v39  ;;  %v3926_v53 = vld [vmem:[#allocation4 + $0x18] sm:$0xff]  ;;  %v3974_v23 = vadd.f32 %v3938_v44, %v14911_v48  ;;  %v3283_v12 = vsel %vm3113_vm7, %v14916_v60, %v3282_v4  ;;  %v13426_v44 = vld [vmem:[%s17463_s8] sm:$0xff]  ;;  %v5825_v31 = vld [vmem:[%s17458_s3 + $0xf8] sm:$0xff] }
 0x35f   : > { %v4296_v52 = vpop.f32.mrf.mxu0  ;;  %v3962_v2 = vadd.f32 %v3926_v53, %v14590_v1  ;;  %3537 = vst.msk [vmem:[#allocation4 + $0x20] sm:$0xff] %vm1441_vm5, %v3501_v6  ;;  %v3479_v6 = vld [vmem:[#allocation4 + $0x90] sm:$0xff]  ;;  %v4190_v56 = vsel %vm3708_vm6, %v4187_v47, %v4189_v42  ;;  %v4652_v20 = vrot.slane %v4650_v29, 2  ;;  %v4655_v47 = vrot.slane %v4653_v15, 3  ;;  %v13386_v53 = vld [vmem:[#allocation2 + $0x10] sm:$0xf0]  ;;  %6724 = vmatpush.bf16.msra.mxu3 %v13426_v44 }
 0x360   : > { %v4421_v13 = vadd.f32 %v4385_v27, %v4296_v52  ;;  %4010 = vst.msk [vmem:[#allocation4 + $0x78] sm:$0xff] %vm1441_vm5, %v3974_v23  ;;  %v4386_v62 = vld [vmem:[#allocation4 + $0x10] sm:$0xff]  ;;  %5947 = vperm.xlu1 %13613, %v5817_v63   ;;  %v12165_v52 = vor.u32 %v13386_v53, %v12164_v14 }
 0x361   : > { %v3875_v26 = vpop.f32.mrf.mxu3  ;;  %3998 = vst.msk [vmem:[#allocation4 + $0x18] sm:$0xff] %vm1441_vm5, %v3962_v2 }
 0x362   : > { %4457 = vst.msk [vmem:[#allocation4 + $0x8] sm:$0xff] %vm1441_vm5, %v4421_v13  ;;  %v2826_v48 = vpop.f32.mrf.mxu1 }
 0x363   : > { %v3413_v46 = vpop.f32.mrf.mxu2  ;;  %v2922_v7 = vadd.f32 %v2886_v45, %v2826_v48  ;;  %v3466_v34 = vld [vmem:[#allocation4 + $0x28] sm:$0xff]  ;;  %v15024_v48 = vor.u32 %v4655_v47, %v4652_v20  ;;  %v15057_v20 = vld [vmem:[#allocation2 + $0x20] sm:$0xff] }
 0x364   : > { %v3514_v1 = vadd.f32 %v3478_v24, %v3413_v46  ;;  %v3502_v9 = vadd.f32 %v3466_v34, %v14627_v50  ;;  %v14997_v50 = vpop.permute.xlu0 %5912  ;;  %v15022_v24 = vld [vmem:[#allocation2 + $0x18] sm:$0xff]  ;;  %v2888_v34 = vld [vmem:[#allocation4 + $0xb0] sm:$0xff] }
 0x365   : > { %11925 = vmatmul.msk.bf16.gmra.mxu3 %vm614_vm0, %v3745_v38  ;;  %2958 = vst.msk [vmem:[#allocation4 + $0xa0] sm:$0xff] %vm1441_vm5, %v2922_v7  ;;  %12136 = vmatmul.msk.bf16.vlgmr.msra.gmra.mxu1 %vm614_vm0, %v4648_v55  ;;  %v3939_v49 = vld [vmem:[#allocation4 + $0x80] sm:$0xff]  ;;  %v5227_v7 = vrot.slane %v12165_v52, 3  ;;  %v15027_v38 = vld [vmem:[#allocation2 + $0x68] sm:$0xff]  ;;  %v4657_v63 = vsel %vm4631_vm8, %v14977_v59, %v15024_v48 }
 0x366   : > { %3550 = vst.msk [vmem:[#allocation4 + $0x88] sm:$0xff] %vm1441_vm5, %v3514_v1  ;;  %v3927_v28 = vld [vmem:[#allocation4 + $0x20] sm:$0xff]  ;;  %v3975_v39 = vadd.f32 %v3939_v49, %v14948_v8  ;;  %v2887_v8 = vld [vmem:[#allocation4 + $0xa8] sm:$0xff]  ;;  %v3480_v1 = vld [vmem:[#allocation4 + $0x98] sm:$0xff] }
 0x367   : > { %3538 = vst.msk [vmem:[#allocation4 + $0x28] sm:$0xff] %vm1441_vm5, %v3502_v9  ;;  %v4299_v36 = vpop.f32.mrf.mxu0  ;;  %v3963_v60 = vadd.f32 %v3927_v28, %v14608_v25  ;;  %v5228_v9 = vrot.slane %v15022_v24, 3 }
 0x368   : > { %11811 = vmatmul.msk.bf16.gmra.mxu2 %vm614_vm0, %v3283_v12  ;;  %v4422_v16 = vadd.f32 %v4386_v62, %v4299_v36  ;;  %4011 = vst.msk [vmem:[#allocation4 + $0x80] sm:$0xff] %vm1441_vm5, %v3975_v39  ;;  %v4387_v46 = vld [vmem:[#allocation4 + $0x18] sm:$0xff]  ;;  %5962 = vperm.xlu1 %13613, %v5820_v43   ;;  %v4191_v39 = vrot.slane %v15027_v38, 2 }
 0x369   : > { %v3878_v22 = vpop.f32.mrf.mxu3  ;;  %3999 = vst.msk [vmem:[#allocation4 + $0x20] sm:$0xff] %vm1441_vm5, %v3963_v60  ;;  %v5229_v28 = vsel %vm5226_vm9, %v5227_v7, %v5228_v9  ;;  %v5823_v36 = vld [vmem:[%s17458_s3 + $0xe8] sm:$0xff] }
 0x36a   : > { %4458 = vst.msk [vmem:[#allocation4 + $0x10] sm:$0xff] %vm1441_vm5, %v4422_v16  ;;  %v2828_v25 = vpop.f32.mrf.mxu1  ;;  %12031 = vmatmul.msk.bf16.gmra.mxu0 %vm614_vm0, %v4190_v56  ;;  %v13367_v62 = vld [vmem:[#allocation2 + $0x28] sm:$0xff] }
 0x36b   : > { %v3416_v11 = vpop.f32.mrf.mxu2  ;;  %v2923_v33 = vadd.f32 %v2887_v8, %v2828_v25  ;;  %v2889_v25 = vld [vmem:[#allocation4 + $0xb8] sm:$0xff]  ;;  %v4662_v14 = vshll.u32 %v13367_v62, 16 }
 0x36c   : > { %v3515_v37 = vadd.f32 %v3479_v6, %v3416_v11  ;;  %v15019_v13 = vpop.permute.xlu0 %5927  ;;  %v3481_v11 = vld [vmem:[#allocation4 + $0xa0] sm:$0xff]  ;;  %v4192_v6 = vsel %vm3708_vm6, %v4189_v42, %v4191_v39 }
 0x36d   : > { %v3940_v0 = vld [vmem:[#allocation4 + $0x88] sm:$0xff]  ;;  %2959 = vst.msk [vmem:[#allocation4 + $0xa8] sm:$0xff] %vm1441_vm5, %v2923_v33  ;;  %v4664_v47 = vrot.slane %v4662_v14, 3 }
 0x36e   : > { %3551 = vst.msk [vmem:[#allocation4 + $0x90] sm:$0xff] %vm1441_vm5, %v3515_v37  ;;  %v3976_v23 = vadd.f32 %v3940_v0, %v3875_v26  ;;  %v3928_v27 = vld [vmem:[#allocation4 + $0x28] sm:$0xff]  ;;  %v4659_v37 = vshrl.u32 %v13367_v62, 16 }
 0x36f   : > { %v3964_v2 = vadd.f32 %v3928_v27, %v14624_v51  ;;  %v4301_v21 = vpop.f32.mrf.mxu0 }
 0x370   : > { %4012 = vst.msk [vmem:[#allocation4 + $0x88] sm:$0xff] %vm1441_vm5, %v3976_v23  ;;  %v4423_v4 = vadd.f32 %v4387_v46, %v4301_v21  ;;  %v4388_v60 = vld [vmem:[#allocation4 + $0x20] sm:$0xff]  ;;  %5977 = vperm.xlu1 %13613, %v5823_v36   ;;  %v4661_v42 = vrot.slane %v4659_v37, 2  ;;  %v5230_v21 = vrot.slane %v15057_v20, 3  ;;  %v4390_v36 = vld [vmem:[#allocation4 + $0x30] sm:$0xff] }
 0x371   : > { %v3880_v26 = vpop.f32.mrf.mxu3  ;;  %4000 = vst.msk [vmem:[#allocation4 + $0x28] sm:$0xff] %vm1441_vm5, %v3964_v2  ;;  %v15064_v46 = vld [vmem:[#allocation2 + $0x70] sm:$0xff] }
 0x372   : > { %4459 = vst.msk [vmem:[#allocation4 + $0x18] sm:$0xff] %vm1441_vm5, %v4423_v4  ;;  %v2831_v51 = vpop.f32.mrf.mxu1 }
 0x373   : > { %v3418_v45 = vpop.f32.mrf.mxu2  ;;  %v2924_v54 = vadd.f32 %v2888_v34, %v2831_v51 }
 0x374   : > { %v3516_v55 = vadd.f32 %v3480_v1, %v3418_v45  ;;  %v15046_v29 = vpop.permute.xlu0 %5942  ;;  %v3482_v2 = vld [vmem:[#allocation4 + $0xa8] sm:$0xff]  ;;  %v4665_v1 = vor.u32 %v4664_v47, %v4661_v42 }
 0x375   : > { %v3941_v12 = vld [vmem:[#allocation4 + $0x90] sm:$0xff]  ;;  %2960 = vst.msk [vmem:[#allocation4 + $0xb0] sm:$0xff] %vm1441_vm5, %v2924_v54  ;;  %12137 = vmatmul.msk.bf16.gmra.mxu1 %vm614_vm0, %v4657_v63  ;;  %v13368_v54 = vld [vmem:[#allocation2 + $0x30] sm:$0xff]  ;;  %v5231_v63 = vsel %vm5226_vm9, %v5228_v9, %v5230_v21 }
 0x376   : > { %3552 = vst.msk [vmem:[#allocation4 + $0x98] sm:$0xff] %vm1441_vm5, %v3516_v55  ;;  %v3977_v49 = vadd.f32 %v3941_v12, %v3878_v22  ;;  %v4666_v55 = vsel %vm4631_vm8, %v15024_v48, %v4665_v1 }
 0x377   : > { %v4304_v59 = vpop.f32.mrf.mxu0 }
 0x378   : > { %12250 = vmatmul.msk.bf16.vlgmr.msra.gmra.mxu2 %vm614_vm0, %v5229_v28  ;;  %4013 = vst.msk [vmem:[#allocation4 + $0x90] sm:$0xff] %vm1441_vm5, %v3977_v49  ;;  %v4424_v16 = vadd.f32 %v4388_v60, %v4304_v59  ;;  %v4389_v23 = vld [vmem:[#allocation4 + $0x28] sm:$0xff]  ;;  %5987 = vperm.xlu1 %13613, %v5825_v31   ;;  %v4193_v49 = vrot.slane %v15064_v46, 2  ;;  %v5828_v28 = vld [vmem:[%s17458_s3 + $0x110] sm:$0xff]  ;;  %v4668_v60 = vshrl.u32 %v13368_v54, 16 }
 0x379   : > { %v3883_v22 = vpop.f32.mrf.mxu3  ;;  %v15129_v46 = vld [vmem:[#allocation2 + $0x30] sm:$0xff] }
 0x37a   : > { %4460 = vst.msk [vmem:[#allocation4 + $0x20] sm:$0xff] %vm1441_vm5, %v4424_v16  ;;  %v2833_v56 = vpop.f32.mrf.mxu1  ;;  %12032 = vmatmul.msk.bf16.gmra.mxu0 %vm614_vm0, %v4192_v6  ;;  %v4671_v16 = vshll.u32 %v13368_v54, 16  ;;  %v4194_v9 = vsel %vm3708_vm6, %v4191_v39, %v4193_v49  ;;  %v4670_v37 = vrot.slane %v4668_v60, 2  ;;  %v4391_v39 = vld [vmem:[#allocation4 + $0x38] sm:$0xff] }
 0x37b   : > { %v3421_v15 = vpop.f32.mrf.mxu2  ;;  %v2925_v44 = vadd.f32 %v2889_v25, %v2833_v56 }
 0x37c   : > { %v3517_v8 = vadd.f32 %v3481_v11, %v3421_v15  ;;  %v15067_v7 = vpop.permute.xlu0 %5957  ;;  %v2891_v11 = vld [vmem:[#allocation4 + $0xc8] sm:$0xff]  ;;  %v4673_v14 = vrot.slane %v4671_v16, 3  ;;  %v2893_v16 = vld [vmem:[#allocation4 + $0xd8] sm:$0xff] }
 0x37d   : > { %v3942_v33 = vld [vmem:[#allocation4 + $0x98] sm:$0xff]  ;;  %2961 = vst.msk [vmem:[#allocation4 + $0xb8] sm:$0xff] %vm1441_vm5, %v2925_v44 }
 0x37e   : > { %3553 = vst.msk [vmem:[#allocation4 + $0xa0] sm:$0xff] %vm1441_vm5, %v3517_v8  ;;  %v3978_v0 = vadd.f32 %v3942_v33, %v3880_v26  ;;  %v2890_v26 = vld [vmem:[#allocation4 + $0xc0] sm:$0xff]  ;;  %v15097_v33 = vld [vmem:[#allocation2 + $0x28] sm:$0xff]  ;;  %v15099_v42 = vor.u32 %v4673_v14, %v4670_v37  ;;  %v4393_v37 = vld [vmem:[#allocation4 + $0x48] sm:$0xff] }
 0x37f   : > { %v4306_v53 = vpop.f32.mrf.mxu0 }
 0x380   : > { %4014 = vst.msk [vmem:[#allocation4 + $0x98] sm:$0xff] %vm1441_vm5, %v3978_v0  ;;  %v4425_v52 = vadd.f32 %v4389_v23, %v4306_v53  ;;  %6002 = vperm.xlu1 %13613, %v5828_v28   ;;  %v15101_v23 = vld [vmem:[#allocation2 + $0x78] sm:$0xff]  ;;  %v4392_v28 = vld [vmem:[#allocation4 + $0x40] sm:$0xff] }
 0x381   : > { %v3885_v27 = vpop.f32.mrf.mxu3 }
 0x382   : > { %4461 = vst.msk [vmem:[#allocation4 + $0x28] sm:$0xff] %vm1441_vm5, %v4425_v52  ;;  %v2836_v4 = vpop.f32.mrf.mxu1 }
 0x383   : > { %v3423_v43 = vpop.f32.mrf.mxu2  ;;  %v2926_v51 = vadd.f32 %v2890_v26, %v2836_v4  ;;  %v5232_v26 = vrot.slane %v15097_v33, 3 }
 0x384   : > { %v3518_v45 = vadd.f32 %v3482_v2, %v3423_v43  ;;  %v3484_v53 = vld [vmem:[#allocation4 + $0xb8] sm:$0xff] }
 0x385   : > { %v3943_v34 = vld [vmem:[#allocation4 + $0xa0] sm:$0xff]  ;;  %2962 = vst.msk [vmem:[#allocation4 + $0xc0] sm:$0xff] %vm1441_vm5, %v2926_v51  ;;  %12138 = vmatmul.msk.bf16.gmra.mxu1 %vm614_vm0, %v4666_v55  ;;  %v4675_v51 = vsel %vm4631_vm8, %v4665_v1, %v15099_v42  ;;  %v5233_v54 = vsel %vm5226_vm9, %v5230_v21, %v5232_v26 }
 0x386   : > { %3554 = vst.msk [vmem:[#allocation4 + $0xa8] sm:$0xff] %vm1441_vm5, %v3518_v45  ;;  %v3979_v12 = vadd.f32 %v3943_v34, %v3883_v22  ;;  %v3483_v22 = vld [vmem:[#allocation4 + $0xb0] sm:$0xff]  ;;  %v13369_v34 = vld [vmem:[#allocation2 + $0x38] sm:$0xff] }
 0x387   : > { %v4309_v48 = vpop.f32.mrf.mxu0 }
 0x388   : > { %12251 = vmatmul.msk.bf16.gmra.mxu2 %vm614_vm0, %v5231_v63  ;;  %4015 = vst.msk [vmem:[#allocation4 + $0xa0] sm:$0xff] %vm1441_vm5, %v3979_v12  ;;  %v4426_v62 = vadd.f32 %v4390_v36, %v4309_v48  ;;  %v4195_v12 = vrot.slane %v15101_v23, 2  ;;  %v4677_v36 = vshrl.u32 %v13369_v34, 16 }
 0x389   : > { %v3888_v59 = vpop.f32.mrf.mxu3  ;;  %v15092_v56 = vpop.permute.xlu0 %5972 }
 0x38a   : > { %4462 = vst.msk [vmem:[#allocation4 + $0x30] sm:$0xff] %vm1441_vm5, %v4426_v62  ;;  %v2838_v15 = vpop.f32.mrf.mxu1  ;;  %12033 = vmatmul.msk.bf16.gmra.mxu0 %vm614_vm0, %v4194_v9  ;;  %v4680_v62 = vshll.u32 %v13369_v34, 16  ;;  %v4196_v20 = vsel %vm3708_vm6, %v4193_v49, %v4195_v12  ;;  %v5826_v49 = vld [vmem:[%s17458_s3 + $0x100] sm:$0xff] }
 0x38b   : > { %v3426_v24 = vpop.f32.mrf.mxu2  ;;  %v2927_v25 = vadd.f32 %v2891_v11, %v2838_v15  ;;  %v4679_v11 = vrot.slane %v4677_v36, 2  ;;  %5992 = vperm.xlu2 %13614, %v5826_v49  }
 0x38c   : > { %v3519_v6 = vadd.f32 %v3483_v22, %v3426_v24  ;;  %v3485_v60 = vld [vmem:[#allocation4 + $0xc0] sm:$0xff] }
 0x38d   : > { %v3944_v8 = vld [vmem:[#allocation4 + $0xa8] sm:$0xff]  ;;  %2963 = vst.msk [vmem:[#allocation4 + $0xc8] sm:$0xff] %vm1441_vm5, %v2927_v25 }
 0x38e   : > { %3555 = vst.msk [vmem:[#allocation4 + $0xb0] sm:$0xff] %vm1441_vm5, %v3519_v6  ;;  %v3980_v44 = vadd.f32 %v3944_v8, %v3885_v27  ;;  %v2892_v27 = vld [vmem:[#allocation4 + $0xd0] sm:$0xff]  ;;  %v4682_v6 = vrot.slane %v4680_v62, 3 }
 0x38f   : > { %v4311_v38 = vpop.f32.mrf.mxu0 }
 0x390   : > { %4016 = vst.msk [vmem:[#allocation4 + $0xa8] sm:$0xff] %vm1441_vm5, %v3980_v44  ;;  %v4427_v0 = vadd.f32 %v4391_v39, %v4311_v38  ;;  %v15135_v38 = vor.u32 %v4682_v6, %v4679_v11 }
 0x391   : > { %v3890_v31 = vpop.f32.mrf.mxu3  ;;  %v15104_v2 = vpop.permute.xlu0 %5982 }
 0x392   : > { %4463 = vst.msk [vmem:[#allocation4 + $0x38] sm:$0xff] %vm1441_vm5, %v4427_v0  ;;  %v2841_v52 = vpop.f32.mrf.mxu1  ;;  %v5234_v0 = vrot.slane %v15129_v46, 3 }
 0x393   : > { %v3428_v47 = vpop.f32.mrf.mxu2  ;;  %v2928_v4 = vadd.f32 %v2892_v27, %v2841_v52 }
 0x394   : > { %v3520_v43 = vadd.f32 %v3484_v53, %v3428_v47  ;;  %v3486_v33 = vld [vmem:[#allocation4 + $0xc8] sm:$0xff]  ;;  %v2894_v53 = vld [vmem:[#allocation4 + $0xe0] sm:$0xff] }
 0x395   : > { %v3945_v45 = vld [vmem:[#allocation4 + $0xb0] sm:$0xff]  ;;  %2964 = vst.msk [vmem:[#allocation4 + $0xd0] sm:$0xff] %vm1441_vm5, %v2928_v4  ;;  %12139 = vmatmul.msk.bf16.gmra.mxu1 %vm614_vm0, %v4675_v51 }
 0x396   : > { %3556 = vst.msk [vmem:[#allocation4 + $0xb8] sm:$0xff] %vm1441_vm5, %v3520_v43  ;;  %v3981_v55 = vadd.f32 %v3945_v45, %v3888_v59  ;;  %v4684_v45 = vsel %vm4631_vm8, %v15099_v42, %v15135_v38  ;;  %v13370_v51 = vld [vmem:[#allocation2 + $0x40] sm:$0xff] }
 0x397   : > { %v4314_v63 = vpop.f32.mrf.mxu0  ;;  %v4686_v36 = vshrl.u32 %v13370_v51, 16  ;;  %v4689_v62 = vshll.u32 %v13370_v51, 16 }
 0x398   : > { %12252 = vmatmul.msk.bf16.gmra.mxu2 %vm614_vm0, %v5233_v54  ;;  %4017 = vst.msk [vmem:[#allocation4 + $0xb0] sm:$0xff] %vm1441_vm5, %v3981_v55  ;;  %v4428_v48 = vadd.f32 %v4392_v28, %v4314_v63  ;;  %v5235_v55 = vsel %vm5226_vm9, %v5232_v26, %v5234_v0  ;;  %v5829_v63 = vld [vmem:[%s17458_s3 + $0x118] sm:$0xff]  ;;  %v4394_v28 = vld [vmem:[#allocation4 + $0x50] sm:$0xff] }
 0x399   : > { %v3893_v1 = vpop.f32.mrf.mxu3  ;;  %v15125_v22 = vpop.permute.xlu0 %5997  ;;  %6007 = vperm.xlu2 %13614, %v5829_v63   ;;  %v4691_v11 = vrot.slane %v4689_v62, 3 }
 0x39a   : > { %4464 = vst.msk [vmem:[#allocation4 + $0x40] sm:$0xff] %vm1441_vm5, %v4428_v48  ;;  %v2843_v21 = vpop.f32.mrf.mxu1  ;;  %12034 = vmatmul.msk.bf16.gmra.mxu0 %vm614_vm0, %v4196_v20 }
 0x39b   : > { %v3431_v59 = vpop.f32.mrf.mxu2  ;;  %v2929_v9 = vadd.f32 %v2893_v16, %v2843_v21  ;;  %v2895_v21 = vld [vmem:[#allocation4 + $0xe8] sm:$0xff] }
 0x39c   : > { %v3521_v24 = vadd.f32 %v3485_v60, %v3431_v59  ;;  %v3487_v60 = vld [vmem:[#allocation4 + $0xd0] sm:$0xff] }
 0x39d   : > { %v3946_v15 = vld [vmem:[#allocation4 + $0xb8] sm:$0xff]  ;;  %2965 = vst.msk [vmem:[#allocation4 + $0xd8] sm:$0xff] %vm1441_vm5, %v2929_v9 }
 0x39e   : > { %3557 = vst.msk [vmem:[#allocation4 + $0xc0] sm:$0xff] %vm1441_vm5, %v3521_v24  ;;  %v3982_v25 = vadd.f32 %v3946_v15, %v3890_v31  ;;  %v15138_v31 = vld [vmem:[#allocation2 + $0x80] sm:$0xff]  ;;  %v4688_v15 = vrot.slane %v4686_v36, 2 }
 0x39f   : > { %v4316_v8 = vpop.f32.mrf.mxu0  ;;  %v4197_v54 = vrot.slane %v15138_v31, 2  ;;  %v15167_v31 = vld [vmem:[#allocation2 + $0x88] sm:$0xff] }
 0x3a0   : > { %4018 = vst.msk [vmem:[#allocation4 + $0xb8] sm:$0xff] %vm1441_vm5, %v3982_v25  ;;  %v4429_v14 = vadd.f32 %v4393_v37, %v4316_v8  ;;  %v15163_v25 = vld [vmem:[#allocation2 + $0x38] sm:$0xff]  ;;  %v4692_v37 = vor.u32 %v4691_v11, %v4688_v15 }
 0x3a1   : > { %v3895_v44 = vpop.f32.mrf.mxu3  ;;  %v1044_v27 = vpop.permute.xlu0 %1043  ;;  %v4198_v26 = vsel %vm3708_vm6, %v4195_v12, %v4197_v54  ;;  %v4395_v12 = vld [vmem:[#allocation4 + $0x58] sm:$0xff] }
 0x3a2   : > { %4465 = vst.msk [vmem:[#allocation4 + $0x48] sm:$0xff] %vm1441_vm5, %v4429_v14  ;;  %v2846_v47 = vpop.f32.mrf.mxu1 }
 0x3a3   : > { %v3433_v39 = vpop.f32.mrf.mxu2  ;;  %v2930_v43 = vadd.f32 %v2894_v53, %v2846_v47  ;;  %v2896_v47 = vld [vmem:[#allocation4 + $0xf0] sm:$0xff] }
 0x3a4   : > { %v3522_v52 = vadd.f32 %v3486_v33, %v3433_v39  ;;  %v3488_v39 = vld [vmem:[#allocation4 + $0xd8] sm:$0xff]  ;;  %v5236_v33 = vrot.slane %v15163_v25, 3 }
 0x3a5   : > { %v3947_v4 = vld [vmem:[#allocation4 + $0xc0] sm:$0xff]  ;;  %2966 = vst.msk [vmem:[#allocation4 + $0xe0] sm:$0xff] %vm1441_vm5, %v2930_v43  ;;  %12140 = vmatmul.msk.bf16.gmra.mxu1 %vm614_vm0, %v4684_v45  ;;  %v4693_v43 = vsel %vm4631_vm8, %v15135_v38, %v4692_v37 }
 0x3a6   : > { %3558 = vst.msk [vmem:[#allocation4 + $0xc8] sm:$0xff] %vm1441_vm5, %v3522_v52  ;;  %v3983_v34 = vadd.f32 %v3947_v4, %v3893_v1  ;;  %v13371_v4 = vld [vmem:[#allocation2 + $0x48] sm:$0xff]  ;;  %v5237_v51 = vsel %vm5226_vm9, %v5234_v0, %v5236_v33  ;;  %v4396_v38 = vld [vmem:[#allocation4 + $0x60] sm:$0xff] }
 0x3a7   : > { %v4319_v42 = vpop.f32.mrf.mxu0  ;;  %v2897_v0 = vld [vmem:[#allocation4 + $0xf8] sm:$0xff] }
 0x3a8   : > { %12253 = vmatmul.msk.bf16.gmra.mxu2 %vm614_vm0, %v5235_v55  ;;  %4019 = vst.msk [vmem:[#allocation4 + $0xc0] sm:$0xff] %vm1441_vm5, %v3983_v34  ;;  %v4430_v48 = vadd.f32 %v4394_v28, %v4319_v42  ;;  %v4199_v34 = vrot.slane %v15167_v31, 2  ;;  %v4695_v28 = vshrl.u32 %v13371_v4, 16 }
 0x3a9   : > { %v3898_v1 = vpop.f32.mrf.mxu3 }
 0x3aa   : > { %4466 = vst.msk [vmem:[#allocation4 + $0x50] sm:$0xff] %vm1441_vm5, %v4430_v48  ;;  %v2848_v20 = vpop.f32.mrf.mxu1  ;;  %12035 = vmatmul.msk.bf16.gmra.mxu0 %vm614_vm0, %v4198_v26  ;;  %v4698_v48 = vshll.u32 %v13371_v4, 16  ;;  %v4200_v62 = vsel %vm3708_vm6, %v4197_v54, %v4199_v34 }
 0x3ab   : > { %v3436_v59 = vpop.f32.mrf.mxu2  ;;  %v2931_v24 = vadd.f32 %v2895_v21, %v2848_v20  ;;  %v4697_v20 = vrot.slane %v4695_v28, 2 }
 0x3ac   : > { %v3523_v16 = vadd.f32 %v3487_v60, %v3436_v59  ;;  %v3489_v36 = vld [vmem:[#allocation4 + $0xe0] sm:$0xff]  ;;  %v4700_v21 = vrot.slane %v4698_v48, 3 }
 0x3ad   : > { %v3948_v9 = vld [vmem:[#allocation4 + $0xc8] sm:$0xff]  ;;  %2967 = vst.msk [vmem:[#allocation4 + $0xe8] sm:$0xff] %vm1441_vm5, %v2931_v24  ;;  %v15188_v24 = vld [vmem:[#allocation2 + $0x40] sm:$0xff] }
 0x3ae   : > { %3559 = vst.msk [vmem:[#allocation4 + $0xd0] sm:$0xff] %vm1441_vm5, %v3523_v16  ;;  %v3984_v6 = vadd.f32 %v3948_v9, %v3895_v44  ;;  %v4397_v9 = vld [vmem:[#allocation4 + $0x68] sm:$0xff] }
 0x3af   : > { %v4321_v23 = vpop.f32.mrf.mxu0 }
 0x3b0   : > { %4020 = vst.msk [vmem:[#allocation4 + $0xc8] sm:$0xff] %vm1441_vm5, %v3984_v6  ;;  %v4431_v49 = vadd.f32 %v4395_v12, %v4321_v23  ;;  %v4701_v6 = vor.u32 %v4700_v21, %v4697_v20 }
 0x3b1   : > { %v3900_v8 = vpop.f32.mrf.mxu3 }
 0x3b2   : > { %4467 = vst.msk [vmem:[#allocation4 + $0x58] sm:$0xff] %vm1441_vm5, %v4431_v49  ;;  %v2851_v44 = vpop.f32.mrf.mxu1  ;;  %v5238_v49 = vrot.slane %v15188_v24, 3 }
 0x3b3   : > { %v3438_v14 = vpop.f32.mrf.mxu2  ;;  %v2932_v52 = vadd.f32 %v2896_v47, %v2851_v44 }
 0x3b4   : > { %v3524_v53 = vadd.f32 %v3488_v39, %v3438_v14  ;;  %v3490_v12 = vld [vmem:[#allocation4 + $0xe8] sm:$0xff]  ;;  %v15192_v14 = vld [vmem:[#allocation2 + $0x90] sm:$0xff] }
 0x3b5   : > { %v3949_v27 = vld [vmem:[#allocation4 + $0xd0] sm:$0xff]  ;;  %2968 = vst.msk [vmem:[#allocation4 + $0xf0] sm:$0xff] %vm1441_vm5, %v2932_v52  ;;  %12141 = vmatmul.msk.bf16.gmra.mxu1 %vm614_vm0, %v4693_v43  ;;  %v2898_v39 = vld [vmem:[#allocation4 + $0x100] sm:$0xff]  ;;  %v5239_v43 = vsel %vm5226_vm9, %v5236_v33, %v5238_v49  ;;  %v4201_v4 = vrot.slane %v15192_v14, 2  ;;  %v2899_v33 = vld [vmem:[#allocation4 + $0x108] sm:$0xff] }
 0x3b6   : > { %3560 = vst.msk [vmem:[#allocation4 + $0xd8] sm:$0xff] %vm1441_vm5, %v3524_v53  ;;  %v3985_v45 = vadd.f32 %v3949_v27, %v3898_v1  ;;  %v4702_v53 = vsel %vm4631_vm8, %v4692_v37, %v4701_v6  ;;  %v13372_v52 = vld [vmem:[#allocation2 + $0x50] sm:$0xff]  ;;  %v4398_v37 = vld [vmem:[#allocation4 + $0x70] sm:$0xff] }
 0x3b7   : > { %v4324_v55 = vpop.f32.mrf.mxu0  ;;  %v4202_v48 = vsel %vm3708_vm6, %v4199_v34, %v4201_v4 }
 0x3b8   : > { %12254 = vmatmul.msk.bf16.gmra.mxu2 %vm614_vm0, %v5237_v51  ;;  %4021 = vst.msk [vmem:[#allocation4 + $0xd0] sm:$0xff] %vm1441_vm5, %v3985_v45  ;;  %v4432_v63 = vadd.f32 %v4396_v38, %v4324_v55  ;;  %v4704_v55 = vshrl.u32 %v13372_v52, 16  ;;  %v4707_v38 = vshll.u32 %v13372_v52, 16 }
 0x3b9   : > { %v3903_v42 = vpop.f32.mrf.mxu3 }
 0x3ba   : > { %4468 = vst.msk [vmem:[#allocation4 + $0x60] sm:$0xff] %vm1441_vm5, %v4432_v63  ;;  %v2853_v46 = vpop.f32.mrf.mxu1  ;;  %12036 = vmatmul.msk.bf16.gmra.mxu0 %vm614_vm0, %v4200_v62 }
 0x3bb   : > { %v3441_v1 = vpop.f32.mrf.mxu2  ;;  %v2933_v60 = vadd.f32 %v2897_v0, %v2853_v46  ;;  %v4706_v46 = vrot.slane %v4704_v55, 2  ;;  %v4709_v0 = vrot.slane %v4707_v38, 3 }
 0x3bc   : > { %v3525_v59 = vadd.f32 %v3489_v36, %v3441_v1  ;;  %v3491_v28 = vld [vmem:[#allocation4 + $0xf0] sm:$0xff] }
 0x3bd   : > { %v3950_v26 = vld [vmem:[#allocation4 + $0xd8] sm:$0xff]  ;;  %2969 = vst.msk [vmem:[#allocation4 + $0xf8] sm:$0xff] %vm1441_vm5, %v2933_v60  ;;  %v15215_v21 = vor.u32 %v4709_v0, %v4706_v46  ;;  %v4401_v0 = vld [vmem:[#allocation4 + $0x88] sm:$0xff] }
 0x3be   : > { %3561 = vst.msk [vmem:[#allocation4 + $0xe0] sm:$0xff] %vm1441_vm5, %v3525_v59  ;;  %v3986_v16 = vadd.f32 %v3950_v26, %v3900_v8  ;;  %v15212_v60 = vld [vmem:[#allocation2 + $0x48] sm:$0xff] }
 0x3bf   : > { %v4326_v54 = vpop.f32.mrf.mxu0  ;;  %v4399_v26 = vld [vmem:[#allocation4 + $0x78] sm:$0xff] }
 0x3c0   : > { %4022 = vst.msk [vmem:[#allocation4 + $0xd8] sm:$0xff] %vm1441_vm5, %v3986_v16  ;;  %v4433_v15 = vadd.f32 %v4397_v9, %v4326_v54  ;;  %v5240_v9 = vrot.slane %v15212_v60, 3 }
 0x3c1   : > { %v3905_v11 = vpop.f32.mrf.mxu3 }
 0x3c2   : > { %4469 = vst.msk [vmem:[#allocation4 + $0x68] sm:$0xff] %vm1441_vm5, %v4433_v15  ;;  %v2856_v8 = vpop.f32.mrf.mxu1  ;;  %v15218_v15 = vld [vmem:[#allocation2 + $0x98] sm:$0xff] }
 0x3c3   : > { %v3443_v23 = vpop.f32.mrf.mxu2  ;;  %v2934_v44 = vadd.f32 %v2898_v39, %v2856_v8  ;;  %v4203_v52 = vrot.slane %v15218_v15, 2 }
 0x3c4   : > { %v3526_v31 = vadd.f32 %v3490_v12, %v3443_v23  ;;  %v3492_v54 = vld [vmem:[#allocation4 + $0xf8] sm:$0xff]  ;;  %v2900_v23 = vld [vmem:[#allocation4 + $0x110] sm:$0xff] }
 0x3c5   : > { %v3951_v47 = vld [vmem:[#allocation4 + $0xe0] sm:$0xff]  ;;  %2970 = vst.msk [vmem:[#allocation4 + $0x100] sm:$0xff] %vm1441_vm5, %v2934_v44  ;;  %12142 = vmatmul.msk.bf16.gmra.mxu1 %vm614_vm0, %v4702_v53  ;;  %v13373_v44 = vld [vmem:[#allocation2 + $0x58] sm:$0xff]  ;;  %v5241_v53 = vsel %vm5226_vm9, %v5238_v49, %v5240_v9  ;;  %v4204_v38 = vsel %vm3708_vm6, %v4201_v4, %v4203_v52 }
 0x3c6   : > { %3562 = vst.msk [vmem:[#allocation4 + $0xe8] sm:$0xff] %vm1441_vm5, %v3526_v31  ;;  %v3987_v27 = vadd.f32 %v3951_v47, %v3903_v42  ;;  %v4711_v31 = vsel %vm4631_vm8, %v4701_v6, %v15215_v21  ;;  %v4400_v6 = vld [vmem:[#allocation4 + $0x80] sm:$0xff] }
 0x3c7   : > { %v4329_v45 = vpop.f32.mrf.mxu0 }
 0x3c8   : > { %12255 = vmatmul.msk.bf16.gmra.mxu2 %vm614_vm0, %v5239_v43  ;;  %4023 = vst.msk [vmem:[#allocation4 + $0xe0] sm:$0xff] %vm1441_vm5, %v3987_v27  ;;  %v4434_v51 = vadd.f32 %v4398_v37, %v4329_v45  ;;  %v4713_v45 = vshrl.u32 %v13373_v44, 16  ;;  %v4716_v37 = vshll.u32 %v13373_v44, 16 }
 0x3c9   : > { %v3908_v63 = vpop.f32.mrf.mxu3 }
 0x3ca   : > { %4470 = vst.msk [vmem:[#allocation4 + $0x70] sm:$0xff] %vm1441_vm5, %v4434_v51  ;;  %v2858_v25 = vpop.f32.mrf.mxu1  ;;  %12037 = vmatmul.msk.bf16.gmra.mxu0 %vm614_vm0, %v4202_v48 }
 0x3cb   : > { %v3446_v42 = vpop.f32.mrf.mxu2  ;;  %v2935_v36 = vadd.f32 %v2899_v33, %v2858_v25  ;;  %v4715_v25 = vrot.slane %v4713_v45, 2  ;;  %v4718_v33 = vrot.slane %v4716_v37, 3 }
 0x3cc   : > { %v3527_v1 = vadd.f32 %v3491_v28, %v3446_v42  ;;  %v3493_v55 = vld [vmem:[#allocation4 + $0x100] sm:$0xff]  ;;  %v4067_v42 = vld [vmem:[#allocation2 + $0xa0] sm:$0x3] }
 0x3cd   : > { %v3952_v62 = vld [vmem:[#allocation4 + $0xe8] sm:$0xff]  ;;  %2971 = vst.msk [vmem:[#allocation4 + $0x108] sm:$0xff] %vm1441_vm5, %v2935_v36  ;;  %v4150_v4 = vunpack.c.l.b16 %v4067_v42 }
 0x3ce   : > { %3563 = vst.msk [vmem:[#allocation4 + $0xf0] sm:$0xff] %vm1441_vm5, %v3527_v1  ;;  %v3988_v59 = vadd.f32 %v3952_v62, %v3905_v11  ;;  %v15239_v62 = vld [vmem:[#allocation2 + $0x50] sm:$0xff] }
 0x3cf   : > { %v4331_v34 = vpop.f32.mrf.mxu0 }
 0x3d0   : > { %4024 = vst.msk [vmem:[#allocation4 + $0xe8] sm:$0xff] %vm1441_vm5, %v3988_v59  ;;  %v4435_v20 = vadd.f32 %v4399_v26, %v4331_v34  ;;  %v15242_v34 = vor.u32 %v4718_v33, %v4715_v25  ;;  %v4403_v25 = vld [vmem:[#allocation4 + $0x98] sm:$0xff] }
 0x3d1   : > { %v3910_v14 = vpop.f32.mrf.mxu3 }
 0x3d2   : > { %4471 = vst.msk [vmem:[#allocation4 + $0x78] sm:$0xff] %vm1441_vm5, %v4435_v20  ;;  %v2861_v11 = vpop.f32.mrf.mxu1 }
 0x3d3   : > { %v3448_v16 = vpop.f32.mrf.mxu2  ;;  %v2936_v8 = vadd.f32 %v2900_v23, %v2861_v11  ;;  %v4979_v23 = vld [vmem:[#allocation4] sm:$0xff] }
 0x3d4   : > { %v3528_v12 = vadd.f32 %v3492_v54, %v3448_v16  ;;  %v3494_v20 = vld [vmem:[#allocation4 + $0x108] sm:$0xff]  ;;  %v5242_v16 = vrot.slane %v15239_v62, 3  ;;  %v4169_v54 = vpack.c.b16 %v4150_v4, %v4150_v4  ;;  %v5782_v62 = vld [vmem:[#allocation3 + $0x8] sm:$0x3] }
 0x3d5   : > { %v3953_v39 = vld [vmem:[#allocation4 + $0xf0] sm:$0xff]  ;;  %2972 = vst.msk [vmem:[#allocation4 + $0x110] sm:$0xff] %vm1441_vm5, %v2936_v8  ;;  %12143 = vmatmul.msk.bf16.gmra.mxu1 %vm614_vm0, %v4711_v31  ;;  %v4720_v8 = vsel %vm4631_vm8, %v15215_v21, %v15242_v34 }
 0x3d6   : > { %3564 = vst.msk [vmem:[#allocation4 + $0xf8] sm:$0xff] %vm1441_vm5, %v3528_v12  ;;  %v3989_v47 = vadd.f32 %v3953_v39, %v3908_v63  ;;  %v2901_v63 = vld [vmem:[#allocation4 + $0x118] sm:$0xff]  ;;  %v13374_v39 = vld [vmem:[#allocation2 + $0x60] sm:$0xff]  ;;  %v5243_v44 = vsel %vm5226_vm9, %v5240_v9, %v5242_v16 }
 0x3d7   : > { %v4334_v27 = vpop.f32.mrf.mxu0  ;;  %v4402_v21 = vld [vmem:[#allocation4 + $0x90] sm:$0xff]  ;;  %v4725_v45 = vshll.u32 %v13374_v39, 16 }
 0x3d8   : > { %12256 = vmatmul.msk.bf16.gmra.mxu2 %vm614_vm0, %v5241_v53  ;;  %4025 = vst.msk [vmem:[#allocation4 + $0xf0] sm:$0xff] %vm1441_vm5, %v3989_v47  ;;  %v4436_v43 = vadd.f32 %v4400_v6, %v4334_v27  ;;  %v4205_v47 = vrot.slane %v4169_v54, 2  ;;  %v4981_v54 = vld [vmem:[#allocation4 + $0x10] sm:$0xff] }
 0x3d9   : > { %v3913_v36 = vpop.f32.mrf.mxu3  ;;  %v4727_v42 = vrot.slane %v4725_v45, 3  ;;  %v5783_v45 = vsel %vm15288_vm12, 0, %v5782_v62 }
 0x3da   : > { %4472 = vst.msk [vmem:[#allocation4 + $0x80] sm:$0xff] %vm1441_vm5, %v4436_v43  ;;  %v2863_v24 = vpop.f32.mrf.mxu1  ;;  %12038 = vmatmul.msk.bf16.gmra.mxu0 %vm614_vm0, %v4204_v38  ;;  %v4722_v43 = vshrl.u32 %v13374_v39, 16  ;;  %v4980_v38 = vld [vmem:[#allocation4 + $0x8] sm:$0xff] }
 0x3db   : > { %v3451_v51 = vpop.f32.mrf.mxu2  ;;  %v2937_v28 = vadd.f32 %v2901_v63, %v2863_v24  ;;  %5784 = vst [vmem:[#allocation3 + $0x8] sm:$0x3] %v5783_v45  ;;  %v4984_v45 = vld [vmem:[#allocation4 + $0x28] sm:$0xff] }
 0x3dc   : > { %v3529_v49 = vadd.f32 %v3493_v55, %v3451_v51  ;;  %v3495_v51 = vld [vmem:[#allocation4 + $0x110] sm:$0xff]  ;;  %v4206_v55 = vsel %vm3708_vm6, %v4203_v52, %v4205_v47 }
 0x3dd   : > { %v3954_v48 = vld [vmem:[#allocation4 + $0xf8] sm:$0xff]  ;;  %2973 = vst.msk [vmem:[#allocation4 + $0x118] sm:$0xff] %vm1441_vm5, %v2937_v28 }
 0x3de   : > { %3565 = vst.msk [vmem:[#allocation4 + $0x100] sm:$0xff] %vm1441_vm5, %v3529_v49  ;;  %v3990_v1 = vadd.f32 %v3954_v48, %v3910_v14  ;;  %v4724_v49 = vrot.slane %v4722_v43, 2  ;;  %v15264_v48 = vld [vmem:[#allocation2 + $0x58] sm:$0xff] }
 0x3df   : > { %v4336_v46 = vpop.f32.mrf.mxu0 }
 0x3e0   : > { %4026 = vst.msk [vmem:[#allocation4 + $0xf8] sm:$0xff] %vm1441_vm5, %v3990_v1  ;;  %v4437_v59 = vadd.f32 %v4401_v0, %v4336_v46  ;;  %v15267_v1 = vor.u32 %v4727_v42, %v4724_v49  ;;  %v5244_v0 = vrot.slane %v15264_v48, 3  ;;  %v13467_v49 = vld [vmem:[%s17463_s8 + $0x28] sm:$0xff]  ;;  %v13487_v42 = vld [vmem:[%s17463_s8 + $0x38] sm:$0xff] }
 0x3e1   : > { %v3915_v53 = vpop.f32.mrf.mxu3  ;;  %7652 = vmatpush.bf16.msrb.mxu1 %v13467_v49  ;;  %8097 = vmatpush.bf16.msrb.mxu2 %v13487_v42  ;;  %v15349_v42 = vld [vmem:[#allocation2 + $0x68] sm:$0xff] }
 0x3e2   : > { %4473 = vst.msk [vmem:[#allocation4 + $0x88] sm:$0xff] %vm1441_vm5, %v4437_v59  ;;  %v4889_v11 = vpop.f32.mrf.mxu1  ;;  %v13447_v59 = vld [vmem:[%s17463_s8 + $0x18] sm:$0xff] }
 0x3e3   : > { %v3453_v26 = vpop.f32.mrf.mxu2  ;;  %v5015_v12 = vadd.f32 %v4979_v23, %v4889_v11  ;;  %7207 = vmatpush.bf16.msrb.mxu0 %v13447_v59  ;;  %v13375_v11 = vld [vmem:[#allocation2 + $0x68] sm:$0xff] }
 0x3e4   : > { %v3530_v15 = vadd.f32 %v3494_v20, %v3453_v26  ;;  %v3496_v46 = vld [vmem:[#allocation4 + $0x118] sm:$0xff] }
 0x3e5   : > { %v3955_v14 = vld [vmem:[#allocation4 + $0x100] sm:$0xff]  ;;  %5051 = vst.msk [vmem:[#allocation4] sm:$0xff] %vm1441_vm5, %v5015_v12  ;;  %12144 = vmatmul.msk.bf16.gmra.mxu1 %vm614_vm0, %v4720_v8  ;;  %v4729_v12 = vsel %vm4631_vm8, %v15242_v34, %v15267_v1  ;;  %v5245_v8 = vsel %vm5226_vm9, %v5242_v16, %v5244_v0  ;;  %v4734_v34 = vshll.u32 %v13375_v11, 16 }
 0x3e6   : > { %3566 = vst.msk [vmem:[#allocation4 + $0x108] sm:$0xff] %vm1441_vm5, %v3530_v15  ;;  %v3991_v31 = vadd.f32 %v3955_v14, %v3913_v36 }
 0x3e7   : > { %v4339_v27 = vpop.f32.mrf.mxu0 }
 0x3e8   : > { %12257 = vmatmul.msk.bf16.gmra.mxu2 %vm614_vm0, %v5243_v44  ;;  %4027 = vst.msk [vmem:[#allocation4 + $0x100] sm:$0xff] %vm1441_vm5, %v3991_v31  ;;  %v4438_v6 = vadd.f32 %v4402_v21, %v4339_v27  ;;  %v4404_v31 = vld [vmem:[#allocation4 + $0xa0] sm:$0xff]  ;;  %v4731_v44 = vshrl.u32 %v13375_v11, 16 }
 0x3e9   : > { %v3918_v36 = vpop.f32.mrf.mxu3 }
 0x3ea   : > { %4474 = vst.msk [vmem:[#allocation4 + $0x90] sm:$0xff] %vm1441_vm5, %v4438_v6  ;;  %12039 = vmatmul.msk.bf16.gmra.mxu0 %vm614_vm0, %v4206_v55  ;;  %v4891_v9 = vpop.f32.mrf.mxu1  ;;  %v4982_v6 = vld [vmem:[#allocation4 + $0x18] sm:$0xff] }
 0x3eb   : > { %v3456_v37 = vpop.f32.mrf.mxu2  ;;  %v5016_v24 = vadd.f32 %v4980_v38, %v4891_v9  ;;  %v13408_v55 = vld [vmem:[#allocation3] sm:$0xff]  ;;  %v4733_v9 = vrot.slane %v4731_v44, 2  ;;  %v4736_v38 = vrot.slane %v4734_v34, 3 }
 0x3ec   : > { %v3531_v60 = vadd.f32 %v3495_v51, %v3456_v37  ;;  %v5441_v27 = vld [vmem:[#allocation4] sm:$0xff]  ;;  %12348 = vmatmul.msk.bf16.vlgmr.msra.gmra.mxu3 %vm1441_vm5, %v13408_v55  ;;  %v13507_v44 = vld [vmem:[%s17463_s8 + $0x48] sm:$0xff] }
 0x3ed   : > { %v3956_v63 = vld [vmem:[#allocation4 + $0x108] sm:$0xff]  ;;  %5052 = vst.msk [vmem:[#allocation4 + $0x8] sm:$0xff] %vm1441_vm5, %v5016_v24  ;;  %8675 = vmatpush.bf16.msrb.mxu3 %v13507_v44 }
 0x3ee   : > { %3567 = vst.msk [vmem:[#allocation4 + $0x110] sm:$0xff] %vm1441_vm5, %v3531_v60  ;;  %v3992_v28 = vadd.f32 %v3956_v63, %v3915_v53  ;;  %v15297_v63 = vld [vmem:[#allocation2 + $0x60] sm:$0xff] }
 0x3ef   : > { %v4341_v52 = vpop.f32.mrf.mxu0  ;;  %v5246_v59 = vrot.slane %v15297_v63, 3 }
 0x3f0   : > { %4028 = vst.msk [vmem:[#allocation4 + $0x108] sm:$0xff] %vm1441_vm5, %v3992_v28  ;;  %v4439_v33 = vadd.f32 %v4403_v25, %v4341_v52  ;;  %v4405_v52 = vld [vmem:[#allocation4 + $0xa8] sm:$0xff]  ;;  %v15310_v25 = vld [vmem:[%s17460_s5] ss:$0 sm:$0xff] }
 0x3f1   : > { %v3920_v37 = vpop.f32.mrf.mxu3 }
 0x3f2   : > { %4475 = vst.msk [vmem:[#allocation4 + $0x98] sm:$0xff] %vm1441_vm5, %v4439_v33  ;;  %v4894_v20 = vpop.f32.mrf.mxu1 }
 0x3f3   : > { %v3458_v4 = vpop.f32.mrf.mxu2  ;;  %v5017_v15 = vadd.f32 %v4981_v54, %v4894_v20  ;;  %v4983_v54 = vld [vmem:[#allocation4 + $0x20] sm:$0xff] }
 0x3f4   : > { %v3532_v26 = vadd.f32 %v3496_v46, %v3458_v4  ;;  %v5442_v46 = vld [vmem:[#allocation4 + $0x8] sm:$0xff] }
 0x3f5   : > { %v3957_v23 = vld [vmem:[#allocation4 + $0x110] sm:$0xff]  ;;  %5053 = vst.msk [vmem:[#allocation4 + $0x10] sm:$0xff] %vm1441_vm5, %v5017_v15  ;;  %12145 = vmatmul.msk.bf16.gmra.mxu1 %vm614_vm0, %v4729_v12  ;;  %v13376_v12 = vld [vmem:[#allocation2 + $0x70] sm:$0xff] }
 0x3f6   : > { %3568 = vst.msk [vmem:[#allocation4 + $0x118] sm:$0xff] %vm1441_vm5, %v3532_v26  ;;  %v3993_v14 = vadd.f32 %v3957_v23, %v3918_v36  ;;  %v15312_v36 = vor.u32 %v4736_v38, %v4733_v9  ;;  %v15318_v26 = vld [vmem:[%s17461_s6] ss:$0 sm:$0xff] }
 0x3f7   : > { %v4344_v39 = vpop.f32.mrf.mxu0 }
 0x3f8   : > { %12258 = vmatmul.msk.bf16.gmra.mxu2 %vm614_vm0, %v5245_v8  ;;  %4029 = vst.msk [vmem:[#allocation4 + $0x110] sm:$0xff] %vm1441_vm5, %v3993_v14  ;;  %v4440_v47 = vadd.f32 %v4404_v31, %v4344_v39  ;;  %v15325_v8 = vld [vmem:[%s17462_s7] ss:$0 sm:$0xff]  ;;  %v4738_v39 = vsel %vm4631_vm8, %v15267_v1, %v15312_v36  ;;  %v5247_v31 = vsel %vm5226_vm9, %v5244_v0, %v5246_v59 }
 0x3f9   : > { %v4406_v1 = vld [vmem:[#allocation4 + $0xb0] sm:$0xff] }
 0x3fa   : > { %4476 = vst.msk [vmem:[#allocation4 + $0xa0] sm:$0xff] %vm1441_vm5, %v4440_v47  ;;  %v4896_v16 = vpop.f32.mrf.mxu1 }
 0x3fb   : > { %v5351_v53 = vpop.f32.mrf.mxu2  ;;  %v5018_v51 = vadd.f32 %v4982_v6, %v4896_v16  ;;  %v4743_v16 = vshll.u32 %v13376_v12, 16 }
 0x3fc   : > { %v5477_v43 = vadd.f32 %v5441_v27, %v5351_v53  ;;  %v4740_v53 = vshrl.u32 %v13376_v12, 16  ;;  %v5443_v6 = vld [vmem:[#allocation4 + $0x10] sm:$0xff] }
 0x3fd   : > { %v3958_v60 = vld [vmem:[#allocation4 + $0x118] sm:$0xff]  ;;  %5054 = vst.msk [vmem:[#allocation4 + $0x18] sm:$0xff] %vm1441_vm5, %v5018_v51 }
 0x3fe   : > { %5513 = vst.msk [vmem:[#allocation4] sm:$0xff] %vm1441_vm5, %v5477_v43  ;;  %v3994_v24 = vadd.f32 %v3958_v60, %v3920_v37  ;;  %v4742_v38 = vrot.slane %v4740_v53, 2  ;;  %v6480_v53 = vld [vmem:[#allocation3 + $0x8] sm:$0xe] }
 0x3ff   : > { %v4346_v28 = vpop.f32.mrf.mxu0 }
 0x400   : > { %4030 = vst.msk [vmem:[#allocation4 + $0x118] sm:$0xff] %vm1441_vm5, %v3994_v24  ;;  %v4441_v33 = vadd.f32 %v4405_v52, %v4346_v28  ;;  %v4745_v24 = vrot.slane %v4743_v16, 3 }
 0x402   : > { %4477 = vst.msk [vmem:[#allocation4 + $0xa8] sm:$0xff] %vm1441_vm5, %v4441_v33  ;;  %v4899_v20 = vpop.f32.mrf.mxu1 }
 0x403   : > { %v5353_v4 = vpop.f32.mrf.mxu2  ;;  %v5019_v23 = vadd.f32 %v4983_v54, %v4899_v20  ;;  %v15353_v54 = vor.u32 %v4745_v24, %v4742_v38 }
 0x404   : > { %v5478_v15 = vadd.f32 %v5442_v46, %v5353_v4  ;;  %v4407_v46 = vld [vmem:[#allocation4 + $0xb8] sm:$0xff] }
 0x405   : > { %v5549_v11 = vld [vmem:[#allocation4] sm:$0xff]  ;;  %5055 = vst.msk [vmem:[#allocation4 + $0x20] sm:$0xff] %vm1441_vm5, %v5019_v23  ;;  %12146 = vmatmul.msk.bf16.gmra.mxu1 %vm614_vm0, %v4738_v39  ;;  %v5444_v12 = vld [vmem:[#allocation4 + $0x18] sm:$0xff]  ;;  %v5838_v39 = vpop.permute.xlu1 %5837 }
 0x406   : > { %v5589_v14 = vmul.f32 %v15310_v25, %v5549_v11  ;;  %5514 = vst.msk [vmem:[#allocation4 + $0x8] sm:$0xff] %vm1441_vm5, %v5478_v15 }
 0x407   : > { %v4349_v34 = vpop.f32.mrf.mxu0 }
 0x408   : > { %v5629_v47 = vadd.f32 %v15318_v26, %v5589_v14  ;;  %12259 = vmatmul.msk.bf16.gmra.mxu2 %vm614_vm0, %v5247_v31  ;;  %v4442_v62 = vadd.f32 %v4406_v1, %v4349_v34  ;;  %v5248_v14 = vrot.slane %v15349_v42, 3 }
 0x40a   : > { %vm5665_vm13 = vcmp.ge.f32.partialorder %v5629_v47, 0.0  ;;  %v5705_v27 = vmul.f32 %v15325_v8, %v5629_v47  ;;  %4478 = vst.msk [vmem:[#allocation4 + $0xb0] sm:$0xff] %vm1441_vm5, %v4442_v62  ;;  %v4901_v43 = vpop.f32.mrf.mxu1 }
 0x40b   : > { %v5356_v48 = vpop.f32.mrf.mxu2  ;;  %v5020_v60 = vadd.f32 %v4984_v45, %v4901_v43  ;;  %v4747_v43 = vsel %vm4631_vm8, %v15312_v36, %v15353_v54 }
 0x40c   : > { %v5741_v0 = vsel %vm5665_vm13, %v5629_v47, %v5705_v27  ;;  %v5479_v37 = vadd.f32 %v5443_v6, %v5356_v48  ;;  %v4985_v47 = vld [vmem:[#allocation4 + $0x30] sm:$0xff]  ;;  %v13377_v48 = vld [vmem:[#allocation2 + $0x78] sm:$0xff]  ;;  %vm6082_vm13 = vsmask.f32 5392 }
 0x40d   : > { %v6010_v51 = vmul.f32 %v14840_v61, %v5741_v0  ;;  %v5550_v55 = vld [vmem:[#allocation4 + $0x8] sm:$0xff]  ;;  %5056 = vst.msk [vmem:[#allocation4 + $0x28] sm:$0xff] %vm1441_vm5, %v5020_v60  ;;  %v4749_v38 = vshrl.u32 %v13377_v48, 16  ;;  %vm15386_vm15 = vmor %vm5780_vm11, %vm6082_vm13 }
 0x40e   : > { %v5590_v9 = vmul.f32 %v15310_v25, %v5550_v55  ;;  %5515 = vst.msk [vmem:[#allocation4 + $0x10] sm:$0xff] %vm1441_vm5, %v5479_v37  ;;  %v5249_v37 = vsel %vm5226_vm9, %v5246_v59, %v5248_v14  ;;  %v13446_v55 = vld [vmem:[%s17463_s8 + $0x10] sm:$0xff] }
 0x40f   : > { %v6046_v49 = vpack.c.bf16 %v6010_v51, %v6010_v51  ;;  %v4351_v4 = vpop.f32.mrf.mxu0  ;;  %7208 = vmatpush.bf16.msrb.mxu0 %v13446_v55 }
 0x410   : > { %v5630_v28 = vadd.f32 %v15318_v26, %v5590_v9  ;;  %v4443_v20 = vadd.f32 %v4407_v46, %v4351_v4  ;;  %v4408_v9 = vld [vmem:[#allocation4 + $0xc0] sm:$0xff] }
 0x411   : > { %v6085_v52 = vshrl.u32 %v6046_v49, 16  ;;  %v6088_v33 = vshll.u32 %v6046_v49, 16 }
 0x412   : > { %vm5666_vm2 = vcmp.ge.f32.partialorder %v5630_v28, 0.0  ;;  %v5706_v61 = vmul.f32 %v15325_v8, %v5630_v28  ;;  %4479 = vst.msk [vmem:[#allocation4 + $0xb8] sm:$0xff] %vm1441_vm5, %v4443_v20  ;;  %v4904_v44 = vpop.f32.mrf.mxu1 }
 0x413   : > { %v6087_v15 = vrot.slane %v6085_v52, 6  ;;  %v6090_v11 = vrot.slane %v6088_v33, 7  ;;  %v5358_v23 = vpop.f32.mrf.mxu2  ;;  %v5021_v16 = vadd.f32 %v4985_v47, %v4904_v44  ;;  %v5445_v33 = vld [vmem:[#allocation4 + $0x20] sm:$0xff] }
 0x414   : > { %v5742_v31 = vsel %vm5666_vm2, %v5630_v28, %v5706_v61  ;;  %v5480_v34 = vadd.f32 %v5444_v12, %v5358_v23  ;;  %v4752_v28 = vshll.u32 %v13377_v48, 16  ;;  %v13428_v12 = vld [vmem:[#allocation3] sm:$0xff]  ;;  %v15394_v48 = vld [vmem:[#allocation2 + $0x70] sm:$0xff] }
 0x415   : > { %v6011_v27 = vmul.f32 %v5838_v39, %v5742_v31  ;;  %v5551_v62 = vld [vmem:[#allocation4 + $0x10] sm:$0xff]  ;;  %v6091_v6 = vor.u32 %v6090_v11, %v6087_v15  ;;  %5057 = vst.msk [vmem:[#allocation4 + $0x30] sm:$0xff] %vm1441_vm5, %v5021_v16  ;;  %12147 = vmatmul.msk.bf16.gmra.mxu1 %vm614_vm0, %v4747_v43  ;;  %v4986_v15 = vld [vmem:[#allocation4 + $0x38] sm:$0xff] }
 0x416   : > { %v5591_v0 = vmul.f32 %v15310_v25, %v5551_v62  ;;  %5516 = vst.msk [vmem:[#allocation4 + $0x18] sm:$0xff] %vm1441_vm5, %v5480_v34  ;;  %v4754_v62 = vrot.slane %v4752_v28, 3 }
 0x417   : > { %v6047_v45 = vpack.c.bf16 %v6011_v27, %v6011_v27  ;;  %v6481_v51 = vsel %vm15359_vm10, %v6091_v6, %v6480_v53  ;;  %v4354_v60 = vpop.f32.mrf.mxu0  ;;  %v6092_v47 = vrot.slane %v6091_v6, 4  ;;  %v4751_v27 = vrot.slane %v4749_v38, 2  ;;  %v5446_v38 = vld [vmem:[#allocation4 + $0x28] sm:$0xff] }
 0x418   : > { %v5631_v36 = vadd.f32 %v15318_v26, %v5591_v0  ;;  %12260 = vmatmul.msk.bf16.gmra.mxu2 %vm614_vm0, %v5249_v37  ;;  %6482 = vst [vmem:[#allocation3 + $0x8] sm:$0xe] %v6481_v51  ;;  %v4444_v49 = vadd.f32 %v4408_v9, %v4354_v60  ;;  %v6990_v6 = vshll.u32 %v13428_v12, 16 }
 0x419   : > { %v6094_v24 = vshrl.u32 %v6047_v45, 16  ;;  %v6097_v63 = vshll.u32 %v6047_v45, 16  ;;  %v4409_v45 = vld [vmem:[#allocation4 + $0xc8] sm:$0xff]  ;;  %v15401_v60 = vor.u32 %v4754_v62, %v4751_v27 }
 0x41a   : > { %vm5667_vm14 = vcmp.ge.f32.partialorder %v5631_v36, 0.0  ;;  %v5707_v59 = vmul.f32 %v15325_v8, %v5631_v36  ;;  %4480 = vst.msk [vmem:[#allocation4 + $0xc0] sm:$0xff] %vm1441_vm5, %v4444_v49  ;;  %v4906_v20 = vpop.f32.mrf.mxu1  ;;  %v5848_v49 = vpop.permute.xlu1 %5847 }
 0x41b   : > { %v5361_v52 = vpop.f32.mrf.mxu2  ;;  %v6096_v4 = vrot.slane %v6094_v24, 6  ;;  %v6099_v46 = vrot.slane %v6097_v63, 7  ;;  %v5022_v44 = vadd.f32 %v4986_v15, %v4906_v20  ;;  %v5250_v24 = vrot.slane %v15394_v48, 3  ;;  %v13378_v20 = vld [vmem:[#allocation2 + $0x80] sm:$0xff] }
 0x41c   : > { %v5743_v61 = vsel %vm5667_vm14, %v5631_v36, %v5707_v59  ;;  %v5481_v11 = vadd.f32 %v5445_v33, %v5361_v52  ;;  %v4987_v33 = vld [vmem:[#allocation4 + $0x40] sm:$0xff] }
 0x41d   : > { %v6012_v39 = vmul.f32 %v14209_v57, %v5743_v61  ;;  %v5552_v31 = vld [vmem:[#allocation4 + $0x18] sm:$0xff]  ;;  %v6100_v34 = vor.u32 %v6099_v46, %v6096_v4  ;;  %5058 = vst.msk [vmem:[#allocation4 + $0x38] sm:$0xff] %vm1441_vm5, %v5022_v44  ;;  %v6988_v46 = vshrl.u32 %v13428_v12, 16  ;;  %v6992_v61 = vrot.slane %v6990_v6, 1  ;;  %v4410_v6 = vld [vmem:[#allocation4 + $0xd0] sm:$0xff] }
 0x41e   : > { %v5592_v53 = vmul.f32 %v15310_v25, %v5552_v31  ;;  %5517 = vst.msk [vmem:[#allocation4 + $0x20] sm:$0xff] %vm1441_vm5, %v5481_v11  ;;  %v5251_v12 = vsel %vm5226_vm9, %v5248_v14, %v5250_v24 }
 0x41f   : > { %v6048_v16 = vpack.c.bf16 %v6012_v39, %v6012_v39  ;;  %v6101_v0 = vsel %vm15386_vm15, %v6092_v47, %v6100_v34  ;;  %v4356_v43 = vpop.f32.mrf.mxu0  ;;  %v6102_v31 = vrot.slane %v6100_v34, 4  ;;  %v6993_v42 = vor.u32 %v6992_v61, %v6988_v46 }
 0x420   : > { %v5632_v57 = vadd.f32 %v15318_v26, %v5592_v53  ;;  %6483 = vst.msk [vmem:[#allocation3 + $0xc] sm:$0xf] %vm834_vm1, %v6101_v0  ;;  %v4445_v36 = vadd.f32 %v4409_v45, %v4356_v43  ;;  %v4756_v53 = vsel %vm4631_vm8, %v15353_v54, %v15401_v60  ;;  %v4758_v54 = vshrl.u32 %v13378_v20, 16 }
 0x421   : > { %v6104_v37 = vshrl.u32 %v6048_v16, 16  ;;  %v6107_v51 = vshll.u32 %v6048_v16, 16 }
 0x422   : > { %vm5668_vm11 = vcmp.ge.f32.partialorder %v5632_v57, 0.0  ;;  %v5708_v55 = vmul.f32 %v15325_v8, %v5632_v57  ;;  %4481 = vst.msk [vmem:[#allocation4 + $0xc8] sm:$0xff] %vm1441_vm5, %v4445_v36  ;;  %v4909_v52 = vpop.f32.mrf.mxu1 }
 0x423   : > { %v5363_v9 = vpop.f32.mrf.mxu2  ;;  %v6106_v63 = vrot.slane %v6104_v37, 6  ;;  %v6109_v59 = vrot.slane %v6107_v51, 7  ;;  %v5023_v39 = vadd.f32 %v4987_v33, %v4909_v52  ;;  %v4988_v52 = vld [vmem:[#allocation4 + $0x48] sm:$0xff] }
 0x424   : > { %v5744_v28 = vsel %vm5668_vm11, %v5632_v57, %v5708_v55  ;;  %v5482_v4 = vadd.f32 %v5446_v38, %v5363_v9  ;;  %v4761_v55 = vshll.u32 %v13378_v20, 16  ;;  %v5447_v9 = vld [vmem:[#allocation4 + $0x30] sm:$0xff] }
 0x425   : > { %v6013_v15 = vmul.f32 %v5848_v49, %v5744_v28  ;;  %v5553_v11 = vld [vmem:[#allocation4 + $0x20] sm:$0xff]  ;;  %v6110_v44 = vor.u32 %v6109_v59, %v6106_v63  ;;  %5059 = vst.msk [vmem:[#allocation4 + $0x40] sm:$0xff] %vm1441_vm5, %v5023_v39  ;;  %12148 = vmatmul.msk.bf16.gmra.mxu1 %vm614_vm0, %v4756_v53 }
 0x426   : > { %v5593_v47 = vmul.f32 %v15310_v25, %v5553_v11  ;;  %5518 = vst.msk [vmem:[#allocation4 + $0x28] sm:$0xff] %vm1441_vm5, %v5482_v4 }
 0x427   : > { %v6049_v27 = vpack.c.bf16 %v6013_v15, %v6013_v15  ;;  %v13409_v34 = vld [vmem:[#allocation3 + $0x8] sm:$0xff]  ;;  %v6111_v16 = vsel %vm15386_vm15, %v6102_v31, %v6110_v44  ;;  %v4359_v57 = vpop.f32.mrf.mxu0  ;;  %v6112_v4 = vrot.slane %v6110_v44, 4  ;;  %v4760_v31 = vrot.slane %v4758_v54, 2  ;;  %v15437_v44 = vld [vmem:[#allocation2 + $0x78] sm:$0xff] }
 0x428   : > { %v15417_v62 = vld [vmem:[#allocation3 + $0x8] sm:$0xff]  ;;  %v5633_v0 = vadd.f32 %v15318_v26, %v5593_v47  ;;  %12261 = vmatmul.msk.bf16.gmra.mxu2 %vm614_vm0, %v5251_v12  ;;  %6484 = vst.msk [vmem:[#allocation3 + $0x10] sm:$0xf] %vm834_vm1, %v6111_v16  ;;  %12349 = vmatmul.msk.bf16.gmra.mxu3 %vm1441_vm5, %v13409_v34  ;;  %v4446_v51 = vadd.f32 %v4410_v6, %v4359_v57  ;;  %v4763_v47 = vrot.slane %v4761_v55, 3  ;;  %v4411_v34 = vld [vmem:[#allocation4 + $0xd8] sm:$0xff] }
 0x429   : > { %v6995_v14 = vshll.u32 %v15417_v62, 16  ;;  %v6114_v43 = vshrl.u32 %v6049_v27, 16  ;;  %v6117_v45 = vshll.u32 %v6049_v27, 16  ;;  %v6999_v48 = vshrl.u32 %v15417_v62, 16 }
 0x42a   : > { %vm5669_vm2 = vcmp.ge.f32.partialorder %v5633_v0, 0.0  ;;  %v5709_v37 = vmul.f32 %v15325_v8, %v5633_v0  ;;  %4482 = vst.msk [vmem:[#allocation4 + $0xd0] sm:$0xff] %vm1441_vm5, %v4446_v51  ;;  %v4911_v28 = vpop.f32.mrf.mxu1  ;;  %v15444_v6 = vor.u32 %v4763_v47, %v4760_v31  ;;  %v4412_v47 = vld [vmem:[#allocation4 + $0xe0] sm:$0xff] }
 0x42b   : > { %v5366_v36 = vpop.f32.mrf.mxu2  ;;  %v15427_v38 = vrot.slane %v6995_v14, 1  ;;  %v6116_v63 = vrot.slane %v6114_v43, 6  ;;  %v6119_v59 = vrot.slane %v6117_v45, 7  ;;  %v5024_v15 = vadd.f32 %v4988_v52, %v4911_v28  ;;  %v5448_v14 = vld [vmem:[#allocation4 + $0x38] sm:$0xff] }
 0x42c   : > { %v5745_v49 = vsel %vm5669_vm2, %v5633_v0, %v5709_v37  ;;  %v5483_v33 = vadd.f32 %v5447_v9, %v5366_v36  ;;  %v5252_v43 = vrot.slane %v15437_v44, 3  ;;  %v4989_v36 = vld [vmem:[#allocation4 + $0x50] sm:$0xff] }
 0x42d   : > { %v6014_v46 = vmul.f32 %v14231_v10, %v5745_v49  ;;  %v5554_v61 = vld [vmem:[#allocation4 + $0x28] sm:$0xff]  ;;  %v6998_v20 = vsel %vm1617_vm4, %v6993_v42, %v15427_v38  ;;  %v6120_v11 = vor.u32 %v6119_v59, %v6116_v63  ;;  %5060 = vst.msk [vmem:[#allocation4 + $0x48] sm:$0xff] %vm1441_vm5, %v5024_v15  ;;  %v13379_v63 = vld [vmem:[#allocation2 + $0x88] sm:$0xff] }
 0x42e   : > { %v5594_v39 = vmul.f32 %v15310_v25, %v5554_v61  ;;  %5519 = vst.msk [vmem:[#allocation4 + $0x30] sm:$0xff] %vm1441_vm5, %v5483_v33  ;;  %12450 = vmatmul.msk.bf16.vlgmr.msrb.gmra.mxu0 %vm1441_vm5, %v6998_v20 }
 0x42f   : > { %v6050_v53 = vpack.c.bf16 %v6014_v46, %v6014_v46  ;;  %v6121_v10 = vsel %vm15386_vm15, %v6112_v4, %v6120_v11  ;;  %v4361_v12 = vpop.f32.mrf.mxu0  ;;  %v6122_v52 = vrot.slane %v6120_v11, 4  ;;  %v4765_v46 = vsel %vm4631_vm8, %v15401_v60, %v15444_v6 }
 0x430   : > { %v5634_v27 = vadd.f32 %v15318_v26, %v5594_v39  ;;  %6485 = vst.msk [vmem:[#allocation3 + $0x14] sm:$0xf] %vm834_vm1, %v6121_v10  ;;  %v4447_v57 = vadd.f32 %v4411_v34, %v4361_v12  ;;  %v4767_v60 = vshrl.u32 %v13379_v63, 16  ;;  %v4770_v34 = vshll.u32 %v13379_v63, 16 }
 0x431   : > { %v6124_v16 = vshrl.u32 %v6050_v53, 16  ;;  %v6127_v0 = vshll.u32 %v6050_v53, 16 }
 0x432   : > { %vm5670_vm13 = vcmp.ge.f32.partialorder %v5634_v27, 0.0  ;;  %v5710_v54 = vmul.f32 %v15325_v8, %v5634_v27  ;;  %4483 = vst.msk [vmem:[#allocation4 + $0xd8] sm:$0xff] %vm1441_vm5, %v4447_v57  ;;  %v4914_v55 = vpop.f32.mrf.mxu1 }
 0x433   : > { %v5368_v42 = vpop.f32.mrf.mxu2  ;;  %v6126_v45 = vrot.slane %v6124_v16, 6  ;;  %v6129_v37 = vrot.slane %v6127_v0, 7  ;;  %v5025_v28 = vadd.f32 %v4989_v36, %v4914_v55  ;;  %v5449_v0 = vld [vmem:[#allocation4 + $0x40] sm:$0xff] }
 0x434   : > { %v5746_v51 = vsel %vm5670_vm13, %v5634_v27, %v5710_v54  ;;  %v5484_v9 = vadd.f32 %v5448_v14, %v5368_v42  ;;  %v7001_v54 = vor.u32 %v6999_v48, %v15427_v38 }
 0x435   : > { %v6015_v59 = vmul.f32 %v14879_v17, %v5746_v51  ;;  %v5555_v49 = vld [vmem:[#allocation4 + $0x30] sm:$0xff]  ;;  %v6130_v33 = vor.u32 %v6129_v37, %v6126_v45  ;;  %5061 = vst.msk [vmem:[#allocation4 + $0x50] sm:$0xff] %vm1441_vm5, %v5025_v28  ;;  %12149 = vmatmul.msk.bf16.gmra.mxu1 %vm614_vm0, %v4765_v46  ;;  %v5253_v17 = vsel %vm5226_vm9, %v5250_v24, %v5252_v43  ;;  %v5863_v45 = vpop.permute.xlu1 %5862  ;;  %v4990_v51 = vld [vmem:[#allocation4 + $0x58] sm:$0xff] }
 0x436   : > { %v5595_v4 = vmul.f32 %v15310_v25, %v5555_v49  ;;  %5520 = vst.msk [vmem:[#allocation4 + $0x38] sm:$0xff] %vm1441_vm5, %v5484_v9 }
 0x437   : > { %v6051_v61 = vpack.c.bf16 %v6015_v59, %v6015_v59  ;;  %v13410_v15 = vld [vmem:[#allocation3 + $0x10] sm:$0xff]  ;;  %v6131_v11 = vsel %vm15386_vm15, %v6122_v52, %v6130_v33  ;;  %v4364_v31 = vpop.f32.mrf.mxu0  ;;  %v6132_v36 = vrot.slane %v6130_v33, 4  ;;  %v4769_v52 = vrot.slane %v4767_v60, 2 }
 0x438   : > { %v15461_v20 = vld [vmem:[#allocation3 + $0x10] sm:$0xff]  ;;  %v5635_v39 = vadd.f32 %v15318_v26, %v5595_v4  ;;  %12262 = vmatmul.msk.bf16.gmra.mxu2 %vm614_vm0, %v5253_v17  ;;  %6486 = vst.msk [vmem:[#allocation3 + $0x18] sm:$0xf] %vm834_vm1, %v6131_v11  ;;  %12350 = vmatmul.msk.bf16.gmra.mxu3 %vm1441_vm5, %v13410_v15  ;;  %v4448_v12 = vadd.f32 %v4412_v47, %v4364_v31  ;;  %v4772_v4 = vrot.slane %v4770_v34, 3 }
 0x439   : > { %v7003_v24 = vshll.u32 %v15461_v20, 16  ;;  %v6134_v53 = vshrl.u32 %v6051_v61, 16  ;;  %v6137_v10 = vshll.u32 %v6051_v61, 16  ;;  %v15482_v61 = vld [vmem:[#allocation2 + $0x80] sm:$0xff]  ;;  %v4413_v11 = vld [vmem:[#allocation4 + $0xe8] sm:$0xff]  ;;  %v7007_v44 = vshrl.u32 %v15461_v20, 16 }
 0x43a   : > { %vm5671_vm14 = vcmp.ge.f32.partialorder %v5635_v39, 0.0  ;;  %v5711_v27 = vmul.f32 %v15325_v8, %v5635_v39  ;;  %4484 = vst.msk [vmem:[#allocation4 + $0xe0] sm:$0xff] %vm1441_vm5, %v4448_v12  ;;  %v4916_v62 = vpop.f32.mrf.mxu1  ;;  %v15489_v48 = vor.u32 %v4772_v4, %v4769_v52  ;;  %v4414_v52 = vld [vmem:[#allocation4 + $0xf0] sm:$0xff] }
 0x43b   : > { %v5371_v16 = vpop.f32.mrf.mxu2  ;;  %v15473_v57 = vrot.slane %v7003_v24, 1  ;;  %v6136_v42 = vrot.slane %v6134_v53, 6  ;;  %v6139_v14 = vrot.slane %v6137_v10, 7  ;;  %v5026_v49 = vadd.f32 %v4990_v51, %v4916_v62  ;;  %v5450_v53 = vld [vmem:[#allocation4 + $0x48] sm:$0xff] }
 0x43c   : > { %v5747_v37 = vsel %vm5671_vm14, %v5635_v39, %v5711_v27  ;;  %v5485_v55 = vadd.f32 %v5449_v0, %v5371_v16  ;;  %v5254_v10 = vrot.slane %v15482_v61, 3  ;;  %v4991_v0 = vld [vmem:[#allocation4 + $0x60] sm:$0xff] }
 0x43d   : > { %v6016_v9 = vmul.f32 %v5863_v45, %v5747_v37  ;;  %v5556_v59 = vld [vmem:[#allocation4 + $0x38] sm:$0xff]  ;;  %v7006_v63 = vsel %vm1617_vm4, %v7001_v54, %v15473_v57  ;;  %v6140_v28 = vor.u32 %v6139_v14, %v6136_v42  ;;  %5062 = vst.msk [vmem:[#allocation4 + $0x58] sm:$0xff] %vm1441_vm5, %v5026_v49  ;;  %v13380_v42 = vld [vmem:[#allocation2 + $0x90] sm:$0xff] }
 0x43e   : > { %v5596_v38 = vmul.f32 %v15310_v25, %v5556_v59  ;;  %5521 = vst.msk [vmem:[#allocation4 + $0x40] sm:$0xff] %vm1441_vm5, %v5485_v55  ;;  %12451 = vmatmul.msk.bf16.gmra.mxu0 %vm1441_vm5, %v7006_v63 }
 0x43f   : > { %v6052_v46 = vpack.c.bf16 %v6016_v9, %v6016_v9  ;;  %v6141_v33 = vsel %vm15386_vm15, %v6132_v36, %v6140_v28  ;;  %v4366_v15 = vpop.f32.mrf.mxu0  ;;  %v6142_v62 = vrot.slane %v6140_v28, 4  ;;  %v4774_v36 = vsel %vm4631_vm8, %v15444_v6, %v15489_v48 }
 0x440   : > { %v5636_v17 = vadd.f32 %v15318_v26, %v5596_v38  ;;  %6487 = vst.msk [vmem:[#allocation3 + $0x1c] sm:$0xf] %vm834_vm1, %v6141_v33  ;;  %v4449_v47 = vadd.f32 %v4413_v11, %v4366_v15  ;;  %v4776_v6 = vshrl.u32 %v13380_v42, 16  ;;  %v4779_v15 = vshll.u32 %v13380_v42, 16 }
 0x441   : > { %v6144_v39 = vshrl.u32 %v6052_v46, 16  ;;  %v6147_v31 = vshll.u32 %v6052_v46, 16 }
 0x442   : > { %vm5672_vm11 = vcmp.ge.f32.partialorder %v5636_v17, 0.0  ;;  %v5712_v60 = vmul.f32 %v15325_v8, %v5636_v17  ;;  %4485 = vst.msk [vmem:[#allocation4 + $0xe8] sm:$0xff] %vm1441_vm5, %v4449_v47  ;;  %v4919_v16 = vpop.f32.mrf.mxu1 }
 0x443   : > { %v5373_v24 = vpop.f32.mrf.mxu2  ;;  %v6146_v27 = vrot.slane %v6144_v39, 6  ;;  %v6149_v12 = vrot.slane %v6147_v31, 7  ;;  %v5027_v37 = vadd.f32 %v4991_v0, %v4919_v16  ;;  %v5451_v39 = vld [vmem:[#allocation4 + $0x50] sm:$0xff]  ;;  %v7009_v31 = vor.u32 %v7007_v44, %v15473_v57 }
 0x444   : > { %v5748_v34 = vsel %vm5672_vm11, %v5636_v17, %v5712_v60  ;;  %v5486_v54 = vadd.f32 %v5450_v53, %v5373_v24 }
 0x445   : > { %v6017_v14 = vmul.f32 %v14241_v35, %v5748_v34  ;;  %v5557_v45 = vld [vmem:[#allocation4 + $0x40] sm:$0xff]  ;;  %v6150_v51 = vor.u32 %v6149_v12, %v6146_v27  ;;  %5063 = vst.msk [vmem:[#allocation4 + $0x60] sm:$0xff] %vm1441_vm5, %v5027_v37  ;;  %12150 = vmatmul.msk.bf16.gmra.mxu1 %vm614_vm0, %v4774_v36  ;;  %v5255_v35 = vsel %vm5226_vm9, %v5252_v43, %v5254_v10  ;;  %v4992_v27 = vld [vmem:[#allocation4 + $0x68] sm:$0xff]  ;;  %v4781_v37 = vrot.slane %v4779_v15, 3  ;;  %v4993_v15 = vld [vmem:[#allocation4 + $0x70] sm:$0xff] }
 0x446   : > { %v5597_v55 = vmul.f32 %v15310_v25, %v5557_v45  ;;  %5522 = vst.msk [vmem:[#allocation4 + $0x48] sm:$0xff] %vm1441_vm5, %v5486_v54  ;;  %v4778_v45 = vrot.slane %v4776_v6, 2 }
 0x447   : > { %v6053_v9 = vpack.c.bf16 %v6017_v14, %v6017_v14  ;;  %v13411_v59 = vld [vmem:[#allocation3 + $0x18] sm:$0xff]  ;;  %v6151_v63 = vsel %vm15386_vm15, %v6142_v62, %v6150_v51  ;;  %v4369_v38 = vpop.f32.mrf.mxu0  ;;  %v6152_v34 = vrot.slane %v6150_v51, 4  ;;  %v15528_v51 = vld [vmem:[#allocation2 + $0x88] sm:$0xff] }
 0x448   : > { %v15506_v49 = vld [vmem:[#allocation3 + $0x18] sm:$0xff]  ;;  %v5637_v28 = vadd.f32 %v15318_v26, %v5597_v55  ;;  %12263 = vmatmul.msk.bf16.gmra.mxu2 %vm614_vm0, %v5255_v35  ;;  %6488 = vst.msk [vmem:[#allocation3 + $0x20] sm:$0xf] %vm834_vm1, %v6151_v63  ;;  %12351 = vmatmul.msk.bf16.gmra.mxu3 %vm1441_vm5, %v13411_v59  ;;  %v4450_v17 = vadd.f32 %v4414_v52, %v4369_v38  ;;  %v5452_v52 = vld [vmem:[#allocation4 + $0x58] sm:$0xff]  ;;  %v5256_v44 = vrot.slane %v15528_v51, 3 }
 0x449   : > { %v7011_v43 = vshll.u32 %v15506_v49, 16  ;;  %v6154_v4 = vshrl.u32 %v6053_v9, 16  ;;  %v6157_v46 = vshll.u32 %v6053_v9, 16  ;;  %v4415_v9 = vld [vmem:[#allocation4 + $0xf8] sm:$0xff]  ;;  %v15535_v6 = vor.u32 %v4781_v37, %v4778_v45  ;;  %v4416_v45 = vld [vmem:[#allocation4 + $0x100] sm:$0xff] }
 0x44a   : > { %vm5673_vm2 = vcmp.ge.f32.partialorder %v5637_v28, 0.0  ;;  %v5713_v33 = vmul.f32 %v15325_v8, %v5637_v28  ;;  %4486 = vst.msk [vmem:[#allocation4 + $0xf0] sm:$0xff] %vm1441_vm5, %v4450_v17  ;;  %v4921_v20 = vpop.f32.mrf.mxu1  ;;  %v7015_v61 = vshrl.u32 %v15506_v49, 16 }
 0x44b   : > { %v5376_v11 = vpop.f32.mrf.mxu2  ;;  %v15518_v60 = vrot.slane %v7011_v43, 1  ;;  %v6156_v47 = vrot.slane %v6154_v4, 6  ;;  %v6159_v24 = vrot.slane %v6157_v46, 7  ;;  %v5028_v54 = vadd.f32 %v4992_v27, %v4921_v20  ;;  %v5878_v46 = vpop.permute.xlu1 %5877 }
 0x44c   : > { %v5749_v53 = vsel %vm5673_vm2, %v5637_v28, %v5713_v33  ;;  %v5487_v12 = vadd.f32 %v5451_v39, %v5376_v11  ;;  %v13381_v39 = vld [vmem:[#allocation2 + $0x98] sm:$0xff] }
 0x44d   : > { %v6018_v16 = vmul.f32 %v14905_v30, %v5749_v53  ;;  %v5558_v0 = vld [vmem:[#allocation4 + $0x48] sm:$0xff]  ;;  %v7014_v42 = vsel %vm1617_vm4, %v7009_v31, %v15518_v60  ;;  %v6160_v14 = vor.u32 %v6159_v24, %v6156_v47  ;;  %5064 = vst.msk [vmem:[#allocation4 + $0x68] sm:$0xff] %vm1441_vm5, %v5028_v54 }
 0x44e   : > { %v5598_v57 = vmul.f32 %v15310_v25, %v5558_v0  ;;  %5523 = vst.msk [vmem:[#allocation4 + $0x50] sm:$0xff] %vm1441_vm5, %v5487_v12  ;;  %12452 = vmatmul.msk.bf16.gmra.mxu0 %vm1441_vm5, %v7014_v42  ;;  %v4783_v12 = vsel %vm4631_vm8, %v15489_v48, %v15535_v6  ;;  %v4785_v48 = vshrl.u32 %v13381_v39, 16 }
 0x44f   : > { %v6054_v62 = vpack.c.bf16 %v6018_v16, %v6018_v16  ;;  %v6161_v30 = vsel %vm15386_vm15, %v6152_v34, %v6160_v14  ;;  %v4371_v36 = vpop.f32.mrf.mxu0  ;;  %v6162_v53 = vrot.slane %v6160_v14, 4  ;;  %v5257_v16 = vsel %vm5226_vm9, %v5254_v10, %v5256_v44 }
 0x450   : > { %v5638_v55 = vadd.f32 %v15318_v26, %v5598_v57  ;;  %6489 = vst.msk [vmem:[#allocation3 + $0x24] sm:$0xf] %vm834_vm1, %v6161_v30  ;;  %v4451_v28 = vadd.f32 %v4415_v9, %v4371_v36  ;;  %v4788_v36 = vshll.u32 %v13381_v39, 16 }
 0x451   : > { %v6164_v35 = vshrl.u32 %v6054_v62, 16  ;;  %v6167_v59 = vshll.u32 %v6054_v62, 16 }
 0x452   : > { %vm5674_vm13 = vcmp.ge.f32.partialorder %v5638_v55, 0.0  ;;  %v5714_v63 = vmul.f32 %v15325_v8, %v5638_v55  ;;  %4487 = vst.msk [vmem:[#allocation4 + $0xf8] sm:$0xff] %vm1441_vm5, %v4451_v28  ;;  %v4924_v17 = vpop.f32.mrf.mxu1 }
 0x453   : > { %v5378_v38 = vpop.f32.mrf.mxu2  ;;  %v6166_v43 = vrot.slane %v6164_v35, 6  ;;  %v6169_v4 = vrot.slane %v6167_v59, 7  ;;  %v5029_v24 = vadd.f32 %v4993_v15, %v4924_v17  ;;  %v5453_v35 = vld [vmem:[#allocation4 + $0x60] sm:$0xff]  ;;  %v7017_v59 = vor.u32 %v7015_v61, %v15518_v60  ;;  %v4528_v60 = vld [vmem:[#allocation2 + $0xa0] sm:$0x7] }
 0x454   : > { %v5750_v33 = vsel %vm5674_vm13, %v5638_v55, %v5714_v63  ;;  %v5488_v11 = vadd.f32 %v5452_v52, %v5378_v38  ;;  %v5454_v61 = vld [vmem:[#allocation4 + $0x68] sm:$0xff] }
 0x455   : > { %v6019_v31 = vmul.f32 %v5878_v46, %v5750_v33  ;;  %v5559_v47 = vld [vmem:[#allocation4 + $0x50] sm:$0xff]  ;;  %v6170_v20 = vor.u32 %v6169_v4, %v6166_v43  ;;  %5065 = vst.msk [vmem:[#allocation4 + $0x70] sm:$0xff] %vm1441_vm5, %v5029_v24  ;;  %12151 = vmatmul.msk.bf16.gmra.mxu1 %vm614_vm0, %v4783_v12  ;;  %v4994_v43 = vld [vmem:[#allocation4 + $0x78] sm:$0xff]  ;;  %v4790_v24 = vrot.slane %v4788_v36, 3  ;;  %v4611_v12 = vunpack.c.l.b16 %v4528_v60 }
 0x456   : > { %v5599_v27 = vmul.f32 %v15310_v25, %v5559_v47  ;;  %5524 = vst.msk [vmem:[#allocation4 + $0x58] sm:$0xff] %vm1441_vm5, %v5488_v11  ;;  %v4787_v47 = vrot.slane %v4785_v48, 2 }
 0x457   : > { %v6055_v34 = vpack.c.bf16 %v6019_v31, %v6019_v31  ;;  %v13412_v0 = vld [vmem:[#allocation3 + $0x20] sm:$0xff]  ;;  %v6171_v42 = vsel %vm15386_vm15, %v6162_v53, %v6170_v20  ;;  %v4374_v57 = vpop.f32.mrf.mxu0  ;;  %v6172_v46 = vrot.slane %v6170_v20, 4  ;;  %v15573_v20 = vld [vmem:[#allocation2 + $0x90] sm:$0xff] }
 0x458   : > { %v15551_v54 = vld [vmem:[#allocation3 + $0x20] sm:$0xff]  ;;  %v5639_v14 = vadd.f32 %v15318_v26, %v5599_v27  ;;  %12264 = vmatmul.msk.bf16.gmra.mxu2 %vm614_vm0, %v5257_v16  ;;  %6490 = vst.msk [vmem:[#allocation3 + $0x28] sm:$0xf] %vm834_vm1, %v6171_v42  ;;  %12352 = vmatmul.msk.bf16.gmra.mxu3 %vm1441_vm5, %v13412_v0  ;;  %v4452_v55 = vadd.f32 %v4416_v45, %v4374_v57  ;;  %v4417_v16 = vld [vmem:[#allocation4 + $0x108] sm:$0xff] }
 0x459   : > { %v7019_v10 = vshll.u32 %v15551_v54, 16  ;;  %v6174_v37 = vshrl.u32 %v6055_v34, 16  ;;  %v6177_v62 = vshll.u32 %v6055_v34, 16  ;;  %v15580_v57 = vor.u32 %v4790_v24, %v4787_v47  ;;  %v4418_v47 = vld [vmem:[#allocation4 + $0x110] sm:$0xff] }
 0x45a   : > { %vm5675_vm14 = vcmp.ge.f32.partialorder %v5639_v14, 0.0  ;;  %v5715_v30 = vmul.f32 %v15325_v8, %v5639_v14  ;;  %4488 = vst.msk [vmem:[#allocation4 + $0x100] sm:$0xff] %vm1441_vm5, %v4452_v55  ;;  %v4926_v49 = vpop.f32.mrf.mxu1  ;;  %v7023_v51 = vshrl.u32 %v15551_v54, 16 }
 0x45b   : > { %v5381_v9 = vpop.f32.mrf.mxu2  ;;  %v15563_v63 = vrot.slane %v7019_v10, 1  ;;  %v6176_v28 = vrot.slane %v6174_v37, 6  ;;  %v6179_v38 = vrot.slane %v6177_v62, 7  ;;  %v5030_v15 = vadd.f32 %v4994_v43, %v4926_v49 }
 0x45c   : > { %v5751_v52 = vsel %vm5675_vm14, %v5639_v14, %v5715_v30  ;;  %v5489_v4 = vadd.f32 %v5453_v35, %v5381_v9  ;;  %v5258_v10 = vrot.slane %v15573_v20, 3  ;;  %v5888_v30 = vpop.permute.xlu1 %5887  ;;  %v4995_v9 = vld [vmem:[#allocation4 + $0x80] sm:$0xff] }
 0x45d   : > { %v6020_v33 = vmul.f32 %v14943_v3, %v5751_v52  ;;  %v5560_v17 = vld [vmem:[#allocation4 + $0x58] sm:$0xff]  ;;  %v7022_v11 = vsel %vm1617_vm4, %v7017_v59, %v15563_v63  ;;  %v6180_v39 = vor.u32 %v6179_v38, %v6176_v28  ;;  %5066 = vst.msk [vmem:[#allocation4 + $0x78] sm:$0xff] %vm1441_vm5, %v5030_v15  ;;  %v4630_v59 = vpack.c.b16 %v4611_v12, %v4611_v12 }
 0x45e   : > { %v5600_v31 = vmul.f32 %v15310_v25, %v5560_v17  ;;  %5525 = vst.msk [vmem:[#allocation4 + $0x60] sm:$0xff] %vm1441_vm5, %v5489_v4  ;;  %12453 = vmatmul.msk.bf16.gmra.mxu0 %vm1441_vm5, %v7022_v11  ;;  %v5259_v17 = vsel %vm5226_vm9, %v5256_v44, %v5258_v10 }
 0x45f   : > { %v6056_v53 = vpack.c.bf16 %v6020_v33, %v6020_v33  ;;  %v6181_v3 = vsel %vm15386_vm15, %v6172_v46, %v6180_v39  ;;  %v4376_v34 = vpop.f32.mrf.mxu0  ;;  %v6182_v49 = vrot.slane %v6180_v39, 4  ;;  %v4792_v46 = vsel %vm4631_vm8, %v15535_v6, %v15580_v57 }
 0x460   : > { %v5640_v27 = vadd.f32 %v15318_v26, %v5600_v31  ;;  %6491 = vst.msk [vmem:[#allocation3 + $0x2c] sm:$0xf] %vm834_vm1, %v6181_v3  ;;  %v4453_v48 = vadd.f32 %v4417_v16, %v4376_v34  ;;  %v4794_v6 = vshrl.u32 %v4630_v59, 16  ;;  %v5455_v34 = vld [vmem:[#allocation4 + $0x70] sm:$0xff]  ;;  %v7025_v16 = vor.u32 %v7023_v51, %v15563_v63 }
 0x461   : > { %v6184_v0 = vshrl.u32 %v6056_v53, 16  ;;  %v6187_v42 = vshll.u32 %v6056_v53, 16 }
 0x462   : > { %vm5676_vm11 = vcmp.ge.f32.partialorder %v5640_v27, 0.0  ;;  %v5716_v14 = vmul.f32 %v15325_v8, %v5640_v27  ;;  %4489 = vst.msk [vmem:[#allocation4 + $0x108] sm:$0xff] %vm1441_vm5, %v4453_v48  ;;  %v4929_v36 = vpop.f32.mrf.mxu1 }
 0x463   : > { %v5383_v45 = vpop.f32.mrf.mxu2  ;;  %v6186_v37 = vrot.slane %v6184_v0, 6  ;;  %v6189_v62 = vrot.slane %v6187_v42, 7  ;;  %v5031_v52 = vadd.f32 %v4995_v9, %v4929_v36 }
 0x464   : > { %v5752_v55 = vsel %vm5676_vm11, %v5640_v27, %v5716_v14  ;;  %v5490_v35 = vadd.f32 %v5454_v61, %v5383_v45  ;;  %v4996_v45 = vld [vmem:[#allocation4 + $0x88] sm:$0xff] }
 0x465   : > { %v6021_v28 = vmul.f32 %v5888_v30, %v5752_v55  ;;  %v5561_v38 = vld [vmem:[#allocation4 + $0x60] sm:$0xff]  ;;  %v6190_v43 = vor.u32 %v6189_v62, %v6186_v37  ;;  %5067 = vst.msk [vmem:[#allocation4 + $0x80] sm:$0xff] %vm1441_vm5, %v5031_v52  ;;  %12152 = vmatmul.msk.bf16.gmra.mxu1 %vm614_vm0, %v4792_v46  ;;  %v15625_v52 = vld [vmem:[%s17461_s6] ss:$0 sm:$0xff] }
 0x466   : > { %v5601_v4 = vmul.f32 %v15310_v25, %v5561_v38  ;;  %5526 = vst.msk [vmem:[#allocation4 + $0x68] sm:$0xff] %vm1441_vm5, %v5490_v35  ;;  %v4796_v35 = vrot.slane %v4794_v6, 2  ;;  %v15618_v38 = vld [vmem:[#allocation2 + $0x98] sm:$0xff] }
 0x467   : > { %v6057_v33 = vpack.c.bf16 %v6021_v28, %v6021_v28  ;;  %v13413_v15 = vld [vmem:[#allocation3 + $0x28] sm:$0xff]  ;;  %v6191_v39 = vsel %vm15386_vm15, %v6182_v49, %v6190_v43  ;;  %v4379_v31 = vpop.f32.mrf.mxu0  ;;  %v6192_v37 = vrot.slane %v6190_v43, 4  ;;  %v4419_v43 = vld [vmem:[#allocation4 + $0x118] sm:$0xff]  ;;  %v5260_v6 = vrot.slane %v15618_v38, 3 }
 0x468   : > { %v15596_v11 = vld [vmem:[#allocation3 + $0x28] sm:$0xff]  ;;  %v5641_v60 = vadd.f32 %v15318_v26, %v5601_v4  ;;  %12265 = vmatmul.msk.bf16.gmra.mxu2 %vm614_vm0, %v5259_v17  ;;  %6492 = vst.msk [vmem:[#allocation3 + $0x30] sm:$0xf] %vm834_vm1, %v6191_v39  ;;  %12353 = vmatmul.msk.bf16.gmra.mxu3 %vm1441_vm5, %v13413_v15  ;;  %v4454_v27 = vadd.f32 %v4418_v47, %v4379_v31  ;;  %v4797_v26 = vshll.u32 %v4630_v59, 16 }
 0x469   : > { %v7027_v44 = vshll.u32 %v15596_v11, 16  ;;  %v6194_v24 = vshrl.u32 %v6057_v33, 16  ;;  %v6197_v53 = vshll.u32 %v6057_v33, 16  ;;  %v7031_v20 = vshrl.u32 %v15596_v11, 16 }
 0x46a   : > { %vm5677_vm2 = vcmp.ge.f32.partialorder %v5641_v60, 0.0  ;;  %v5717_v3 = vmul.f32 %v15325_v8, %v5641_v60  ;;  %4490 = vst.msk [vmem:[#allocation4 + $0x110] sm:$0xff] %vm1441_vm5, %v4454_v27  ;;  %v4931_v54 = vpop.f32.mrf.mxu1  ;;  %v4799_v59 = vrot.slane %v4797_v26, 3 }
 0x46b   : > { %v5386_v12 = vpop.f32.mrf.mxu2  ;;  %v15608_v0 = vrot.slane %v7027_v44, 1  ;;  %v6196_v42 = vrot.slane %v6194_v24, 6  ;;  %v6199_v14 = vrot.slane %v6197_v53, 7  ;;  %v5032_v55 = vadd.f32 %v4996_v45, %v4931_v54  ;;  %v4997_v24 = vld [vmem:[#allocation4 + $0x90] sm:$0xff] }
 0x46c   : > { %v5753_v48 = vsel %vm5677_vm2, %v5641_v60, %v5717_v3  ;;  %v5491_v61 = vadd.f32 %v5455_v34, %v5386_v12  ;;  %v4800_v15 = vor.u32 %v4799_v59, %v4796_v35  ;;  %v5456_v60 = vld [vmem:[#allocation4 + $0x78] sm:$0xff]  ;;  %v15636_v34 = vld [vmem:[%s17460_s5] ss:$0 sm:$0xff]  ;;  %v5457_v59 = vld [vmem:[#allocation4 + $0x80] sm:$0xff] }
 0x46d   : > { %v6022_v62 = vmul.f32 %v14649_v5, %v5753_v48  ;;  %v5562_v30 = vld [vmem:[#allocation4 + $0x68] sm:$0xff]  ;;  %v7030_v36 = vsel %vm1617_vm4, %v7025_v16, %v15608_v0  ;;  %v6200_v9 = vor.u32 %v6199_v14, %v6196_v42  ;;  %5068 = vst.msk [vmem:[#allocation4 + $0x88] sm:$0xff] %vm1441_vm5, %v5032_v55  ;;  %v5123_v14 = vld [vmem:[#allocation2 + $0xa0] sm:$0x7] }
 0x46e   : > { %v5602_v63 = vmul.f32 %v15310_v25, %v5562_v30  ;;  %5527 = vst.msk [vmem:[#allocation4 + $0x70] sm:$0xff] %vm1441_vm5, %v5491_v61  ;;  %12454 = vmatmul.msk.bf16.gmra.mxu0 %vm1441_vm5, %v7030_v36  ;;  %v4801_v42 = vsel %vm4631_vm8, %v15580_v57, %v4800_v15  ;;  %v13466_v61 = vld [vmem:[%s17463_s8 + $0x20] sm:$0xff] }
 0x46f   : > { %v6058_v28 = vpack.c.bf16 %v6022_v62, %v6022_v62  ;;  %v6201_v5 = vsel %vm15386_vm15, %v6192_v37, %v6200_v9  ;;  %v4381_v49 = vpop.f32.mrf.mxu0  ;;  %v6202_v12 = vrot.slane %v6200_v9, 4  ;;  %7653 = vmatpush.bf16.msrb.mxu1 %v13466_v61  ;;  %v15665_v55 = vld [vmem:[%s17462_s7] ss:$0 sm:$0xff]  ;;  %v12474_v9 = vld [vmem:[#allocation3] sm:$0xe] }
 0x470   : > { %v5642_v25 = vadd.f32 %v15625_v52, %v5602_v63  ;;  %6493 = vst.msk [vmem:[#allocation3 + $0x34] sm:$0xf] %vm834_vm1, %v6201_v5  ;;  %v4455_v17 = vadd.f32 %v4419_v43, %v4381_v49  ;;  %v5206_v63 = vunpack.c.l.b16 %v5123_v14  ;;  %v13448_v5 = vld [vmem:[#allocation3] sm:$0xf0]  ;;  %v5903_v43 = vpop.permute.xlu1 %5902 }
 0x471   : > { %v6204_v4 = vshrl.u32 %v6058_v28, 16  ;;  %v6207_v46 = vshll.u32 %v6058_v28, 16  ;;  %v7033_v28 = vor.u32 %v7031_v20, %v15608_v0 }
 0x472   : > { %vm5678_vm13 = vcmp.ge.f32.partialorder %v5642_v25, 0.0  ;;  %v5718_v33 = vmul.f32 %v15325_v8, %v5642_v25  ;;  %4491 = vst.msk [vmem:[#allocation4 + $0x118] sm:$0xff] %vm1441_vm5, %v4455_v17  ;;  %v4934_v44 = vpop.f32.mrf.mxu1 }
 0x473   : > { %v5388_v39 = vpop.f32.mrf.mxu2  ;;  %v6206_v31 = vrot.slane %v6204_v4, 6  ;;  %v6209_v47 = vrot.slane %v6207_v46, 7  ;;  %v5033_v26 = vadd.f32 %v4997_v24, %v4934_v44  ;;  %v15676_v44 = vld [vmem:[#allocation3 + $0x8] sm:$0xff]  ;;  %v12475_v24 = vor.u32 %v13448_v5, %v12474_v9 }
 0x474   : > { %v5754_v51 = vsel %vm5678_vm13, %v5642_v25, %v5718_v33  ;;  %v5492_v53 = vadd.f32 %v5456_v60, %v5388_v39  ;;  %v4998_v33 = vld [vmem:[#allocation4 + $0x98] sm:$0xff]  ;;  %v7544_v14 = vrot.slane %v15676_v44, 1  ;;  %v13506_v44 = vld [vmem:[%s17463_s8 + $0x40] sm:$0xff] }
 0x475   : > { %v6023_v3 = vmul.f32 %v14967_v41, %v5754_v51  ;;  %v5563_v27 = vld [vmem:[#allocation4 + $0x70] sm:$0xff]  ;;  %v6210_v8 = vor.u32 %v6209_v47, %v6206_v31  ;;  %5069 = vst.msk [vmem:[#allocation4 + $0x90] sm:$0xff] %vm1441_vm5, %v5033_v26  ;;  %12153 = vmatmul.msk.bf16.gmra.mxu1 %vm614_vm0, %v4801_v42  ;;  %v5261_v41 = vsel %vm5226_vm9, %v5258_v10, %v5260_v6  ;;  %v7543_v42 = vrot.slane %v12475_v24, 1 }
 0x476   : > { %v5603_v16 = vmul.f32 %v15636_v34, %v5563_v27  ;;  %5528 = vst.msk [vmem:[#allocation4 + $0x78] sm:$0xff] %vm1441_vm5, %v5492_v53  ;;  %8676 = vmatpush.bf16.msrb.mxu3 %v13506_v44 }
 0x477   : > { %v6059_v48 = vpack.c.bf16 %v6023_v3, %v6023_v3  ;;  %v13414_v54 = vld [vmem:[#allocation3 + $0x30] sm:$0xff]  ;;  %v6211_v57 = vsel %vm15386_vm15, %v6202_v12, %v6210_v8  ;;  %v6212_v15 = vrot.slane %v6210_v8, 4  ;;  %v5225_v3 = vpack.c.b16 %v5206_v63, %v5206_v63 }
 0x478   : > { %v15649_v45 = vld [vmem:[#allocation3 + $0x30] sm:$0xff]  ;;  %v5643_v37 = vadd.f32 %v15625_v52, %v5603_v16  ;;  %12266 = vmatmul.msk.bf16.gmra.mxu2 %vm614_vm0, %v5261_v41  ;;  %6494 = vst.msk [vmem:[#allocation3 + $0x38] sm:$0xf] %vm834_vm1, %v6211_v57  ;;  %12354 = vmatmul.msk.bf16.gmra.mxu3 %vm1441_vm5, %v13414_v54 }
 0x479   : > { %v7035_v10 = vshll.u32 %v15649_v45, 16  ;;  %v6214_v62 = vshrl.u32 %v6059_v48, 16  ;;  %v6217_v30 = vshll.u32 %v6059_v48, 16  ;;  %v5458_v41 = vld [vmem:[#allocation4 + $0x88] sm:$0xff]  ;;  %v5262_v54 = vrot.slane %v5225_v3, 3 }
 0x47a   : > { %vm5679_vm14 = vcmp.ge.f32.partialorder %v5643_v37, 0.0  ;;  %v5719_v36 = vmul.f32 %v15665_v55, %v5643_v37  ;;  %v4936_v46 = vpop.f32.mrf.mxu1  ;;  %v7039_v38 = vshrl.u32 %v15649_v45, 16  ;;  %v5000_v3 = vld [vmem:[#allocation4 + $0xa8] sm:$0xff] }
 0x47b   : > { %v5391_v35 = vpop.f32.mrf.mxu2  ;;  %v15669_v11 = vrot.slane %v7035_v10, 1  ;;  %v6216_v25 = vrot.slane %v6214_v62, 6  ;;  %v6219_v49 = vrot.slane %v6217_v30, 7  ;;  %v5034_v31 = vadd.f32 %v4998_v33, %v4936_v46  ;;  %v4999_v10 = vld [vmem:[#allocation4 + $0xa0] sm:$0xff] }
 0x47c   : > { %v5755_v4 = vsel %vm5679_vm14, %v5643_v37, %v5719_v36  ;;  %v5493_v17 = vadd.f32 %v5457_v59, %v5391_v35 }
 0x47d   : > { %v6024_v39 = vmul.f32 %v5903_v43, %v5755_v4  ;;  %v5564_v60 = vld [vmem:[#allocation4 + $0x78] sm:$0xff]  ;;  %v7038_v47 = vsel %vm1617_vm4, %v7033_v28, %v15669_v11  ;;  %v6220_v51 = vor.u32 %v6219_v49, %v6216_v25  ;;  %5070 = vst.msk [vmem:[#allocation4 + $0x98] sm:$0xff] %vm1441_vm5, %v5034_v31  ;;  %v7545_v28 = vsel %vm2190_vm3, %v7543_v42, %v7544_v14  ;;  %v6726_v43 = vpop.f32.mrf.mxu3  ;;  %v13486_v4 = vld [vmem:[%s17463_s8 + $0x30] sm:$0xff]  ;;  %v5459_v31 = vld [vmem:[#allocation4 + $0x90] sm:$0xff] }
 0x47e   : > { %v5604_v0 = vmul.f32 %v15636_v34, %v5564_v60  ;;  %5529 = vst.msk [vmem:[#allocation4 + $0x80] sm:$0xff] %vm1441_vm5, %v5493_v17  ;;  %12455 = vmatmul.msk.bf16.gmra.mxu0 %vm1441_vm5, %v7038_v47  ;;  %8098 = vmatpush.bf16.msrb.mxu2 %v13486_v4  ;;  %v7041_v47 = vor.u32 %v7039_v38, %v15669_v11 }
 0x47f   : > { %v6060_v53 = vpack.c.bf16 %v6024_v39, %v6024_v39  ;;  %v6221_v27 = vsel %vm15386_vm15, %v6212_v15, %v6220_v51  ;;  %v6222_v63 = vrot.slane %v6220_v51, 4  ;;  %6816 = vst.msk [vmem:[#allocation4] sm:$0xff] %vm1441_vm5, %v6726_v43 }
 0x480   : > { %v5644_v26 = vadd.f32 %v15625_v52, %v5604_v0  ;;  %6495 = vst.msk [vmem:[#allocation3 + $0x3c] sm:$0xf] %vm834_vm1, %v6221_v27 }
 0x481   : > { %v6224_v12 = vshrl.u32 %v6060_v53, 16  ;;  %v6227_v8 = vshll.u32 %v6060_v53, 16 }
 0x482   : > { %vm5680_vm11 = vcmp.ge.f32.partialorder %v5644_v26, 0.0  ;;  %v5720_v16 = vmul.f32 %v15665_v55, %v5644_v26  ;;  %v4939_v20 = vpop.f32.mrf.mxu1 }
 0x483   : > { %v5393_v48 = vpop.f32.mrf.mxu2  ;;  %v6226_v61 = vrot.slane %v6224_v12, 6  ;;  %v6229_v57 = vrot.slane %v6227_v8, 7  ;;  %v5035_v9 = vadd.f32 %v4999_v10, %v4939_v20 }
 0x484   : > { %v5756_v37 = vsel %vm5680_vm11, %v5644_v26, %v5720_v16  ;;  %v5494_v62 = vadd.f32 %v5458_v41, %v5393_v48  ;;  %v13468_v48 = vld [vmem:[#allocation3 + $0x8] sm:$0xf0] }
 0x485   : > { %v6025_v30 = vmul.f32 %v14667_v40, %v5756_v37  ;;  %v5565_v36 = vld [vmem:[#allocation4 + $0x80] sm:$0xff]  ;;  %v6230_v35 = vor.u32 %v6229_v57, %v6226_v61  ;;  %5071 = vst.msk [vmem:[#allocation4 + $0xa0] sm:$0xff] %vm1441_vm5, %v5035_v9  ;;  %12552 = vmatmul.msk.bf16.vlgmr.msrb.gmra.mxu1 %vm1441_vm5, %v7545_v28  ;;  %v5263_v40 = vsel %vm5226_vm9, %v5260_v6, %v5262_v54  ;;  %v15720_v54 = vld [vmem:[#allocation3 + $0x10] sm:$0xff]  ;;  %v6728_v20 = vpop.f32.mrf.mxu3 }
 0x486   : > { %v5605_v59 = vmul.f32 %v15636_v34, %v5565_v36  ;;  %5530 = vst.msk [vmem:[#allocation4 + $0x88] sm:$0xff] %vm1441_vm5, %v5494_v62  ;;  %v12576_v57 = vld [vmem:[#allocation3 + $0x8] sm:$0xe] }
 0x487   : > { %v6061_v5 = vpack.c.bf16 %v6025_v30, %v6025_v30  ;;  %v13415_v25 = vld [vmem:[#allocation3 + $0x38] sm:$0xff]  ;;  %v6231_v46 = vsel %vm15386_vm15, %v6222_v63, %v6230_v35  ;;  %v6232_v26 = vrot.slane %v6230_v35, 4  ;;  %v12577_v62 = vor.u32 %v13468_v48, %v12576_v57  ;;  %6817 = vst.msk [vmem:[#allocation4 + $0x8] sm:$0xff] %vm1441_vm5, %v6728_v20 }
 0x488   : > { %v15696_v49 = vld [vmem:[#allocation3 + $0x38] sm:$0xff]  ;;  %v5645_v33 = vadd.f32 %v15625_v52, %v5605_v59  ;;  %12267 = vmatmul.msk.bf16.gmra.mxu2 %vm614_vm0, %v5263_v40  ;;  %12355 = vmatmul.msk.bf16.gmra.mxu3 %vm1441_vm5, %v13415_v25  ;;  %6496 = vst.msk [vmem:[#allocation3 + $0x40] sm:$0xf] %vm834_vm1, %v6231_v46  ;;  %v7546_v63 = vrot.slane %v15720_v54, 1  ;;  %v5460_v59 = vld [vmem:[#allocation4 + $0x98] sm:$0xff]  ;;  %v5918_v25 = vpop.permute.xlu1 %5917 }
 0x489   : > { %v7043_v6 = vshll.u32 %v15696_v49, 16  ;;  %v6234_v17 = vshrl.u32 %v6061_v5, 16  ;;  %v6237_v15 = vshll.u32 %v6061_v5, 16  ;;  %v5001_v46 = vld [vmem:[#allocation4 + $0xb0] sm:$0xff]  ;;  %v7988_v38 = vrot.slane %v12577_v62, 1 }
 0x48a   : > { %vm5681_vm2 = vcmp.ge.f32.partialorder %v5645_v33, 0.0  ;;  %v5721_v39 = vmul.f32 %v15665_v55, %v5645_v33  ;;  %v4941_v45 = vpop.f32.mrf.mxu1 }
 0x48b   : > { %v5396_v60 = vpop.f32.mrf.mxu2  ;;  %v15712_v51 = vrot.slane %v7043_v6, 1  ;;  %v6236_v0 = vrot.slane %v6234_v17, 6  ;;  %v6239_v24 = vrot.slane %v6237_v15, 7  ;;  %v5036_v16 = vadd.f32 %v5000_v3, %v4941_v45 }
 0x48c   : > { %v5757_v53 = vsel %vm5681_vm2, %v5645_v33, %v5721_v39  ;;  %v5495_v27 = vadd.f32 %v5459_v31, %v5396_v60  ;;  %v5461_v48 = vld [vmem:[#allocation4 + $0xa0] sm:$0xff] }
 0x48d   : > { %v6026_v12 = vmul.f32 %v14997_v50, %v5757_v53  ;;  %v5566_v8 = vld [vmem:[#allocation4 + $0x88] sm:$0xff]  ;;  %v7046_v42 = vsel %vm1617_vm4, %v7041_v47, %v15712_v51  ;;  %v6240_v41 = vor.u32 %v6239_v24, %v6236_v0  ;;  %5072 = vst.msk [vmem:[#allocation4 + $0xa8] sm:$0xff] %vm1441_vm5, %v5036_v16  ;;  %v7547_v47 = vsel %vm2190_vm3, %v7544_v14, %v7546_v63 }
 0x48e   : > { %v5606_v11 = vmul.f32 %v15636_v34, %v5566_v8  ;;  %5531 = vst.msk [vmem:[#allocation4 + $0x90] sm:$0xff] %vm1441_vm5, %v5495_v27  ;;  %12456 = vmatmul.msk.bf16.gmra.mxu0 %vm1441_vm5, %v7046_v42  ;;  %v15723_v50 = vld [vmem:[#allocation3 + $0x10] sm:$0xff]  ;;  %v7047_v27 = vshrl.u32 %v15696_v49, 16 }
 0x48f   : > { %v6062_v61 = vpack.c.bf16 %v6026_v12, %v6026_v12  ;;  %v6241_v37 = vsel %vm15386_vm15, %v6232_v26, %v6240_v41  ;;  %v7989_v28 = vrot.slane %v15723_v50, 1  ;;  %v6242_v39 = vrot.slane %v6240_v41, 4 }
 0x490   : > { %v5646_v10 = vadd.f32 %v15625_v52, %v5606_v11  ;;  %6497 = vst.msk [vmem:[#allocation3 + $0x44] sm:$0xf] %vm834_vm1, %v6241_v37  ;;  %v7049_v41 = vor.u32 %v7047_v27, %v15712_v51  ;;  %v15768_v51 = vld [vmem:[#allocation3 + $0x18] sm:$0xff] }
 0x491   : > { %v6244_v30 = vshrl.u32 %v6062_v61, 16  ;;  %v6247_v36 = vshll.u32 %v6062_v61, 16  ;;  %v7990_v24 = vsel %vm2190_vm3, %v7988_v38, %v7989_v28  ;;  %v7548_v38 = vrot.slane %v15768_v51, 1 }
 0x492   : > { %vm5682_vm0 = vcmp.ge.f32.partialorder %v5646_v10, 0.0  ;;  %v5722_v9 = vmul.f32 %v15665_v55, %v5646_v10  ;;  %v4944_v4 = vpop.f32.mrf.mxu1 }
 0x493   : > { %v5398_v35 = vpop.f32.mrf.mxu2  ;;  %v6246_v5 = vrot.slane %v6244_v30, 6  ;;  %v6249_v40 = vrot.slane %v6247_v36, 7  ;;  %v5037_v15 = vadd.f32 %v5001_v46, %v4944_v4 }
 0x494   : > { %v5758_v43 = vsel %vm5682_vm0, %v5646_v10, %v5722_v9  ;;  %v5496_v33 = vadd.f32 %v5460_v59, %v5398_v35  ;;  %v5002_v10 = vld [vmem:[#allocation4 + $0xb8] sm:$0xff] }
 0x495   : > { %v6027_v6 = vmul.f32 %v5918_v25, %v5758_v43  ;;  %v5567_v17 = vld [vmem:[#allocation4 + $0x90] sm:$0xff]  ;;  %v6250_v60 = vor.u32 %v6249_v40, %v6246_v5  ;;  %5073 = vst.msk [vmem:[#allocation4 + $0xb0] sm:$0xff] %vm1441_vm5, %v5037_v15  ;;  %12553 = vmatmul.msk.bf16.gmra.mxu1 %vm1441_vm5, %v7547_v47 }
 0x496   : > { %v5607_v31 = vmul.f32 %v15636_v34, %v5567_v17  ;;  %5532 = vst.msk [vmem:[#allocation4 + $0x98] sm:$0xff] %vm1441_vm5, %v5496_v33  ;;  %v15771_v25 = vld [vmem:[#allocation3 + $0x18] sm:$0xff]  ;;  %v5462_v17 = vld [vmem:[#allocation4 + $0xa8] sm:$0xff] }
 0x497   : > { %v6063_v0 = vpack.c.bf16 %v6027_v6, %v6027_v6  ;;  %v13416_v53 = vld [vmem:[#allocation3 + $0x40] sm:$0xff]  ;;  %v6251_v3 = vsel %vm15386_vm15, %v6242_v39, %v6250_v60  ;;  %v6252_v62 = vrot.slane %v6250_v60, 4  ;;  %v7991_v15 = vrot.slane %v15771_v25, 1 }
 0x498   : > { %v15745_v45 = vld [vmem:[#allocation3 + $0x40] sm:$0xff]  ;;  %v5647_v14 = vadd.f32 %v15625_v52, %v5607_v31  ;;  %12654 = vmatmul.msk.bf16.vlgmr.msrb.gmra.mxu2 %vm1441_vm5, %v7990_v24  ;;  %6498 = vst.msk [vmem:[#allocation3 + $0x48] sm:$0xf] %vm834_vm1, %v6251_v3  ;;  %12356 = vmatmul.msk.bf16.gmra.mxu3 %vm1441_vm5, %v13416_v53 }
 0x499   : > { %v7051_v26 = vshll.u32 %v15745_v45, 16  ;;  %v6254_v12 = vshrl.u32 %v6063_v0, 16  ;;  %v6257_v8 = vshll.u32 %v6063_v0, 16  ;;  %v5003_v0 = vld [vmem:[#allocation4 + $0xc0] sm:$0xff] }
 0x49a   : > { %vm5683_vm13 = vcmp.ge.f32.partialorder %v5647_v14, 0.0  ;;  %v5723_v16 = vmul.f32 %v15665_v55, %v5647_v14  ;;  %v4946_v20 = vpop.f32.mrf.mxu1 }
 0x49b   : > { %v5401_v42 = vpop.f32.mrf.mxu2  ;;  %v15760_v11 = vrot.slane %v7051_v26, 1  ;;  %v6256_v61 = vrot.slane %v6254_v12, 6  ;;  %v6259_v57 = vrot.slane %v6257_v8, 7  ;;  %v5038_v9 = vadd.f32 %v5002_v10, %v4946_v20 }
 0x49c   : > { %v5759_v37 = vsel %vm5683_vm13, %v5647_v14, %v5723_v16  ;;  %v5497_v49 = vadd.f32 %v5461_v48, %v5401_v42  ;;  %v7549_v12 = vsel %vm2190_vm3, %v7546_v63, %v7548_v38  ;;  %v7055_v63 = vshrl.u32 %v15745_v45, 16  ;;  %v5463_v20 = vld [vmem:[#allocation4 + $0xb0] sm:$0xff] }
 0x49d   : > { %v6028_v30 = vmul.f32 %v14701_v58, %v5759_v37  ;;  %v5568_v36 = vld [vmem:[#allocation4 + $0x98] sm:$0xff]  ;;  %v7054_v35 = vsel %vm1617_vm4, %v7049_v41, %v15760_v11  ;;  %v6260_v59 = vor.u32 %v6259_v57, %v6256_v61  ;;  %5074 = vst.msk [vmem:[#allocation4 + $0xb8] sm:$0xff] %vm1441_vm5, %v5038_v9  ;;  %v5933_v61 = vpop.permute.xlu1 %5932 }
 0x49e   : > { %v5608_v5 = vmul.f32 %v15636_v34, %v5568_v36  ;;  %5533 = vst.msk [vmem:[#allocation4 + $0xa0] sm:$0xff] %vm1441_vm5, %v5497_v49  ;;  %12457 = vmatmul.msk.bf16.gmra.mxu0 %vm1441_vm5, %v7054_v35  ;;  %v7300_v49 = vld [vmem:[#allocation4] sm:$0xff] }
 0x49f   : > { %v6064_v40 = vpack.c.bf16 %v6028_v30, %v6028_v30  ;;  %v6261_v58 = vsel %vm15386_vm15, %v6252_v62, %v6260_v59  ;;  %v6262_v14 = vrot.slane %v6260_v59, 4  ;;  %v7057_v62 = vor.u32 %v7055_v63, %v15760_v11  ;;  %v5004_v59 = vld [vmem:[#allocation4 + $0xc8] sm:$0xff]  ;;  %v5005_v63 = vld [vmem:[#allocation4 + $0xd0] sm:$0xff] }
 0x4a0   : > { %v5648_v43 = vadd.f32 %v15625_v52, %v5608_v5  ;;  %6499 = vst.msk [vmem:[#allocation3 + $0x4c] sm:$0xf] %vm834_vm1, %v6261_v58 }
 0x4a1   : > { %v6264_v4 = vshrl.u32 %v6064_v40, 16  ;;  %v6267_v46 = vshll.u32 %v6064_v40, 16 }
 0x4a2   : > { %vm5684_vm14 = vcmp.ge.f32.partialorder %v5648_v43, 0.0  ;;  %v5724_v33 = vmul.f32 %v15665_v55, %v5648_v43  ;;  %v4949_v47 = vpop.f32.mrf.mxu1 }
 0x4a3   : > { %v5403_v6 = vpop.f32.mrf.mxu2  ;;  %v6266_v39 = vrot.slane %v6264_v4, 6  ;;  %v6269_v60 = vrot.slane %v6267_v46, 7  ;;  %v5039_v44 = vadd.f32 %v5003_v0, %v4949_v47 }
 0x4a4   : > { %v5760_v31 = vsel %vm5684_vm14, %v5648_v43, %v5724_v33  ;;  %v5498_v24 = vadd.f32 %v5462_v17, %v5403_v6 }
 0x4a5   : > { %v6029_v53 = vmul.f32 %v15019_v13, %v5760_v31  ;;  %v5569_v3 = vld [vmem:[#allocation4 + $0xa0] sm:$0xff]  ;;  %v6270_v27 = vor.u32 %v6269_v60, %v6266_v39  ;;  %5075 = vst.msk [vmem:[#allocation4 + $0xc0] sm:$0xff] %vm1441_vm5, %v5039_v44  ;;  %12554 = vmatmul.msk.bf16.gmra.mxu1 %vm1441_vm5, %v7549_v12  ;;  %v7992_v13 = vsel %vm2190_vm3, %v7989_v28, %v7991_v15  ;;  %v15815_v39 = vld [vmem:[#allocation3 + $0x20] sm:$0xff]  ;;  %v7301_v12 = vld [vmem:[#allocation4 + $0x8] sm:$0xff] }
 0x4a6   : > { %v5609_v26 = vmul.f32 %v15636_v34, %v5569_v3  ;;  %5534 = vst.msk [vmem:[#allocation4 + $0xa8] sm:$0xff] %vm1441_vm5, %v5498_v24  ;;  %v15818_v31 = vld [vmem:[#allocation3 + $0x20] sm:$0xff]  ;;  %v7550_v44 = vrot.slane %v15815_v39, 1 }
 0x4a7   : > { %v6065_v8 = vpack.c.bf16 %v6029_v53, %v6029_v53  ;;  %v13417_v16 = vld [vmem:[#allocation3 + $0x48] sm:$0xff]  ;;  %v6271_v48 = vsel %vm15386_vm15, %v6262_v14, %v6270_v27  ;;  %v6272_v43 = vrot.slane %v6270_v27, 4  ;;  %v5464_v27 = vld [vmem:[#allocation4 + $0xb8] sm:$0xff] }
 0x4a8   : > { %v15795_v42 = vld [vmem:[#allocation3 + $0x48] sm:$0xff]  ;;  %v5649_v54 = vadd.f32 %v15625_v52, %v5609_v26  ;;  %12655 = vmatmul.msk.bf16.gmra.mxu2 %vm1441_vm5, %v7992_v13  ;;  %6500 = vst.msk [vmem:[#allocation3 + $0x50] sm:$0xf] %vm834_vm1, %v6271_v48  ;;  %12357 = vmatmul.msk.bf16.gmra.mxu3 %vm1441_vm5, %v13417_v16 }
 0x4a9   : > { %v7059_v50 = vshll.u32 %v15795_v42, 16  ;;  %v6274_v41 = vshrl.u32 %v6065_v8, 16  ;;  %v6277_v28 = vshll.u32 %v6065_v8, 16  ;;  %v7993_v8 = vrot.slane %v15818_v31, 1 }
 0x4aa   : > { %vm5685_vm11 = vcmp.ge.f32.partialorder %v5649_v54, 0.0  ;;  %v5725_v57 = vmul.f32 %v15665_v55, %v5649_v54  ;;  %v4951_v45 = vpop.f32.mrf.mxu1 }
 0x4ab   : > { %v5406_v37 = vpop.f32.mrf.mxu2  ;;  %v7210_v10 = vpop.f32.mrf.mxu0  ;;  %v15807_v30 = vrot.slane %v7059_v50, 1  ;;  %v6276_v36 = vrot.slane %v6274_v41, 6  ;;  %v6279_v9 = vrot.slane %v6277_v28, 7  ;;  %v5040_v33 = vadd.f32 %v5004_v59, %v4951_v45 }
 0x4ac   : > { %v5761_v35 = vsel %vm5685_vm11, %v5649_v54, %v5725_v57  ;;  %v5499_v5 = vadd.f32 %v5463_v20, %v5406_v37  ;;  %v7336_v40 = vadd.f32 %v7300_v49, %v7210_v10  ;;  %v6731_v58 = vpop.f32.mrf.mxu3  ;;  %v7063_v45 = vshrl.u32 %v15795_v42, 16 }
 0x4ad   : > { %v6030_v4 = vmul.f32 %v5933_v61, %v5761_v35  ;;  %v5570_v46 = vld [vmem:[#allocation4 + $0xa8] sm:$0xff]  ;;  %6818 = vst.msk [vmem:[#allocation4 + $0x10] sm:$0xff] %vm1441_vm5, %v6731_v58  ;;  %v7062_v6 = vsel %vm1617_vm4, %v7057_v62, %v15807_v30  ;;  %v6280_v11 = vor.u32 %v6279_v9, %v6276_v36  ;;  %v7551_v62 = vsel %vm2190_vm3, %v7548_v38, %v7550_v44  ;;  %v5465_v58 = vld [vmem:[#allocation4 + $0xc0] sm:$0xff] }
 0x4ae   : > { %v5610_v17 = vmul.f32 %v15636_v34, %v5570_v46  ;;  %5535 = vst.msk [vmem:[#allocation4 + $0xb0] sm:$0xff] %vm1441_vm5, %v5499_v5  ;;  %12458 = vmatmul.msk.bf16.gmra.mxu0 %vm1441_vm5, %v7062_v6  ;;  %v7065_v46 = vor.u32 %v7063_v45, %v15807_v30 }
 0x4af   : > { %v6066_v60 = vpack.c.bf16 %v6030_v4, %v6030_v4  ;;  %5076 = vst.msk [vmem:[#allocation4 + $0xc8] sm:$0xff] %vm1441_vm5, %v5040_v33  ;;  %v6281_v47 = vsel %vm15386_vm15, %v6272_v43, %v6280_v11  ;;  %v6282_v20 = vrot.slane %v6280_v11, 4 }
 0x4b0   : > { %v5650_v0 = vadd.f32 %v15625_v52, %v5610_v17  ;;  %7372 = vst.msk [vmem:[#allocation4] sm:$0xff] %vm1441_vm5, %v7336_v40  ;;  %v5006_v17 = vld [vmem:[#allocation4 + $0xd8] sm:$0xff] }
 0x4b1   : > { %6501 = vst.msk [vmem:[#allocation3 + $0x54] sm:$0xf] %vm834_vm1, %v6281_v47  ;;  %v6284_v24 = vshrl.u32 %v6066_v60, 16  ;;  %v6287_v53 = vshll.u32 %v6066_v60, 16 }
 0x4b2   : > { %vm5686_vm2 = vcmp.ge.f32.partialorder %v5650_v0, 0.0  ;;  %v5726_v3 = vmul.f32 %v15665_v55, %v5650_v0  ;;  %v4954_v54 = vpop.f32.mrf.mxu1 }
 0x4b3   : > { %v5408_v14 = vpop.f32.mrf.mxu2  ;;  %v7212_v26 = vpop.f32.mrf.mxu0  ;;  %v6286_v13 = vrot.slane %v6284_v24, 6  ;;  %v6289_v16 = vrot.slane %v6287_v53, 7  ;;  %v5041_v37 = vadd.f32 %v5005_v63, %v4954_v54 }
 0x4b4   : > { %v5762_v48 = vsel %vm5686_vm2, %v5650_v0, %v5726_v3  ;;  %v5500_v50 = vadd.f32 %v5464_v27, %v5408_v14  ;;  %v7337_v41 = vadd.f32 %v7301_v12, %v7212_v26  ;;  %v6733_v28 = vpop.f32.mrf.mxu3  ;;  %v7302_v4 = vld [vmem:[#allocation4 + $0x10] sm:$0xff] }
 0x4b5   : > { %v6031_v61 = vmul.f32 %v14724_v19, %v5762_v48  ;;  %v5571_v57 = vld [vmem:[#allocation4 + $0xb0] sm:$0xff]  ;;  %6819 = vst.msk [vmem:[#allocation4 + $0x18] sm:$0xff] %vm1441_vm5, %v6733_v28  ;;  %v6290_v10 = vor.u32 %v6289_v16, %v6286_v13  ;;  %12555 = vmatmul.msk.bf16.gmra.mxu1 %vm1441_vm5, %v7551_v62  ;;  %v7994_v19 = vsel %vm2190_vm3, %v7991_v15, %v7993_v8  ;;  %v15865_v13 = vld [vmem:[#allocation3 + $0x28] sm:$0xff] }
 0x4b6   : > { %v5611_v49 = vmul.f32 %v15636_v34, %v5571_v57  ;;  %5536 = vst.msk [vmem:[#allocation4 + $0xb8] sm:$0xff] %vm1441_vm5, %v5500_v50 }
 0x4b7   : > { %v6067_v36 = vpack.c.bf16 %v6031_v61, %v6031_v61  ;;  %5077 = vst.msk [vmem:[#allocation4 + $0xd0] sm:$0xff] %vm1441_vm5, %v5041_v37  ;;  %v6291_v9 = vsel %vm15386_vm15, %v6282_v20, %v6290_v10  ;;  %v6292_v27 = vrot.slane %v6290_v10, 4  ;;  %v7552_v61 = vrot.slane %v15865_v13, 1  ;;  %v5466_v37 = vld [vmem:[#allocation4 + $0xc8] sm:$0xff] }
 0x4b8   : > { %v5651_v35 = vadd.f32 %v15625_v52, %v5611_v49  ;;  %7373 = vst.msk [vmem:[#allocation4 + $0x8] sm:$0xff] %vm1441_vm5, %v7337_v41  ;;  %12656 = vmatmul.msk.bf16.gmra.mxu2 %vm1441_vm5, %v7994_v19  ;;  %v13418_v51 = vld [vmem:[#allocation3 + $0x50] sm:$0xff]  ;;  %v5948_v41 = vpop.permute.xlu1 %5947 }
 0x4b9   : > { %v15849_v38 = vld [vmem:[#allocation3 + $0x50] sm:$0xff]  ;;  %v6294_v59 = vshrl.u32 %v6067_v36, 16  ;;  %v6297_v5 = vshll.u32 %v6067_v36, 16  ;;  %6502 = vst.msk [vmem:[#allocation3 + $0x58] sm:$0xf] %vm834_vm1, %v6291_v9  ;;  %12358 = vmatmul.msk.bf16.gmra.mxu3 %vm1441_vm5, %v13418_v51 }
 0x4ba   : > { %vm5687_vm0 = vcmp.ge.f32.partialorder %v5651_v35, 0.0  ;;  %v5727_v25 = vmul.f32 %v15665_v55, %v5651_v35  ;;  %v7067_v15 = vshll.u32 %v15849_v38, 16  ;;  %v4956_v11 = vpop.f32.mrf.mxu1 }
 0x4bb   : > { %v5411_v40 = vpop.f32.mrf.mxu2  ;;  %v7215_v43 = vpop.f32.mrf.mxu0  ;;  %v6296_v33 = vrot.slane %v6294_v59, 6  ;;  %v6299_v6 = vrot.slane %v6297_v5, 7  ;;  %v5042_v14 = vadd.f32 %v5006_v17, %v4956_v11  ;;  %v7071_v11 = vshrl.u32 %v15849_v38, 16 }
 0x4bc   : > { %v5763_v42 = vsel %vm5687_vm0, %v5651_v35, %v5727_v25  ;;  %v5501_v60 = vadd.f32 %v5465_v58, %v5411_v40  ;;  %v7338_v47 = vadd.f32 %v7302_v4, %v7215_v43  ;;  %v6736_v0 = vpop.f32.mrf.mxu3  ;;  %v15857_v24 = vrot.slane %v7067_v15, 1  ;;  %v7303_v10 = vld [vmem:[#allocation4 + $0x18] sm:$0xff]  ;;  %v5007_v35 = vld [vmem:[#allocation4 + $0xe0] sm:$0xff] }
 0x4bd   : > { %v6032_v53 = vmul.f32 %v15046_v29, %v5763_v42  ;;  %v5572_v3 = vld [vmem:[#allocation4 + $0xb8] sm:$0xff]  ;;  %6820 = vst.msk [vmem:[#allocation4 + $0x20] sm:$0xff] %vm1441_vm5, %v6736_v0  ;;  %v6300_v26 = vor.u32 %v6299_v6, %v6296_v33  ;;  %v15869_v29 = vld [vmem:[#allocation3 + $0x28] sm:$0xff]  ;;  %v7553_v4 = vsel %vm2190_vm3, %v7550_v44, %v7552_v61 }
 0x4be   : > { %v5612_v30 = vmul.f32 %v15636_v34, %v5572_v3  ;;  %5537 = vst.msk [vmem:[#allocation4 + $0xc0] sm:$0xff] %vm1441_vm5, %v5501_v60  ;;  %v7070_v12 = vsel %vm1617_vm4, %v7065_v46, %v15857_v24  ;;  %v7995_v49 = vrot.slane %v15869_v29, 1  ;;  %v5467_v0 = vld [vmem:[#allocation4 + $0xd0] sm:$0xff] }
 0x4bf   : > { %v6068_v16 = vpack.c.bf16 %v6032_v53, %v6032_v53  ;;  %5078 = vst.msk [vmem:[#allocation4 + $0xd8] sm:$0xff] %vm1441_vm5, %v5042_v14  ;;  %12459 = vmatmul.msk.bf16.gmra.mxu0 %vm1441_vm5, %v7070_v12  ;;  %v6301_v48 = vsel %vm15386_vm15, %v6292_v27, %v6300_v26  ;;  %v6302_v40 = vrot.slane %v6300_v26, 4  ;;  %v7073_v14 = vor.u32 %v7071_v11, %v15857_v24  ;;  %v5008_v12 = vld [vmem:[#allocation4 + $0xe8] sm:$0xff] }
 0x4c0   : > { %v5652_v54 = vadd.f32 %v15625_v52, %v5612_v30  ;;  %7374 = vst.msk [vmem:[#allocation4 + $0x10] sm:$0xff] %vm1441_vm5, %v7338_v47  ;;  %v7996_v33 = vsel %vm2190_vm3, %v7993_v8, %v7995_v49  ;;  %v5963_v29 = vpop.permute.xlu1 %5962 }
 0x4c1   : > { %6503 = vst.msk [vmem:[#allocation3 + $0x5c] sm:$0xf] %vm834_vm1, %v6301_v48  ;;  %v6304_v63 = vshrl.u32 %v6068_v16, 16  ;;  %v6307_v50 = vshll.u32 %v6068_v16, 16 }
 0x4c2   : > { %vm5688_vm13 = vcmp.ge.f32.partialorder %v5652_v54, 0.0  ;;  %v5728_v28 = vmul.f32 %v15665_v55, %v5652_v54  ;;  %v4959_v9 = vpop.f32.mrf.mxu1 }
 0x4c3   : > { %v5413_v57 = vpop.f32.mrf.mxu2  ;;  %v7217_v20 = vpop.f32.mrf.mxu0  ;;  %v6306_v62 = vrot.slane %v6304_v63, 6  ;;  %v6309_v36 = vrot.slane %v6307_v50, 7  ;;  %v5043_v15 = vadd.f32 %v5007_v35, %v4959_v9 }
 0x4c4   : > { %v5764_v19 = vsel %vm5688_vm13, %v5652_v54, %v5728_v28  ;;  %v5502_v51 = vadd.f32 %v5466_v37, %v5413_v57  ;;  %v7339_v45 = vadd.f32 %v7303_v10, %v7217_v20  ;;  %v6738_v59 = vpop.f32.mrf.mxu3  ;;  %v7304_v3 = vld [vmem:[#allocation4 + $0x20] sm:$0xff]  ;;  %v15915_v10 = vld [vmem:[#allocation3 + $0x30] sm:$0xff] }
 0x4c5   : > { %v6033_v5 = vmul.f32 %v5948_v41, %v5764_v19  ;;  %v5573_v25 = vld [vmem:[#allocation4 + $0xc0] sm:$0xff]  ;;  %6821 = vst.msk [vmem:[#allocation4 + $0x28] sm:$0xff] %vm1441_vm5, %v6738_v59  ;;  %v6310_v58 = vor.u32 %v6309_v36, %v6306_v62  ;;  %12556 = vmatmul.msk.bf16.gmra.mxu1 %vm1441_vm5, %v7553_v4 }
 0x4c6   : > { %v5613_v43 = vmul.f32 %v15636_v34, %v5573_v25  ;;  %5538 = vst.msk [vmem:[#allocation4 + $0xc8] sm:$0xff] %vm1441_vm5, %v5502_v51 }
 0x4c7   : > { %v6069_v46 = vpack.c.bf16 %v6033_v5, %v6033_v5  ;;  %5079 = vst.msk [vmem:[#allocation4 + $0xe0] sm:$0xff] %vm1441_vm5, %v5043_v15  ;;  %v6311_v6 = vsel %vm15386_vm15, %v6302_v40, %v6310_v58  ;;  %v6312_v57 = vrot.slane %v6310_v58, 4  ;;  %v5468_v5 = vld [vmem:[#allocation4 + $0xd8] sm:$0xff] }
 0x4c8   : > { %v5653_v42 = vadd.f32 %v15625_v52, %v5613_v43  ;;  %7375 = vst.msk [vmem:[#allocation4 + $0x18] sm:$0xff] %vm1441_vm5, %v7339_v45  ;;  %12657 = vmatmul.msk.bf16.gmra.mxu2 %vm1441_vm5, %v7996_v33  ;;  %v13419_v39 = vld [vmem:[#allocation3 + $0x58] sm:$0xff]  ;;  %v7554_v45 = vrot.slane %v15915_v10, 1 }
 0x4c9   : > { %v15899_v44 = vld [vmem:[#allocation3 + $0x58] sm:$0xff]  ;;  %v6314_v17 = vshrl.u32 %v6069_v46, 16  ;;  %v6317_v60 = vshll.u32 %v6069_v46, 16  ;;  %6504 = vst.msk [vmem:[#allocation3 + $0x60] sm:$0xf] %vm834_vm1, %v6311_v6  ;;  %12359 = vmatmul.msk.bf16.gmra.mxu3 %vm1441_vm5, %v13419_v39 }
 0x4ca   : > { %vm5689_vm14 = vcmp.ge.f32.partialorder %v5653_v42, 0.0  ;;  %v5729_v31 = vmul.f32 %v15665_v55, %v5653_v42  ;;  %v7075_v8 = vshll.u32 %v15899_v44, 16  ;;  %v4961_v30 = vpop.f32.mrf.mxu1  ;;  %v5009_v33 = vld [vmem:[#allocation4 + $0xf0] sm:$0xff] }
 0x4cb   : > { %v5416_v47 = vpop.f32.mrf.mxu2  ;;  %v7220_v53 = vpop.f32.mrf.mxu0  ;;  %v6316_v27 = vrot.slane %v6314_v17, 6  ;;  %v6319_v26 = vrot.slane %v6317_v60, 7  ;;  %v5044_v28 = vadd.f32 %v5008_v12, %v4961_v30 }
 0x4cc   : > { %v5765_v38 = vsel %vm5689_vm14, %v5653_v42, %v5729_v31  ;;  %v5503_v16 = vadd.f32 %v5467_v0, %v5416_v47  ;;  %v7340_v48 = vadd.f32 %v7304_v3, %v7220_v53  ;;  %v6741_v54 = vpop.f32.mrf.mxu3  ;;  %v15907_v63 = vrot.slane %v7075_v8, 1  ;;  %v7305_v15 = vld [vmem:[#allocation4 + $0x28] sm:$0xff] }
 0x4cd   : > { %v6034_v50 = vmul.f32 %v14758_v32, %v5765_v38  ;;  %v5574_v41 = vld [vmem:[#allocation4 + $0xc8] sm:$0xff]  ;;  %6822 = vst.msk [vmem:[#allocation4 + $0x30] sm:$0xff] %vm1441_vm5, %v6741_v54  ;;  %v6320_v37 = vor.u32 %v6319_v26, %v6316_v27  ;;  %v7555_v0 = vsel %vm2190_vm3, %v7552_v61, %v7554_v45  ;;  %v7079_v27 = vshrl.u32 %v15899_v44, 16 }
 0x4ce   : > { %v5614_v24 = vmul.f32 %v15636_v34, %v5574_v41  ;;  %5539 = vst.msk [vmem:[#allocation4 + $0xd0] sm:$0xff] %vm1441_vm5, %v5503_v16  ;;  %v7078_v20 = vsel %vm1617_vm4, %v7073_v14, %v15907_v63  ;;  %v15919_v32 = vld [vmem:[#allocation3 + $0x30] sm:$0xff]  ;;  %v5469_v12 = vld [vmem:[#allocation4 + $0xe0] sm:$0xff] }
 0x4cf   : > { %v6070_v62 = vpack.c.bf16 %v6034_v50, %v6034_v50  ;;  %5080 = vst.msk [vmem:[#allocation4 + $0xe8] sm:$0xff] %vm1441_vm5, %v5044_v28  ;;  %12460 = vmatmul.msk.bf16.gmra.mxu0 %vm1441_vm5, %v7078_v20  ;;  %v6321_v36 = vsel %vm15386_vm15, %v6312_v57, %v6320_v37  ;;  %v7997_v40 = vrot.slane %v15919_v32, 1  ;;  %v6322_v31 = vrot.slane %v6320_v37, 4  ;;  %v5010_v57 = vld [vmem:[#allocation4 + $0xf8] sm:$0xff]  ;;  %v16017_v32 = vld [vmem:[%s17462_s7] ss:$0 sm:$0xff] }
 0x4d0   : > { %v5654_v19 = vadd.f32 %v15625_v52, %v5614_v24  ;;  %7376 = vst.msk [vmem:[#allocation4 + $0x20] sm:$0xff] %vm1441_vm5, %v7340_v48  ;;  %v7081_v54 = vor.u32 %v7079_v27, %v15907_v63 }
 0x4d1   : > { %6505 = vst.msk [vmem:[#allocation3 + $0x64] sm:$0xf] %vm834_vm1, %v6321_v36  ;;  %v6324_v9 = vshrl.u32 %v6070_v62, 16  ;;  %v6327_v35 = vshll.u32 %v6070_v62, 16 }
 0x4d2   : > { %vm5690_vm11 = vcmp.ge.f32.partialorder %v5654_v19, 0.0  ;;  %v5730_v51 = vmul.f32 %v15665_v55, %v5654_v19  ;;  %v4964_v46 = vpop.f32.mrf.mxu1 }
 0x4d3   : > { %v5418_v59 = vpop.f32.mrf.mxu2  ;;  %v7222_v25 = vpop.f32.mrf.mxu0  ;;  %v6326_v58 = vrot.slane %v6324_v9, 6  ;;  %v6329_v43 = vrot.slane %v6327_v35, 7  ;;  %v5045_v60 = vadd.f32 %v5009_v33, %v4964_v46 }
 0x4d4   : > { %v5766_v4 = vsel %vm5690_vm11, %v5654_v19, %v5730_v51  ;;  %v5504_v6 = vadd.f32 %v5468_v5, %v5418_v59  ;;  %v7341_v42 = vadd.f32 %v7305_v15, %v7222_v25  ;;  %v6743_v39 = vpop.f32.mrf.mxu3  ;;  %v7306_v48 = vld [vmem:[#allocation4 + $0x30] sm:$0xff] }
 0x4d5   : > { %v6035_v11 = vmul.f32 %v15067_v7, %v5766_v4  ;;  %v5575_v17 = vld [vmem:[#allocation4 + $0xd0] sm:$0xff]  ;;  %6823 = vst.msk [vmem:[#allocation4 + $0x38] sm:$0xff] %vm1441_vm5, %v6743_v39  ;;  %v6330_v8 = vor.u32 %v6329_v43, %v6326_v58  ;;  %12557 = vmatmul.msk.bf16.gmra.mxu1 %vm1441_vm5, %v7555_v0  ;;  %v7998_v7 = vsel %vm2190_vm3, %v7995_v49, %v7997_v40 }
 0x4d6   : > { %v5615_v47 = vmul.f32 %v15636_v34, %v5575_v17  ;;  %5540 = vst.msk [vmem:[#allocation4 + $0xd8] sm:$0xff] %vm1441_vm5, %v5504_v6  ;;  %v15965_v5 = vld [vmem:[#allocation3 + $0x38] sm:$0xff]  ;;  %v5470_v39 = vld [vmem:[#allocation4 + $0xe8] sm:$0xff] }
 0x4d7   : > { %v6071_v53 = vpack.c.bf16 %v6035_v11, %v6035_v11  ;;  %5081 = vst.msk [vmem:[#allocation4 + $0xf0] sm:$0xff] %vm1441_vm5, %v5045_v60  ;;  %v6331_v3 = vsel %vm15386_vm15, %v6322_v31, %v6330_v8  ;;  %v6332_v35 = vrot.slane %v6330_v8, 4  ;;  %v15969_v15 = vld [vmem:[#allocation3 + $0x38] sm:$0xff]  ;;  %v7556_v6 = vrot.slane %v15965_v5, 1 }
 0x4d8   : > { %v5655_v14 = vadd.f32 %v15625_v52, %v5615_v47  ;;  %7377 = vst.msk [vmem:[#allocation4 + $0x28] sm:$0xff] %vm1441_vm5, %v7341_v42  ;;  %12658 = vmatmul.msk.bf16.gmra.mxu2 %vm1441_vm5, %v7998_v7  ;;  %v13420_v13 = vld [vmem:[#allocation3 + $0x60] sm:$0xff]  ;;  %v7999_v60 = vrot.slane %v15969_v15, 1 }
 0x4d9   : > { %v15950_v61 = vld [vmem:[#allocation3 + $0x60] sm:$0xff]  ;;  %v6334_v26 = vshrl.u32 %v6071_v53, 16  ;;  %v6337_v38 = vshll.u32 %v6071_v53, 16  ;;  %6506 = vst.msk [vmem:[#allocation3 + $0x68] sm:$0xf] %vm834_vm1, %v6331_v3  ;;  %12360 = vmatmul.msk.bf16.gmra.mxu3 %vm1441_vm5, %v13420_v13  ;;  %v5011_v53 = vld [vmem:[#allocation4 + $0x100] sm:$0xff] }
 0x4da   : > { %vm5691_vm2 = vcmp.ge.f32.partialorder %v5655_v14, 0.0  ;;  %v5731_v49 = vmul.f32 %v15665_v55, %v5655_v14  ;;  %v7083_v52 = vshll.u32 %v15950_v61, 16  ;;  %v4966_v28 = vpop.f32.mrf.mxu1 }
 0x4db   : > { %v5421_v30 = vpop.f32.mrf.mxu2  ;;  %v7225_v16 = vpop.f32.mrf.mxu0  ;;  %v6336_v50 = vrot.slane %v6334_v26, 6  ;;  %v6339_v44 = vrot.slane %v6337_v38, 7  ;;  %v5046_v9 = vadd.f32 %v5010_v57, %v4966_v28 }
 0x4dc   : > { %v5767_v41 = vsel %vm5691_vm2, %v5655_v14, %v5731_v49  ;;  %v5505_v37 = vadd.f32 %v5469_v12, %v5421_v30  ;;  %v7342_v24 = vadd.f32 %v7306_v48, %v7225_v16  ;;  %v6746_v20 = vpop.f32.mrf.mxu3  ;;  %v15958_v62 = vrot.slane %v7083_v52, 1  ;;  %v7307_v17 = vld [vmem:[#allocation4 + $0x38] sm:$0xff] }
 0x4dd   : > { %v6036_v36 = vmul.f32 %v5963_v29, %v5767_v41  ;;  %v5576_v19 = vld [vmem:[#allocation4 + $0xd8] sm:$0xff]  ;;  %6824 = vst.msk [vmem:[#allocation4 + $0x40] sm:$0xff] %vm1441_vm5, %v6746_v20  ;;  %v6340_v51 = vor.u32 %v6339_v44, %v6336_v50  ;;  %v15989_v29 = vld [vmem:[%s17460_s5] ss:$0 sm:$0xff]  ;;  %v8000_v30 = vsel %vm2190_vm3, %v7997_v40, %v7999_v60  ;;  %v7087_v48 = vshrl.u32 %v15950_v61, 16 }
 0x4de   : > { %v5616_v59 = vmul.f32 %v15636_v34, %v5576_v19  ;;  %5541 = vst.msk [vmem:[#allocation4 + $0xe0] sm:$0xff] %vm1441_vm5, %v5505_v37  ;;  %v7086_v63 = vsel %vm1617_vm4, %v7081_v54, %v15958_v62  ;;  %v15976_v34 = vld [vmem:[%s17461_s6] ss:$0 sm:$0xff] }
 0x4df   : > { %v6072_v25 = vpack.c.bf16 %v6036_v36, %v6036_v36  ;;  %5082 = vst.msk [vmem:[#allocation4 + $0xf8] sm:$0xff] %vm1441_vm5, %v5046_v9  ;;  %12461 = vmatmul.msk.bf16.gmra.mxu0 %vm1441_vm5, %v7086_v63  ;;  %v6341_v58 = vsel %vm15386_vm15, %v6332_v35, %v6340_v51  ;;  %v6342_v26 = vrot.slane %v6340_v51, 4  ;;  %v5471_v28 = vld [vmem:[#allocation4 + $0xf0] sm:$0xff]  ;;  %v7089_v37 = vor.u32 %v7087_v48, %v15958_v62  ;;  %v5012_v9 = vld [vmem:[#allocation4 + $0x108] sm:$0xff] }
 0x4e0   : > { %v5656_v43 = vadd.f32 %v15976_v34, %v5616_v59  ;;  %7378 = vst.msk [vmem:[#allocation4 + $0x30] sm:$0xff] %vm1441_vm5, %v7342_v24 }
 0x4e1   : > { %6507 = vst.msk [vmem:[#allocation3 + $0x6c] sm:$0xf] %vm834_vm1, %v6341_v58  ;;  %v6344_v4 = vshrl.u32 %v6072_v25, 16  ;;  %v6347_v46 = vshll.u32 %v6072_v25, 16 }
 0x4e2   : > { %vm5692_vm0 = vcmp.ge.f32.partialorder %v5656_v43, 0.0  ;;  %v5732_v33 = vmul.f32 %v15665_v55, %v5656_v43  ;;  %v4969_v0 = vpop.f32.mrf.mxu1 }
 0x4e3   : > { %v5423_v42 = vpop.f32.mrf.mxu2  ;;  %v7227_v11 = vpop.f32.mrf.mxu0  ;;  %v6346_v31 = vrot.slane %v6344_v4, 6  ;;  %v6349_v8 = vrot.slane %v6347_v46, 7  ;;  %v5047_v55 = vadd.f32 %v5011_v53, %v4969_v0 }
 0x4e4   : > { %v5768_v47 = vsel %vm5692_vm0, %v5656_v43, %v5732_v33  ;;  %v5506_v7 = vadd.f32 %v5470_v39, %v5423_v42  ;;  %v7343_v3 = vadd.f32 %v7307_v17, %v7227_v11  ;;  %v6748_v14 = vpop.f32.mrf.mxu3  ;;  %v7308_v61 = vld [vmem:[#allocation4 + $0x40] sm:$0xff]  ;;  %v16031_v42 = vld [vmem:[#allocation3 + $0x40] sm:$0xff] }
 0x4e5   : > { %v6037_v13 = vmul.f32 %v14780_v18, %v5768_v47  ;;  %v5577_v27 = vld [vmem:[#allocation4 + $0xe0] sm:$0xff]  ;;  %6825 = vst.msk [vmem:[#allocation4 + $0x48] sm:$0xff] %vm1441_vm5, %v6748_v14  ;;  %v6350_v38 = vor.u32 %v6349_v8, %v6346_v31  ;;  %v7557_v18 = vsel %vm2190_vm3, %v7554_v45, %v7556_v6  ;;  %v5978_v47 = vpop.permute.xlu1 %5977  ;;  %v7558_v53 = vrot.slane %v16031_v42, 1  ;;  %v13527_v42 = vld [vmem:[%s17463_s8 + $0x58] sm:$0xff] }
 0x4e6   : > { %v5617_v49 = vmul.f32 %v15989_v29, %v5577_v27  ;;  %5542 = vst.msk [vmem:[#allocation4 + $0xe8] sm:$0xff] %vm1441_vm5, %v5506_v7  ;;  %12558 = vmatmul.msk.bf16.gmra.mxu1 %vm1441_vm5, %v7557_v18  ;;  %v5013_v18 = vld [vmem:[#allocation4 + $0x110] sm:$0xff]  ;;  %9120 = vmatpush.bf16.msra.mxu0 %v13527_v42 }
 0x4e7   : > { %v6073_v52 = vpack.c.bf16 %v6037_v13, %v6037_v13  ;;  %5083 = vst.msk [vmem:[#allocation4 + $0x100] sm:$0xff] %vm1441_vm5, %v5047_v55  ;;  %v6351_v12 = vsel %vm15386_vm15, %v6342_v26, %v6350_v38  ;;  %v6352_v4 = vrot.slane %v6350_v38, 4 }
 0x4e8   : > { %v5657_v16 = vadd.f32 %v15976_v34, %v5617_v49  ;;  %7379 = vst.msk [vmem:[#allocation4 + $0x38] sm:$0xff] %vm1441_vm5, %v7343_v3  ;;  %12659 = vmatmul.msk.bf16.gmra.mxu2 %vm1441_vm5, %v8000_v30  ;;  %v13421_v10 = vld [vmem:[#allocation3 + $0x68] sm:$0xff]  ;;  %v5472_v3 = vld [vmem:[#allocation4 + $0xf8] sm:$0xff] }
 0x4e9   : > { %v16010_v45 = vld [vmem:[#allocation3 + $0x68] sm:$0xff]  ;;  %v6354_v54 = vshrl.u32 %v6073_v52, 16  ;;  %v6357_v50 = vshll.u32 %v6073_v52, 16  ;;  %6508 = vst.msk [vmem:[#allocation3 + $0x70] sm:$0xf] %vm834_vm1, %v6351_v12  ;;  %12361 = vmatmul.msk.bf16.gmra.mxu3 %vm1441_vm5, %v13421_v10 }
 0x4ea   : > { %vm5693_vm13 = vcmp.ge.f32.partialorder %v5657_v16, 0.0  ;;  %v5733_v40 = vmul.f32 %v16017_v32, %v5657_v16  ;;  %v7091_v44 = vshll.u32 %v16010_v45, 16  ;;  %v4971_v19 = vpop.f32.mrf.mxu1 }
 0x4eb   : > { %v5426_v41 = vpop.f32.mrf.mxu2  ;;  %v7230_v57 = vpop.f32.mrf.mxu0  ;;  %v6356_v24 = vrot.slane %v6354_v54, 6  ;;  %v6359_v20 = vrot.slane %v6357_v50, 7  ;;  %v5048_v43 = vadd.f32 %v5012_v9, %v4971_v19 }
 0x4ec   : > { %v5769_v36 = vsel %vm5693_vm13, %v5657_v16, %v5733_v40  ;;  %v5507_v35 = vadd.f32 %v5471_v28, %v5426_v41  ;;  %v7344_v51 = vadd.f32 %v7308_v61, %v7230_v57  ;;  %v6751_v59 = vpop.f32.mrf.mxu3  ;;  %v16023_v63 = vrot.slane %v7091_v44, 1  ;;  %v7309_v13 = vld [vmem:[#allocation4 + $0x48] sm:$0xff] }
 0x4ed   : > { %v6038_v25 = vmul.f32 %v15092_v56, %v5769_v36  ;;  %v5578_v58 = vld [vmem:[#allocation4 + $0xe8] sm:$0xff]  ;;  %6826 = vst.msk [vmem:[#allocation4 + $0x50] sm:$0xff] %vm1441_vm5, %v6751_v59  ;;  %v6360_v46 = vor.u32 %v6359_v20, %v6356_v24  ;;  %v16035_v56 = vld [vmem:[#allocation3 + $0x40] sm:$0xff]  ;;  %v7559_v44 = vsel %vm2190_vm3, %v7556_v6, %v7558_v53 }
 0x4ee   : > { %v5618_v62 = vmul.f32 %v15989_v29, %v5578_v58  ;;  %5543 = vst.msk [vmem:[#allocation4 + $0xf0] sm:$0xff] %vm1441_vm5, %v5507_v35  ;;  %v7094_v33 = vsel %vm1617_vm4, %v7089_v37, %v16023_v63  ;;  %v8001_v27 = vrot.slane %v16035_v56, 1  ;;  %v7095_v37 = vshrl.u32 %v16010_v45, 16  ;;  %v5473_v19 = vld [vmem:[#allocation4 + $0x100] sm:$0xff] }
 0x4ef   : > { %v6074_v39 = vpack.c.bf16 %v6038_v25, %v6038_v25  ;;  %5084 = vst.msk [vmem:[#allocation4 + $0x108] sm:$0xff] %vm1441_vm5, %v5048_v43  ;;  %12462 = vmatmul.msk.bf16.gmra.mxu0 %vm1441_vm5, %v7094_v33  ;;  %v6361_v11 = vsel %vm15386_vm15, %v6352_v4, %v6360_v46  ;;  %v6362_v54 = vrot.slane %v6360_v46, 4  ;;  %v5014_v43 = vld [vmem:[#allocation4 + $0x118] sm:$0xff] }
 0x4f0   : > { %v5658_v17 = vadd.f32 %v15976_v34, %v5618_v62  ;;  %7380 = vst.msk [vmem:[#allocation4 + $0x40] sm:$0xff] %vm1441_vm5, %v7344_v51  ;;  %v8002_v28 = vsel %vm2190_vm3, %v7999_v60, %v8001_v27  ;;  %v7097_v51 = vor.u32 %v7095_v37, %v16023_v63 }
 0x4f1   : > { %6509 = vst.msk [vmem:[#allocation3 + $0x74] sm:$0xf] %vm834_vm1, %v6361_v11  ;;  %v6364_v31 = vshrl.u32 %v6074_v39, 16  ;;  %v6367_v8 = vshll.u32 %v6074_v39, 16 }
 0x4f2   : > { %vm5694_vm14 = vcmp.ge.f32.partialorder %v5658_v17, 0.0  ;;  %v5734_v0 = vmul.f32 %v16017_v32, %v5658_v17  ;;  %v4974_v49 = vpop.f32.mrf.mxu1 }
 0x4f3   : > { %v5428_v7 = vpop.f32.mrf.mxu2  ;;  %v7232_v14 = vpop.f32.mrf.mxu0  ;;  %v6366_v55 = vrot.slane %v6364_v31, 6  ;;  %v6369_v26 = vrot.slane %v6367_v8, 7  ;;  %v5049_v48 = vadd.f32 %v5013_v18, %v4974_v49 }
 0x4f4   : > { %v5770_v38 = vsel %vm5694_vm14, %v5658_v17, %v5734_v0  ;;  %v5508_v52 = vadd.f32 %v5472_v3, %v5428_v7  ;;  %v7345_v30 = vadd.f32 %v7309_v13, %v7232_v14  ;;  %v6753_v12 = vpop.f32.mrf.mxu3  ;;  %v7310_v35 = vld [vmem:[#allocation4 + $0x50] sm:$0xff]  ;;  %v16081_v0 = vld [vmem:[#allocation3 + $0x48] sm:$0xff] }
 0x4f5   : > { %v6039_v16 = vmul.f32 %v5978_v47, %v5770_v38  ;;  %v5579_v10 = vld [vmem:[#allocation4 + $0xf0] sm:$0xff]  ;;  %6827 = vst.msk [vmem:[#allocation4 + $0x58] sm:$0xff] %vm1441_vm5, %v6753_v12  ;;  %v6370_v50 = vor.u32 %v6369_v26, %v6366_v55  ;;  %v5988_v26 = vpop.permute.xlu1 %5987  ;;  %v7560_v49 = vrot.slane %v16081_v0, 1 }
 0x4f6   : > { %v5619_v40 = vmul.f32 %v15989_v29, %v5579_v10  ;;  %5544 = vst.msk [vmem:[#allocation4 + $0xf8] sm:$0xff] %vm1441_vm5, %v5508_v52  ;;  %12559 = vmatmul.msk.bf16.gmra.mxu1 %vm1441_vm5, %v7559_v44  ;;  %v5474_v52 = vld [vmem:[#allocation4 + $0x108] sm:$0xff]  ;;  %v7745_v44 = vld [vmem:[#allocation4] sm:$0xff] }
 0x4f7   : > { %v6075_v41 = vpack.c.bf16 %v6039_v16, %v6039_v16  ;;  %5085 = vst.msk [vmem:[#allocation4 + $0x110] sm:$0xff] %vm1441_vm5, %v5049_v48  ;;  %v6371_v57 = vsel %vm15386_vm15, %v6362_v54, %v6370_v50  ;;  %v6372_v31 = vrot.slane %v6370_v50, 4 }
 0x4f8   : > { %v5659_v61 = vadd.f32 %v15976_v34, %v5619_v40  ;;  %7381 = vst.msk [vmem:[#allocation4 + $0x48] sm:$0xff] %vm1441_vm5, %v7345_v30  ;;  %12660 = vmatmul.msk.bf16.gmra.mxu2 %vm1441_vm5, %v8002_v28  ;;  %v13422_v5 = vld [vmem:[#allocation3 + $0x70] sm:$0xff] }
 0x4f9   : > { %v16065_v6 = vld [vmem:[#allocation3 + $0x70] sm:$0xff]  ;;  %v6374_v24 = vshrl.u32 %v6075_v41, 16  ;;  %v6377_v20 = vshll.u32 %v6075_v41, 16  ;;  %6510 = vst.msk [vmem:[#allocation3 + $0x78] sm:$0xf] %vm834_vm1, %v6371_v57  ;;  %12362 = vmatmul.msk.bf16.gmra.mxu3 %vm1441_vm5, %v13422_v5 }
 0x4fa   : > { %vm5695_vm11 = vcmp.ge.f32.partialorder %v5659_v61, 0.0  ;;  %v5735_v15 = vmul.f32 %v16017_v32, %v5659_v61  ;;  %v7099_v60 = vshll.u32 %v16065_v6, 16  ;;  %v4976_v58 = vpop.f32.mrf.mxu1  ;;  %v7103_v56 = vshrl.u32 %v16065_v6, 16 }
 0x4fb   : > { %v5431_v36 = vpop.f32.mrf.mxu2  ;;  %v7235_v9 = vpop.f32.mrf.mxu0  ;;  %v6376_v59 = vrot.slane %v6374_v24, 6  ;;  %v6379_v25 = vrot.slane %v6377_v20, 7  ;;  %v5050_v17 = vadd.f32 %v5014_v43, %v4976_v58 }
 0x4fc   : > { %v5771_v45 = vsel %vm5695_vm11, %v5659_v61, %v5735_v15  ;;  %v5509_v4 = vadd.f32 %v5473_v19, %v5431_v36  ;;  %v7346_v46 = vadd.f32 %v7310_v35, %v7235_v9  ;;  %v6756_v62 = vpop.f32.mrf.mxu3  ;;  %v16073_v33 = vrot.slane %v7099_v60, 1  ;;  %v7311_v12 = vld [vmem:[#allocation4 + $0x58] sm:$0xff] }
 0x4fd   : > { %v6040_v39 = vmul.f32 %v15104_v2, %v5771_v45  ;;  %v5580_v11 = vld [vmem:[#allocation4 + $0xf8] sm:$0xff]  ;;  %6828 = vst.msk [vmem:[#allocation4 + $0x60] sm:$0xff] %vm1441_vm5, %v6756_v62  ;;  %v6380_v8 = vor.u32 %v6379_v25, %v6376_v59  ;;  %v16085_v2 = vld [vmem:[#allocation3 + $0x48] sm:$0xff]  ;;  %v7561_v15 = vsel %vm2190_vm3, %v7558_v53, %v7560_v49  ;;  %v5993_v59 = vpop.permute.xlu2 %5992 }
 0x4fe   : > { %v5620_v63 = vmul.f32 %v15989_v29, %v5580_v11  ;;  %5545 = vst.msk [vmem:[#allocation4 + $0x100] sm:$0xff] %vm1441_vm5, %v5509_v4  ;;  %v7102_v47 = vsel %vm1617_vm4, %v7097_v51, %v16073_v33  ;;  %v8003_v16 = vrot.slane %v16085_v2, 1  ;;  %v5475_v43 = vld [vmem:[#allocation4 + $0x110] sm:$0xff]  ;;  %v7105_v62 = vor.u32 %v7103_v56, %v16073_v33  ;;  %v6003_v2 = vpop.permute.xlu1 %6002 }
 0x4ff   : > { %v6076_v7 = vpack.c.bf16 %v6040_v39, %v6040_v39  ;;  %5086 = vst.msk [vmem:[#allocation4 + $0x118] sm:$0xff] %vm1441_vm5, %v5050_v17  ;;  %12463 = vmatmul.msk.bf16.gmra.mxu0 %vm1441_vm5, %v7102_v47  ;;  %v6381_v3 = vsel %vm15386_vm15, %v6372_v31, %v6380_v8  ;;  %v6382_v37 = vrot.slane %v6380_v8, 4  ;;  %v7746_v8 = vld [vmem:[#allocation4 + $0x8] sm:$0xff] }
 0x500   : > { %v5660_v14 = vadd.f32 %v15976_v34, %v5620_v63  ;;  %7382 = vst.msk [vmem:[#allocation4 + $0x50] sm:$0xff] %vm1441_vm5, %v7346_v46  ;;  %v8004_v36 = vsel %vm2190_vm3, %v8001_v27, %v8003_v16 }
 0x501   : > { %6511 = vst.msk [vmem:[#allocation3 + $0x7c] sm:$0xf] %vm834_vm1, %v6381_v3  ;;  %v6384_v13 = vshrl.u32 %v6076_v7, 16  ;;  %v6387_v55 = vshll.u32 %v6076_v7, 16 }
 0x502   : > { %vm5696_vm2 = vcmp.ge.f32.partialorder %v5660_v14, 0.0  ;;  %v5736_v38 = vmul.f32 %v16017_v32, %v5660_v14  ;;  %v7655_v40 = vpop.f32.mrf.mxu1 }
 0x503   : > { %v5433_v18 = vpop.f32.mrf.mxu2  ;;  %v7237_v30 = vpop.f32.mrf.mxu0  ;;  %v6386_v10 = vrot.slane %v6384_v13, 6  ;;  %v6389_v48 = vrot.slane %v6387_v55, 7  ;;  %v7781_v5 = vadd.f32 %v7745_v44, %v7655_v40 }
 0x504   : > { %v5772_v54 = vsel %vm5696_vm2, %v5660_v14, %v5736_v38  ;;  %v5510_v50 = vadd.f32 %v5474_v52, %v5433_v18  ;;  %v7347_v41 = vadd.f32 %v7311_v12, %v7237_v30  ;;  %v6758_v28 = vpop.f32.mrf.mxu3  ;;  %v7312_v46 = vld [vmem:[#allocation4 + $0x60] sm:$0xff]  ;;  %v16133_v18 = vld [vmem:[#allocation3 + $0x50] sm:$0xff] }
 0x505   : > { %v6041_v57 = vmul.f32 %v5988_v26, %v5772_v54  ;;  %v5581_v61 = vld [vmem:[#allocation4 + $0x100] sm:$0xff]  ;;  %6829 = vst.msk [vmem:[#allocation4 + $0x68] sm:$0xff] %vm1441_vm5, %v6758_v28  ;;  %v6390_v24 = vor.u32 %v6389_v48, %v6386_v10  ;;  %v16137_v30 = vld [vmem:[#allocation3 + $0x50] sm:$0xff]  ;;  %v13547_v48 = vld [vmem:[%s17463_s8 + $0x68] sm:$0xff] }
 0x506   : > { %v5621_v20 = vmul.f32 %v15989_v29, %v5581_v61  ;;  %5546 = vst.msk [vmem:[#allocation4 + $0x108] sm:$0xff] %vm1441_vm5, %v5510_v50  ;;  %12560 = vmatmul.msk.bf16.gmra.mxu1 %vm1441_vm5, %v7561_v15  ;;  %v13567_v54 = vld [vmem:[%s17463_s8 + $0x78] sm:$0xff] }
 0x507   : > { %v6077_v60 = vpack.c.bf16 %v6041_v57, %v6041_v57  ;;  %7817 = vst.msk [vmem:[#allocation4] sm:$0xff] %vm1441_vm5, %v7781_v5  ;;  %v6391_v19 = vsel %vm15386_vm15, %v6382_v37, %v6390_v24  ;;  %v6392_v55 = vrot.slane %v6390_v24, 4  ;;  %9565 = vmatpush.bf16.msra.mxu1 %v13547_v48  ;;  %10143 = vmatpush.bf16.msra.mxu2 %v13567_v54  ;;  %v5476_v57 = vld [vmem:[#allocation4 + $0x118] sm:$0xff]  ;;  %v8005_v37 = vrot.slane %v16137_v30, 1 }
 0x508   : > { %v5661_v53 = vadd.f32 %v15976_v34, %v5621_v20  ;;  %7383 = vst.msk [vmem:[#allocation4 + $0x58] sm:$0xff] %vm1441_vm5, %v7347_v41  ;;  %12661 = vmatmul.msk.bf16.gmra.mxu2 %vm1441_vm5, %v8004_v36  ;;  %v13423_v9 = vld [vmem:[#allocation3 + $0x78] sm:$0xff]  ;;  %v7562_v41 = vrot.slane %v16133_v18, 1 }
 0x509   : > { %v16118_v35 = vld [vmem:[#allocation3 + $0x78] sm:$0xff]  ;;  %v6394_v51 = vshrl.u32 %v6077_v60, 16  ;;  %v6397_v27 = vshll.u32 %v6077_v60, 16  ;;  %6512 = vst.msk [vmem:[#allocation3 + $0x80] sm:$0xf] %vm834_vm1, %v6391_v19  ;;  %12363 = vmatmul.msk.bf16.gmra.mxu3 %vm1441_vm5, %v13423_v9 }
 0x50a   : > { %vm5697_vm0 = vcmp.ge.f32.partialorder %v5661_v53, 0.0  ;;  %v5737_v25 = vmul.f32 %v16017_v32, %v5661_v53  ;;  %v7107_v45 = vshll.u32 %v16118_v35, 16  ;;  %v7657_v31 = vpop.f32.mrf.mxu1  ;;  %v7747_v19 = vld [vmem:[#allocation4 + $0x10] sm:$0xff] }
 0x50b   : > { %v5436_v58 = vpop.f32.mrf.mxu2  ;;  %v7240_v4 = vpop.f32.mrf.mxu0  ;;  %v6396_v6 = vrot.slane %v6394_v51, 6  ;;  %v6399_v39 = vrot.slane %v6397_v27, 7  ;;  %v7782_v13 = vadd.f32 %v7746_v8, %v7657_v31 }
 0x50c   : > { %v5773_v11 = vsel %vm5697_vm0, %v5661_v53, %v5737_v25  ;;  %v5511_v17 = vadd.f32 %v5475_v43, %v5436_v58  ;;  %v7348_v63 = vadd.f32 %v7312_v46, %v7240_v4  ;;  %v6761_v47 = vpop.f32.mrf.mxu3  ;;  %v16126_v7 = vrot.slane %v7107_v45, 1  ;;  %v7313_v5 = vld [vmem:[#allocation4 + $0x68] sm:$0xff] }
 0x50d   : > { %v6042_v3 = vmul.f32 %v5993_v59, %v5773_v11  ;;  %v5582_v14 = vld [vmem:[#allocation4 + $0x108] sm:$0xff]  ;;  %6830 = vst.msk [vmem:[#allocation4 + $0x70] sm:$0xff] %vm1441_vm5, %v6761_v47  ;;  %v6400_v26 = vor.u32 %v6399_v39, %v6396_v6  ;;  %v7563_v45 = vsel %vm2190_vm3, %v7560_v49, %v7562_v41  ;;  %v7111_v46 = vshrl.u32 %v16118_v35, 16  ;;  %v13587_v11 = vld [vmem:[%s17463_s8 + $0x88] sm:$0xff] }
 0x50e   : > { %v5622_v38 = vmul.f32 %v15989_v29, %v5582_v14  ;;  %5547 = vst.msk [vmem:[#allocation4 + $0x110] sm:$0xff] %vm1441_vm5, %v5511_v17  ;;  %v7110_v33 = vsel %vm1617_vm4, %v7105_v62, %v16126_v7  ;;  %v8190_v31 = vld [vmem:[#allocation4] sm:$0xff]  ;;  %10588 = vmatpush.bf16.msra.mxu3 %v13587_v11 }
 0x50f   : > { %v6078_v52 = vpack.c.bf16 %v6042_v3, %v6042_v3  ;;  %7818 = vst.msk [vmem:[#allocation4 + $0x8] sm:$0xff] %vm1441_vm5, %v7782_v13  ;;  %12464 = vmatmul.msk.bf16.gmra.mxu0 %vm1441_vm5, %v7110_v33  ;;  %v6401_v12 = vsel %vm15386_vm15, %v6392_v55, %v6400_v26  ;;  %v6402_v27 = vrot.slane %v6400_v26, 4  ;;  %v7748_v55 = vld [vmem:[#allocation4 + $0x18] sm:$0xff] }
 0x510   : > { %v5662_v10 = vadd.f32 %v15976_v34, %v5622_v38  ;;  %7384 = vst.msk [vmem:[#allocation4 + $0x60] sm:$0xff] %vm1441_vm5, %v7348_v63  ;;  %v7113_v63 = vor.u32 %v7111_v46, %v16126_v7 }
 0x511   : > { %6513 = vst.msk [vmem:[#allocation3 + $0x84] sm:$0xf] %vm834_vm1, %v6401_v12  ;;  %v6404_v50 = vshrl.u32 %v6078_v52, 16  ;;  %v6407_v40 = vshll.u32 %v6078_v52, 16 }
 0x512   : > { %vm5698_vm13 = vcmp.ge.f32.partialorder %v5662_v10, 0.0  ;;  %v5738_v44 = vmul.f32 %v16017_v32, %v5662_v10  ;;  %v7660_v36 = vpop.f32.mrf.mxu1 }
 0x513   : > { %v5438_v28 = vpop.f32.mrf.mxu2  ;;  %v7242_v61 = vpop.f32.mrf.mxu0  ;;  %v6406_v24 = vrot.slane %v6404_v50, 6  ;;  %v6409_v20 = vrot.slane %v6407_v40, 7  ;;  %v7783_v51 = vadd.f32 %v7747_v19, %v7660_v36 }
 0x514   : > { %v5774_v15 = vsel %vm5698_vm13, %v5662_v10, %v5738_v44  ;;  %v5512_v60 = vadd.f32 %v5476_v57, %v5438_v28  ;;  %v7349_v42 = vadd.f32 %v7313_v5, %v7242_v61  ;;  %v6763_v53 = vpop.f32.mrf.mxu3  ;;  %v7314_v35 = vld [vmem:[#allocation4 + $0x70] sm:$0xff] }
 0x515   : > { %v6043_v9 = vmul.f32 %v15125_v22, %v5774_v15  ;;  %v5583_v56 = vld [vmem:[#allocation4 + $0x110] sm:$0xff]  ;;  %6831 = vst.msk [vmem:[#allocation4 + $0x78] sm:$0xff] %vm1441_vm5, %v6763_v53  ;;  %v6410_v59 = vor.u32 %v6409_v20, %v6406_v24  ;;  %v8006_v22 = vsel %vm2190_vm3, %v8003_v16, %v8005_v37 }
 0x516   : > { %v5623_v25 = vmul.f32 %v15989_v29, %v5583_v56  ;;  %5548 = vst.msk [vmem:[#allocation4 + $0x118] sm:$0xff] %vm1441_vm5, %v5512_v60  ;;  %12561 = vmatmul.msk.bf16.gmra.mxu1 %vm1441_vm5, %v7563_v45  ;;  %v16192_v44 = vld [vmem:[#allocation3 + $0x58] sm:$0xff]  ;;  %v6008_v60 = vpop.permute.xlu2 %6007  ;;  %v8191_v1 = vld [vmem:[#allocation4 + $0x8] sm:$0xff] }
 0x517   : > { %v6079_v58 = vpack.c.bf16 %v6043_v9, %v6043_v9  ;;  %7819 = vst.msk [vmem:[#allocation4 + $0x10] sm:$0xff] %vm1441_vm5, %v7783_v51  ;;  %v6411_v43 = vsel %vm15386_vm15, %v6402_v27, %v6410_v59  ;;  %v6412_v54 = vrot.slane %v6410_v59, 4  ;;  %v5788_v28 = vld [vmem:[#allocation3 + $0x98] sm:$0xe]  ;;  %v7564_v19 = vrot.slane %v16192_v44, 1 }
 0x518   : > { %v5663_v4 = vadd.f32 %v15976_v34, %v5623_v25  ;;  %7385 = vst.msk [vmem:[#allocation4 + $0x68] sm:$0xff] %vm1441_vm5, %v7349_v42  ;;  %12662 = vmatmul.msk.bf16.gmra.mxu2 %vm1441_vm5, %v8006_v22  ;;  %v13424_v0 = vld [vmem:[#allocation3 + $0x80] sm:$0xff]  ;;  %v16196_v61 = vld [vmem:[#allocation3 + $0x58] sm:$0xff]  ;;  %v7749_v25 = vld [vmem:[#allocation4 + $0x20] sm:$0xff] }
 0x519   : > { %v16174_v49 = vld [vmem:[#allocation3 + $0x80] sm:$0xff]  ;;  %v6414_v62 = vshrl.u32 %v6079_v58, 16  ;;  %v6417_v6 = vshll.u32 %v6079_v58, 16  ;;  %6514 = vst.msk [vmem:[#allocation3 + $0x88] sm:$0xf] %vm834_vm1, %v6411_v43  ;;  %12364 = vmatmul.msk.bf16.gmra.mxu3 %vm1441_vm5, %v13424_v0  ;;  %v7565_v46 = vsel %vm2190_vm3, %v7562_v41, %v7564_v19 }
 0x51a   : > { %vm5699_vm14 = vcmp.ge.f32.partialorder %v5663_v4, 0.0  ;;  %v5739_v16 = vmul.f32 %v16017_v32, %v5663_v4  ;;  %v7115_v39 = vshll.u32 %v16174_v49, 16  ;;  %v7662_v13 = vpop.f32.mrf.mxu1  ;;  %v7119_v30 = vshrl.u32 %v16174_v49, 16 }
 0x51b   : > { %v8100_v17 = vpop.f32.mrf.mxu2  ;;  %v7245_v8 = vpop.f32.mrf.mxu0  ;;  %v6416_v47 = vrot.slane %v6414_v62, 6  ;;  %v6419_v3 = vrot.slane %v6417_v6, 7  ;;  %v7784_v48 = vadd.f32 %v7748_v55, %v7662_v13 }
 0x51c   : > { %v5775_v14 = vsel %vm5699_vm14, %v5663_v4, %v5739_v16  ;;  %v8226_v26 = vadd.f32 %v8190_v31, %v8100_v17  ;;  %v7350_v38 = vadd.f32 %v7314_v35, %v7245_v8  ;;  %v6766_v33 = vpop.f32.mrf.mxu3  ;;  %v16185_v52 = vrot.slane %v7115_v39, 1  ;;  %v7315_v51 = vld [vmem:[#allocation4 + $0x78] sm:$0xff]  ;;  %v13488_v39 = vld [vmem:[#allocation3 + $0x8] sm:$0xf0]  ;;  %v12678_v31 = vld [vmem:[#allocation3 + $0x8] sm:$0xe] }
 0x51d   : > { %v6044_v12 = vmul.f32 %v6003_v2, %v5775_v14  ;;  %v5584_v10 = vld [vmem:[#allocation4 + $0x118] sm:$0xff]  ;;  %6832 = vst.msk [vmem:[#allocation4 + $0x80] sm:$0xff] %vm1441_vm5, %v6766_v33  ;;  %v6420_v50 = vor.u32 %v6419_v3, %v6416_v47  ;;  %v13489_v2 = vld [vmem:[#allocation3 + $0x10] sm:$0xff]  ;;  %v12679_v3 = vor.u32 %v13488_v39, %v12678_v31 }
 0x51e   : > { %v5624_v7 = vmul.f32 %v15989_v29, %v5584_v10  ;;  %8262 = vst.msk [vmem:[#allocation4] sm:$0xff] %vm1441_vm5, %v8226_v26  ;;  %v7118_v40 = vsel %vm1617_vm4, %v7113_v63, %v16185_v52  ;;  %v5789_v29 = vsel %vm15359_vm10, 0, %v5788_v28  ;;  %v8192_v35 = vld [vmem:[#allocation4 + $0x10] sm:$0xff]  ;;  %v8442_v14 = vshrl.u32 %v13489_v2, 16 }
 0x51f   : > { %v6080_v57 = vpack.c.bf16 %v6044_v12, %v6044_v12  ;;  %7820 = vst.msk [vmem:[#allocation4 + $0x18] sm:$0xff] %vm1441_vm5, %v7784_v48  ;;  %12465 = vmatmul.msk.bf16.gmra.mxu0 %vm1441_vm5, %v7118_v40  ;;  %v6421_v5 = vsel %vm15386_vm15, %v6412_v54, %v6420_v50  ;;  %v7121_v48 = vor.u32 %v7119_v30, %v16185_v52  ;;  %v16243_v52 = vld [vmem:[#allocation3 + $0x60] sm:$0xff] }
 0x520   : > { %v5664_v24 = vadd.f32 %v15976_v34, %v5624_v7  ;;  %7386 = vst.msk [vmem:[#allocation4 + $0x70] sm:$0xff] %vm1441_vm5, %v7350_v38  ;;  %v8007_v34 = vrot.slane %v16196_v61, 1  ;;  %v7750_v38 = vld [vmem:[#allocation4 + $0x28] sm:$0xff]  ;;  %v7752_v61 = vld [vmem:[#allocation4 + $0x38] sm:$0xff] }
 0x521   : > { %v6424_v20 = vshrl.u32 %v6080_v57, 16  ;;  %v6427_v15 = vshll.u32 %v6080_v57, 16  ;;  %6515 = vst.msk [vmem:[#allocation3 + $0x8c] sm:$0xf] %vm834_vm1, %v6421_v5  ;;  %v16239_v57 = vld [vmem:[#allocation3 + $0x60] sm:$0xff] }
 0x522   : > { %vm5700_vm11 = vcmp.ge.f32.partialorder %v5664_v24, 0.0  ;;  %v5740_v36 = vmul.f32 %v16017_v32, %v5664_v24  ;;  %5790 = vst [vmem:[#allocation3 + $0x98] sm:$0xe] %v5789_v29  ;;  %v7665_v59 = vpop.f32.mrf.mxu1  ;;  %v6422_v32 = vrot.slane %v6420_v50, 4  ;;  %v8008_v6 = vsel %vm2190_vm3, %v8005_v37, %v8007_v34 }
 0x523   : > { %v6426_v42 = vrot.slane %v6424_v20, 6  ;;  %v6429_v53 = vrot.slane %v6427_v15, 7  ;;  %v8102_v9 = vpop.f32.mrf.mxu2  ;;  %v7247_v56 = vpop.f32.mrf.mxu0  ;;  %v7785_v4 = vadd.f32 %v7749_v25, %v7665_v59  ;;  %v8445_v50 = vshll.u32 %v13489_v2, 16 }
 0x524   : > { %v5776_v27 = vsel %vm5700_vm11, %v5664_v24, %v5740_v36  ;;  %v8227_v45 = vadd.f32 %v8191_v1, %v8102_v9  ;;  %v7351_v58 = vadd.f32 %v7315_v51, %v7247_v56  ;;  %v6768_v22 = vpop.f32.mrf.mxu3  ;;  %v7316_v47 = vld [vmem:[#allocation4 + $0x80] sm:$0xff]  ;;  %v8434_v29 = vshrl.u32 %v12679_v3, 16 }
 0x525   : > { %v6045_v43 = vmul.f32 %v6008_v60, %v5776_v27  ;;  %6833 = vst.msk [vmem:[#allocation4 + $0x88] sm:$0xff] %vm1441_vm5, %v6768_v22  ;;  %v6430_v0 = vor.u32 %v6429_v53, %v6426_v42  ;;  %v8437_v24 = vshll.u32 %v12679_v3, 16  ;;  %v13526_v36 = vld [vmem:[%s17463_s8 + $0x50] sm:$0xff]  ;;  %v8444_v42 = vrot.slane %v8442_v14, 1 }
 0x526   : > { %8263 = vst.msk [vmem:[#allocation4 + $0x8] sm:$0xff] %vm1441_vm5, %v8227_v45  ;;  %12562 = vmatmul.msk.bf16.gmra.mxu1 %vm1441_vm5, %v7565_v46  ;;  %v8447_v53 = vrot.slane %v8445_v50, 2  ;;  %v7566_v56 = vrot.slane %v16239_v57, 1  ;;  %9121 = vmatpush.bf16.msra.mxu0 %v13526_v36  ;;  %v8193_v51 = vld [vmem:[#allocation4 + $0x18] sm:$0xff]  ;;  %v8009_v25 = vrot.slane %v16243_v52, 1  ;;  %v8436_v45 = vrot.slane %v8434_v29, 1 }
 0x527   : > { %v6081_v62 = vpack.c.bf16 %v6045_v43, %v6045_v43  ;;  %7821 = vst.msk [vmem:[#allocation4 + $0x20] sm:$0xff] %vm1441_vm5, %v7785_v4  ;;  %v6431_v16 = vsel %vm15386_vm15, %v6422_v32, %v6430_v0  ;;  %v6432_v7 = vrot.slane %v6430_v0, 4  ;;  %v7751_v4 = vld [vmem:[#allocation4 + $0x30] sm:$0xff]  ;;  %v7753_v50 = vld [vmem:[#allocation4 + $0x40] sm:$0xff]  ;;  %v16299_v36 = vld [vmem:[#allocation3 + $0x10] sm:$0xff] }
 0x528   : > { %7387 = vst.msk [vmem:[#allocation4 + $0x78] sm:$0xff] %vm1441_vm5, %v7351_v58  ;;  %12663 = vmatmul.msk.bf16.gmra.mxu2 %vm1441_vm5, %v8008_v6  ;;  %v13425_v18 = vld [vmem:[#allocation3 + $0x88] sm:$0xff]  ;;  %v8439_v58 = vrot.slane %v8437_v24, 2  ;;  %v7567_v6 = vsel %vm2190_vm3, %v7564_v19, %v7566_v56  ;;  %v13490_v19 = vld [vmem:[#allocation3 + $0x18] sm:$0xff] }
 0x529   : > { %v16226_v41 = vld [vmem:[#allocation3 + $0x88] sm:$0xff]  ;;  %6516 = vst.msk [vmem:[#allocation3 + $0x90] sm:$0xf] %vm834_vm1, %v6431_v16  ;;  %v6434_v11 = vshrl.u32 %v6081_v62, 16  ;;  %v6437_v17 = vshll.u32 %v6081_v62, 16  ;;  %12365 = vmatmul.msk.bf16.gmra.mxu3 %vm1441_vm5, %v13425_v18  ;;  %v16257_v62 = vor.u32 %v8447_v53, %v8444_v42  ;;  %v8010_v16 = vsel %vm2190_vm3, %v8007_v34, %v8009_v25 }
 0x52a   : > { %v7123_v37 = vshll.u32 %v16226_v41, 16  ;;  %v7667_v26 = vpop.f32.mrf.mxu1  ;;  %v6518_v5 = vld [vmem:[#allocation3 + $0x98] sm:$0x3]  ;;  %v8440_v18 = vor.u32 %v8439_v58, %v8436_v45  ;;  %v7127_v39 = vshrl.u32 %v16226_v41, 16  ;;  %v8451_v14 = vshrl.u32 %v13490_v19, 16  ;;  %v16281_v41 = vld [vmem:[#allocation3 + $0x68] sm:$0xff] }
 0x52b   : > { %v8105_v8 = vpop.f32.mrf.mxu2  ;;  %v7250_v63 = vpop.f32.mrf.mxu0  ;;  %v6436_v13 = vrot.slane %v6434_v11, 6  ;;  %v6439_v55 = vrot.slane %v6437_v17, 7  ;;  %v7786_v49 = vadd.f32 %v7750_v38, %v7667_v26  ;;  %v16285_v26 = vld [vmem:[#allocation3 + $0x68] sm:$0xff] }
 0x52c   : > { %v8228_v33 = vadd.f32 %v8192_v35, %v8105_v8  ;;  %v7352_v12 = vadd.f32 %v7316_v47, %v7250_v63  ;;  %v6771_v10 = vpop.f32.mrf.mxu3  ;;  %v16233_v54 = vrot.slane %v7123_v37, 1  ;;  %v7317_v59 = vld [vmem:[#allocation4 + $0x88] sm:$0xff]  ;;  %v8449_v44 = vsel %vm3113_vm7, %v8440_v18, %v16257_v62  ;;  %v12780_v53 = vld [vmem:[#allocation3 + $0x8] sm:$0xc] }
 0x52d   : > { %6834 = vst.msk [vmem:[#allocation4 + $0x90] sm:$0xff] %vm1441_vm5, %v6771_v10  ;;  %v6440_v40 = vor.u32 %v6439_v55, %v6436_v13  ;;  %v8454_v13 = vshll.u32 %v13490_v19, 16  ;;  %v8453_v38 = vrot.slane %v8451_v14, 1  ;;  %v13492_v14 = vld [vmem:[#allocation3 + $0x28] sm:$0xff] }
 0x52e   : > { %8264 = vst.msk [vmem:[#allocation4 + $0x10] sm:$0xff] %vm1441_vm5, %v8228_v33  ;;  %v7126_v28 = vsel %vm1617_vm4, %v7121_v48, %v16233_v54  ;;  %v8194_v30 = vld [vmem:[#allocation4 + $0x20] sm:$0xff]  ;;  %v7129_v35 = vor.u32 %v7127_v39, %v16233_v54  ;;  %v8011_v54 = vrot.slane %v16285_v26, 1  ;;  %v7756_v26 = vld [vmem:[#allocation4 + $0x58] sm:$0xff] }
 0x52f   : > { %7822 = vst.msk [vmem:[#allocation4 + $0x28] sm:$0xff] %vm1441_vm5, %v7786_v49  ;;  %12466 = vmatmul.msk.bf16.gmra.mxu0 %vm1441_vm5, %v7126_v28  ;;  %v6441_v20 = vsel %vm15386_vm15, %v6432_v7, %v6440_v40  ;;  %v6442_v15 = vrot.slane %v6440_v40, 4  ;;  %v8456_v33 = vrot.slane %v8454_v13, 2 }
 0x530   : > { %7388 = vst.msk [vmem:[#allocation4 + $0x80] sm:$0xff] %vm1441_vm5, %v7352_v12  ;;  %v6888_v60 = vld [vmem:[#allocation3 + $0x90] sm:$0x1]  ;;  %v7568_v12 = vrot.slane %v16281_v41, 1  ;;  %v8012_v42 = vsel %vm2190_vm3, %v8009_v25, %v8011_v54 }
 0x531   : > { %v6967_v9 = vunpack.c.l.b16 %v6888_v60  ;;  %6517 = vst.msk [vmem:[#allocation3 + $0x94] sm:$0xf] %vm834_vm1, %v6441_v20  ;;  %v6519_v1 = vsel %vm15288_vm12, %v6442_v15, %v6518_v5  ;;  %v16291_v20 = vor.u32 %v8456_v33, %v8453_v38  ;;  %v13508_v15 = vld [vmem:[#allocation3 + $0x8] sm:$0xf0] }
 0x532   : > { %6520 = vst [vmem:[#allocation3 + $0x98] sm:$0x3] %v6519_v1  ;;  %v7670_v43 = vpop.f32.mrf.mxu1  ;;  %v7569_v60 = vsel %vm2190_vm3, %v7566_v56, %v7568_v12  ;;  %v12781_v57 = vor.u32 %v13508_v15, %v12780_v53  ;;  %v13491_v1 = vld [vmem:[#allocation3 + $0x20] sm:$0xff]  ;;  %v9012_v56 = vrot.slane %v16299_v36, 2  ;;  %v7757_v53 = vld [vmem:[#allocation4 + $0x60] sm:$0xff] }
 0x533   : > { %v8107_v23 = vpop.f32.mrf.mxu2  ;;  %v7252_v27 = vpop.f32.mrf.mxu0  ;;  %v6986_v22 = vpack.c.b16 %v6967_v9, %v6967_v9  ;;  %v7787_v21 = vadd.f32 %v7751_v4, %v7670_v43  ;;  %v8458_v9 = vsel %vm3113_vm7, %v16257_v62, %v16291_v20  ;;  %v16324_v62 = vld [vmem:[#allocation3 + $0x70] sm:$0xff] }
 0x534   : > { %v8229_v32 = vadd.f32 %v8193_v51, %v8107_v23  ;;  %v7353_v0 = vadd.f32 %v7317_v59, %v7252_v27  ;;  %v6773_v46 = vpop.f32.mrf.mxu3  ;;  %v7318_v8 = vld [vmem:[#allocation4 + $0x90] sm:$0xff]  ;;  %v7754_v27 = vld [vmem:[#allocation4 + $0x48] sm:$0xff]  ;;  %v9011_v58 = vrot.slane %v12781_v57, 2  ;;  %v8013_v19 = vrot.slane %v16324_v62, 1 }
 0x535   : > { %6835 = vst.msk [vmem:[#allocation4 + $0x98] sm:$0xff] %vm1441_vm5, %v6773_v46  ;;  %v7131_v2 = vshll.u32 %v6986_v22, 16 }
 0x536   : > { %8265 = vst.msk [vmem:[#allocation4 + $0x18] sm:$0xff] %vm1441_vm5, %v8229_v32  ;;  %12563 = vmatmul.msk.bf16.gmra.mxu1 %vm1441_vm5, %v7567_v6  ;;  %v8195_v48 = vld [vmem:[#allocation4 + $0x28] sm:$0xff]  ;;  %v8460_v32 = vshrl.u32 %v13491_v1, 16  ;;  %v9013_v46 = vsel %vm3708_vm6, %v9011_v58, %v9012_v56 }
 0x537   : > { %7823 = vst.msk [vmem:[#allocation4 + $0x30] sm:$0xff] %vm1441_vm5, %v7787_v21  ;;  %v7133_v11 = vrot.slane %v7131_v2, 1  ;;  %v16320_v21 = vld [vmem:[#allocation3 + $0x70] sm:$0xff] }
 0x538   : > { %7389 = vst.msk [vmem:[#allocation4 + $0x88] sm:$0xff] %vm1441_vm5, %v7353_v0  ;;  %12664 = vmatmul.msk.bf16.gmra.mxu2 %vm1441_vm5, %v8010_v16  ;;  %v8463_v0 = vshll.u32 %v13491_v1, 16  ;;  %v8462_v6 = vrot.slane %v8460_v32, 1  ;;  %v7570_v16 = vrot.slane %v16320_v21, 1  ;;  %v13493_v58 = vld [vmem:[#allocation3 + $0x30] sm:$0xff] }
 0x539   : > { %12756 = vmatmul.msk.bf16.vlgmr.msrb.gmra.mxu3 %vm1441_vm5, %v8449_v44  ;;  %v7134_v55 = vsel %vm1617_vm4, %v7129_v35, %v7133_v11  ;;  %v7755_v11 = vld [vmem:[#allocation4 + $0x50] sm:$0xff] }
 0x53a   : > { %v7672_v37 = vpop.f32.mrf.mxu1  ;;  %v8465_v2 = vrot.slane %v8463_v0, 2  ;;  %v7571_v35 = vsel %vm2190_vm3, %v7568_v12, %v7570_v16  ;;  %v7758_v0 = vld [vmem:[#allocation4 + $0x68] sm:$0xff] }
 0x53b   : > { %v8110_v17 = vpop.f32.mrf.mxu2  ;;  %v7788_v63 = vadd.f32 %v7752_v61, %v7672_v37 }
 0x53c   : > { %v8230_v31 = vadd.f32 %v8194_v30, %v8110_v17  ;;  %v7255_v34 = vpop.f32.mrf.mxu0  ;;  %v6776_v3 = vpop.f32.mrf.mxu3  ;;  %v7319_v28 = vld [vmem:[#allocation4 + $0x98] sm:$0xff] }
 0x53d   : > { %v7354_v47 = vadd.f32 %v7318_v8, %v7255_v34  ;;  %7824 = vst.msk [vmem:[#allocation4 + $0x38] sm:$0xff] %vm1441_vm5, %v7788_v63  ;;  %v8466_v8 = vor.u32 %v8465_v2, %v8462_v6  ;;  %v16336_v63 = vld [vmem:[#allocation3 + $0x18] sm:$0xff] }
 0x53e   : > { %8266 = vst.msk [vmem:[#allocation4 + $0x20] sm:$0xff] %vm1441_vm5, %v8230_v31  ;;  %v8196_v23 = vld [vmem:[#allocation4 + $0x30] sm:$0xff]  ;;  %v9014_v13 = vrot.slane %v16336_v63, 2 }
 0x53f   : > { %12467 = vmatmul.msk.bf16.gmra.mxu0 %vm1441_vm5, %v7134_v55  ;;  %7390 = vst.msk [vmem:[#allocation4 + $0x90] sm:$0xff] %vm1441_vm5, %v7354_v47  ;;  %v8014_v47 = vsel %vm2190_vm3, %v8011_v54, %v8013_v19 }
 0x540   : > { %6836 = vst.msk [vmem:[#allocation4 + $0xa0] sm:$0xff] %vm1441_vm5, %v6776_v3  ;;  %v8467_v3 = vsel %vm3113_vm7, %v16291_v20, %v8466_v8 }
 0x542   : > { %v7675_v49 = vpop.f32.mrf.mxu1 }
 0x543   : > { %v8112_v10 = vpop.f32.mrf.mxu2  ;;  %v7789_v5 = vadd.f32 %v7753_v50, %v7675_v49  ;;  %v8469_v50 = vshrl.u32 %v13492_v14, 16 }
 0x544   : > { %v8231_v7 = vadd.f32 %v8195_v48, %v8112_v10  ;;  %v7257_v40 = vpop.f32.mrf.mxu0  ;;  %v6778_v24 = vpop.f32.mrf.mxu3  ;;  %v8197_v44 = vld [vmem:[#allocation4 + $0x38] sm:$0xff] }
 0x545   : > { %v7355_v29 = vadd.f32 %v7319_v28, %v7257_v40  ;;  %7825 = vst.msk [vmem:[#allocation4 + $0x40] sm:$0xff] %vm1441_vm5, %v7789_v5  ;;  %v9015_v40 = vsel %vm3708_vm6, %v9012_v56, %v9014_v13  ;;  %v16358_v28 = vld [vmem:[#allocation3 + $0x78] sm:$0xff] }
 0x546   : > { %8267 = vst.msk [vmem:[#allocation4 + $0x28] sm:$0xff] %vm1441_vm5, %v8231_v7  ;;  %12564 = vmatmul.msk.bf16.gmra.mxu1 %vm1441_vm5, %v7569_v60  ;;  %v8472_v7 = vshll.u32 %v13492_v14, 16  ;;  %v16362_v5 = vld [vmem:[#allocation3 + $0x78] sm:$0xff]  ;;  %v7572_v20 = vrot.slane %v16358_v28, 1 }
 0x547   : > { %7391 = vst.msk [vmem:[#allocation4 + $0x98] sm:$0xff] %vm1441_vm5, %v7355_v29  ;;  %v7320_v45 = vld [vmem:[#allocation4 + $0xa0] sm:$0xff]  ;;  %v8471_v29 = vrot.slane %v8469_v50, 1  ;;  %v8015_v36 = vrot.slane %v16362_v5, 1 }
 0x548   : > { %12665 = vmatmul.msk.bf16.gmra.mxu2 %vm1441_vm5, %v8012_v42  ;;  %6837 = vst.msk [vmem:[#allocation4 + $0xa8] sm:$0xff] %vm1441_vm5, %v6778_v24  ;;  %v8474_v24 = vrot.slane %v8472_v7, 2  ;;  %v7760_v7 = vld [vmem:[#allocation4 + $0x78] sm:$0xff] }
 0x549   : > { %12757 = vmatmul.msk.bf16.gmra.mxu3 %vm1441_vm5, %v8458_v9 }
 0x54a   : > { %v7677_v51 = vpop.f32.mrf.mxu1 }
 0x54b   : > { %v8115_v52 = vpop.f32.mrf.mxu2  ;;  %v7790_v22 = vadd.f32 %v7754_v27, %v7677_v51  ;;  %v8475_v51 = vor.u32 %v8474_v24, %v8471_v29  ;;  %v7573_v27 = vsel %vm2190_vm3, %v7570_v16, %v7572_v20 }
 0x54c   : > { %v8232_v59 = vadd.f32 %v8196_v23, %v8115_v52  ;;  %v7260_v25 = vpop.f32.mrf.mxu0  ;;  %v6781_v4 = vpop.f32.mrf.mxu3  ;;  %v8198_v41 = vld [vmem:[#allocation4 + $0x40] sm:$0xff] }
 0x54d   : > { %v7356_v43 = vadd.f32 %v7320_v45, %v7260_v25  ;;  %7826 = vst.msk [vmem:[#allocation4 + $0x48] sm:$0xff] %vm1441_vm5, %v7790_v22  ;;  %v8016_v25 = vsel %vm2190_vm3, %v8013_v19, %v8015_v36  ;;  %v8476_v45 = vsel %vm3113_vm7, %v8466_v8, %v8475_v51 }
 0x54e   : > { %8268 = vst.msk [vmem:[#allocation4 + $0x30] sm:$0xff] %vm1441_vm5, %v8232_v59  ;;  %v16374_v59 = vld [vmem:[#allocation3 + $0x20] sm:$0xff] }
 0x54f   : > { %12858 = vmatmul.msk.bf16.vlgmr.msra.gmra.mxu0 %vm1441_vm5, %v9013_v46  ;;  %7392 = vst.msk [vmem:[#allocation4 + $0xa0] sm:$0xff] %vm1441_vm5, %v7356_v43  ;;  %v7321_v37 = vld [vmem:[#allocation4 + $0xa8] sm:$0xff]  ;;  %v9016_v22 = vrot.slane %v16374_v59, 2 }
 0x550   : > { %6838 = vst.msk [vmem:[#allocation4 + $0xb0] sm:$0xff] %vm1441_vm5, %v6781_v4 }
 0x551   : > { %v9017_v19 = vsel %vm3708_vm6, %v9014_v13, %v9016_v22 }
 0x552   : > { %v7680_v39 = vpop.f32.mrf.mxu1 }
 0x553   : > { %v8117_v18 = vpop.f32.mrf.mxu2  ;;  %v7791_v61 = vadd.f32 %v7755_v11, %v7680_v39  ;;  %v16395_v39 = vld [vmem:[#allocation3 + $0x80] sm:$0xff] }
 0x554   : > { %v8233_v17 = vadd.f32 %v8197_v44, %v8117_v18  ;;  %v7262_v30 = vpop.f32.mrf.mxu0  ;;  %v6783_v34 = vpop.f32.mrf.mxu3  ;;  %v8199_v60 = vld [vmem:[#allocation4 + $0x48] sm:$0xff]  ;;  %v8478_v18 = vshrl.u32 %v13493_v58, 16  ;;  %v8481_v44 = vshll.u32 %v13493_v58, 16  ;;  %v16399_v11 = vld [vmem:[#allocation3 + $0x80] sm:$0xff] }
 0x555   : > { %v7357_v31 = vadd.f32 %v7321_v37, %v7262_v30  ;;  %7827 = vst.msk [vmem:[#allocation4 + $0x50] sm:$0xff] %vm1441_vm5, %v7791_v61  ;;  %v7574_v37 = vrot.slane %v16395_v39, 1 }
 0x556   : > { %8269 = vst.msk [vmem:[#allocation4 + $0x38] sm:$0xff] %vm1441_vm5, %v8233_v17  ;;  %12565 = vmatmul.msk.bf16.gmra.mxu1 %vm1441_vm5, %v7571_v35  ;;  %v8480_v17 = vrot.slane %v8478_v18, 1  ;;  %v8483_v30 = vrot.slane %v8481_v44, 2  ;;  %v7759_v35 = vld [vmem:[#allocation4 + $0x70] sm:$0xff] }
 0x557   : > { %7393 = vst.msk [vmem:[#allocation4 + $0xa8] sm:$0xff] %vm1441_vm5, %v7357_v31  ;;  %v7322_v10 = vld [vmem:[#allocation4 + $0xb0] sm:$0xff] }
 0x558   : > { %12666 = vmatmul.msk.bf16.gmra.mxu2 %vm1441_vm5, %v8014_v47  ;;  %6839 = vst.msk [vmem:[#allocation4 + $0xb8] sm:$0xff] %vm1441_vm5, %v6783_v34  ;;  %v8017_v34 = vrot.slane %v16399_v11, 1  ;;  %v7762_v11 = vld [vmem:[#allocation4 + $0x88] sm:$0xff] }
 0x559   : > { %12758 = vmatmul.msk.bf16.gmra.mxu3 %vm1441_vm5, %v8467_v3 }
 0x55a   : > { %v7682_v38 = vpop.f32.mrf.mxu1 }
 0x55b   : > { %v8120_v55 = vpop.f32.mrf.mxu2  ;;  %v7792_v48 = vadd.f32 %v7756_v26, %v7682_v38  ;;  %v7575_v38 = vsel %vm2190_vm3, %v7572_v20, %v7574_v37  ;;  %v16411_v26 = vld [vmem:[#allocation3 + $0x28] sm:$0xff] }
 0x55c   : > { %v8234_v33 = vadd.f32 %v8198_v41, %v8120_v55  ;;  %v7265_v12 = vpop.f32.mrf.mxu0  ;;  %v6786_v49 = vpop.f32.mrf.mxu3  ;;  %v8200_v4 = vld [vmem:[#allocation4 + $0x50] sm:$0xff]  ;;  %v8484_v41 = vor.u32 %v8483_v30, %v8480_v17 }
 0x55d   : > { %v7358_v54 = vadd.f32 %v7322_v10, %v7265_v12  ;;  %7828 = vst.msk [vmem:[#allocation4 + $0x58] sm:$0xff] %vm1441_vm5, %v7792_v48  ;;  %v13494_v10 = vld [vmem:[#allocation3 + $0x38] sm:$0xff]  ;;  %v9018_v48 = vrot.slane %v16411_v26, 2 }
 0x55e   : > { %8270 = vst.msk [vmem:[#allocation4 + $0x40] sm:$0xff] %vm1441_vm5, %v8234_v33  ;;  %v8018_v33 = vsel %vm2190_vm3, %v8015_v36, %v8017_v34  ;;  %v8485_v12 = vsel %vm3113_vm7, %v8475_v51, %v8484_v41 }
 0x55f   : > { %12859 = vmatmul.msk.bf16.gmra.mxu0 %vm1441_vm5, %v9015_v40  ;;  %7394 = vst.msk [vmem:[#allocation4 + $0xb0] sm:$0xff] %vm1441_vm5, %v7358_v54  ;;  %v7323_v1 = vld [vmem:[#allocation4 + $0xb8] sm:$0xff]  ;;  %v9019_v36 = vsel %vm3708_vm6, %v9016_v22, %v9018_v48 }
 0x560   : > { %6840 = vst.msk [vmem:[#allocation4 + $0xc0] sm:$0xff] %vm1441_vm5, %v6786_v49 }
 0x563   : > { %v8122_v15 = vpop.f32.mrf.mxu2  ;;  %v7685_v42 = vpop.f32.mrf.mxu1 }
 0x564   : > { %v8235_v57 = vadd.f32 %v8199_v60, %v8122_v15  ;;  %v7267_v9 = vpop.f32.mrf.mxu0  ;;  %v7793_v56 = vadd.f32 %v7757_v53, %v7685_v42  ;;  %v6788_v23 = vpop.f32.mrf.mxu3  ;;  %v8201_v31 = vld [vmem:[#allocation4 + $0x58] sm:$0xff]  ;;  %v8487_v15 = vshrl.u32 %v13494_v10, 16  ;;  %v8490_v60 = vshll.u32 %v13494_v10, 16  ;;  %v16432_v42 = vld [vmem:[#allocation3 + $0x88] sm:$0xff] }
 0x565   : > { %v7359_v52 = vadd.f32 %v7323_v1, %v7267_v9  ;;  %6841 = vst.msk [vmem:[#allocation4 + $0xc8] sm:$0xff] %vm1441_vm5, %v6788_v23  ;;  %v16436_v53 = vld [vmem:[#allocation3 + $0x88] sm:$0xff]  ;;  %v7576_v1 = vrot.slane %v16432_v42, 1 }
 0x566   : > { %8271 = vst.msk [vmem:[#allocation4 + $0x48] sm:$0xff] %vm1441_vm5, %v8235_v57  ;;  %12566 = vmatmul.msk.bf16.gmra.mxu1 %vm1441_vm5, %v7573_v27  ;;  %v8489_v57 = vrot.slane %v8487_v15, 1  ;;  %v8492_v9 = vrot.slane %v8490_v60, 2  ;;  %v8019_v23 = vrot.slane %v16436_v53, 1  ;;  %v7761_v27 = vld [vmem:[#allocation4 + $0x80] sm:$0xff] }
 0x567   : > { %7829 = vst.msk [vmem:[#allocation4 + $0x60] sm:$0xff] %vm1441_vm5, %v7793_v56  ;;  %v7324_v62 = vld [vmem:[#allocation4 + $0xc0] sm:$0xff] }
 0x568   : > { %7395 = vst.msk [vmem:[#allocation4 + $0xb8] sm:$0xff] %vm1441_vm5, %v7359_v52  ;;  %12667 = vmatmul.msk.bf16.gmra.mxu2 %vm1441_vm5, %v8016_v25  ;;  %v13496_v15 = vld [vmem:[#allocation3 + $0x48] sm:$0xff] }
 0x569   : > { %12759 = vmatmul.msk.bf16.gmra.mxu3 %vm1441_vm5, %v8476_v45  ;;  %v13566_v60 = vld [vmem:[%s17463_s8 + $0x70] sm:$0xff] }
 0x56a   : > { %10144 = vmatpush.bf16.msra.mxu2 %v13566_v60 }
 0x56b   : > { %v8125_v43 = vpop.f32.mrf.mxu2  ;;  %v7687_v32 = vpop.f32.mrf.mxu1 }
 0x56c   : > { %v8236_v46 = vadd.f32 %v8200_v4, %v8125_v43  ;;  %v7270_v21 = vpop.f32.mrf.mxu0  ;;  %v7794_v6 = vadd.f32 %v7758_v0, %v7687_v32  ;;  %v6791_v16 = vpop.f32.mrf.mxu3  ;;  %v7325_v3 = vld [vmem:[#allocation4 + $0xc8] sm:$0xff]  ;;  %v16442_v4 = vor.u32 %v8492_v9, %v8489_v57  ;;  %v7577_v32 = vsel %vm2190_vm3, %v7574_v37, %v7576_v1 }
 0x56d   : > { %v7360_v2 = vadd.f32 %v7324_v62, %v7270_v21  ;;  %6842 = vst.msk [vmem:[#allocation4 + $0xd0] sm:$0xff] %vm1441_vm5, %v6791_v16  ;;  %v16450_v0 = vld [vmem:[#allocation3 + $0x30] sm:$0xff]  ;;  %v13546_v62 = vld [vmem:[%s17463_s8 + $0x60] sm:$0xff] }
 0x56e   : > { %8272 = vst.msk [vmem:[#allocation4 + $0x50] sm:$0xff] %vm1441_vm5, %v8236_v46  ;;  %v8202_v49 = vld [vmem:[#allocation4 + $0x60] sm:$0xff]  ;;  %v8020_v46 = vsel %vm2190_vm3, %v8017_v34, %v8019_v23  ;;  %v7444_v21 = vld [vmem:[#allocation3 + $0x90] sm:$0x1]  ;;  %9566 = vmatpush.bf16.msra.mxu1 %v13546_v62  ;;  %v9020_v16 = vrot.slane %v16450_v0, 2 }
 0x56f   : > { %7830 = vst.msk [vmem:[#allocation4 + $0x68] sm:$0xff] %vm1441_vm5, %v7794_v6  ;;  %12860 = vmatmul.msk.bf16.gmra.mxu0 %vm1441_vm5, %v9017_v19  ;;  %v8494_v6 = vsel %vm3113_vm7, %v8484_v41, %v16442_v4  ;;  %v7523_v18 = vunpack.c.l.b16 %v7444_v21 }
 0x570   : > { %7396 = vst.msk [vmem:[#allocation4 + $0xc0] sm:$0xff] %vm1441_vm5, %v7360_v2  ;;  %v13495_v2 = vld [vmem:[#allocation3 + $0x40] sm:$0xff] }
 0x573   : > { %v8127_v61 = vpop.f32.mrf.mxu2  ;;  %v7690_v8 = vpop.f32.mrf.mxu1 }
 0x574   : > { %v8237_v63 = vadd.f32 %v8201_v31, %v8127_v61  ;;  %v7272_v47 = vpop.f32.mrf.mxu0  ;;  %v7795_v14 = vadd.f32 %v7759_v35, %v7690_v8  ;;  %v6793_v55 = vpop.f32.mrf.mxu3  ;;  %v7326_v5 = vld [vmem:[#allocation4 + $0xd0] sm:$0xff]  ;;  %v8496_v8 = vshrl.u32 %v13495_v2, 16  ;;  %v8499_v35 = vshll.u32 %v13495_v2, 16 }
 0x575   : > { %v7361_v13 = vadd.f32 %v7325_v3, %v7272_v47  ;;  %6843 = vst.msk [vmem:[#allocation4 + $0xd8] sm:$0xff] %vm1441_vm5, %v6793_v55  ;;  %v7542_v47 = vpack.c.b16 %v7523_v18, %v7523_v18  ;;  %v16477_v3 = vld [vmem:[#allocation3 + $0x90] sm:$0xff] }
 0x576   : > { %8273 = vst.msk [vmem:[#allocation4 + $0x58] sm:$0xff] %vm1441_vm5, %v8237_v63  ;;  %12567 = vmatmul.msk.bf16.gmra.mxu1 %vm1441_vm5, %v7575_v38  ;;  %v8203_v52 = vld [vmem:[#allocation4 + $0x68] sm:$0xff]  ;;  %v9021_v63 = vsel %vm3708_vm6, %v9018_v48, %v9020_v16  ;;  %v8021_v26 = vrot.slane %v16477_v3, 1 }
 0x577   : > { %7831 = vst.msk [vmem:[#allocation4 + $0x70] sm:$0xff] %vm1441_vm5, %v7795_v14  ;;  %v8498_v14 = vrot.slane %v8496_v8, 1  ;;  %v7578_v55 = vrot.slane %v7542_v47, 1  ;;  %v12984_v47 = vld [vmem:[#allocation3 + $0x10] sm:$0xc] }
 0x578   : > { %7397 = vst.msk [vmem:[#allocation4 + $0xc8] sm:$0xff] %vm1441_vm5, %v7361_v13  ;;  %12668 = vmatmul.msk.bf16.gmra.mxu2 %vm1441_vm5, %v8018_v33  ;;  %v8501_v13 = vrot.slane %v8499_v35, 2  ;;  %v16527_v35 = vld [vmem:[#allocation3 + $0x40] sm:$0xff] }
 0x579   : > { %12760 = vmatmul.msk.bf16.gmra.mxu3 %vm1441_vm5, %v8485_v12  ;;  %v7763_v12 = vld [vmem:[#allocation4 + $0x90] sm:$0xff]  ;;  %v9024_v3 = vrot.slane %v16527_v35, 2 }
 0x57b   : > { %v8130_v54 = vpop.f32.mrf.mxu2  ;;  %v7692_v50 = vpop.f32.mrf.mxu1 }
 0x57c   : > { %v8238_v40 = vadd.f32 %v8202_v49, %v8130_v54  ;;  %v7275_v28 = vpop.f32.mrf.mxu0  ;;  %v7796_v29 = vadd.f32 %v7760_v7, %v7692_v50  ;;  %v6796_v20 = vpop.f32.mrf.mxu3  ;;  %v7327_v45 = vld [vmem:[#allocation4 + $0xd8] sm:$0xff] }
 0x57d   : > { %v7362_v24 = vadd.f32 %v7326_v5, %v7275_v28  ;;  %6844 = vst.msk [vmem:[#allocation4 + $0xe0] sm:$0xff] %vm1441_vm5, %v6796_v20  ;;  %v7579_v28 = vsel %vm2190_vm3, %v7576_v1, %v7578_v55  ;;  %v16488_v5 = vld [vmem:[#allocation3 + $0x38] sm:$0xff]  ;;  %v7764_v1 = vld [vmem:[#allocation4 + $0x98] sm:$0xff] }
 0x57e   : > { %8274 = vst.msk [vmem:[#allocation4 + $0x60] sm:$0xff] %vm1441_vm5, %v8238_v40  ;;  %v8204_v19 = vld [vmem:[#allocation4 + $0x70] sm:$0xff]  ;;  %v16482_v40 = vor.u32 %v8501_v13, %v8498_v14 }
 0x57f   : > { %7832 = vst.msk [vmem:[#allocation4 + $0x78] sm:$0xff] %vm1441_vm5, %v7796_v29  ;;  %12861 = vmatmul.msk.bf16.gmra.mxu0 %vm1441_vm5, %v9019_v36  ;;  %v8022_v29 = vsel %vm2190_vm3, %v8019_v23, %v8021_v26  ;;  %v9022_v36 = vrot.slane %v16488_v5, 2  ;;  %v13549_v14 = vld [vmem:[#allocation3 + $0x18] sm:$0xff] }
 0x580   : > { %7398 = vst.msk [vmem:[#allocation4 + $0xd0] sm:$0xff] %vm1441_vm5, %v7362_v24  ;;  %v7889_v24 = vld [vmem:[#allocation3 + $0x98] sm:$0x1]  ;;  %v8503_v20 = vsel %vm3113_vm7, %v16442_v4, %v16482_v40  ;;  %v12882_v4 = vld [vmem:[#allocation3 + $0x10] sm:$0xc] }
 0x581   : > { %v7968_v57 = vunpack.c.l.b16 %v7889_v24 }
 0x583   : > { %v8132_v56 = vpop.f32.mrf.mxu2  ;;  %v7695_v51 = vpop.f32.mrf.mxu1 }
 0x584   : > { %v8239_v59 = vadd.f32 %v8203_v52, %v8132_v56  ;;  %v7277_v25 = vpop.f32.mrf.mxu0  ;;  %v7797_v58 = vadd.f32 %v7761_v27, %v7695_v51  ;;  %v6798_v43 = vpop.f32.mrf.mxu3  ;;  %v7328_v37 = vld [vmem:[#allocation4 + $0xe0] sm:$0xff] }
 0x585   : > { %v7363_v22 = vadd.f32 %v7327_v45, %v7277_v25  ;;  %6845 = vst.msk [vmem:[#allocation4 + $0xe8] sm:$0xff] %vm1441_vm5, %v6798_v43  ;;  %v13528_v25 = vld [vmem:[#allocation3 + $0x10] sm:$0xf0]  ;;  %v8505_v45 = vshrl.u32 %v13496_v15, 16  ;;  %v16514_v43 = vld [vmem:[#allocation3 + $0x18] sm:$0xff] }
 0x586   : > { %8275 = vst.msk [vmem:[#allocation4 + $0x68] sm:$0xff] %vm1441_vm5, %v8239_v59  ;;  %12568 = vmatmul.msk.bf16.gmra.mxu1 %vm1441_vm5, %v7577_v32  ;;  %v8205_v38 = vld [vmem:[#allocation4 + $0x78] sm:$0xff]  ;;  %v7987_v32 = vpack.c.b16 %v7968_v57, %v7968_v57 }
 0x587   : > { %7833 = vst.msk [vmem:[#allocation4 + $0x80] sm:$0xff] %vm1441_vm5, %v7797_v58  ;;  %v8508_v58 = vshll.u32 %v13496_v15, 16  ;;  %v8507_v21 = vrot.slane %v8505_v45, 1 }
 0x588   : > { %7399 = vst.msk [vmem:[#allocation4 + $0xd8] sm:$0xff] %vm1441_vm5, %v7363_v22  ;;  %12669 = vmatmul.msk.bf16.gmra.mxu2 %vm1441_vm5, %v8020_v46  ;;  %v9023_v22 = vsel %vm3708_vm6, %v9020_v16, %v9022_v36  ;;  %v12883_v46 = vor.u32 %v13528_v25, %v12882_v4  ;;  %v8023_v16 = vrot.slane %v7987_v32, 1  ;;  %v7767_v25 = vld [vmem:[#allocation4 + $0xb0] sm:$0xff] }
 0x589   : > { %12761 = vmatmul.msk.bf16.gmra.mxu3 %vm1441_vm5, %v8494_v6  ;;  %v8510_v62 = vrot.slane %v8508_v58, 2  ;;  %v9457_v6 = vrot.slane %v16514_v43, 2 }
 0x58b   : > { %v8135_v44 = vpop.f32.mrf.mxu2  ;;  %v7697_v39 = vpop.f32.mrf.mxu1 }
 0x58c   : > { %v8240_v17 = vadd.f32 %v8204_v19, %v8135_v44  ;;  %v7280_v30 = vpop.f32.mrf.mxu0  ;;  %v7798_v61 = vadd.f32 %v7762_v11, %v7697_v39  ;;  %v6801_v34 = vpop.f32.mrf.mxu3  ;;  %v7329_v54 = vld [vmem:[#allocation4 + $0xe8] sm:$0xff]  ;;  %v7765_v44 = vld [vmem:[#allocation4 + $0xa0] sm:$0xff] }
 0x58d   : > { %v7364_v31 = vadd.f32 %v7328_v37, %v7280_v30  ;;  %6846 = vst.msk [vmem:[#allocation4 + $0xf0] sm:$0xff] %vm1441_vm5, %v6801_v34  ;;  %v13548_v34 = vld [vmem:[#allocation3 + $0x10] sm:$0xf0] }
 0x58e   : > { %8276 = vst.msk [vmem:[#allocation4 + $0x70] sm:$0xff] %vm1441_vm5, %v8240_v17  ;;  %v8206_v53 = vld [vmem:[#allocation4 + $0x80] sm:$0xff]  ;;  %v9456_v17 = vrot.slane %v12883_v46, 2  ;;  %v12985_v13 = vor.u32 %v13548_v34, %v12984_v47 }
 0x58f   : > { %7834 = vst.msk [vmem:[#allocation4 + $0x88] sm:$0xff] %vm1441_vm5, %v7798_v61  ;;  %12862 = vmatmul.msk.bf16.gmra.mxu0 %vm1441_vm5, %v9021_v63  ;;  %v8024_v63 = vsel %vm2190_vm3, %v8021_v26, %v8023_v16 }
 0x590   : > { %7400 = vst.msk [vmem:[#allocation4 + $0xe0] sm:$0xff] %vm1441_vm5, %v7364_v31  ;;  %v16521_v31 = vor.u32 %v8510_v62, %v8507_v21  ;;  %v9458_v8 = vsel %vm3708_vm6, %v9456_v17, %v9457_v6 }
 0x592   : > { %v8512_v55 = vsel %vm3113_vm7, %v16482_v40, %v16521_v31  ;;  %v9905_v40 = vshll.u32 %v12985_v13, 16 }
 0x593   : > { %v8137_v41 = vpop.f32.mrf.mxu2  ;;  %v7700_v33 = vpop.f32.mrf.mxu1 }
 0x594   : > { %v8241_v10 = vadd.f32 %v8205_v38, %v8137_v41  ;;  %v7282_v48 = vpop.f32.mrf.mxu0  ;;  %v7799_v49 = vadd.f32 %v7763_v12, %v7700_v33  ;;  %v6803_v7 = vpop.f32.mrf.mxu3  ;;  %v7330_v23 = vld [vmem:[#allocation4 + $0xf0] sm:$0xff]  ;;  %v13497_v41 = vld [vmem:[#allocation3 + $0x50] sm:$0xff]  ;;  %v9910_v12 = vshrl.u32 %v13549_v14, 16 }
 0x595   : > { %v7365_v50 = vadd.f32 %v7329_v54, %v7282_v48  ;;  %6847 = vst.msk [vmem:[#allocation4 + $0xf8] sm:$0xff] %vm1441_vm5, %v6803_v7  ;;  %v13586_v38 = vld [vmem:[%s17463_s8 + $0x80] sm:$0xff]  ;;  %v7766_v54 = vld [vmem:[#allocation4 + $0xa8] sm:$0xff]  ;;  %v8514_v15 = vshrl.u32 %v13497_v41, 16  ;;  %v8517_v60 = vshll.u32 %v13497_v41, 16 }
 0x596   : > { %8277 = vst.msk [vmem:[#allocation4 + $0x78] sm:$0xff] %vm1441_vm5, %v8241_v10  ;;  %12569 = vmatmul.msk.bf16.gmra.mxu1 %vm1441_vm5, %v7579_v28  ;;  %v8207_v2 = vld [vmem:[#allocation4 + $0x88] sm:$0xff]  ;;  %v9913_v10 = vshll.u32 %v13549_v14, 16  ;;  %v9902_v28 = vshrl.u32 %v12985_v13, 16  ;;  %10589 = vmatpush.bf16.msra.mxu3 %v13586_v38  ;;  %v9912_v57 = vrot.slane %v9910_v12, 2  ;;  %v8768_v13 = vld [vmem:[#allocation4] sm:$0xff] }
 0x597   : > { %7835 = vst.msk [vmem:[#allocation4 + $0x90] sm:$0xff] %vm1441_vm5, %v7799_v49 }
 0x598   : > { %7401 = vst.msk [vmem:[#allocation4 + $0xe8] sm:$0xff] %vm1441_vm5, %v7365_v50  ;;  %12670 = vmatmul.msk.bf16.gmra.mxu2 %vm1441_vm5, %v8022_v29 }
 0x599   : > { %12762 = vmatmul.msk.bf16.gmra.mxu3 %vm1441_vm5, %v8503_v20 }
 0x59b   : > { %v8140_v42 = vpop.f32.mrf.mxu2  ;;  %v7702_v9 = vpop.f32.mrf.mxu1 }
 0x59c   : > { %v8242_v56 = vadd.f32 %v8206_v53, %v8140_v42  ;;  %v7285_v52 = vpop.f32.mrf.mxu0  ;;  %v7800_v51 = vadd.f32 %v7764_v1, %v7702_v9  ;;  %v6806_v59 = vpop.f32.mrf.mxu3  ;;  %v7331_v11 = vld [vmem:[#allocation4 + $0xf8] sm:$0xff]  ;;  %v9025_v42 = vsel %vm3708_vm6, %v9022_v36, %v9024_v3  ;;  %v9915_v9 = vrot.slane %v9913_v10, 3 }
 0x59d   : > { %v7366_v27 = vadd.f32 %v7330_v23, %v7285_v52  ;;  %6848 = vst.msk [vmem:[#allocation4 + $0x100] sm:$0xff] %vm1441_vm5, %v6806_v59  ;;  %v16551_v53 = vld [vmem:[#allocation3 + $0x20] sm:$0xff]  ;;  %v9904_v1 = vrot.slane %v9902_v28, 2  ;;  %v8516_v52 = vrot.slane %v8514_v15, 1  ;;  %v8519_v23 = vrot.slane %v8517_v60, 2  ;;  %v8769_v60 = vld [vmem:[#allocation4 + $0x8] sm:$0xff] }
 0x59e   : > { %8278 = vst.msk [vmem:[#allocation4 + $0x80] sm:$0xff] %vm1441_vm5, %v8242_v56  ;;  %v8208_v33 = vld [vmem:[#allocation4 + $0x90] sm:$0xff]  ;;  %v9907_v56 = vrot.slane %v9905_v40, 3  ;;  %v9459_v5 = vrot.slane %v16551_v53, 2 }
 0x59f   : > { %7836 = vst.msk [vmem:[#allocation4 + $0x98] sm:$0xff] %vm1441_vm5, %v7800_v51  ;;  %12863 = vmatmul.msk.bf16.gmra.mxu0 %vm1441_vm5, %v9023_v22  ;;  %v16560_v62 = vor.u32 %v8519_v23, %v8516_v52  ;;  %v13551_v52 = vld [vmem:[#allocation3 + $0x28] sm:$0xff]  ;;  %v13499_v23 = vld [vmem:[#allocation3 + $0x60] sm:$0xff] }
 0x5a0   : > { %7402 = vst.msk [vmem:[#allocation4 + $0xf0] sm:$0xff] %vm1441_vm5, %v7366_v27  ;;  %v16558_v27 = vor.u32 %v9915_v9, %v9912_v57  ;;  %v9908_v21 = vor.u32 %v9907_v56, %v9904_v1  ;;  %v16605_v1 = vld [vmem:[#allocation3 + $0x50] sm:$0xff] }
 0x5a1   : > { %v8521_v43 = vsel %vm3113_vm7, %v16521_v31, %v16560_v62 }
 0x5a2   : > { %v9917_v16 = vsel %vm4631_vm8, %v9908_v21, %v16558_v27 }
 0x5a3   : > { %v8142_v0 = vpop.f32.mrf.mxu2  ;;  %v7705_v18 = vpop.f32.mrf.mxu1 }
 0x5a4   : > { %v8243_v19 = vadd.f32 %v8207_v2, %v8142_v0  ;;  %v7287_v39 = vpop.f32.mrf.mxu0  ;;  %v7801_v30 = vadd.f32 %v7765_v44, %v7705_v18  ;;  %v6808_v61 = vpop.f32.mrf.mxu3  ;;  %v7332_v7 = vld [vmem:[#allocation4 + $0x100] sm:$0xff]  ;;  %v9460_v0 = vsel %vm3708_vm6, %v9457_v6, %v9459_v5  ;;  %v13550_v18 = vld [vmem:[#allocation3 + $0x20] sm:$0xff]  ;;  %v13498_v6 = vld [vmem:[#allocation3 + $0x58] sm:$0xff] }
 0x5a5   : > { %v7367_v37 = vadd.f32 %v7331_v11, %v7287_v39  ;;  %6849 = vst.msk [vmem:[#allocation4 + $0x108] sm:$0xff] %vm1441_vm5, %v6808_v61  ;;  %v16568_v2 = vld [vmem:[#allocation3 + $0x48] sm:$0xff]  ;;  %v9919_v11 = vshrl.u32 %v13550_v18, 16  ;;  %v9922_v17 = vshll.u32 %v13550_v18, 16  ;;  %v8526_v31 = vshll.u32 %v13498_v6, 16 }
 0x5a6   : > { %8279 = vst.msk [vmem:[#allocation4 + $0x88] sm:$0xff] %vm1441_vm5, %v8243_v19  ;;  %12960 = vmatmul.msk.bf16.vlgmr.msra.gmra.mxu1 %vm1441_vm5, %v9458_v8  ;;  %v8209_v36 = vld [vmem:[#allocation4 + $0x98] sm:$0xff]  ;;  %v9026_v44 = vrot.slane %v16568_v2, 2 }
 0x5a7   : > { %7837 = vst.msk [vmem:[#allocation4 + $0xa0] sm:$0xff] %vm1441_vm5, %v7801_v30  ;;  %v9924_v12 = vrot.slane %v9922_v17, 3 }
 0x5a8   : > { %7403 = vst.msk [vmem:[#allocation4 + $0xf8] sm:$0xff] %vm1441_vm5, %v7367_v37  ;;  %12671 = vmatmul.msk.bf16.gmra.mxu2 %vm1441_vm5, %v8024_v63  ;;  %v7768_v37 = vld [vmem:[#allocation4 + $0xb8] sm:$0xff]  ;;  %v9027_v38 = vsel %vm3708_vm6, %v9024_v3, %v9026_v44 }
 0x5a9   : > { %12763 = vmatmul.msk.bf16.gmra.mxu3 %vm1441_vm5, %v8512_v55  ;;  %v8523_v55 = vshrl.u32 %v13498_v6, 16  ;;  %v16626_v6 = vld [vmem:[#allocation3 + $0x30] sm:$0xff] }
 0x5ab   : > { %v8145_v26 = vpop.f32.mrf.mxu2  ;;  %v7707_v48 = vpop.f32.mrf.mxu1  ;;  %v8525_v10 = vrot.slane %v8523_v55, 1 }
 0x5ac   : > { %v8244_v49 = vadd.f32 %v8208_v33, %v8145_v26  ;;  %v7290_v50 = vpop.f32.mrf.mxu0  ;;  %v7802_v29 = vadd.f32 %v7766_v54, %v7707_v48  ;;  %v6811_v20 = vpop.f32.mrf.mxu3  ;;  %v7333_v22 = vld [vmem:[#allocation4 + $0x108] sm:$0xff]  ;;  %v16588_v26 = vld [vmem:[#allocation3 + $0x28] sm:$0xff]  ;;  %v9921_v33 = vrot.slane %v9919_v11, 2  ;;  %v8528_v48 = vrot.slane %v8526_v31, 2  ;;  %v8771_v31 = vld [vmem:[#allocation4 + $0x18] sm:$0xff] }
 0x5ad   : > { %v7368_v24 = vadd.f32 %v7332_v7, %v7290_v50  ;;  %6850 = vst.msk [vmem:[#allocation4 + $0x110] sm:$0xff] %vm1441_vm5, %v6811_v20  ;;  %v9461_v54 = vrot.slane %v16588_v26, 2  ;;  %v7769_v7 = vld [vmem:[#allocation4 + $0xc0] sm:$0xff] }
 0x5ae   : > { %8280 = vst.msk [vmem:[#allocation4 + $0x90] sm:$0xff] %vm1441_vm5, %v8244_v49  ;;  %v8210_v39 = vld [vmem:[#allocation4 + $0xa0] sm:$0xff]  ;;  %v16595_v50 = vor.u32 %v9924_v12, %v9921_v33  ;;  %v16643_v12 = vld [vmem:[#allocation3 + $0x58] sm:$0xff] }
 0x5af   : > { %7838 = vst.msk [vmem:[#allocation4 + $0xa8] sm:$0xff] %vm1441_vm5, %v7802_v29  ;;  %12864 = vmatmul.msk.bf16.gmra.mxu0 %vm1441_vm5, %v9025_v42  ;;  %v16597_v42 = vor.u32 %v8528_v48, %v8525_v10  ;;  %v9462_v9 = vsel %vm3708_vm6, %v9459_v5, %v9461_v54  ;;  %v9028_v5 = vrot.slane %v16605_v1, 2  ;;  %v13552_v48 = vld [vmem:[#allocation3 + $0x30] sm:$0xff] }
 0x5b0   : > { %7404 = vst.msk [vmem:[#allocation4 + $0x100] sm:$0xff] %vm1441_vm5, %v7368_v24  ;;  %v9926_v56 = vsel %vm4631_vm8, %v16558_v27, %v16595_v50  ;;  %v9931_v27 = vshll.u32 %v13551_v52, 16 }
 0x5b1   : > { %v8530_v53 = vsel %vm3113_vm7, %v16560_v62, %v16597_v42  ;;  %v8535_v62 = vshll.u32 %v13499_v23, 16 }
 0x5b3   : > { %v8147_v51 = vpop.f32.mrf.mxu2  ;;  %v7710_v59 = vpop.f32.mrf.mxu1  ;;  %v8537_v17 = vrot.slane %v8535_v62, 2  ;;  %v8773_v62 = vld [vmem:[#allocation4 + $0x28] sm:$0xff] }
 0x5b4   : > { %v8245_v45 = vadd.f32 %v8209_v36, %v8147_v51  ;;  %v7292_v58 = vpop.f32.mrf.mxu0  ;;  %v7803_v4 = vadd.f32 %v7767_v25, %v7710_v59  ;;  %v6813_v46 = vpop.f32.mrf.mxu3  ;;  %v7334_v8 = vld [vmem:[#allocation4 + $0x110] sm:$0xff]  ;;  %v9928_v59 = vshrl.u32 %v13551_v52, 16 }
 0x5b5   : > { %v7369_v32 = vadd.f32 %v7333_v22, %v7292_v58  ;;  %6851 = vst.msk [vmem:[#allocation4 + $0x118] sm:$0xff] %vm1441_vm5, %v6813_v46 }
 0x5b6   : > { %8281 = vst.msk [vmem:[#allocation4 + $0x98] sm:$0xff] %vm1441_vm5, %v8245_v45  ;;  %12961 = vmatmul.msk.bf16.gmra.mxu1 %vm1441_vm5, %v9460_v0  ;;  %v8211_v35 = vld [vmem:[#allocation4 + $0xa8] sm:$0xff]  ;;  %v8770_v0 = vld [vmem:[#allocation4 + $0x10] sm:$0xff] }
 0x5b7   : > { %7839 = vst.msk [vmem:[#allocation4 + $0xb0] sm:$0xff] %vm1441_vm5, %v7803_v4  ;;  %v7770_v45 = vld [vmem:[#allocation4 + $0xc8] sm:$0xff] }
 0x5b8   : > { %7405 = vst.msk [vmem:[#allocation4 + $0x108] sm:$0xff] %vm1441_vm5, %v7369_v32  ;;  %13062 = vmatmul.msk.bf16.vlgmr.msra.gmra.mxu2 %vm1441_vm5, %v9917_v16  ;;  %v8532_v16 = vshrl.u32 %v13499_v23, 16  ;;  %v16664_v23 = vld [vmem:[#allocation3 + $0x38] sm:$0xff] }
 0x5b9   : > { %12764 = vmatmul.msk.bf16.gmra.mxu3 %vm1441_vm5, %v8521_v43  ;;  %v9029_v43 = vsel %vm3708_vm6, %v9026_v44, %v9028_v5 }
 0x5ba   : > { %v8534_v11 = vrot.slane %v8532_v16, 1 }
 0x5bb   : > { %v8150_v19 = vpop.f32.mrf.mxu2  ;;  %v7712_v30 = vpop.f32.mrf.mxu1 }
 0x5bc   : > { %v8246_v61 = vadd.f32 %v8210_v39, %v8150_v19  ;;  %v7295_v34 = vpop.f32.mrf.mxu0  ;;  %v7804_v63 = vadd.f32 %v7768_v37, %v7712_v30  ;;  %v8678_v14 = vpop.f32.mrf.mxu3  ;;  %v7335_v29 = vld [vmem:[#allocation4 + $0x118] sm:$0xff]  ;;  %v9930_v19 = vrot.slane %v9928_v59, 2  ;;  %v9933_v39 = vrot.slane %v9931_v27, 3 }
 0x5bd   : > { %v7370_v47 = vadd.f32 %v7334_v8, %v7295_v34  ;;  %v8804_v41 = vadd.f32 %v8768_v13, %v8678_v14  ;;  %v9463_v30 = vrot.slane %v16626_v6, 2  ;;  %v7771_v34 = vld [vmem:[#allocation4 + $0xd0] sm:$0xff] }
 0x5be   : > { %8282 = vst.msk [vmem:[#allocation4 + $0xa0] sm:$0xff] %vm1441_vm5, %v8246_v61  ;;  %v8212_v36 = vld [vmem:[#allocation4 + $0xb0] sm:$0xff]  ;;  %v16633_v61 = vor.u32 %v9933_v39, %v9930_v19  ;;  %v16681_v39 = vld [vmem:[#allocation3 + $0x60] sm:$0xff] }
 0x5bf   : > { %7840 = vst.msk [vmem:[#allocation4 + $0xb8] sm:$0xff] %vm1441_vm5, %v7804_v63  ;;  %12865 = vmatmul.msk.bf16.gmra.mxu0 %vm1441_vm5, %v9027_v38  ;;  %v9464_v33 = vsel %vm3708_vm6, %v9461_v54, %v9463_v30  ;;  %v13500_v54 = vld [vmem:[#allocation3 + $0x68] sm:$0xff] }
 0x5c0   : > { %7406 = vst.msk [vmem:[#allocation4 + $0x110] sm:$0xff] %vm1441_vm5, %v7370_v47  ;;  %v9935_v10 = vsel %vm4631_vm8, %v16595_v50, %v16633_v61  ;;  %v9940_v50 = vshll.u32 %v13552_v48, 16 }
 0x5c1   : > { %8840 = vst.msk [vmem:[#allocation4] sm:$0xff] %vm1441_vm5, %v8804_v41  ;;  %v16635_v41 = vor.u32 %v8537_v17, %v8534_v11  ;;  %v13553_v17 = vld [vmem:[#allocation3 + $0x38] sm:$0xff] }
 0x5c3   : > { %v8152_v49 = vpop.f32.mrf.mxu2  ;;  %v7715_v3 = vpop.f32.mrf.mxu1  ;;  %v8539_v26 = vsel %vm3113_vm7, %v16597_v42, %v16635_v41  ;;  %v8544_v42 = vshll.u32 %v13500_v54, 16 }
 0x5c4   : > { %v8247_v28 = vadd.f32 %v8211_v35, %v8152_v49  ;;  %v7297_v40 = vpop.f32.mrf.mxu0  ;;  %v7805_v24 = vadd.f32 %v7769_v7, %v7715_v3  ;;  %v8680_v15 = vpop.f32.mrf.mxu3  ;;  %v9030_v49 = vrot.slane %v16643_v12, 2  ;;  %v9937_v7 = vshrl.u32 %v13552_v48, 16 }
 0x5c5   : > { %v7371_v20 = vadd.f32 %v7335_v29, %v7297_v40  ;;  %v8805_v57 = vadd.f32 %v8769_v60, %v8680_v15  ;;  %v7772_v40 = vld [vmem:[#allocation4 + $0xd8] sm:$0xff]  ;;  %v8546_v27 = vrot.slane %v8544_v42, 2 }
 0x5c6   : > { %8283 = vst.msk [vmem:[#allocation4 + $0xa8] sm:$0xff] %vm1441_vm5, %v8247_v28  ;;  %12962 = vmatmul.msk.bf16.gmra.mxu1 %vm1441_vm5, %v9462_v9  ;;  %v8213_v2 = vld [vmem:[#allocation4 + $0xb8] sm:$0xff]  ;;  %v8772_v9 = vld [vmem:[#allocation4 + $0x20] sm:$0xff] }
 0x5c7   : > { %7841 = vst.msk [vmem:[#allocation4 + $0xc0] sm:$0xff] %vm1441_vm5, %v7805_v24  ;;  %v8775_v42 = vld [vmem:[#allocation4 + $0x38] sm:$0xff] }
 0x5c8   : > { %7407 = vst.msk [vmem:[#allocation4 + $0x118] sm:$0xff] %vm1441_vm5, %v7371_v20  ;;  %13063 = vmatmul.msk.bf16.gmra.mxu2 %vm1441_vm5, %v9926_v56  ;;  %v9213_v4 = vld [vmem:[#allocation4] sm:$0xff]  ;;  %v8541_v56 = vshrl.u32 %v13500_v54, 16  ;;  %v16702_v54 = vld [vmem:[#allocation3 + $0x40] sm:$0xff] }
 0x5c9   : > { %8841 = vst.msk [vmem:[#allocation4 + $0x8] sm:$0xff] %vm1441_vm5, %v8805_v57  ;;  %12765 = vmatmul.msk.bf16.gmra.mxu3 %vm1441_vm5, %v8530_v53  ;;  %v9031_v53 = vsel %vm3708_vm6, %v9028_v5, %v9030_v49 }
 0x5ca   : > { %v8543_v59 = vrot.slane %v8541_v56, 1 }
 0x5cb   : > { %v8155_v51 = vpop.f32.mrf.mxu2  ;;  %v7717_v25 = vpop.f32.mrf.mxu1 }
 0x5cc   : > { %v8248_v58 = vadd.f32 %v8212_v36, %v8155_v51  ;;  %v9123_v22 = vpop.f32.mrf.mxu0  ;;  %v7806_v32 = vadd.f32 %v7770_v45, %v7717_v25  ;;  %v8683_v21 = vpop.f32.mrf.mxu3  ;;  %v9939_v51 = vrot.slane %v9937_v7, 2  ;;  %v9942_v36 = vrot.slane %v9940_v50, 3 }
 0x5cd   : > { %v9249_v46 = vadd.f32 %v9213_v4, %v9123_v22  ;;  %v8806_v18 = vadd.f32 %v8770_v0, %v8683_v21  ;;  %v9465_v25 = vrot.slane %v16664_v23, 2  ;;  %v7773_v22 = vld [vmem:[#allocation4 + $0xe0] sm:$0xff] }
 0x5ce   : > { %8284 = vst.msk [vmem:[#allocation4 + $0xb0] sm:$0xff] %vm1441_vm5, %v8248_v58  ;;  %v8214_v3 = vld [vmem:[#allocation4 + $0xc0] sm:$0xff]  ;;  %v16671_v58 = vor.u32 %v9942_v36, %v9939_v51 }
 0x5cf   : > { %7842 = vst.msk [vmem:[#allocation4 + $0xc8] sm:$0xff] %vm1441_vm5, %v7806_v32  ;;  %12866 = vmatmul.msk.bf16.gmra.mxu0 %vm1441_vm5, %v9029_v43  ;;  %v9466_v19 = vsel %vm3708_vm6, %v9463_v30, %v9465_v25  ;;  %v13501_v30 = vld [vmem:[#allocation3 + $0x70] sm:$0xff]  ;;  %v16719_v36 = vld [vmem:[#allocation3 + $0x68] sm:$0xff] }
 0x5d0   : > { %9285 = vst.msk [vmem:[#allocation4] sm:$0xff] %vm1441_vm5, %v9249_v46  ;;  %v9214_v47 = vld [vmem:[#allocation4 + $0x8] sm:$0xff]  ;;  %v9944_v11 = vsel %vm4631_vm8, %v16633_v61, %v16671_v58  ;;  %v9949_v61 = vshll.u32 %v13553_v17, 16 }
 0x5d1   : > { %8842 = vst.msk [vmem:[#allocation4 + $0x10] sm:$0xff] %vm1441_vm5, %v8806_v18  ;;  %v16673_v18 = vor.u32 %v8546_v27, %v8543_v59  ;;  %v13554_v27 = vld [vmem:[#allocation3 + $0x40] sm:$0xff] }
 0x5d3   : > { %v8157_v37 = vpop.f32.mrf.mxu2  ;;  %v7720_v44 = vpop.f32.mrf.mxu1  ;;  %v8548_v6 = vsel %vm3113_vm7, %v16635_v41, %v16673_v18  ;;  %v8553_v41 = vshll.u32 %v13501_v30, 16 }
 0x5d4   : > { %v8249_v8 = vadd.f32 %v8213_v2, %v8157_v37  ;;  %v9125_v63 = vpop.f32.mrf.mxu0  ;;  %v7807_v14 = vadd.f32 %v7771_v34, %v7720_v44  ;;  %v8685_v55 = vpop.f32.mrf.mxu3  ;;  %v9032_v37 = vrot.slane %v16681_v39, 2  ;;  %v9946_v34 = vshrl.u32 %v13553_v17, 16 }
 0x5d5   : > { %v9250_v13 = vadd.f32 %v9214_v47, %v9125_v63  ;;  %v8807_v38 = vadd.f32 %v8771_v31, %v8685_v55  ;;  %v7774_v63 = vld [vmem:[#allocation4 + $0xe8] sm:$0xff]  ;;  %v8555_v50 = vrot.slane %v8553_v41, 2 }
 0x5d6   : > { %8285 = vst.msk [vmem:[#allocation4 + $0xb8] sm:$0xff] %vm1441_vm5, %v8249_v8  ;;  %12963 = vmatmul.msk.bf16.gmra.mxu1 %vm1441_vm5, %v9464_v33  ;;  %v8215_v1 = vld [vmem:[#allocation4 + $0xc8] sm:$0xff]  ;;  %v8774_v33 = vld [vmem:[#allocation4 + $0x30] sm:$0xff] }
 0x5d7   : > { %7843 = vst.msk [vmem:[#allocation4 + $0xd0] sm:$0xff] %vm1441_vm5, %v7807_v14  ;;  %v8777_v41 = vld [vmem:[#allocation4 + $0x48] sm:$0xff] }
 0x5d8   : > { %9286 = vst.msk [vmem:[#allocation4 + $0x8] sm:$0xff] %vm1441_vm5, %v9250_v13  ;;  %13064 = vmatmul.msk.bf16.gmra.mxu2 %vm1441_vm5, %v9935_v10  ;;  %v9215_v20 = vld [vmem:[#allocation4 + $0x10] sm:$0xff]  ;;  %v8550_v10 = vshrl.u32 %v13501_v30, 16  ;;  %v16740_v30 = vld [vmem:[#allocation3 + $0x48] sm:$0xff] }
 0x5d9   : > { %8843 = vst.msk [vmem:[#allocation4 + $0x18] sm:$0xff] %vm1441_vm5, %v8807_v38  ;;  %12766 = vmatmul.msk.bf16.gmra.mxu3 %vm1441_vm5, %v8539_v26  ;;  %v9033_v26 = vsel %vm3708_vm6, %v9030_v49, %v9032_v37 }
 0x5da   : > { %v8552_v7 = vrot.slane %v8550_v10, 1 }
 0x5db   : > { %v8160_v35 = vpop.f32.mrf.mxu2  ;;  %v7722_v28 = vpop.f32.mrf.mxu1 }
 0x5dc   : > { %v8250_v29 = vadd.f32 %v8214_v3, %v8160_v35  ;;  %v9128_v24 = vpop.f32.mrf.mxu0  ;;  %v7808_v15 = vadd.f32 %v7772_v40, %v7722_v28  ;;  %v8688_v57 = vpop.f32.mrf.mxu3  ;;  %v9948_v35 = vrot.slane %v9946_v34, 2  ;;  %v9951_v3 = vrot.slane %v9949_v61, 3 }
 0x5dd   : > { %v9251_v60 = vadd.f32 %v9215_v20, %v9128_v24  ;;  %v8808_v52 = vadd.f32 %v8772_v9, %v8688_v57  ;;  %v9467_v28 = vrot.slane %v16702_v54, 2  ;;  %v7775_v24 = vld [vmem:[#allocation4 + $0xf0] sm:$0xff] }
 0x5de   : > { %8286 = vst.msk [vmem:[#allocation4 + $0xc0] sm:$0xff] %vm1441_vm5, %v8250_v29  ;;  %v8216_v44 = vld [vmem:[#allocation4 + $0xd0] sm:$0xff]  ;;  %v16709_v29 = vor.u32 %v9951_v3, %v9948_v35  ;;  %v16757_v3 = vld [vmem:[#allocation3 + $0x70] sm:$0xff] }
 0x5df   : > { %7844 = vst.msk [vmem:[#allocation4 + $0xd8] sm:$0xff] %vm1441_vm5, %v7808_v15  ;;  %12867 = vmatmul.msk.bf16.gmra.mxu0 %vm1441_vm5, %v9031_v53  ;;  %v9468_v51 = vsel %vm3708_vm6, %v9465_v25, %v9467_v28  ;;  %v13502_v25 = vld [vmem:[#allocation3 + $0x78] sm:$0xff] }
 0x5e0   : > { %9287 = vst.msk [vmem:[#allocation4 + $0x10] sm:$0xff] %vm1441_vm5, %v9251_v60  ;;  %v9216_v46 = vld [vmem:[#allocation4 + $0x18] sm:$0xff]  ;;  %v9953_v59 = vsel %vm4631_vm8, %v16671_v58, %v16709_v29  ;;  %v9958_v58 = vshll.u32 %v13554_v27, 16 }
 0x5e1   : > { %8844 = vst.msk [vmem:[#allocation4 + $0x20] sm:$0xff] %vm1441_vm5, %v8808_v52  ;;  %v16711_v52 = vor.u32 %v8555_v50, %v8552_v7  ;;  %v13555_v50 = vld [vmem:[#allocation3 + $0x48] sm:$0xff] }
 0x5e3   : > { %v8162_v45 = vpop.f32.mrf.mxu2  ;;  %v7725_v5 = vpop.f32.mrf.mxu1  ;;  %v8557_v23 = vsel %vm3113_vm7, %v16673_v18, %v16711_v52  ;;  %v8562_v18 = vshll.u32 %v13502_v25, 16 }
 0x5e4   : > { %v8251_v4 = vadd.f32 %v8215_v1, %v8162_v45  ;;  %v9130_v32 = vpop.f32.mrf.mxu0  ;;  %v7809_v21 = vadd.f32 %v7773_v22, %v7725_v5  ;;  %v8690_v16 = vpop.f32.mrf.mxu3  ;;  %v9034_v45 = vrot.slane %v16719_v36, 2  ;;  %v9955_v22 = vshrl.u32 %v13554_v27, 16 }
 0x5e5   : > { %v9252_v0 = vadd.f32 %v9216_v46, %v9130_v32  ;;  %v8809_v43 = vadd.f32 %v8773_v62, %v8690_v16  ;;  %v7776_v32 = vld [vmem:[#allocation4 + $0xf8] sm:$0xff]  ;;  %v8564_v61 = vrot.slane %v8562_v18, 2 }
 0x5e6   : > { %8287 = vst.msk [vmem:[#allocation4 + $0xc8] sm:$0xff] %vm1441_vm5, %v8251_v4  ;;  %12964 = vmatmul.msk.bf16.gmra.mxu1 %vm1441_vm5, %v9466_v19  ;;  %v8217_v12 = vld [vmem:[#allocation4 + $0xd8] sm:$0xff]  ;;  %v8776_v19 = vld [vmem:[#allocation4 + $0x40] sm:$0xff] }
 0x5e7   : > { %7845 = vst.msk [vmem:[#allocation4 + $0xe0] sm:$0xff] %vm1441_vm5, %v7809_v21  ;;  %v8779_v18 = vld [vmem:[#allocation4 + $0x58] sm:$0xff] }
 0x5e8   : > { %9288 = vst.msk [vmem:[#allocation4 + $0x18] sm:$0xff] %vm1441_vm5, %v9252_v0  ;;  %13065 = vmatmul.msk.bf16.gmra.mxu2 %vm1441_vm5, %v9944_v11  ;;  %v9217_v13 = vld [vmem:[#allocation4 + $0x20] sm:$0xff]  ;;  %v8559_v11 = vshrl.u32 %v13502_v25, 16  ;;  %v16778_v25 = vld [vmem:[#allocation3 + $0x50] sm:$0xff] }
 0x5e9   : > { %8845 = vst.msk [vmem:[#allocation4 + $0x28] sm:$0xff] %vm1441_vm5, %v8809_v43  ;;  %12767 = vmatmul.msk.bf16.gmra.mxu3 %vm1441_vm5, %v8548_v6  ;;  %v9035_v6 = vsel %vm3708_vm6, %v9032_v37, %v9034_v45 }
 0x5ea   : > { %v8561_v34 = vrot.slane %v8559_v11, 1 }
 0x5eb   : > { %v8165_v2 = vpop.f32.mrf.mxu2  ;;  %v7727_v8 = vpop.f32.mrf.mxu1 }
 0x5ec   : > { %v8252_v47 = vadd.f32 %v8216_v44, %v8165_v2  ;;  %v9133_v14 = vpop.f32.mrf.mxu0  ;;  %v7810_v55 = vadd.f32 %v7774_v63, %v7727_v8  ;;  %v8693_v38 = vpop.f32.mrf.mxu3  ;;  %v9957_v2 = vrot.slane %v9955_v22, 2  ;;  %v9960_v44 = vrot.slane %v9958_v58, 3 }
 0x5ed   : > { %v9253_v31 = vadd.f32 %v9217_v13, %v9133_v14  ;;  %v8810_v48 = vadd.f32 %v8774_v33, %v8693_v38  ;;  %v9469_v8 = vrot.slane %v16740_v30, 2  ;;  %v7777_v14 = vld [vmem:[#allocation4 + $0x100] sm:$0xff] }
 0x5ee   : > { %8288 = vst.msk [vmem:[#allocation4 + $0xd0] sm:$0xff] %vm1441_vm5, %v8252_v47  ;;  %v8218_v5 = vld [vmem:[#allocation4 + $0xe0] sm:$0xff]  ;;  %v16747_v47 = vor.u32 %v9960_v44, %v9957_v2  ;;  %v16795_v44 = vld [vmem:[#allocation3 + $0x78] sm:$0xff] }
 0x5ef   : > { %7846 = vst.msk [vmem:[#allocation4 + $0xe8] sm:$0xff] %vm1441_vm5, %v7810_v55  ;;  %12868 = vmatmul.msk.bf16.gmra.mxu0 %vm1441_vm5, %v9033_v26  ;;  %v9470_v35 = vsel %vm3708_vm6, %v9467_v28, %v9469_v8  ;;  %v13503_v28 = vld [vmem:[#allocation3 + $0x80] sm:$0xff] }
 0x5f0   : > { %9289 = vst.msk [vmem:[#allocation4 + $0x20] sm:$0xff] %vm1441_vm5, %v9253_v31  ;;  %v9218_v60 = vld [vmem:[#allocation4 + $0x28] sm:$0xff]  ;;  %v9962_v7 = vsel %vm4631_vm8, %v16709_v29, %v16747_v47  ;;  %v9967_v29 = vshll.u32 %v13555_v50, 16 }
 0x5f1   : > { %8846 = vst.msk [vmem:[#allocation4 + $0x30] sm:$0xff] %vm1441_vm5, %v8810_v48  ;;  %v16749_v48 = vor.u32 %v8564_v61, %v8561_v34  ;;  %v13556_v61 = vld [vmem:[#allocation3 + $0x50] sm:$0xff] }
 0x5f3   : > { %v8167_v40 = vpop.f32.mrf.mxu2  ;;  %v7730_v49 = vpop.f32.mrf.mxu1  ;;  %v8566_v54 = vsel %vm3113_vm7, %v16711_v52, %v16749_v48  ;;  %v8571_v52 = vshll.u32 %v13503_v28, 16 }
 0x5f4   : > { %v8253_v20 = vadd.f32 %v8217_v12, %v8167_v40  ;;  %v9135_v15 = vpop.f32.mrf.mxu0  ;;  %v7811_v57 = vadd.f32 %v7775_v24, %v7730_v49  ;;  %v8695_v56 = vpop.f32.mrf.mxu3  ;;  %v9036_v40 = vrot.slane %v16757_v3, 2  ;;  %v9964_v24 = vshrl.u32 %v13555_v50, 16 }
 0x5f5   : > { %v9254_v9 = vadd.f32 %v9218_v60, %v9135_v15  ;;  %v8811_v53 = vadd.f32 %v8775_v42, %v8695_v56  ;;  %v7778_v15 = vld [vmem:[#allocation4 + $0x108] sm:$0xff]  ;;  %v8573_v58 = vrot.slane %v8571_v52, 2 }
 0x5f6   : > { %8289 = vst.msk [vmem:[#allocation4 + $0xd8] sm:$0xff] %vm1441_vm5, %v8253_v20  ;;  %12965 = vmatmul.msk.bf16.gmra.mxu1 %vm1441_vm5, %v9468_v51  ;;  %v8219_v39 = vld [vmem:[#allocation4 + $0xe8] sm:$0xff]  ;;  %v8778_v51 = vld [vmem:[#allocation4 + $0x50] sm:$0xff] }
 0x5f7   : > { %7847 = vst.msk [vmem:[#allocation4 + $0xf0] sm:$0xff] %vm1441_vm5, %v7811_v57  ;;  %v8781_v52 = vld [vmem:[#allocation4 + $0x68] sm:$0xff] }
 0x5f8   : > { %9290 = vst.msk [vmem:[#allocation4 + $0x28] sm:$0xff] %vm1441_vm5, %v9254_v9  ;;  %13066 = vmatmul.msk.bf16.gmra.mxu2 %vm1441_vm5, %v9953_v59  ;;  %v9219_v0 = vld [vmem:[#allocation4 + $0x30] sm:$0xff]  ;;  %v8568_v59 = vshrl.u32 %v13503_v28, 16 }
 0x5f9   : > { %8847 = vst.msk [vmem:[#allocation4 + $0x38] sm:$0xff] %vm1441_vm5, %v8811_v53  ;;  %12768 = vmatmul.msk.bf16.gmra.mxu3 %vm1441_vm5, %v8557_v23  ;;  %v9037_v23 = vsel %vm3708_vm6, %v9034_v45, %v9036_v40  ;;  %v16816_v28 = vld [vmem:[#allocation3 + $0x58] sm:$0xff] }
 0x5fa   : > { %v8570_v22 = vrot.slane %v8568_v59, 1 }
 0x5fb   : > { %v8170_v1 = vpop.f32.mrf.mxu2  ;;  %v7732_v4 = vpop.f32.mrf.mxu1 }
 0x5fc   : > { %v8254_v46 = vadd.f32 %v8218_v5, %v8170_v1  ;;  %v9138_v21 = vpop.f32.mrf.mxu0  ;;  %v7812_v16 = vadd.f32 %v7776_v32, %v7732_v4  ;;  %v8698_v43 = vpop.f32.mrf.mxu3  ;;  %v9966_v1 = vrot.slane %v9964_v24, 2  ;;  %v9969_v5 = vrot.slane %v9967_v29, 3 }
 0x5fd   : > { %v9255_v62 = vadd.f32 %v9219_v0, %v9138_v21  ;;  %v8812_v17 = vadd.f32 %v8776_v19, %v8698_v43  ;;  %v9471_v4 = vrot.slane %v16778_v25, 2  ;;  %v7779_v21 = vld [vmem:[#allocation4 + $0x110] sm:$0xff] }
 0x5fe   : > { %8290 = vst.msk [vmem:[#allocation4 + $0xe0] sm:$0xff] %vm1441_vm5, %v8254_v46  ;;  %v8220_v49 = vld [vmem:[#allocation4 + $0xf0] sm:$0xff]  ;;  %v16785_v46 = vor.u32 %v9969_v5, %v9966_v1  ;;  %v16833_v5 = vld [vmem:[#allocation3 + $0x80] sm:$0xff] }
 0x5ff   : > { %7848 = vst.msk [vmem:[#allocation4 + $0xf8] sm:$0xff] %vm1441_vm5, %v7812_v16  ;;  %12869 = vmatmul.msk.bf16.gmra.mxu0 %vm1441_vm5, %v9035_v6  ;;  %v9472_v2 = vsel %vm3708_vm6, %v9469_v8, %v9471_v4  ;;  %v13504_v8 = vld [vmem:[#allocation3 + $0x88] sm:$0xff] }
 0x600   : > { %9291 = vst.msk [vmem:[#allocation4 + $0x30] sm:$0xff] %vm1441_vm5, %v9255_v62  ;;  %v9220_v31 = vld [vmem:[#allocation4 + $0x38] sm:$0xff]  ;;  %v9971_v34 = vsel %vm4631_vm8, %v16747_v47, %v16785_v46  ;;  %v9976_v47 = vshll.u32 %v13556_v61, 16 }
 0x601   : > { %8848 = vst.msk [vmem:[#allocation4 + $0x40] sm:$0xff] %vm1441_vm5, %v8812_v17  ;;  %v16787_v17 = vor.u32 %v8573_v58, %v8570_v22  ;;  %v13557_v58 = vld [vmem:[#allocation3 + $0x58] sm:$0xff] }
 0x603   : > { %v8172_v63 = vpop.f32.mrf.mxu2  ;;  %v7735_v37 = vpop.f32.mrf.mxu1  ;;  %v8575_v30 = vsel %vm3113_vm7, %v16749_v48, %v16787_v17  ;;  %v8580_v48 = vshll.u32 %v13504_v8, 16 }
 0x604   : > { %v8255_v13 = vadd.f32 %v8219_v39, %v8172_v63  ;;  %v9140_v55 = vpop.f32.mrf.mxu0  ;;  %v7813_v38 = vadd.f32 %v7777_v14, %v7735_v37  ;;  %v8700_v10 = vpop.f32.mrf.mxu3  ;;  %v9038_v63 = vrot.slane %v16795_v44, 2  ;;  %v9973_v14 = vshrl.u32 %v13556_v61, 16 }
 0x605   : > { %v9256_v33 = vadd.f32 %v9220_v31, %v9140_v55  ;;  %v8813_v26 = vadd.f32 %v8777_v41, %v8700_v10  ;;  %v7780_v55 = vld [vmem:[#allocation4 + $0x118] sm:$0xff]  ;;  %v8582_v29 = vrot.slane %v8580_v48, 2 }
 0x606   : > { %8291 = vst.msk [vmem:[#allocation4 + $0xe8] sm:$0xff] %vm1441_vm5, %v8255_v13  ;;  %12966 = vmatmul.msk.bf16.gmra.mxu1 %vm1441_vm5, %v9470_v35  ;;  %v8221_v36 = vld [vmem:[#allocation4 + $0xf8] sm:$0xff]  ;;  %v8780_v35 = vld [vmem:[#allocation4 + $0x60] sm:$0xff] }
 0x607   : > { %7849 = vst.msk [vmem:[#allocation4 + $0x100] sm:$0xff] %vm1441_vm5, %v7813_v38 }
 0x608   : > { %9292 = vst.msk [vmem:[#allocation4 + $0x38] sm:$0xff] %vm1441_vm5, %v9256_v33  ;;  %13067 = vmatmul.msk.bf16.gmra.mxu2 %vm1441_vm5, %v9962_v7  ;;  %v9221_v9 = vld [vmem:[#allocation4 + $0x40] sm:$0xff]  ;;  %v8577_v7 = vshrl.u32 %v13504_v8, 16  ;;  %v16854_v8 = vld [vmem:[#allocation3 + $0x60] sm:$0xff] }
 0x609   : > { %8849 = vst.msk [vmem:[#allocation4 + $0x48] sm:$0xff] %vm1441_vm5, %v8813_v26  ;;  %12769 = vmatmul.msk.bf16.gmra.mxu3 %vm1441_vm5, %v8566_v54  ;;  %v9039_v54 = vsel %vm3708_vm6, %v9036_v40, %v9038_v63 }
 0x60a   : > { %v8579_v24 = vrot.slane %v8577_v7, 1 }
 0x60b   : > { %v8175_v12 = vpop.f32.mrf.mxu2  ;;  %v7737_v20 = vpop.f32.mrf.mxu1 }
 0x60c   : > { %v8256_v60 = vadd.f32 %v8220_v49, %v8175_v12  ;;  %v9143_v57 = vpop.f32.mrf.mxu0  ;;  %v7814_v56 = vadd.f32 %v7778_v15, %v7737_v20  ;;  %v8703_v53 = vpop.f32.mrf.mxu3  ;;  %v9975_v12 = vrot.slane %v9973_v14, 2  ;;  %v9978_v49 = vrot.slane %v9976_v47, 3 }
 0x60d   : > { %v9257_v42 = vadd.f32 %v9221_v9, %v9143_v57  ;;  %v8814_v27 = vadd.f32 %v8778_v51, %v8703_v53  ;;  %v9473_v20 = vrot.slane %v16816_v28, 2  ;;  %v9658_v9 = vld [vmem:[#allocation4] sm:$0xff] }
 0x60e   : > { %8292 = vst.msk [vmem:[#allocation4 + $0xf0] sm:$0xff] %vm1441_vm5, %v8256_v60  ;;  %v8222_v37 = vld [vmem:[#allocation4 + $0x100] sm:$0xff]  ;;  %v16823_v60 = vor.u32 %v9978_v49, %v9975_v12 }
 0x60f   : > { %7850 = vst.msk [vmem:[#allocation4 + $0x108] sm:$0xff] %vm1441_vm5, %v7814_v56  ;;  %12870 = vmatmul.msk.bf16.gmra.mxu0 %vm1441_vm5, %v9037_v23  ;;  %v9474_v1 = vsel %vm3708_vm6, %v9471_v4, %v9473_v20  ;;  %v13505_v4 = vld [vmem:[#allocation3 + $0x90] sm:$0xff] }
 0x610   : > { %9293 = vst.msk [vmem:[#allocation4 + $0x40] sm:$0xff] %vm1441_vm5, %v9257_v42  ;;  %v9222_v62 = vld [vmem:[#allocation4 + $0x48] sm:$0xff]  ;;  %v9980_v22 = vsel %vm4631_vm8, %v16785_v46, %v16823_v60  ;;  %v9985_v46 = vshll.u32 %v13557_v58, 16 }
 0x611   : > { %8850 = vst.msk [vmem:[#allocation4 + $0x50] sm:$0xff] %vm1441_vm5, %v8814_v27  ;;  %v16825_v27 = vor.u32 %v8582_v29, %v8579_v24  ;;  %v16871_v29 = vld [vmem:[#allocation3 + $0x88] sm:$0xff] }
 0x613   : > { %v8177_v32 = vpop.f32.mrf.mxu2  ;;  %v7740_v45 = vpop.f32.mrf.mxu1  ;;  %v8584_v25 = vsel %vm3113_vm7, %v16787_v17, %v16825_v27  ;;  %v8589_v17 = vshll.u32 %v13505_v4, 16 }
 0x614   : > { %v8257_v0 = vadd.f32 %v8221_v36, %v8177_v32  ;;  %v9145_v16 = vpop.f32.mrf.mxu0  ;;  %v7815_v43 = vadd.f32 %v7779_v21, %v7740_v45  ;;  %v8705_v11 = vpop.f32.mrf.mxu3  ;;  %v9040_v32 = vrot.slane %v16833_v5, 2  ;;  %v9982_v21 = vshrl.u32 %v13557_v58, 16  ;;  %v8784_v58 = vld [vmem:[#allocation4 + $0x80] sm:$0xff] }
 0x615   : > { %v9258_v19 = vadd.f32 %v9222_v62, %v9145_v16  ;;  %v8815_v6 = vadd.f32 %v8779_v18, %v8705_v11  ;;  %v9659_v62 = vld [vmem:[#allocation4 + $0x8] sm:$0xff]  ;;  %v8591_v47 = vrot.slane %v8589_v17, 2 }
 0x616   : > { %8293 = vst.msk [vmem:[#allocation4 + $0xf8] sm:$0xff] %vm1441_vm5, %v8257_v0  ;;  %12967 = vmatmul.msk.bf16.gmra.mxu1 %vm1441_vm5, %v9472_v2  ;;  %v8223_v3 = vld [vmem:[#allocation4 + $0x108] sm:$0xff]  ;;  %v8782_v2 = vld [vmem:[#allocation4 + $0x70] sm:$0xff] }
 0x617   : > { %7851 = vst.msk [vmem:[#allocation4 + $0x110] sm:$0xff] %vm1441_vm5, %v7815_v43 }
 0x618   : > { %9294 = vst.msk [vmem:[#allocation4 + $0x48] sm:$0xff] %vm1441_vm5, %v9258_v19  ;;  %13068 = vmatmul.msk.bf16.gmra.mxu2 %vm1441_vm5, %v9971_v34  ;;  %v9223_v33 = vld [vmem:[#allocation4 + $0x50] sm:$0xff]  ;;  %v8586_v34 = vshrl.u32 %v13505_v4, 16 }
 0x619   : > { %8851 = vst.msk [vmem:[#allocation4 + $0x58] sm:$0xff] %vm1441_vm5, %v8815_v6  ;;  %12770 = vmatmul.msk.bf16.gmra.mxu3 %vm1441_vm5, %v8575_v30  ;;  %v9041_v30 = vsel %vm3708_vm6, %v9038_v63, %v9040_v32 }
 0x61a   : > { %v8588_v14 = vrot.slane %v8586_v34, 1 }
 0x61b   : > { %v8180_v39 = vpop.f32.mrf.mxu2  ;;  %v7742_v13 = vpop.f32.mrf.mxu1 }
 0x61c   : > { %v8258_v31 = vadd.f32 %v8222_v37, %v8180_v39  ;;  %v9148_v38 = vpop.f32.mrf.mxu0  ;;  %v7816_v10 = vadd.f32 %v7780_v55, %v7742_v13  ;;  %v8708_v26 = vpop.f32.mrf.mxu3  ;;  %v9984_v39 = vrot.slane %v9982_v21, 2  ;;  %v9987_v37 = vrot.slane %v9985_v46, 3  ;;  %v8334_v55 = vld [vmem:[#allocation3 + $0x98] sm:$0x3] }
 0x61d   : > { %v9259_v41 = vadd.f32 %v9223_v33, %v9148_v38  ;;  %v8816_v50 = vadd.f32 %v8780_v35, %v8708_v26  ;;  %v9475_v13 = vrot.slane %v16854_v8, 2  ;;  %v8413_v12 = vunpack.c.l.b16 %v8334_v55 }
 0x61e   : > { %8294 = vst.msk [vmem:[#allocation4 + $0x100] sm:$0xff] %vm1441_vm5, %v8258_v31  ;;  %v8224_v45 = vld [vmem:[#allocation4 + $0x110] sm:$0xff]  ;;  %v16861_v63 = vor.u32 %v9987_v37, %v9984_v39 }
 0x61f   : > { %7852 = vst.msk [vmem:[#allocation4 + $0x118] sm:$0xff] %vm1441_vm5, %v7816_v10  ;;  %12871 = vmatmul.msk.bf16.gmra.mxu0 %vm1441_vm5, %v9039_v54  ;;  %v9660_v10 = vld [vmem:[#allocation4 + $0x10] sm:$0xff]  ;;  %v16863_v54 = vor.u32 %v8591_v47, %v8588_v14  ;;  %v9476_v24 = vsel %vm3708_vm6, %v9473_v20, %v9475_v13  ;;  %v8432_v20 = vpack.c.b16 %v8413_v12, %v8413_v12  ;;  %v16907_v47 = vld [vmem:[#allocation3 + $0x90] sm:$0xff] }
 0x620   : > { %9295 = vst.msk [vmem:[#allocation4 + $0x50] sm:$0xff] %vm1441_vm5, %v9259_v41  ;;  %v9224_v42 = vld [vmem:[#allocation4 + $0x58] sm:$0xff] }
 0x621   : > { %8852 = vst.msk [vmem:[#allocation4 + $0x60] sm:$0xff] %vm1441_vm5, %v8816_v50  ;;  %v8783_v50 = vld [vmem:[#allocation4 + $0x78] sm:$0xff]  ;;  %v8593_v28 = vsel %vm3113_vm7, %v16825_v27, %v16863_v54  ;;  %v8598_v27 = vshll.u32 %v8432_v20, 16 }
 0x623   : > { %v8182_v15 = vpop.f32.mrf.mxu2  ;;  %v9568_v57 = vpop.f32.mrf.mxu1 }
 0x624   : > { %v8259_v40 = vadd.f32 %v8223_v3, %v8182_v15  ;;  %v9150_v56 = vpop.f32.mrf.mxu0  ;;  %v9694_v53 = vadd.f32 %v9658_v9, %v9568_v57  ;;  %v8710_v59 = vpop.f32.mrf.mxu3  ;;  %v9989_v15 = vsel %vm4631_vm8, %v16823_v60, %v16861_v63  ;;  %v13558_v3 = vld [vmem:[#allocation3 + $0x60] sm:$0xff] }
 0x625   : > { %v9260_v51 = vadd.f32 %v9224_v42, %v9150_v56  ;;  %v8817_v23 = vadd.f32 %v8781_v52, %v8710_v59  ;;  %v9991_v56 = vshrl.u32 %v13558_v3, 16  ;;  %v9994_v60 = vshll.u32 %v13558_v3, 16 }
 0x626   : > { %8295 = vst.msk [vmem:[#allocation4 + $0x108] sm:$0xff] %vm1441_vm5, %v8259_v40  ;;  %12968 = vmatmul.msk.bf16.gmra.mxu1 %vm1441_vm5, %v9474_v1  ;;  %v8225_v31 = vld [vmem:[#allocation4 + $0x118] sm:$0xff]  ;;  %v9042_v40 = vrot.slane %v16871_v29, 2 }
 0x627   : > { %9730 = vst.msk [vmem:[#allocation4] sm:$0xff] %vm1441_vm5, %v9694_v53  ;;  %v9661_v53 = vld [vmem:[#allocation4 + $0x18] sm:$0xff]  ;;  %v9993_v21 = vrot.slane %v9991_v56, 2  ;;  %v9996_v46 = vrot.slane %v9994_v60, 3  ;;  %v13086_v56 = vld [vmem:[#allocation3 + $0x10] sm:$0x8] }
 0x628   : > { %9296 = vst.msk [vmem:[#allocation4 + $0x58] sm:$0xff] %vm1441_vm5, %v9260_v51  ;;  %13069 = vmatmul.msk.bf16.gmra.mxu2 %vm1441_vm5, %v9980_v22  ;;  %v9225_v19 = vld [vmem:[#allocation4 + $0x60] sm:$0xff] }
 0x629   : > { %8853 = vst.msk [vmem:[#allocation4 + $0x68] sm:$0xff] %vm1441_vm5, %v8817_v23  ;;  %12771 = vmatmul.msk.bf16.gmra.mxu3 %vm1441_vm5, %v8584_v25  ;;  %v8595_v25 = vshrl.u32 %v8432_v20, 16  ;;  %v8912_v20 = vld [vmem:[#allocation3 + $0x98] sm:$0x3] }
 0x62b   : > { %v8185_v36 = vpop.f32.mrf.mxu2  ;;  %v9570_v16 = vpop.f32.mrf.mxu1 }
 0x62c   : > { %v8260_v0 = vadd.f32 %v8224_v45, %v8185_v36  ;;  %v9153_v43 = vpop.f32.mrf.mxu0  ;;  %v9695_v11 = vadd.f32 %v9659_v62, %v9570_v16  ;;  %v8713_v6 = vpop.f32.mrf.mxu3  ;;  %v9043_v36 = vsel %vm3708_vm6, %v9040_v32, %v9042_v40  ;;  %v16892_v45 = vld [vmem:[#allocation3 + $0x68] sm:$0xff]  ;;  %v8600_v16 = vrot.slane %v8598_v27, 2 }
 0x62d   : > { %v9261_v18 = vadd.f32 %v9225_v19, %v9153_v43  ;;  %v8818_v61 = vadd.f32 %v8782_v2, %v8713_v6  ;;  %v9477_v62 = vrot.slane %v16892_v45, 2  ;;  %v16899_v19 = vor.u32 %v9996_v46, %v9993_v21 }
 0x62e   : > { %8296 = vst.msk [vmem:[#allocation4 + $0x110] sm:$0xff] %vm1441_vm5, %v8260_v0  ;;  %v10236_v9 = vld [vmem:[#allocation4] sm:$0xff]  ;;  %v8597_v0 = vrot.slane %v8595_v25, 1 }
 0x62f   : > { %9731 = vst.msk [vmem:[#allocation4 + $0x8] sm:$0xff] %vm1441_vm5, %v9695_v11  ;;  %12872 = vmatmul.msk.bf16.gmra.mxu0 %vm1441_vm5, %v9041_v30  ;;  %v9662_v11 = vld [vmem:[#allocation4 + $0x20] sm:$0xff]  ;;  %v8785_v30 = vld [vmem:[#allocation4 + $0x88] sm:$0xff]  ;;  %v9478_v14 = vsel %vm3708_vm6, %v9475_v13, %v9477_v62  ;;  %v9998_v55 = vsel %vm4631_vm8, %v16861_v63, %v16899_v19  ;;  %v9044_v13 = vrot.slane %v16907_v47, 2 }
 0x630   : > { %9297 = vst.msk [vmem:[#allocation4 + $0x60] sm:$0xff] %vm1441_vm5, %v9261_v18  ;;  %v9226_v26 = vld [vmem:[#allocation4 + $0x68] sm:$0xff]  ;;  %v8601_v39 = vor.u32 %v8600_v16, %v8597_v0 }
 0x631   : > { %8854 = vst.msk [vmem:[#allocation4 + $0x70] sm:$0xff] %vm1441_vm5, %v8818_v61  ;;  %v9663_v63 = vld [vmem:[#allocation4 + $0x28] sm:$0xff] }
 0x632   : > { %v8602_v8 = vsel %vm3113_vm7, %v16863_v54, %v8601_v39 }
 0x633   : > { %v8187_v44 = vpop.f32.mrf.mxu2  ;;  %v9573_v33 = vpop.f32.mrf.mxu1 }
 0x634   : > { %v8261_v38 = vadd.f32 %v8225_v31, %v8187_v44  ;;  %v9155_v41 = vpop.f32.mrf.mxu0  ;;  %v9696_v35 = vadd.f32 %v9660_v10, %v9573_v33  ;;  %v8715_v48 = vpop.f32.mrf.mxu3  ;;  %v13559_v44 = vld [vmem:[#allocation3 + $0x68] sm:$0xff] }
 0x635   : > { %v9262_v7 = vadd.f32 %v9226_v26, %v9155_v41  ;;  %v8819_v49 = vadd.f32 %v8783_v50, %v8715_v48  ;;  %v10000_v33 = vshrl.u32 %v13559_v44, 16  ;;  %v10003_v10 = vshll.u32 %v13559_v44, 16 }
 0x636   : > { %8297 = vst.msk [vmem:[#allocation4 + $0x118] sm:$0xff] %vm1441_vm5, %v8261_v38  ;;  %12969 = vmatmul.msk.bf16.gmra.mxu1 %vm1441_vm5, %v9476_v24  ;;  %v10237_v5 = vld [vmem:[#allocation4 + $0x8] sm:$0xff]  ;;  %v9045_v24 = vsel %vm3708_vm6, %v9042_v40, %v9044_v13  ;;  %v8991_v40 = vunpack.c.l.b16 %v8912_v20 }
 0x637   : > { %9732 = vst.msk [vmem:[#allocation4 + $0x10] sm:$0xff] %vm1441_vm5, %v9696_v35  ;;  %v10002_v3 = vrot.slane %v10000_v33, 2  ;;  %v16967_v33 = vld [vmem:[#allocation3 + $0x20] sm:$0xff] }
 0x638   : > { %9298 = vst.msk [vmem:[#allocation4 + $0x68] sm:$0xff] %vm1441_vm5, %v9262_v7  ;;  %13070 = vmatmul.msk.bf16.gmra.mxu2 %vm1441_vm5, %v9989_v15  ;;  %v9227_v52 = vld [vmem:[#allocation4 + $0x70] sm:$0xff]  ;;  %v16927_v15 = vld [vmem:[#allocation3 + $0x70] sm:$0xff]  ;;  %v9010_v0 = vpack.c.b16 %v8991_v40, %v8991_v40 }
 0x639   : > { %8855 = vst.msk [vmem:[#allocation4 + $0x78] sm:$0xff] %vm1441_vm5, %v8819_v49  ;;  %12772 = vmatmul.msk.bf16.gmra.mxu3 %vm1441_vm5, %v8593_v28  ;;  %v8786_v49 = vld [vmem:[#allocation4 + $0x90] sm:$0xff]  ;;  %v10005_v28 = vrot.slane %v10003_v10, 3  ;;  %v9479_v29 = vrot.slane %v16927_v15, 2 }
 0x63b   : > { %v10146_v57 = vpop.f32.mrf.mxu2  ;;  %v9575_v42 = vpop.f32.mrf.mxu1  ;;  %v9480_v46 = vsel %vm3708_vm6, %v9477_v62, %v9479_v29  ;;  %v9046_v62 = vrot.slane %v9010_v0, 2 }
 0x63c   : > { %v10272_v51 = vadd.f32 %v10236_v9, %v10146_v57  ;;  %v9158_v59 = vpop.f32.mrf.mxu0  ;;  %v9697_v23 = vadd.f32 %v9661_v53, %v9575_v42  ;;  %v8718_v22 = vpop.f32.mrf.mxu3  ;;  %v13568_v57 = vld [vmem:[#allocation3 + $0x10] sm:$0xf0]  ;;  %v16933_v9 = vld [vmem:[#allocation3 + $0x18] sm:$0xff]  ;;  %v16936_v53 = vor.u32 %v10005_v28, %v10002_v3 }
 0x63d   : > { %v9263_v1 = vadd.f32 %v9227_v52, %v9158_v59  ;;  %v8820_v4 = vadd.f32 %v8784_v58, %v8718_v22  ;;  %v9664_v52 = vld [vmem:[#allocation4 + $0x30] sm:$0xff]  ;;  %v9047_v44 = vsel %vm3708_vm6, %v9044_v13, %v9046_v62 }
 0x63e   : > { %10308 = vst.msk [vmem:[#allocation4] sm:$0xff] %vm1441_vm5, %v10272_v51  ;;  %v10238_v38 = vld [vmem:[#allocation4 + $0x10] sm:$0xff]  ;;  %v13087_v51 = vor.u32 %v13568_v57, %v13086_v56  ;;  %v10007_v16 = vsel %vm4631_vm8, %v16899_v19, %v16936_v53 }
 0x63f   : > { %9733 = vst.msk [vmem:[#allocation4 + $0x18] sm:$0xff] %vm1441_vm5, %v9697_v23  ;;  %12873 = vmatmul.msk.bf16.gmra.mxu0 %vm1441_vm5, %v9043_v36  ;;  %v10480_v36 = vrot.slane %v16933_v9, 3  ;;  %v13561_v57 = vld [vmem:[#allocation3 + $0x78] sm:$0xff] }
 0x640   : > { %9299 = vst.msk [vmem:[#allocation4 + $0x70] sm:$0xff] %vm1441_vm5, %v9263_v1  ;;  %v9228_v2 = vld [vmem:[#allocation4 + $0x78] sm:$0xff]  ;;  %v10018_v40 = vshrl.u32 %v13561_v57, 16 }
 0x641   : > { %8856 = vst.msk [vmem:[#allocation4 + $0x80] sm:$0xff] %vm1441_vm5, %v8820_v4  ;;  %v8787_v4 = vld [vmem:[#allocation4 + $0x98] sm:$0xff] }
 0x643   : > { %v10148_v43 = vpop.f32.mrf.mxu2  ;;  %v9578_v32 = vpop.f32.mrf.mxu1 }
 0x644   : > { %v10273_v18 = vadd.f32 %v10237_v5, %v10148_v43  ;;  %v9160_v6 = vpop.f32.mrf.mxu0  ;;  %v9698_v34 = vadd.f32 %v9662_v11, %v9578_v32  ;;  %v8720_v61 = vpop.f32.mrf.mxu3  ;;  %v10479_v43 = vrot.slane %v13087_v51, 3  ;;  %v13560_v5 = vld [vmem:[#allocation3 + $0x70] sm:$0xff] }
 0x645   : > { %v9264_v17 = vadd.f32 %v9228_v2, %v9160_v6  ;;  %v8821_v37 = vadd.f32 %v8785_v30, %v8720_v61  ;;  %v10012_v6 = vshll.u32 %v13560_v5, 16  ;;  %v9665_v2 = vld [vmem:[#allocation4 + $0x38] sm:$0xff]  ;;  %v9667_v51 = vld [vmem:[#allocation4 + $0x48] sm:$0xff] }
 0x646   : > { %10309 = vst.msk [vmem:[#allocation4 + $0x8] sm:$0xff] %vm1441_vm5, %v10273_v18  ;;  %12970 = vmatmul.msk.bf16.gmra.mxu1 %vm1441_vm5, %v9478_v14  ;;  %v10239_v42 = vld [vmem:[#allocation4 + $0x18] sm:$0xff]  ;;  %v10481_v45 = vsel %vm5226_vm9, %v10479_v43, %v10480_v36  ;;  %v10009_v18 = vshrl.u32 %v13560_v5, 16  ;;  %v8788_v14 = vld [vmem:[#allocation4 + $0xa0] sm:$0xff]  ;;  %v9668_v5 = vld [vmem:[#allocation4 + $0x50] sm:$0xff] }
 0x647   : > { %9734 = vst.msk [vmem:[#allocation4 + $0x20] sm:$0xff] %vm1441_vm5, %v9698_v34 }
 0x648   : > { %9300 = vst.msk [vmem:[#allocation4 + $0x78] sm:$0xff] %vm1441_vm5, %v9264_v17  ;;  %13071 = vmatmul.msk.bf16.gmra.mxu2 %vm1441_vm5, %v9998_v55  ;;  %v9229_v7 = vld [vmem:[#allocation4 + $0x80] sm:$0xff] }
 0x649   : > { %8857 = vst.msk [vmem:[#allocation4 + $0x88] sm:$0xff] %vm1441_vm5, %v8821_v37  ;;  %12773 = vmatmul.msk.bf16.gmra.mxu3 %vm1441_vm5, %v8602_v8  ;;  %v16961_v8 = vld [vmem:[#allocation3 + $0x78] sm:$0xff] }
 0x64a   : > { %v9481_v10 = vrot.slane %v16961_v8, 2 }
 0x64b   : > { %v10151_v31 = vpop.f32.mrf.mxu2  ;;  %v9580_v41 = vpop.f32.mrf.mxu1 }
 0x64c   : > { %v10274_v26 = vadd.f32 %v10238_v38, %v10151_v31  ;;  %v9163_v35 = vpop.f32.mrf.mxu0  ;;  %v9699_v48 = vadd.f32 %v9663_v63, %v9580_v41  ;;  %v8723_v12 = vpop.f32.mrf.mxu3  ;;  %v10011_v31 = vrot.slane %v10009_v18, 2  ;;  %v10014_v38 = vrot.slane %v10012_v6, 3 }
 0x64d   : > { %v9265_v50 = vadd.f32 %v9229_v7, %v9163_v35  ;;  %v8822_v54 = vadd.f32 %v8786_v49, %v8723_v12  ;;  %v9482_v28 = vsel %vm3708_vm6, %v9479_v29, %v9481_v10 }
 0x64e   : > { %10310 = vst.msk [vmem:[#allocation4 + $0x10] sm:$0xff] %vm1441_vm5, %v10274_v26  ;;  %v10240_v11 = vld [vmem:[#allocation4 + $0x20] sm:$0xff]  ;;  %v16970_v63 = vor.u32 %v10014_v38, %v10011_v31  ;;  %v9669_v31 = vld [vmem:[#allocation4 + $0x58] sm:$0xff] }
 0x64f   : > { %9735 = vst.msk [vmem:[#allocation4 + $0x28] sm:$0xff] %vm1441_vm5, %v9699_v48  ;;  %12874 = vmatmul.msk.bf16.gmra.mxu0 %vm1441_vm5, %v9045_v24  ;;  %v9666_v26 = vld [vmem:[#allocation4 + $0x40] sm:$0xff]  ;;  %v10482_v24 = vrot.slane %v16967_v33, 3 }
 0x650   : > { %9301 = vst.msk [vmem:[#allocation4 + $0x80] sm:$0xff] %vm1441_vm5, %v9265_v50  ;;  %v9230_v22 = vld [vmem:[#allocation4 + $0x88] sm:$0xff]  ;;  %v10016_v20 = vsel %vm4631_vm8, %v16936_v53, %v16970_v63 }
 0x651   : > { %8858 = vst.msk [vmem:[#allocation4 + $0x90] sm:$0xff] %vm1441_vm5, %v8822_v54  ;;  %v8789_v54 = vld [vmem:[#allocation4 + $0xa8] sm:$0xff]  ;;  %v10483_v15 = vsel %vm5226_vm9, %v10480_v36, %v10482_v24  ;;  %v16997_v36 = vld [vmem:[#allocation3 + $0x28] sm:$0xff] }
 0x653   : > { %v10153_v60 = vpop.f32.mrf.mxu2  ;;  %v9583_v59 = vpop.f32.mrf.mxu1 }
 0x654   : > { %v10275_v23 = vadd.f32 %v10239_v42, %v10153_v60  ;;  %v9165_v1 = vpop.f32.mrf.mxu0  ;;  %v9700_v58 = vadd.f32 %v9664_v52, %v9583_v59  ;;  %v8725_v27 = vpop.f32.mrf.mxu3  ;;  %v10021_v60 = vshll.u32 %v13561_v57, 16 }
 0x655   : > { %v9266_v25 = vadd.f32 %v9230_v22, %v9165_v1  ;;  %v8823_v21 = vadd.f32 %v8787_v4, %v8725_v27  ;;  %v10020_v27 = vrot.slane %v10018_v40, 2 }
 0x656   : > { %10311 = vst.msk [vmem:[#allocation4 + $0x18] sm:$0xff] %vm1441_vm5, %v10275_v23  ;;  %12971 = vmatmul.msk.bf16.gmra.mxu1 %vm1441_vm5, %v9480_v46  ;;  %v10241_v47 = vld [vmem:[#allocation4 + $0x28] sm:$0xff]  ;;  %v10023_v4 = vrot.slane %v10021_v60, 3 }
 0x657   : > { %9736 = vst.msk [vmem:[#allocation4 + $0x30] sm:$0xff] %vm1441_vm5, %v9700_v58  ;;  %v8790_v58 = vld [vmem:[#allocation4 + $0xb0] sm:$0xff]  ;;  %v8793_v60 = vld [vmem:[#allocation4 + $0xc8] sm:$0xff] }
 0x658   : > { %9302 = vst.msk [vmem:[#allocation4 + $0x88] sm:$0xff] %vm1441_vm5, %v9266_v25  ;;  %13072 = vmatmul.msk.bf16.gmra.mxu2 %vm1441_vm5, %v10007_v16  ;;  %v9231_v61 = vld [vmem:[#allocation4 + $0x90] sm:$0xff]  ;;  %v16992_v25 = vld [vmem:[#allocation3 + $0x80] sm:$0xff]  ;;  %v17000_v16 = vor.u32 %v10023_v4, %v10020_v27  ;;  %v9671_v27 = vld [vmem:[#allocation4 + $0x68] sm:$0xff] }
 0x659   : > { %8859 = vst.msk [vmem:[#allocation4 + $0x98] sm:$0xff] %vm1441_vm5, %v8823_v21  ;;  %13164 = vmatmul.msk.bf16.vlgmr.msra.gmra.mxu3 %vm1441_vm5, %v10481_v45  ;;  %v9483_v21 = vrot.slane %v16992_v25, 2 }
 0x65b   : > { %v10156_v32 = vpop.f32.mrf.mxu2  ;;  %v9585_v19 = vpop.f32.mrf.mxu1 }
 0x65c   : > { %v10276_v34 = vadd.f32 %v10240_v11, %v10156_v32  ;;  %v9168_v17 = vpop.f32.mrf.mxu0  ;;  %v9701_v30 = vadd.f32 %v9665_v2, %v9585_v19  ;;  %v8728_v37 = vpop.f32.mrf.mxu3  ;;  %v8791_v19 = vld [vmem:[#allocation4 + $0xb8] sm:$0xff]  ;;  %v10484_v2 = vrot.slane %v16997_v36, 3 }
 0x65d   : > { %v9267_v39 = vadd.f32 %v9231_v61, %v9168_v17  ;;  %v8824_v55 = vadd.f32 %v8788_v14, %v8728_v37  ;;  %v9484_v17 = vsel %vm3708_vm6, %v9481_v10, %v9483_v21  ;;  %v10025_v61 = vsel %vm4631_vm8, %v16970_v63, %v17000_v16 }
 0x65e   : > { %10312 = vst.msk [vmem:[#allocation4 + $0x20] sm:$0xff] %vm1441_vm5, %v10276_v34  ;;  %v10242_v56 = vld [vmem:[#allocation4 + $0x30] sm:$0xff] }
 0x65f   : > { %9737 = vst.msk [vmem:[#allocation4 + $0x38] sm:$0xff] %vm1441_vm5, %v9701_v30  ;;  %12875 = vmatmul.msk.bf16.gmra.mxu0 %vm1441_vm5, %v9047_v44  ;;  %v13562_v30 = vld [vmem:[#allocation3 + $0x80] sm:$0xff] }
 0x660   : > { %9303 = vst.msk [vmem:[#allocation4 + $0x90] sm:$0xff] %vm1441_vm5, %v9267_v39  ;;  %v9232_v48 = vld [vmem:[#allocation4 + $0x98] sm:$0xff]  ;;  %v10485_v39 = vsel %vm5226_vm9, %v10482_v24, %v10484_v2  ;;  %v10030_v44 = vshll.u32 %v13562_v30, 16 }
 0x661   : > { %8860 = vst.msk [vmem:[#allocation4 + $0xa0] sm:$0xff] %vm1441_vm5, %v8824_v55  ;;  %v10027_v55 = vshrl.u32 %v13562_v30, 16 }
 0x663   : > { %v10158_v41 = vpop.f32.mrf.mxu2  ;;  %v9588_v13 = vpop.f32.mrf.mxu1 }
 0x664   : > { %v10277_v35 = vadd.f32 %v10241_v47, %v10158_v41  ;;  %v9170_v7 = vpop.f32.mrf.mxu0  ;;  %v9702_v50 = vadd.f32 %v9666_v26, %v9588_v13  ;;  %v8730_v49 = vpop.f32.mrf.mxu3  ;;  %v8792_v13 = vld [vmem:[#allocation4 + $0xc0] sm:$0xff] }
 0x665   : > { %v9268_v12 = vadd.f32 %v9232_v48, %v9170_v7  ;;  %v8825_v3 = vadd.f32 %v8789_v54, %v8730_v49  ;;  %v10029_v7 = vrot.slane %v10027_v55, 2  ;;  %v10032_v48 = vrot.slane %v10030_v44, 3  ;;  %v8795_v44 = vld [vmem:[#allocation4 + $0xd8] sm:$0xff] }
 0x666   : > { %10313 = vst.msk [vmem:[#allocation4 + $0x28] sm:$0xff] %vm1441_vm5, %v10277_v35  ;;  %12972 = vmatmul.msk.bf16.gmra.mxu1 %vm1441_vm5, %v9482_v28  ;;  %v10243_v0 = vld [vmem:[#allocation4 + $0x38] sm:$0xff]  ;;  %v17020_v35 = vld [vmem:[#allocation3 + $0x88] sm:$0xff] }
 0x667   : > { %9738 = vst.msk [vmem:[#allocation4 + $0x40] sm:$0xff] %vm1441_vm5, %v9702_v50  ;;  %v17025_v50 = vld [vmem:[#allocation3 + $0x30] sm:$0xff]  ;;  %v17028_v24 = vor.u32 %v10032_v48, %v10029_v7  ;;  %v9670_v28 = vld [vmem:[#allocation4 + $0x60] sm:$0xff]  ;;  %v9673_v7 = vld [vmem:[#allocation4 + $0x78] sm:$0xff] }
 0x668   : > { %9304 = vst.msk [vmem:[#allocation4 + $0x98] sm:$0xff] %vm1441_vm5, %v9268_v12  ;;  %13073 = vmatmul.msk.bf16.gmra.mxu2 %vm1441_vm5, %v10016_v20  ;;  %v9233_v52 = vld [vmem:[#allocation4 + $0xa0] sm:$0xff]  ;;  %v9485_v12 = vrot.slane %v17020_v35, 2 }
 0x669   : > { %8861 = vst.msk [vmem:[#allocation4 + $0xa8] sm:$0xff] %vm1441_vm5, %v8825_v3  ;;  %13165 = vmatmul.msk.bf16.gmra.mxu3 %vm1441_vm5, %v10483_v15 }
 0x66b   : > { %v10161_v29 = vpop.f32.mrf.mxu2  ;;  %v9590_v42 = vpop.f32.mrf.mxu1 }
 0x66c   : > { %v10278_v53 = vadd.f32 %v10242_v56, %v10161_v29  ;;  %v9173_v59 = vpop.f32.mrf.mxu0  ;;  %v9703_v23 = vadd.f32 %v9667_v51, %v9590_v42  ;;  %v8733_v22 = vpop.f32.mrf.mxu3  ;;  %v10486_v42 = vrot.slane %v17025_v50, 3 }
 0x66d   : > { %v9269_v1 = vadd.f32 %v9233_v52, %v9173_v59  ;;  %v8826_v9 = vadd.f32 %v8790_v58, %v8733_v22  ;;  %v10034_v59 = vsel %vm4631_vm8, %v17000_v16, %v17028_v24  ;;  %v13563_v52 = vld [vmem:[#allocation3 + $0x88] sm:$0xff] }
 0x66e   : > { %10314 = vst.msk [vmem:[#allocation4 + $0x30] sm:$0xff] %vm1441_vm5, %v10278_v53  ;;  %v10244_v14 = vld [vmem:[#allocation4 + $0x40] sm:$0xff]  ;;  %v9486_v53 = vsel %vm3708_vm6, %v9483_v21, %v9485_v12  ;;  %v10036_v58 = vshrl.u32 %v13563_v52, 16 }
 0x66f   : > { %9739 = vst.msk [vmem:[#allocation4 + $0x48] sm:$0xff] %vm1441_vm5, %v9703_v23  ;;  %v10487_v23 = vsel %vm5226_vm9, %v10484_v2, %v10486_v42 }
 0x670   : > { %9305 = vst.msk [vmem:[#allocation4 + $0xa0] sm:$0xff] %vm1441_vm5, %v9269_v1  ;;  %v9234_v32 = vld [vmem:[#allocation4 + $0xa8] sm:$0xff] }
 0x671   : > { %8862 = vst.msk [vmem:[#allocation4 + $0xb0] sm:$0xff] %vm1441_vm5, %v8826_v9  ;;  %v10039_v9 = vshll.u32 %v13563_v52, 16 }
 0x673   : > { %v10163_v46 = vpop.f32.mrf.mxu2  ;;  %v9593_v43 = vpop.f32.mrf.mxu1 }
 0x674   : > { %v10279_v45 = vadd.f32 %v10243_v0, %v10163_v46  ;;  %v9175_v62 = vpop.f32.mrf.mxu0  ;;  %v9704_v11 = vadd.f32 %v9668_v5, %v9593_v43  ;;  %v8735_v6 = vpop.f32.mrf.mxu3  ;;  %v8794_v43 = vld [vmem:[#allocation4 + $0xd0] sm:$0xff] }
 0x675   : > { %v9270_v18 = vadd.f32 %v9234_v32, %v9175_v62  ;;  %v8827_v34 = vadd.f32 %v8791_v19, %v8735_v6  ;;  %v10038_v62 = vrot.slane %v10036_v58, 2  ;;  %v10041_v32 = vrot.slane %v10039_v9, 3  ;;  %v8797_v9 = vld [vmem:[#allocation4 + $0xe8] sm:$0xff] }
 0x676   : > { %10315 = vst.msk [vmem:[#allocation4 + $0x38] sm:$0xff] %vm1441_vm5, %v10279_v45  ;;  %12973 = vmatmul.msk.bf16.gmra.mxu1 %vm1441_vm5, %v9484_v17  ;;  %v10245_v54 = vld [vmem:[#allocation4 + $0x48] sm:$0xff]  ;;  %v9672_v17 = vld [vmem:[#allocation4 + $0x70] sm:$0xff] }
 0x677   : > { %9740 = vst.msk [vmem:[#allocation4 + $0x50] sm:$0xff] %vm1441_vm5, %v9704_v11  ;;  %v17048_v45 = vld [vmem:[#allocation3 + $0x90] sm:$0xff]  ;;  %v17053_v11 = vld [vmem:[#allocation3 + $0x38] sm:$0xff]  ;;  %v17056_v2 = vor.u32 %v10041_v32, %v10038_v62 }
 0x678   : > { %9306 = vst.msk [vmem:[#allocation4 + $0xa8] sm:$0xff] %vm1441_vm5, %v9270_v18  ;;  %13074 = vmatmul.msk.bf16.gmra.mxu2 %vm1441_vm5, %v10025_v61  ;;  %v9235_v10 = vld [vmem:[#allocation4 + $0xb0] sm:$0xff]  ;;  %v9487_v18 = vrot.slane %v17048_v45, 2 }
 0x679   : > { %8863 = vst.msk [vmem:[#allocation4 + $0xb8] sm:$0xff] %vm1441_vm5, %v8827_v34  ;;  %13166 = vmatmul.msk.bf16.gmra.mxu3 %vm1441_vm5, %v10485_v39 }
 0x67b   : > { %v10166_v37 = vpop.f32.mrf.mxu2  ;;  %v9595_v8 = vpop.f32.mrf.mxu1 }
 0x67c   : > { %v10280_v38 = vadd.f32 %v10244_v14, %v10166_v37  ;;  %v9178_v33 = vpop.f32.mrf.mxu0  ;;  %v9705_v41 = vadd.f32 %v9669_v31, %v9595_v8  ;;  %v8738_v63 = vpop.f32.mrf.mxu3  ;;  %v10488_v8 = vrot.slane %v17053_v11, 3  ;;  %v9675_v11 = vld [vmem:[#allocation4 + $0x88] sm:$0xff] }
 0x67d   : > { %v9271_v47 = vadd.f32 %v9235_v10, %v9178_v33  ;;  %v8828_v26 = vadd.f32 %v8792_v13, %v8738_v63  ;;  %v10043_v33 = vsel %vm4631_vm8, %v17028_v24, %v17056_v2  ;;  %v13564_v10 = vld [vmem:[#allocation3 + $0x90] sm:$0xff] }
 0x67e   : > { %10316 = vst.msk [vmem:[#allocation4 + $0x40] sm:$0xff] %vm1441_vm5, %v10280_v38  ;;  %v10246_v22 = vld [vmem:[#allocation4 + $0x50] sm:$0xff]  ;;  %v9488_v38 = vsel %vm3708_vm6, %v9485_v12, %v9487_v18  ;;  %v10045_v13 = vshrl.u32 %v13564_v10, 16 }
 0x67f   : > { %9741 = vst.msk [vmem:[#allocation4 + $0x58] sm:$0xff] %vm1441_vm5, %v9705_v41  ;;  %v10489_v41 = vsel %vm5226_vm9, %v10486_v42, %v10488_v8 }
 0x680   : > { %9307 = vst.msk [vmem:[#allocation4 + $0xb0] sm:$0xff] %vm1441_vm5, %v9271_v47  ;;  %v9236_v15 = vld [vmem:[#allocation4 + $0xb8] sm:$0xff] }
 0x681   : > { %8864 = vst.msk [vmem:[#allocation4 + $0xc0] sm:$0xff] %vm1441_vm5, %v8828_v26  ;;  %v10048_v26 = vshll.u32 %v13564_v10, 16 }
 0x683   : > { %v10168_v49 = vpop.f32.mrf.mxu2  ;;  %v9598_v3 = vpop.f32.mrf.mxu1 }
 0x684   : > { %v10281_v20 = vadd.f32 %v10245_v54, %v10168_v49  ;;  %v9180_v57 = vpop.f32.mrf.mxu0  ;;  %v9706_v29 = vadd.f32 %v9670_v28, %v9598_v3  ;;  %v8740_v40 = vpop.f32.mrf.mxu3  ;;  %v8796_v3 = vld [vmem:[#allocation4 + $0xe0] sm:$0xff] }
 0x685   : > { %v9272_v56 = vadd.f32 %v9236_v15, %v9180_v57  ;;  %v8829_v51 = vadd.f32 %v8793_v60, %v8740_v40  ;;  %v10047_v57 = vrot.slane %v10045_v13, 2  ;;  %v10050_v15 = vrot.slane %v10048_v26, 3 }
 0x686   : > { %10317 = vst.msk [vmem:[#allocation4 + $0x48] sm:$0xff] %vm1441_vm5, %v10281_v20  ;;  %12974 = vmatmul.msk.bf16.gmra.mxu1 %vm1441_vm5, %v9486_v53  ;;  %v10247_v19 = vld [vmem:[#allocation4 + $0x58] sm:$0xff]  ;;  %v17076_v20 = vld [vmem:[#allocation3 + $0x98] sm:$0xff]  ;;  %v9674_v53 = vld [vmem:[#allocation4 + $0x80] sm:$0xff] }
 0x687   : > { %9742 = vst.msk [vmem:[#allocation4 + $0x60] sm:$0xff] %vm1441_vm5, %v9706_v29  ;;  %v17081_v29 = vld [vmem:[#allocation3 + $0x40] sm:$0xff]  ;;  %v17084_v42 = vor.u32 %v10050_v15, %v10047_v57 }
 0x688   : > { %9308 = vst.msk [vmem:[#allocation4 + $0xb8] sm:$0xff] %vm1441_vm5, %v9272_v56  ;;  %13075 = vmatmul.msk.bf16.gmra.mxu2 %vm1441_vm5, %v10034_v59  ;;  %v9237_v21 = vld [vmem:[#allocation4 + $0xc0] sm:$0xff]  ;;  %v9489_v56 = vrot.slane %v17076_v20, 2 }
 0x689   : > { %8865 = vst.msk [vmem:[#allocation4 + $0xc8] sm:$0xff] %vm1441_vm5, %v8829_v51  ;;  %13167 = vmatmul.msk.bf16.gmra.mxu3 %vm1441_vm5, %v10487_v23 }
 0x68b   : > { %v10171_v1 = vpop.f32.mrf.mxu2  ;;  %v9600_v25 = vpop.f32.mrf.mxu1 }
 0x68c   : > { %v10282_v4 = vadd.f32 %v10246_v22, %v10171_v1  ;;  %v9183_v36 = vpop.f32.mrf.mxu0  ;;  %v9707_v46 = vadd.f32 %v9671_v27, %v9600_v25  ;;  %v8743_v16 = vpop.f32.mrf.mxu3  ;;  %v10490_v25 = vrot.slane %v17081_v29, 3 }
 0x68d   : > { %v9273_v0 = vadd.f32 %v9237_v21, %v9183_v36  ;;  %v8830_v5 = vadd.f32 %v8794_v43, %v8743_v16  ;;  %v10052_v36 = vsel %vm4631_vm8, %v17056_v2, %v17084_v42  ;;  %v9357_v21 = vld [vmem:[#allocation3 + $0xa0] sm:$0x3] }
 0x68e   : > { %10318 = vst.msk [vmem:[#allocation4 + $0x50] sm:$0xff] %vm1441_vm5, %v10282_v4  ;;  %v10248_v63 = vld [vmem:[#allocation4 + $0x60] sm:$0xff]  ;;  %v9490_v4 = vsel %vm3708_vm6, %v9487_v18, %v9489_v56  ;;  %v9436_v16 = vunpack.c.l.b16 %v9357_v21 }
 0x68f   : > { %9743 = vst.msk [vmem:[#allocation4 + $0x68] sm:$0xff] %vm1441_vm5, %v9707_v46  ;;  %v13565_v46 = vld [vmem:[#allocation3 + $0x98] sm:$0xff]  ;;  %v9678_v21 = vld [vmem:[#allocation4 + $0xa0] sm:$0xff] }
 0x690   : > { %9309 = vst.msk [vmem:[#allocation4 + $0xc0] sm:$0xff] %vm1441_vm5, %v9273_v0  ;;  %v9238_v39 = vld [vmem:[#allocation4 + $0xc8] sm:$0xff]  ;;  %v10491_v0 = vsel %vm5226_vm9, %v10488_v8, %v10490_v25  ;;  %v10054_v45 = vshrl.u32 %v13565_v46, 16  ;;  %v10057_v62 = vshll.u32 %v13565_v46, 16 }
 0x691   : > { %8866 = vst.msk [vmem:[#allocation4 + $0xd0] sm:$0xff] %vm1441_vm5, %v8830_v5 }
 0x693   : > { %v10173_v6 = vpop.f32.mrf.mxu2  ;;  %v9603_v34 = vpop.f32.mrf.mxu1 }
 0x694   : > { %v10283_v61 = vadd.f32 %v10247_v19, %v10173_v6  ;;  %v9185_v30 = vpop.f32.mrf.mxu0  ;;  %v9708_v37 = vadd.f32 %v9672_v17, %v9603_v34  ;;  %v8745_v55 = vpop.f32.mrf.mxu3 }
 0x695   : > { %v9274_v14 = vadd.f32 %v9238_v39, %v9185_v30  ;;  %v8831_v31 = vadd.f32 %v8795_v44, %v8745_v55  ;;  %v9455_v39 = vpack.c.b16 %v9436_v16, %v9436_v16  ;;  %v9802_v55 = vld [vmem:[#allocation3 + $0xa0] sm:$0x7]  ;;  %v17109_v44 = vld [vmem:[#allocation3 + $0x48] sm:$0xff] }
 0x696   : > { %10319 = vst.msk [vmem:[#allocation4 + $0x58] sm:$0xff] %vm1441_vm5, %v10283_v61  ;;  %12975 = vmatmul.msk.bf16.gmra.mxu1 %vm1441_vm5, %v9488_v38  ;;  %v10249_v60 = vld [vmem:[#allocation4 + $0x68] sm:$0xff]  ;;  %v8798_v61 = vld [vmem:[#allocation4 + $0xf0] sm:$0xff]  ;;  %v9881_v10 = vunpack.c.l.b16 %v9802_v55 }
 0x697   : > { %9744 = vst.msk [vmem:[#allocation4 + $0x70] sm:$0xff] %vm1441_vm5, %v9708_v37  ;;  %v10056_v37 = vrot.slane %v10054_v45, 2  ;;  %v9491_v8 = vrot.slane %v9455_v39, 2 }
 0x698   : > { %9310 = vst.msk [vmem:[#allocation4 + $0xc8] sm:$0xff] %vm1441_vm5, %v9274_v14  ;;  %13076 = vmatmul.msk.bf16.gmra.mxu2 %vm1441_vm5, %v10043_v33  ;;  %v9239_v12 = vld [vmem:[#allocation4 + $0xd0] sm:$0xff]  ;;  %v10059_v14 = vrot.slane %v10057_v62, 3  ;;  %v8801_v62 = vld [vmem:[#allocation4 + $0x108] sm:$0xff] }
 0x699   : > { %8867 = vst.msk [vmem:[#allocation4 + $0xd8] sm:$0xff] %vm1441_vm5, %v8831_v31  ;;  %13168 = vmatmul.msk.bf16.gmra.mxu3 %vm1441_vm5, %v10489_v41 }
 0x69a   : > { %v10060_v33 = vor.u32 %v10059_v14, %v10056_v37 }
 0x69b   : > { %v10176_v47 = vpop.f32.mrf.mxu2  ;;  %v9605_v35 = vpop.f32.mrf.mxu1 }
 0x69c   : > { %v10284_v48 = vadd.f32 %v10248_v63, %v10176_v47  ;;  %v9188_v50 = vpop.f32.mrf.mxu0  ;;  %v9709_v49 = vadd.f32 %v9673_v7, %v9605_v35  ;;  %v8748_v24 = vpop.f32.mrf.mxu3  ;;  %v9676_v47 = vld [vmem:[#allocation4 + $0x90] sm:$0xff] }
 0x69d   : > { %v9275_v54 = vadd.f32 %v9239_v12, %v9188_v50  ;;  %v8832_v28 = vadd.f32 %v8796_v3, %v8748_v24  ;;  %v8799_v50 = vld [vmem:[#allocation4 + $0xf8] sm:$0xff]  ;;  %v10492_v12 = vrot.slane %v17109_v44, 3  ;;  %v10061_v24 = vsel %vm4631_vm8, %v17084_v42, %v10060_v33  ;;  %v8802_v44 = vld [vmem:[#allocation4 + $0x110] sm:$0xff] }
 0x69e   : > { %10320 = vst.msk [vmem:[#allocation4 + $0x60] sm:$0xff] %vm1441_vm5, %v10284_v48  ;;  %v10250_v5 = vld [vmem:[#allocation4 + $0x70] sm:$0xff]  ;;  %v9900_v3 = vpack.c.b16 %v9881_v10, %v9881_v10 }
 0x69f   : > { %9745 = vst.msk [vmem:[#allocation4 + $0x78] sm:$0xff] %vm1441_vm5, %v9709_v49 }
 0x6a0   : > { %9311 = vst.msk [vmem:[#allocation4 + $0xd0] sm:$0xff] %vm1441_vm5, %v9275_v54  ;;  %v9240_v23 = vld [vmem:[#allocation4 + $0xd8] sm:$0xff]  ;;  %v9492_v54 = vsel %vm3708_vm6, %v9489_v56, %v9491_v8  ;;  %v10063_v15 = vshrl.u32 %v9900_v3, 16  ;;  %v10066_v56 = vshll.u32 %v9900_v3, 16 }
 0x6a1   : > { %8868 = vst.msk [vmem:[#allocation4 + $0xe0] sm:$0xff] %vm1441_vm5, %v8832_v28  ;;  %v10493_v28 = vsel %vm5226_vm9, %v10490_v25, %v10492_v12 }
 0x6a3   : > { %v10178_v40 = vpop.f32.mrf.mxu2  ;;  %v9608_v51 = vpop.f32.mrf.mxu1 }
 0x6a4   : > { %v10285_v59 = vadd.f32 %v10249_v60, %v10178_v40  ;;  %v9190_v52 = vpop.f32.mrf.mxu0  ;;  %v9710_v1 = vadd.f32 %v9674_v53, %v9608_v51  ;;  %v8750_v58 = vpop.f32.mrf.mxu3  ;;  %v9677_v60 = vld [vmem:[#allocation4 + $0x98] sm:$0xff] }
 0x6a5   : > { %v9276_v22 = vadd.f32 %v9240_v23, %v9190_v52  ;;  %v8833_v27 = vadd.f32 %v8797_v9, %v8750_v58  ;;  %v10068_v58 = vrot.slane %v10066_v56, 3  ;;  %v13576_v9 = vld [vmem:[#allocation3 + $0x50] sm:$0xff] }
 0x6a6   : > { %10321 = vst.msk [vmem:[#allocation4 + $0x68] sm:$0xff] %vm1441_vm5, %v10285_v59  ;;  %12976 = vmatmul.msk.bf16.gmra.mxu1 %vm1441_vm5, %v9490_v4  ;;  %v10251_v38 = vld [vmem:[#allocation4 + $0x78] sm:$0xff] }
 0x6a7   : > { %9746 = vst.msk [vmem:[#allocation4 + $0x80] sm:$0xff] %vm1441_vm5, %v9710_v1  ;;  %v8800_v1 = vld [vmem:[#allocation4 + $0x100] sm:$0xff] }
 0x6a8   : > { %9312 = vst.msk [vmem:[#allocation4 + $0xd8] sm:$0xff] %vm1441_vm5, %v9276_v22  ;;  %13077 = vmatmul.msk.bf16.gmra.mxu2 %vm1441_vm5, %v10052_v36  ;;  %v9241_v19 = vld [vmem:[#allocation4 + $0xe0] sm:$0xff]  ;;  %v10065_v22 = vrot.slane %v10063_v15, 2 }
 0x6a9   : > { %8869 = vst.msk [vmem:[#allocation4 + $0xe8] sm:$0xff] %vm1441_vm5, %v8833_v27  ;;  %13169 = vmatmul.msk.bf16.gmra.mxu3 %vm1441_vm5, %v10491_v0 }
 0x6aa   : > { %v10069_v4 = vor.u32 %v10068_v58, %v10065_v22 }
 0x6ab   : > { %v10181_v43 = vpop.f32.mrf.mxu2  ;;  %v9610_v32 = vpop.f32.mrf.mxu1 }
 0x6ac   : > { %v10286_v18 = vadd.f32 %v10250_v5, %v10181_v43  ;;  %v9193_v6 = vpop.f32.mrf.mxu0  ;;  %v9711_v2 = vadd.f32 %v9675_v11, %v9610_v32  ;;  %v8753_v17 = vpop.f32.mrf.mxu3  ;;  %v10494_v32 = vrot.slane %v13576_v9, 3  ;;  %v17158_v9 = vld [vmem:[%s17464_s9] ss:$0 sm:$0xff] }
 0x6ad   : > { %v9277_v34 = vadd.f32 %v9241_v19, %v9193_v6  ;;  %v8834_v30 = vadd.f32 %v8798_v61, %v8753_v17  ;;  %v9679_v17 = vld [vmem:[#allocation4 + $0xa8] sm:$0xff] }
 0x6ae   : > { %10322 = vst.msk [vmem:[#allocation4 + $0x70] sm:$0xff] %vm1441_vm5, %v10286_v18  ;;  %v10252_v57 = vld [vmem:[#allocation4 + $0x80] sm:$0xff]  ;;  %v10070_v18 = vsel %vm4631_vm8, %v10060_v33, %v10069_v4  ;;  %v10495_v6 = vsel %vm5226_vm9, %v10492_v12, %v10494_v32 }
 0x6af   : > { %9747 = vst.msk [vmem:[#allocation4 + $0x88] sm:$0xff] %vm1441_vm5, %v9711_v2 }
 0x6b0   : > { %9313 = vst.msk [vmem:[#allocation4 + $0xe0] sm:$0xff] %vm1441_vm5, %v9277_v34  ;;  %v9242_v26 = vld [vmem:[#allocation4 + $0xe8] sm:$0xff] }
 0x6b1   : > { %8870 = vst.msk [vmem:[#allocation4 + $0xf0] sm:$0xff] %vm1441_vm5, %v8834_v30 }
 0x6b3   : > { %v10183_v31 = vpop.f32.mrf.mxu2  ;;  %v9613_v41 = vpop.f32.mrf.mxu1 }
 0x6b4   : > { %v10287_v63 = vadd.f32 %v10251_v38, %v10183_v31  ;;  %v9195_v13 = vpop.f32.mrf.mxu0  ;;  %v9712_v35 = vadd.f32 %v9676_v47, %v9613_v41  ;;  %v8755_v48 = vpop.f32.mrf.mxu3  ;;  %v13577_v31 = vld [vmem:[#allocation3 + $0x58] sm:$0xff] }
 0x6b5   : > { %v9278_v7 = vadd.f32 %v9242_v26, %v9195_v13  ;;  %v8835_v49 = vadd.f32 %v8799_v50, %v8755_v48  ;;  %v9680_v41 = vld [vmem:[#allocation4 + $0xb0] sm:$0xff]  ;;  %v8803_v48 = vld [vmem:[#allocation4 + $0x118] sm:$0xff]  ;;  %v10496_v50 = vrot.slane %v13577_v31, 3 }
 0x6b6   : > { %10323 = vst.msk [vmem:[#allocation4 + $0x78] sm:$0xff] %vm1441_vm5, %v10287_v63  ;;  %12977 = vmatmul.msk.bf16.gmra.mxu1 %vm1441_vm5, %v9492_v54  ;;  %v10253_v27 = vld [vmem:[#allocation4 + $0x88] sm:$0xff] }
 0x6b7   : > { %9748 = vst.msk [vmem:[#allocation4 + $0x90] sm:$0xff] %vm1441_vm5, %v9712_v35 }
 0x6b8   : > { %9314 = vst.msk [vmem:[#allocation4 + $0xe8] sm:$0xff] %vm1441_vm5, %v9278_v7  ;;  %13078 = vmatmul.msk.bf16.gmra.mxu2 %vm1441_vm5, %v10061_v24  ;;  %v9243_v53 = vld [vmem:[#allocation4 + $0xf0] sm:$0xff] }
 0x6b9   : > { %8871 = vst.msk [vmem:[#allocation4 + $0xf8] sm:$0xff] %vm1441_vm5, %v8835_v49  ;;  %13170 = vmatmul.msk.bf16.gmra.mxu3 %vm1441_vm5, %v10493_v28  ;;  %v10497_v49 = vsel %vm5226_vm9, %v10494_v32, %v10496_v50  ;;  %v9681_v28 = vld [vmem:[#allocation4 + $0xb8] sm:$0xff] }
 0x6bb   : > { %v10186_v20 = vpop.f32.mrf.mxu2  ;;  %v9615_v40 = vpop.f32.mrf.mxu1 }
 0x6bc   : > { %v10288_v42 = vadd.f32 %v10252_v57, %v10186_v20  ;;  %v9198_v51 = vpop.f32.mrf.mxu0  ;;  %v9713_v59 = vadd.f32 %v9677_v60, %v9615_v40  ;;  %v8758_v23 = vpop.f32.mrf.mxu3 }
 0x6bd   : > { %v9279_v52 = vadd.f32 %v9243_v53, %v9198_v51  ;;  %v8836_v29 = vadd.f32 %v8800_v1, %v8758_v23  ;;  %v17153_v53 = vld [vmem:[#allocation3 + $0x60] sm:$0xff]  ;;  %v9682_v1 = vld [vmem:[#allocation4 + $0xc0] sm:$0xff] }
 0x6be   : > { %10324 = vst.msk [vmem:[#allocation4 + $0x80] sm:$0xff] %vm1441_vm5, %v10288_v42  ;;  %v10254_v2 = vld [vmem:[#allocation4 + $0x90] sm:$0xff]  ;;  %v10681_v42 = vld [vmem:[#allocation4] sm:$0xff] }
 0x6bf   : > { %9749 = vst.msk [vmem:[#allocation4 + $0x98] sm:$0xff] %vm1441_vm5, %v9713_v59 }
 0x6c0   : > { %9315 = vst.msk [vmem:[#allocation4 + $0xf0] sm:$0xff] %vm1441_vm5, %v9279_v52  ;;  %v9244_v16 = vld [vmem:[#allocation4 + $0xf8] sm:$0xff] }
 0x6c1   : > { %8872 = vst.msk [vmem:[#allocation4 + $0x100] sm:$0xff] %vm1441_vm5, %v8836_v29 }
 0x6c3   : > { %v10188_v25 = vpop.f32.mrf.mxu2  ;;  %v9618_v36 = vpop.f32.mrf.mxu1 }
 0x6c4   : > { %v10289_v46 = vadd.f32 %v10253_v27, %v10188_v25  ;;  %v9200_v0 = vpop.f32.mrf.mxu0  ;;  %v9714_v43 = vadd.f32 %v9678_v21, %v9618_v36  ;;  %v8760_v45 = vpop.f32.mrf.mxu3  ;;  %v10682_v36 = vld [vmem:[#allocation4 + $0x8] sm:$0xff]  ;;  %v10498_v21 = vrot.slane %v17153_v53, 3 }
 0x6c5   : > { %v9280_v5 = vadd.f32 %v9244_v16, %v9200_v0  ;;  %v8837_v11 = vadd.f32 %v8801_v62, %v8760_v45  ;;  %v17165_v0 = vld [vmem:[%s17465_s10] ss:$0 sm:$0xff] }
 0x6c6   : > { %10325 = vst.msk [vmem:[#allocation4 + $0x88] sm:$0xff] %vm1441_vm5, %v10289_v46  ;;  %v10255_v33 = vld [vmem:[#allocation4 + $0x98] sm:$0xff]  ;;  %v10499_v45 = vsel %vm5226_vm9, %v10496_v50, %v10498_v21 }
 0x6c7   : > { %9750 = vst.msk [vmem:[#allocation4 + $0xa0] sm:$0xff] %vm1441_vm5, %v9714_v43 }
 0x6c8   : > { %9316 = vst.msk [vmem:[#allocation4 + $0xf8] sm:$0xff] %vm1441_vm5, %v9280_v5  ;;  %13079 = vmatmul.msk.bf16.gmra.mxu2 %vm1441_vm5, %v10070_v18  ;;  %v9245_v39 = vld [vmem:[#allocation4 + $0x100] sm:$0xff]  ;;  %v17174_v5 = vld [vmem:[%s17466_s11] ss:$0 sm:$0xff] }
 0x6c9   : > { %8873 = vst.msk [vmem:[#allocation4 + $0x108] sm:$0xff] %vm1441_vm5, %v8837_v11  ;;  %13171 = vmatmul.msk.bf16.gmra.mxu3 %vm1441_vm5, %v10495_v6  ;;  %v9683_v6 = vld [vmem:[#allocation4 + $0xc8] sm:$0xff] }
 0x6cb   : > { %v10191_v19 = vpop.f32.mrf.mxu2  ;;  %v9620_v34 = vpop.f32.mrf.mxu1 }
 0x6cc   : > { %v10290_v61 = vadd.f32 %v10254_v2, %v10191_v19  ;;  %v9203_v30 = vpop.f32.mrf.mxu0  ;;  %v9715_v37 = vadd.f32 %v9679_v17, %v9620_v34  ;;  %v8763_v55 = vpop.f32.mrf.mxu3 }
 0x6cd   : > { %v9281_v14 = vadd.f32 %v9245_v39, %v9203_v30  ;;  %v8838_v8 = vadd.f32 %v8802_v44, %v8763_v55  ;;  %v17192_v55 = vld [vmem:[#allocation3 + $0x68] sm:$0xff] }
 0x6ce   : > { %10326 = vst.msk [vmem:[#allocation4 + $0x90] sm:$0xff] %vm1441_vm5, %v10290_v61  ;;  %v10256_v24 = vld [vmem:[#allocation4 + $0xa0] sm:$0xff]  ;;  %v10683_v61 = vld [vmem:[#allocation4 + $0x10] sm:$0xff] }
 0x6cf   : > { %9751 = vst.msk [vmem:[#allocation4 + $0xa8] sm:$0xff] %vm1441_vm5, %v9715_v37 }
 0x6d0   : > { %9317 = vst.msk [vmem:[#allocation4 + $0x100] sm:$0xff] %vm1441_vm5, %v9281_v14  ;;  %v9246_v13 = vld [vmem:[#allocation4 + $0x108] sm:$0xff] }
 0x6d1   : > { %8874 = vst.msk [vmem:[#allocation4 + $0x110] sm:$0xff] %vm1441_vm5, %v8838_v8 }
 0x6d3   : > { %v10193_v38 = vpop.f32.mrf.mxu2  ;;  %v9623_v10 = vpop.f32.mrf.mxu1 }
 0x6d4   : > { %v10291_v47 = vadd.f32 %v10255_v33, %v10193_v38  ;;  %v9205_v63 = vpop.f32.mrf.mxu0  ;;  %v9716_v26 = vadd.f32 %v9680_v41, %v9623_v10  ;;  %v8765_v7 = vpop.f32.mrf.mxu3  ;;  %v9684_v33 = vld [vmem:[#allocation4 + $0xd0] sm:$0xff] }
 0x6d5   : > { %v9282_v35 = vadd.f32 %v9246_v13, %v9205_v63  ;;  %v8839_v12 = vadd.f32 %v8803_v48, %v8765_v7  ;;  %v10684_v13 = vld [vmem:[#allocation4 + $0x18] sm:$0xff] }
 0x6d6   : > { %10327 = vst.msk [vmem:[#allocation4 + $0x98] sm:$0xff] %vm1441_vm5, %v10291_v47  ;;  %v10257_v52 = vld [vmem:[#allocation4 + $0xa8] sm:$0xff] }
 0x6d7   : > { %9752 = vst.msk [vmem:[#allocation4 + $0xb0] sm:$0xff] %vm1441_vm5, %v9716_v26  ;;  %v10500_v26 = vrot.slane %v17192_v55, 3 }
 0x6d8   : > { %9318 = vst.msk [vmem:[#allocation4 + $0x108] sm:$0xff] %vm1441_vm5, %v9282_v35  ;;  %v9247_v15 = vld [vmem:[#allocation4 + $0x110] sm:$0xff] }
 0x6d9   : > { %8875 = vst.msk [vmem:[#allocation4 + $0x118] sm:$0xff] %vm1441_vm5, %v8839_v12  ;;  %13172 = vmatmul.msk.bf16.gmra.mxu3 %vm1441_vm5, %v10497_v49  ;;  %v10501_v12 = vsel %vm5226_vm9, %v10498_v21, %v10500_v26 }
 0x6db   : > { %v10196_v54 = vpop.f32.mrf.mxu2  ;;  %v9625_v3 = vpop.f32.mrf.mxu1 }
 0x6dc   : > { %v10292_v20 = vadd.f32 %v10256_v24, %v10196_v54  ;;  %v9208_v57 = vpop.f32.mrf.mxu0  ;;  %v9717_v56 = vadd.f32 %v9681_v28, %v9625_v3  ;;  %v10591_v60 = vpop.f32.mrf.mxu3  ;;  %v9685_v28 = vld [vmem:[#allocation4 + $0xd8] sm:$0xff] }
 0x6dd   : > { %v9283_v40 = vadd.f32 %v9247_v15, %v9208_v57  ;;  %v10717_v51 = vadd.f32 %v10681_v42, %v10591_v60 }
 0x6de   : > { %10328 = vst.msk [vmem:[#allocation4 + $0xa0] sm:$0xff] %vm1441_vm5, %v10292_v20  ;;  %v10258_v11 = vld [vmem:[#allocation4 + $0xb0] sm:$0xff] }
 0x6df   : > { %9753 = vst.msk [vmem:[#allocation4 + $0xb8] sm:$0xff] %vm1441_vm5, %v9717_v56 }
 0x6e0   : > { %9319 = vst.msk [vmem:[#allocation4 + $0x110] sm:$0xff] %vm1441_vm5, %v9283_v40  ;;  %v9248_v58 = vld [vmem:[#allocation4 + $0x118] sm:$0xff]  ;;  %v10685_v40 = vld [vmem:[#allocation4 + $0x20] sm:$0xff] }
 0x6e1   : > { %10753 = vst.msk [vmem:[#allocation4] sm:$0xff] %vm1441_vm5, %v10717_v51 }
 0x6e3   : > { %v10198_v59 = vpop.f32.mrf.mxu2  ;;  %v9628_v23 = vpop.f32.mrf.mxu1 }
 0x6e4   : > { %v10293_v29 = vadd.f32 %v10257_v52, %v10198_v59  ;;  %v9210_v22 = vpop.f32.mrf.mxu0  ;;  %v9718_v25 = vadd.f32 %v9682_v1, %v9628_v23  ;;  %v10593_v4 = vpop.f32.mrf.mxu3  ;;  %v17213_v59 = vld [vmem:[#allocation3 + $0x70] sm:$0xff] }
 0x6e5   : > { %v9284_v27 = vadd.f32 %v9248_v58, %v9210_v22  ;;  %v10718_v46 = vadd.f32 %v10682_v36, %v10593_v4  ;;  %v9686_v22 = vld [vmem:[#allocation4 + $0xe0] sm:$0xff]  ;;  %v10686_v36 = vld [vmem:[#allocation4 + $0x28] sm:$0xff]  ;;  %v10502_v21 = vrot.slane %v17213_v59, 3 }
 0x6e6   : > { %10329 = vst.msk [vmem:[#allocation4 + $0xa8] sm:$0xff] %vm1441_vm5, %v10293_v29  ;;  %v10259_v31 = vld [vmem:[#allocation4 + $0xb8] sm:$0xff] }
 0x6e7   : > { %9754 = vst.msk [vmem:[#allocation4 + $0xc0] sm:$0xff] %vm1441_vm5, %v9718_v25 }
 0x6e8   : > { %v10789_v16 = vld [vmem:[#allocation4] sm:$0xff]  ;;  %9320 = vst.msk [vmem:[#allocation4 + $0x118] sm:$0xff] %vm1441_vm5, %v9284_v27 }
 0x6e9   : > { %v10829_v43 = vmul.f32 %v17158_v9, %v10789_v16  ;;  %10754 = vst.msk [vmem:[#allocation4 + $0x8] sm:$0xff] %vm1441_vm5, %v10718_v46  ;;  %13173 = vmatmul.msk.bf16.gmra.mxu3 %vm1441_vm5, %v10499_v45 }
 0x6eb   : > { %v10869_v62 = vadd.f32 %v17165_v0, %v10829_v43  ;;  %v10201_v32 = vpop.f32.mrf.mxu2  ;;  %v9630_v18 = vpop.f32.mrf.mxu1 }
 0x6ec   : > { %v10294_v19 = vadd.f32 %v10258_v11, %v10201_v32  ;;  %v9719_v34 = vadd.f32 %v9683_v6, %v9630_v18  ;;  %v10596_v17 = vpop.f32.mrf.mxu3 }
 0x6ed   : > { %vm10905_vm1 = vcmp.ge.f32.partialorder %v10869_v62, 0.0  ;;  %v10945_v2 = vmul.f32 %v17174_v5, %v10869_v62  ;;  %v10719_v30 = vadd.f32 %v10683_v61, %v10596_v17 }
 0x6ee   : > { %10330 = vst.msk [vmem:[#allocation4 + $0xb0] sm:$0xff] %vm1441_vm5, %v10294_v19  ;;  %v10260_v24 = vld [vmem:[#allocation4 + $0xc0] sm:$0xff]  ;;  %v9687_v19 = vld [vmem:[#allocation4 + $0xe8] sm:$0xff] }
 0x6ef   : > { %v10981_v39 = vsel %vm10905_vm1, %v10869_v62, %v10945_v2  ;;  %9755 = vst.msk [vmem:[#allocation4 + $0xc8] sm:$0xff] %vm1441_vm5, %v9719_v34  ;;  %v10503_v62 = vsel %vm5226_vm9, %v10500_v26, %v10502_v21  ;;  %v10688_v26 = vld [vmem:[#allocation4 + $0x38] sm:$0xff] }
 0x6f0   : > { %11017 = vst.msk [vmem:[%s17183_s16] sm:$0xff] %vm1441_vm5, %v10981_v39  ;;  %v10790_v37 = vld [vmem:[#allocation4 + $0x8] sm:$0xff] }
 0x6f1   : > { %v10830_v14 = vmul.f32 %v17158_v9, %v10790_v37  ;;  %10755 = vst.msk [vmem:[#allocation4 + $0x10] sm:$0xff] %vm1441_vm5, %v10719_v30  ;;  %v10687_v30 = vld [vmem:[#allocation4 + $0x30] sm:$0xff] }
 0x6f3   : > { %v10870_v44 = vadd.f32 %v17165_v0, %v10830_v14  ;;  %v10203_v8 = vpop.f32.mrf.mxu2  ;;  %v9633_v38 = vpop.f32.mrf.mxu1 }
 0x6f4   : > { %v10295_v10 = vadd.f32 %v10259_v31, %v10203_v8  ;;  %v9720_v47 = vadd.f32 %v9684_v33, %v9633_v38  ;;  %v10598_v63 = vpop.f32.mrf.mxu3 }
 0x6f5   : > { %vm10906_vm3 = vcmp.ge.f32.partialorder %v10870_v44, 0.0  ;;  %v10946_v41 = vmul.f32 %v17174_v5, %v10870_v44  ;;  %v10720_v35 = vadd.f32 %v10684_v13, %v10598_v63 }
 0x6f6   : > { %10331 = vst.msk [vmem:[#allocation4 + $0xb8] sm:$0xff] %vm1441_vm5, %v10295_v10  ;;  %v10261_v1 = vld [vmem:[#allocation4 + $0xc8] sm:$0xff]  ;;  %v9688_v10 = vld [vmem:[#allocation4 + $0xf0] sm:$0xff] }
 0x6f7   : > { %v10982_v7 = vsel %vm10906_vm3, %v10870_v44, %v10946_v41  ;;  %9756 = vst.msk [vmem:[#allocation4 + $0xd0] sm:$0xff] %vm1441_vm5, %v9720_v47  ;;  %v17234_v44 = vld [vmem:[#allocation3 + $0x78] sm:$0xff] }
 0x6f8   : > { %11018 = vst.msk [vmem:[%s17183_s16 + $0x8] sm:$0xff] %vm1441_vm5, %v10982_v7  ;;  %v10791_v48 = vld [vmem:[#allocation4 + $0x10] sm:$0xff] }
 0x6f9   : > { %v10831_v50 = vmul.f32 %v17158_v9, %v10791_v48  ;;  %10756 = vst.msk [vmem:[#allocation4 + $0x18] sm:$0xff] %vm1441_vm5, %v10720_v35  ;;  %13174 = vmatmul.msk.bf16.gmra.mxu3 %vm1441_vm5, %v10501_v12  ;;  %v10504_v35 = vrot.slane %v17234_v44, 3 }
 0x6fb   : > { %v10871_v49 = vadd.f32 %v17165_v0, %v10831_v50  ;;  %v10206_v54 = vpop.f32.mrf.mxu2  ;;  %v9635_v3 = vpop.f32.mrf.mxu1 }
 0x6fc   : > { %v10296_v20 = vadd.f32 %v10260_v24, %v10206_v54  ;;  %v9721_v15 = vadd.f32 %v9685_v28, %v9635_v3  ;;  %v10601_v56 = vpop.f32.mrf.mxu3 }
 0x6fd   : > { %vm10907_vm4 = vcmp.ge.f32.partialorder %v10871_v49, 0.0  ;;  %v10947_v57 = vmul.f32 %v17174_v5, %v10871_v49  ;;  %v10721_v60 = vadd.f32 %v10685_v40, %v10601_v56 }
 0x6fe   : > { %10332 = vst.msk [vmem:[#allocation4 + $0xc0] sm:$0xff] %vm1441_vm5, %v10296_v20  ;;  %v10262_v18 = vld [vmem:[#allocation4 + $0xd0] sm:$0xff]  ;;  %v9689_v20 = vld [vmem:[#allocation4 + $0xf8] sm:$0xff] }
 0x6ff   : > { %v10983_v42 = vsel %vm10907_vm4, %v10871_v49, %v10947_v57  ;;  %9757 = vst.msk [vmem:[#allocation4 + $0xd8] sm:$0xff] %vm1441_vm5, %v9721_v15  ;;  %v10505_v49 = vsel %vm5226_vm9, %v10502_v21, %v10504_v35  ;;  %v10690_v21 = vld [vmem:[#allocation4 + $0x48] sm:$0xff] }
 0x700   : > { %11019 = vst.msk [vmem:[%s17183_s16 + $0x10] sm:$0xff] %vm1441_vm5, %v10983_v42  ;;  %v10792_v51 = vld [vmem:[#allocation4 + $0x18] sm:$0xff] }
 0x701   : > { %v10832_v53 = vmul.f32 %v17158_v9, %v10792_v51  ;;  %10757 = vst.msk [vmem:[#allocation4 + $0x20] sm:$0xff] %vm1441_vm5, %v10721_v60  ;;  %v10689_v60 = vld [vmem:[#allocation4 + $0x40] sm:$0xff] }
 0x703   : > { %v10872_v52 = vadd.f32 %v17165_v0, %v10832_v53  ;;  %v10208_v23 = vpop.f32.mrf.mxu2  ;;  %v9638_v29 = vpop.f32.mrf.mxu1 }
 0x704   : > { %v10297_v58 = vadd.f32 %v10261_v1, %v10208_v23  ;;  %v9722_v27 = vadd.f32 %v9686_v22, %v9638_v29  ;;  %v10603_v4 = vpop.f32.mrf.mxu3 }
 0x705   : > { %vm10908_vm6 = vcmp.ge.f32.partialorder %v10872_v52, 0.0  ;;  %v10948_v25 = vmul.f32 %v17174_v5, %v10872_v52  ;;  %v10722_v46 = vadd.f32 %v10686_v36, %v10603_v4 }
 0x706   : > { %10333 = vst.msk [vmem:[#allocation4 + $0xc8] sm:$0xff] %vm1441_vm5, %v10297_v58  ;;  %v10263_v38 = vld [vmem:[#allocation4 + $0xd8] sm:$0xff]  ;;  %v9690_v58 = vld [vmem:[#allocation4 + $0x100] sm:$0xff] }
 0x707   : > { %v10984_v16 = vsel %vm10908_vm6, %v10872_v52, %v10948_v25  ;;  %9758 = vst.msk [vmem:[#allocation4 + $0xe0] sm:$0xff] %vm1441_vm5, %v9722_v27  ;;  %v17255_v52 = vld [vmem:[#allocation3 + $0x80] sm:$0xff] }
 0x708   : > { %11020 = vst.msk [vmem:[%s17183_s16 + $0x18] sm:$0xff] %vm1441_vm5, %v10984_v16  ;;  %v10793_v43 = vld [vmem:[#allocation4 + $0x20] sm:$0xff] }
 0x709   : > { %v10833_v45 = vmul.f32 %v17158_v9, %v10793_v43  ;;  %10758 = vst.msk [vmem:[#allocation4 + $0x28] sm:$0xff] %vm1441_vm5, %v10722_v46  ;;  %13175 = vmatmul.msk.bf16.gmra.mxu3 %vm1441_vm5, %v10503_v62  ;;  %v10506_v46 = vrot.slane %v17255_v52, 3 }
 0x70b   : > { %v10873_v32 = vadd.f32 %v17165_v0, %v10833_v45  ;;  %v10211_v11 = vpop.f32.mrf.mxu2  ;;  %v9640_v6 = vpop.f32.mrf.mxu1 }
 0x70c   : > { %v10298_v2 = vadd.f32 %v10262_v18, %v10211_v11  ;;  %v9723_v17 = vadd.f32 %v9687_v19, %v9640_v6  ;;  %v10606_v61 = vpop.f32.mrf.mxu3 }
 0x70d   : > { %vm10909_vm7 = vcmp.ge.f32.partialorder %v10873_v32, 0.0  ;;  %v10949_v34 = vmul.f32 %v17174_v5, %v10873_v32  ;;  %v10723_v39 = vadd.f32 %v10687_v30, %v10606_v61 }
 0x70e   : > { %10334 = vst.msk [vmem:[#allocation4 + $0xd0] sm:$0xff] %vm1441_vm5, %v10298_v2  ;;  %v10264_v3 = vld [vmem:[#allocation4 + $0xe0] sm:$0xff]  ;;  %v9691_v2 = vld [vmem:[#allocation4 + $0x108] sm:$0xff] }
 0x70f   : > { %v10985_v37 = vsel %vm10909_vm7, %v10873_v32, %v10949_v34  ;;  %9759 = vst.msk [vmem:[#allocation4 + $0xe8] sm:$0xff] %vm1441_vm5, %v9723_v17  ;;  %v10507_v32 = vsel %vm5226_vm9, %v10504_v35, %v10506_v46  ;;  %v10692_v35 = vld [vmem:[#allocation4 + $0x58] sm:$0xff] }
 0x710   : > { %11021 = vst.msk [vmem:[%s17183_s16 + $0x20] sm:$0xff] %vm1441_vm5, %v10985_v37  ;;  %v10794_v14 = vld [vmem:[#allocation4 + $0x28] sm:$0xff] }
 0x711   : > { %v10834_v55 = vmul.f32 %v17158_v9, %v10794_v14  ;;  %10759 = vst.msk [vmem:[#allocation4 + $0x30] sm:$0xff] %vm1441_vm5, %v10723_v39  ;;  %v10691_v39 = vld [vmem:[#allocation4 + $0x50] sm:$0xff] }
 0x713   : > { %v10874_v8 = vadd.f32 %v17165_v0, %v10834_v55  ;;  %v10213_v31 = vpop.f32.mrf.mxu2  ;;  %v9643_v33 = vpop.f32.mrf.mxu1 }
 0x714   : > { %v10299_v41 = vadd.f32 %v10263_v38, %v10213_v31  ;;  %v9724_v63 = vadd.f32 %v9688_v10, %v9643_v33  ;;  %v10608_v13 = vpop.f32.mrf.mxu3 }
 0x715   : > { %vm10910_vm8 = vcmp.ge.f32.partialorder %v10874_v8, 0.0  ;;  %v10950_v47 = vmul.f32 %v17174_v5, %v10874_v8  ;;  %v10724_v7 = vadd.f32 %v10688_v26, %v10608_v13 }
 0x716   : > { %10335 = vst.msk [vmem:[#allocation4 + $0xd8] sm:$0xff] %vm1441_vm5, %v10299_v41  ;;  %v10265_v29 = vld [vmem:[#allocation4 + $0xe8] sm:$0xff]  ;;  %v9692_v41 = vld [vmem:[#allocation4 + $0x110] sm:$0xff] }
 0x717   : > { %v10986_v48 = vsel %vm10910_vm8, %v10874_v8, %v10950_v47  ;;  %9760 = vst.msk [vmem:[#allocation4 + $0xf0] sm:$0xff] %vm1441_vm5, %v9724_v63  ;;  %v13583_v8 = vld [vmem:[#allocation3 + $0x88] sm:$0xff] }
 0x718   : > { %11022 = vst.msk [vmem:[%s17183_s16 + $0x28] sm:$0xff] %vm1441_vm5, %v10986_v48  ;;  %v10795_v50 = vld [vmem:[#allocation4 + $0x30] sm:$0xff] }
 0x719   : > { %v10835_v12 = vmul.f32 %v17158_v9, %v10795_v50  ;;  %10760 = vst.msk [vmem:[#allocation4 + $0x38] sm:$0xff] %vm1441_vm5, %v10724_v7  ;;  %13176 = vmatmul.msk.bf16.gmra.mxu3 %vm1441_vm5, %v10505_v49  ;;  %v10508_v7 = vrot.slane %v13583_v8, 3 }
 0x71b   : > { %v10875_v54 = vadd.f32 %v17165_v0, %v10835_v12  ;;  %v10216_v24 = vpop.f32.mrf.mxu2  ;;  %v9645_v28 = vpop.f32.mrf.mxu1 }
 0x71c   : > { %v10300_v57 = vadd.f32 %v10264_v3, %v10216_v24  ;;  %v9725_v56 = vadd.f32 %v9689_v20, %v9645_v28  ;;  %v10611_v40 = vpop.f32.mrf.mxu3 }
 0x71d   : > { %vm10911_vm12 = vcmp.ge.f32.partialorder %v10875_v54, 0.0  ;;  %v10951_v15 = vmul.f32 %v17174_v5, %v10875_v54  ;;  %v10725_v42 = vadd.f32 %v10689_v60, %v10611_v40 }
 0x71e   : > { %10336 = vst.msk [vmem:[#allocation4 + $0xe0] sm:$0xff] %vm1441_vm5, %v10300_v57  ;;  %v10266_v6 = vld [vmem:[#allocation4 + $0xf0] sm:$0xff]  ;;  %v9693_v57 = vld [vmem:[#allocation4 + $0x118] sm:$0xff] }
 0x71f   : > { %v10987_v51 = vsel %vm10911_vm12, %v10875_v54, %v10951_v15  ;;  %9761 = vst.msk [vmem:[#allocation4 + $0xf8] sm:$0xff] %vm1441_vm5, %v9725_v56  ;;  %v10509_v54 = vsel %vm5226_vm9, %v10506_v46, %v10508_v7 }
 0x720   : > { %11023 = vst.msk [vmem:[%s17183_s16 + $0x30] sm:$0xff] %vm1441_vm5, %v10987_v51  ;;  %v10796_v53 = vld [vmem:[#allocation4 + $0x38] sm:$0xff] }
 0x721   : > { %v10836_v59 = vmul.f32 %v17158_v9, %v10796_v53  ;;  %10761 = vst.msk [vmem:[#allocation4 + $0x40] sm:$0xff] %vm1441_vm5, %v10725_v42  ;;  %v10693_v42 = vld [vmem:[#allocation4 + $0x60] sm:$0xff] }
 0x723   : > { %v10876_v23 = vadd.f32 %v17165_v0, %v10836_v59  ;;  %v10218_v1 = vpop.f32.mrf.mxu2  ;;  %v9648_v22 = vpop.f32.mrf.mxu1 }
 0x724   : > { %v10301_v25 = vadd.f32 %v10265_v29, %v10218_v1  ;;  %v9726_v4 = vadd.f32 %v9690_v58, %v9648_v22  ;;  %v10613_v36 = vpop.f32.mrf.mxu3 }
 0x725   : > { %vm10912_vm10 = vcmp.ge.f32.partialorder %v10876_v23, 0.0  ;;  %v10952_v27 = vmul.f32 %v17174_v5, %v10876_v23  ;;  %v10726_v16 = vadd.f32 %v10690_v21, %v10613_v36 }
 0x726   : > { %10337 = vst.msk [vmem:[#allocation4 + $0xe8] sm:$0xff] %vm1441_vm5, %v10301_v25  ;;  %v10267_v33 = vld [vmem:[#allocation4 + $0xf8] sm:$0xff] }
 0x727   : > { %v10988_v43 = vsel %vm10912_vm10, %v10876_v23, %v10952_v27  ;;  %9762 = vst.msk [vmem:[#allocation4 + $0x100] sm:$0xff] %vm1441_vm5, %v9726_v4  ;;  %v13584_v23 = vld [vmem:[#allocation3 + $0x90] sm:$0xff] }
 0x728   : > { %11024 = vst.msk [vmem:[%s17183_s16 + $0x38] sm:$0xff] %vm1441_vm5, %v10988_v43  ;;  %v10797_v45 = vld [vmem:[#allocation4 + $0x40] sm:$0xff]  ;;  %v10694_v4 = vld [vmem:[#allocation4 + $0x68] sm:$0xff]  ;;  %v10510_v36 = vrot.slane %v13584_v23, 3 }
 0x729   : > { %v10837_v62 = vmul.f32 %v17158_v9, %v10797_v45  ;;  %10762 = vst.msk [vmem:[#allocation4 + $0x48] sm:$0xff] %vm1441_vm5, %v10726_v16  ;;  %13177 = vmatmul.msk.bf16.gmra.mxu3 %vm1441_vm5, %v10507_v32 }
 0x72a   : > { %v10511_v45 = vsel %vm5226_vm9, %v10508_v7, %v10510_v36 }
 0x72b   : > { %v10877_v11 = vadd.f32 %v17165_v0, %v10837_v62  ;;  %v10221_v18 = vpop.f32.mrf.mxu2  ;;  %v9650_v19 = vpop.f32.mrf.mxu1 }
 0x72c   : > { %v10302_v34 = vadd.f32 %v10266_v6, %v10221_v18  ;;  %v9727_v61 = vadd.f32 %v9691_v2, %v9650_v19  ;;  %v10616_v30 = vpop.f32.mrf.mxu3  ;;  %v10695_v2 = vld [vmem:[#allocation4 + $0x70] sm:$0xff] }
 0x72d   : > { %vm10913_vm15 = vcmp.ge.f32.partialorder %v10877_v11, 0.0  ;;  %v10953_v17 = vmul.f32 %v17174_v5, %v10877_v11  ;;  %v10727_v37 = vadd.f32 %v10691_v39, %v10616_v30  ;;  %v13585_v39 = vld [vmem:[#allocation3 + $0x98] sm:$0xff] }
 0x72e   : > { %10338 = vst.msk [vmem:[#allocation4 + $0xf0] sm:$0xff] %vm1441_vm5, %v10302_v34  ;;  %v10268_v28 = vld [vmem:[#allocation4 + $0x100] sm:$0xff] }
 0x72f   : > { %v10989_v14 = vsel %vm10913_vm15, %v10877_v11, %v10953_v17  ;;  %9763 = vst.msk [vmem:[#allocation4 + $0x108] sm:$0xff] %vm1441_vm5, %v9727_v61 }
 0x730   : > { %11025 = vst.msk [vmem:[%s17183_s16 + $0x40] sm:$0xff] %vm1441_vm5, %v10989_v14  ;;  %v10798_v55 = vld [vmem:[#allocation4 + $0x48] sm:$0xff] }
 0x731   : > { %v10838_v44 = vmul.f32 %v17158_v9, %v10798_v55  ;;  %10763 = vst.msk [vmem:[#allocation4 + $0x50] sm:$0xff] %vm1441_vm5, %v10727_v37 }
 0x733   : > { %v10878_v31 = vadd.f32 %v17165_v0, %v10838_v44  ;;  %v10223_v38 = vpop.f32.mrf.mxu2  ;;  %v9653_v10 = vpop.f32.mrf.mxu1 }
 0x734   : > { %v10303_v47 = vadd.f32 %v10267_v33, %v10223_v38  ;;  %v9728_v13 = vadd.f32 %v9692_v41, %v9653_v10  ;;  %v10618_v26 = vpop.f32.mrf.mxu3  ;;  %v10696_v38 = vld [vmem:[#allocation4 + $0x78] sm:$0xff]  ;;  %v10512_v33 = vrot.slane %v13585_v39, 3 }
 0x735   : > { %vm10914_vm2 = vcmp.ge.f32.partialorder %v10878_v31, 0.0  ;;  %v10954_v63 = vmul.f32 %v17174_v5, %v10878_v31  ;;  %v10728_v48 = vadd.f32 %v10692_v35, %v10618_v26  ;;  %v10380_v26 = vld [vmem:[#allocation3 + $0xa0] sm:$0x7] }
 0x736   : > { %10339 = vst.msk [vmem:[#allocation4 + $0xf8] sm:$0xff] %vm1441_vm5, %v10303_v47  ;;  %v10269_v22 = vld [vmem:[#allocation4 + $0x108] sm:$0xff] }
 0x737   : > { %v10990_v50 = vsel %vm10914_vm2, %v10878_v31, %v10954_v63  ;;  %9764 = vst.msk [vmem:[#allocation4 + $0x110] sm:$0xff] %vm1441_vm5, %v9728_v13  ;;  %v10513_v13 = vsel %vm5226_vm9, %v10510_v36, %v10512_v33 }
 0x738   : > { %11026 = vst.msk [vmem:[%s17183_s16 + $0x48] sm:$0xff] %vm1441_vm5, %v10990_v50  ;;  %v10799_v12 = vld [vmem:[#allocation4 + $0x50] sm:$0xff]  ;;  %v10697_v50 = vld [vmem:[#allocation4 + $0x80] sm:$0xff] }
 0x739   : > { %v10839_v49 = vmul.f32 %v17158_v9, %v10799_v12  ;;  %10764 = vst.msk [vmem:[#allocation4 + $0x58] sm:$0xff] %vm1441_vm5, %v10728_v48  ;;  %13178 = vmatmul.msk.bf16.gmra.mxu3 %vm1441_vm5, %v10509_v54  ;;  %v10459_v12 = vunpack.c.l.b16 %v10380_v26 }
 0x73b   : > { %v10879_v24 = vadd.f32 %v17165_v0, %v10839_v49  ;;  %v10226_v3 = vpop.f32.mrf.mxu2  ;;  %v9655_v20 = vpop.f32.mrf.mxu1 }
 0x73c   : > { %v10304_v15 = vadd.f32 %v10268_v28, %v10226_v3  ;;  %v9729_v40 = vadd.f32 %v9693_v57, %v9655_v20  ;;  %v10621_v60 = vpop.f32.mrf.mxu3  ;;  %v10478_v28 = vpack.c.b16 %v10459_v12, %v10459_v12 }
 0x73d   : > { %vm10915_vm0 = vcmp.ge.f32.partialorder %v10879_v24, 0.0  ;;  %v10955_v56 = vmul.f32 %v17174_v5, %v10879_v24  ;;  %v10729_v51 = vadd.f32 %v10693_v42, %v10621_v60 }
 0x73e   : > { %10340 = vst.msk [vmem:[#allocation4 + $0x100] sm:$0xff] %vm1441_vm5, %v10304_v15  ;;  %v10270_v11 = vld [vmem:[#allocation4 + $0x110] sm:$0xff] }
 0x73f   : > { %v10991_v53 = vsel %vm10915_vm0, %v10879_v24, %v10955_v56  ;;  %9765 = vst.msk [vmem:[#allocation4 + $0x118] sm:$0xff] %vm1441_vm5, %v9729_v40  ;;  %v10698_v56 = vld [vmem:[#allocation4 + $0x88] sm:$0xff]  ;;  %v10514_v40 = vrot.slane %v10478_v28, 3 }
 0x740   : > { %11027 = vst.msk [vmem:[%s17183_s16 + $0x50] sm:$0xff] %vm1441_vm5, %v10991_v53  ;;  %v10800_v59 = vld [vmem:[#allocation4 + $0x58] sm:$0xff] }
 0x741   : > { %v10840_v52 = vmul.f32 %v17158_v9, %v10800_v59  ;;  %10765 = vst.msk [vmem:[#allocation4 + $0x60] sm:$0xff] %vm1441_vm5, %v10729_v51  ;;  %v10515_v59 = vsel %vm5226_vm9, %v10512_v33, %v10514_v40 }
 0x743   : > { %v10880_v1 = vadd.f32 %v17165_v0, %v10840_v52  ;;  %v10228_v29 = vpop.f32.mrf.mxu2 }
 0x744   : > { %v10305_v58 = vadd.f32 %v10269_v22, %v10228_v29  ;;  %v10623_v27 = vpop.f32.mrf.mxu3  ;;  %v10699_v29 = vld [vmem:[#allocation4 + $0x90] sm:$0xff] }
 0x745   : > { %vm10916_vm13 = vcmp.ge.f32.partialorder %v10880_v1, 0.0  ;;  %v10956_v25 = vmul.f32 %v17174_v5, %v10880_v1  ;;  %v10730_v21 = vadd.f32 %v10694_v4, %v10623_v27 }
 0x746   : > { %10341 = vst.msk [vmem:[#allocation4 + $0x108] sm:$0xff] %vm1441_vm5, %v10305_v58  ;;  %v10271_v55 = vld [vmem:[#allocation4 + $0x118] sm:$0xff] }
 0x747   : > { %v10992_v46 = vsel %vm10916_vm13, %v10880_v1, %v10956_v25  ;;  %10766 = vst.msk [vmem:[#allocation4 + $0x68] sm:$0xff] %vm1441_vm5, %v10730_v21 }
 0x748   : > { %11028 = vst.msk [vmem:[%s17183_s16 + $0x58] sm:$0xff] %vm1441_vm5, %v10992_v46  ;;  %v10801_v16 = vld [vmem:[#allocation4 + $0x60] sm:$0xff]  ;;  %v10700_v46 = vld [vmem:[#allocation4 + $0x98] sm:$0xff] }
 0x749   : > { %v10841_v43 = vmul.f32 %v17158_v9, %v10801_v16  ;;  %13179 = vmatmul.msk.bf16.gmra.mxu3 %vm1441_vm5, %v10511_v45 }
 0x74b   : > { %v10881_v62 = vadd.f32 %v17165_v0, %v10841_v43  ;;  %v10231_v32 = vpop.f32.mrf.mxu2 }
 0x74c   : > { %v10306_v18 = vadd.f32 %v10270_v11, %v10231_v32  ;;  %v10626_v19 = vpop.f32.mrf.mxu3 }
 0x74d   : > { %vm10917_vm14 = vcmp.ge.f32.partialorder %v10881_v62, 0.0  ;;  %v10957_v6 = vmul.f32 %v17174_v5, %v10881_v62  ;;  %v10731_v34 = vadd.f32 %v10695_v2, %v10626_v19 }
 0x74e   : > { %10342 = vst.msk [vmem:[#allocation4 + $0x110] sm:$0xff] %vm1441_vm5, %v10306_v18  ;;  %v10802_v61 = vld [vmem:[#allocation4 + $0x68] sm:$0xff] }
 0x74f   : > { %v10993_v17 = vsel %vm10917_vm14, %v10881_v62, %v10957_v6  ;;  %v10842_v30 = vmul.f32 %v17158_v9, %v10802_v61  ;;  %10767 = vst.msk [vmem:[#allocation4 + $0x70] sm:$0xff] %vm1441_vm5, %v10731_v34  ;;  %v10701_v6 = vld [vmem:[#allocation4 + $0xa0] sm:$0xff] }
 0x750   : > { %11029 = vst.msk [vmem:[%s17183_s16 + $0x60] sm:$0xff] %vm1441_vm5, %v10993_v17 }
 0x751   : > { %v10882_v37 = vadd.f32 %v17165_v0, %v10842_v30 }
 0x753   : > { %v10233_v14 = vpop.f32.mrf.mxu2  ;;  %vm10918_vm11 = vcmp.ge.f32.partialorder %v10882_v37, 0.0  ;;  %v10958_v8 = vmul.f32 %v17174_v5, %v10882_v37 }
 0x754   : > { %v10307_v44 = vadd.f32 %v10271_v55, %v10233_v14  ;;  %v10628_v31 = vpop.f32.mrf.mxu3 }
 0x755   : > { %v10732_v10 = vadd.f32 %v10696_v38, %v10628_v31  ;;  %v10994_v41 = vsel %vm10918_vm11, %v10882_v37, %v10958_v8  ;;  %v10702_v37 = vld [vmem:[#allocation4 + $0xa8] sm:$0xff] }
 0x756   : > { %10343 = vst.msk [vmem:[#allocation4 + $0x118] sm:$0xff] %vm1441_vm5, %v10307_v44  ;;  %v10803_v47 = vld [vmem:[#allocation4 + $0x70] sm:$0xff] }
 0x757   : > { %11030 = vst.msk [vmem:[%s17183_s16 + $0x68] sm:$0xff] %vm1441_vm5, %v10994_v41  ;;  %v10843_v63 = vmul.f32 %v17158_v9, %v10803_v47 }
 0x758   : > { %10768 = vst.msk [vmem:[#allocation4 + $0x78] sm:$0xff] %vm1441_vm5, %v10732_v10  ;;  %v10703_v10 = vld [vmem:[#allocation4 + $0xb0] sm:$0xff] }
 0x759   : > { %13180 = vmatmul.msk.bf16.gmra.mxu3 %vm1441_vm5, %v10513_v13  ;;  %v10883_v35 = vadd.f32 %v17165_v0, %v10843_v63 }
 0x75b   : > { %vm10919_vm1 = vcmp.ge.f32.partialorder %v10883_v35, 0.0  ;;  %v10959_v7 = vmul.f32 %v17174_v5, %v10883_v35 }
 0x75c   : > { %v10631_v48 = vpop.f32.mrf.mxu3 }
 0x75d   : > { %v10733_v49 = vadd.f32 %v10697_v50, %v10631_v48  ;;  %v10995_v54 = vsel %vm10919_vm1, %v10883_v35, %v10959_v7  ;;  %v10704_v48 = vld [vmem:[#allocation4 + $0xb8] sm:$0xff] }
 0x75e   : > { %11031 = vst.msk [vmem:[%s17183_s16 + $0x70] sm:$0xff] %vm1441_vm5, %v10995_v54 }
 0x75f   : > { %v10804_v24 = vld [vmem:[#allocation4 + $0x78] sm:$0xff]  ;;  %10769 = vst.msk [vmem:[#allocation4 + $0x80] sm:$0xff] %vm1441_vm5, %v10733_v49 }
 0x760   : > { %v10844_v3 = vmul.f32 %v17158_v9, %v10804_v24 }
 0x762   : > { %v10884_v20 = vadd.f32 %v17165_v0, %v10844_v3 }
 0x764   : > { %vm10920_vm3 = vcmp.ge.f32.partialorder %v10884_v20, 0.0  ;;  %v10960_v57 = vmul.f32 %v17174_v5, %v10884_v20  ;;  %v10633_v15 = vpop.f32.mrf.mxu3 }
 0x765   : > { %v10734_v60 = vadd.f32 %v10698_v56, %v10633_v15 }
 0x766   : > { %v10996_v42 = vsel %vm10920_vm3, %v10884_v20, %v10960_v57  ;;  %v10805_v51 = vld [vmem:[#allocation4 + $0x80] sm:$0xff] }
 0x767   : > { %11032 = vst.msk [vmem:[%s17183_s16 + $0x78] sm:$0xff] %vm1441_vm5, %v10996_v42  ;;  %v10845_v53 = vmul.f32 %v17158_v9, %v10805_v51  ;;  %v10705_v20 = vld [vmem:[#allocation4 + $0xc0] sm:$0xff] }
 0x768   : > { %10770 = vst.msk [vmem:[#allocation4 + $0x88] sm:$0xff] %vm1441_vm5, %v10734_v60 }
 0x769   : > { %13181 = vmatmul.msk.bf16.gmra.mxu3 %vm1441_vm5, %v10515_v59  ;;  %v10885_v52 = vadd.f32 %v17165_v0, %v10845_v53  ;;  %v10706_v53 = vld [vmem:[#allocation4 + $0xc8] sm:$0xff] }
 0x76b   : > { %vm10921_vm4 = vcmp.ge.f32.partialorder %v10885_v52, 0.0  ;;  %v10961_v23 = vmul.f32 %v17174_v5, %v10885_v52 }
 0x76c   : > { %v10636_v1 = vpop.f32.mrf.mxu3 }
 0x76d   : > { %v10735_v22 = vadd.f32 %v10699_v29, %v10636_v1  ;;  %v10997_v58 = vsel %vm10921_vm4, %v10885_v52, %v10961_v23 }
 0x76e   : > { %11033 = vst.msk [vmem:[%s17183_s16 + $0x80] sm:$0xff] %vm1441_vm5, %v10997_v58 }
 0x76f   : > { %v10806_v25 = vld [vmem:[#allocation4 + $0x88] sm:$0xff]  ;;  %10771 = vst.msk [vmem:[#allocation4 + $0x90] sm:$0xff] %vm1441_vm5, %v10735_v22 }
 0x770   : > { %v10846_v27 = vmul.f32 %v17158_v9, %v10806_v25  ;;  %v10707_v25 = vld [vmem:[#allocation4 + $0xd0] sm:$0xff] }
 0x772   : > { %v10886_v4 = vadd.f32 %v17165_v0, %v10846_v27 }
 0x774   : > { %vm10922_vm9 = vcmp.ge.f32.partialorder %v10886_v4, 0.0  ;;  %v10962_v36 = vmul.f32 %v17174_v5, %v10886_v4  ;;  %v10638_v21 = vpop.f32.mrf.mxu3 }
 0x775   : > { %v10736_v16 = vadd.f32 %v10700_v46, %v10638_v21 }
 0x776   : > { %v10998_v43 = vsel %vm10922_vm9, %v10886_v4, %v10962_v36  ;;  %v10807_v45 = vld [vmem:[#allocation4 + $0x90] sm:$0xff] }
 0x777   : > { %11034 = vst.msk [vmem:[%s17183_s16 + $0x88] sm:$0xff] %vm1441_vm5, %v10998_v43  ;;  %v10847_v62 = vmul.f32 %v17158_v9, %v10807_v45  ;;  %v10708_v45 = vld [vmem:[#allocation4 + $0xd8] sm:$0xff] }
 0x778   : > { %10772 = vst.msk [vmem:[#allocation4 + $0x98] sm:$0xff] %vm1441_vm5, %v10736_v16 }
 0x779   : > { %v10887_v32 = vadd.f32 %v17165_v0, %v10847_v62 }
 0x77b   : > { %vm10923_vm6 = vcmp.ge.f32.partialorder %v10887_v32, 0.0  ;;  %v10963_v11 = vmul.f32 %v17174_v5, %v10887_v32 }
 0x77c   : > { %v10641_v18 = vpop.f32.mrf.mxu3 }
 0x77d   : > { %v10737_v19 = vadd.f32 %v10701_v6, %v10641_v18  ;;  %v10999_v2 = vsel %vm10923_vm6, %v10887_v32, %v10963_v11 }
 0x77e   : > { %11035 = vst.msk [vmem:[%s17183_s16 + $0x90] sm:$0xff] %vm1441_vm5, %v10999_v2 }
 0x77f   : > { %v10808_v34 = vld [vmem:[#allocation4 + $0x98] sm:$0xff]  ;;  %10773 = vst.msk [vmem:[#allocation4 + $0xa0] sm:$0xff] %vm1441_vm5, %v10737_v19 }
 0x780   : > { %v10848_v17 = vmul.f32 %v17158_v9, %v10808_v34  ;;  %v10709_v34 = vld [vmem:[#allocation4 + $0xe0] sm:$0xff] }
 0x782   : > { %v10888_v61 = vadd.f32 %v17165_v0, %v10848_v17 }
 0x784   : > { %vm10924_vm7 = vcmp.ge.f32.partialorder %v10888_v61, 0.0  ;;  %v10964_v30 = vmul.f32 %v17174_v5, %v10888_v61  ;;  %v10643_v39 = vpop.f32.mrf.mxu3 }
 0x785   : > { %v10738_v14 = vadd.f32 %v10702_v37, %v10643_v39 }
 0x786   : > { %v11000_v55 = vsel %vm10924_vm7, %v10888_v61, %v10964_v30  ;;  %v10809_v44 = vld [vmem:[#allocation4 + $0xa0] sm:$0xff] }
 0x787   : > { %11036 = vst.msk [vmem:[%s17183_s16 + $0x98] sm:$0xff] %vm1441_vm5, %v11000_v55  ;;  %v10849_v8 = vmul.f32 %v17158_v9, %v10809_v44  ;;  %v10710_v44 = vld [vmem:[#allocation4 + $0xe8] sm:$0xff] }
 0x788   : > { %10774 = vst.msk [vmem:[#allocation4 + $0xa8] sm:$0xff] %vm1441_vm5, %v10738_v14 }
 0x789   : > { %v10889_v31 = vadd.f32 %v17165_v0, %v10849_v8 }
 0x78b   : > { %vm10925_vm8 = vcmp.ge.f32.partialorder %v10889_v31, 0.0  ;;  %v10965_v38 = vmul.f32 %v17174_v5, %v10889_v31 }
 0x78c   : > { %v10646_v33 = vpop.f32.mrf.mxu3 }
 0x78d   : > { %v10739_v41 = vadd.f32 %v10703_v10, %v10646_v33  ;;  %v11001_v47 = vsel %vm10925_vm8, %v10889_v31, %v10965_v38 }
 0x78e   : > { %11037 = vst.msk [vmem:[%s17183_s16 + $0xa0] sm:$0xff] %vm1441_vm5, %v11001_v47 }
 0x78f   : > { %v10810_v63 = vld [vmem:[#allocation4 + $0xa8] sm:$0xff]  ;;  %10775 = vst.msk [vmem:[#allocation4 + $0xb0] sm:$0xff] %vm1441_vm5, %v10739_v41 }
 0x790   : > { %v10850_v13 = vmul.f32 %v17158_v9, %v10810_v63  ;;  %v10711_v63 = vld [vmem:[#allocation4 + $0xf0] sm:$0xff] }
 0x792   : > { %v10890_v26 = vadd.f32 %v17165_v0, %v10850_v13 }
 0x794   : > { %vm10926_vm12 = vcmp.ge.f32.partialorder %v10890_v26, 0.0  ;;  %v10966_v35 = vmul.f32 %v17174_v5, %v10890_v26  ;;  %v10648_v7 = vpop.f32.mrf.mxu3 }
 0x795   : > { %v10740_v50 = vadd.f32 %v10704_v48, %v10648_v7 }
 0x796   : > { %v11002_v12 = vsel %vm10926_vm12, %v10890_v26, %v10966_v35  ;;  %v10811_v49 = vld [vmem:[#allocation4 + $0xb0] sm:$0xff] }
 0x797   : > { %11038 = vst.msk [vmem:[%s17183_s16 + $0xa8] sm:$0xff] %vm1441_vm5, %v11002_v12  ;;  %v10851_v54 = vmul.f32 %v17158_v9, %v10811_v49  ;;  %v10712_v49 = vld [vmem:[#allocation4 + $0xf8] sm:$0xff] }
 0x798   : > { %10776 = vst.msk [vmem:[#allocation4 + $0xb8] sm:$0xff] %vm1441_vm5, %v10740_v50 }
 0x799   : > { %v10891_v24 = vadd.f32 %v17165_v0, %v10851_v54 }
 0x79b   : > { %vm10927_vm10 = vcmp.ge.f32.partialorder %v10891_v24, 0.0  ;;  %v10967_v3 = vmul.f32 %v17174_v5, %v10891_v24 }
 0x79c   : > { %v10651_v28 = vpop.f32.mrf.mxu3 }
 0x79d   : > { %v10741_v57 = vadd.f32 %v10705_v20, %v10651_v28  ;;  %v11003_v15 = vsel %vm10927_vm10, %v10891_v24, %v10967_v3 }
 0x79e   : > { %11039 = vst.msk [vmem:[%s17183_s16 + $0xb0] sm:$0xff] %vm1441_vm5, %v11003_v15 }
 0x79f   : > { %v10812_v56 = vld [vmem:[#allocation4 + $0xb8] sm:$0xff]  ;;  %10777 = vst.msk [vmem:[#allocation4 + $0xc0] sm:$0xff] %vm1441_vm5, %v10741_v57 }
 0x7a0   : > { %v10852_v40 = vmul.f32 %v17158_v9, %v10812_v56  ;;  %v10713_v56 = vld [vmem:[#allocation4 + $0x100] sm:$0xff] }
 0x7a2   : > { %v10892_v60 = vadd.f32 %v17165_v0, %v10852_v40 }
 0x7a4   : > { %vm10928_vm15 = vcmp.ge.f32.partialorder %v10892_v60, 0.0  ;;  %v10968_v42 = vmul.f32 %v17174_v5, %v10892_v60  ;;  %v10653_v51 = vpop.f32.mrf.mxu3 }
 0x7a5   : > { %v10742_v59 = vadd.f32 %v10706_v53, %v10653_v51 }
 0x7a6   : > { %v11004_v52 = vsel %vm10928_vm15, %v10892_v60, %v10968_v42  ;;  %v10813_v23 = vld [vmem:[#allocation4 + $0xc0] sm:$0xff] }
 0x7a7   : > { %11040 = vst.msk [vmem:[%s17183_s16 + $0xb8] sm:$0xff] %vm1441_vm5, %v11004_v52  ;;  %v10853_v1 = vmul.f32 %v17158_v9, %v10813_v23  ;;  %v10714_v23 = vld [vmem:[#allocation4 + $0x108] sm:$0xff] }
 0x7a8   : > { %10778 = vst.msk [vmem:[#allocation4 + $0xc8] sm:$0xff] %vm1441_vm5, %v10742_v59 }
 0x7a9   : > { %v10893_v29 = vadd.f32 %v17165_v0, %v10853_v1 }
 0x7ab   : > { %vm10929_vm2 = vcmp.ge.f32.partialorder %v10893_v29, 0.0  ;;  %v10969_v22 = vmul.f32 %v17174_v5, %v10893_v29 }
 0x7ac   : > { %v10656_v58 = vpop.f32.mrf.mxu3 }
 0x7ad   : > { %v10743_v27 = vadd.f32 %v10707_v25, %v10656_v58  ;;  %v11005_v4 = vsel %vm10929_vm2, %v10893_v29, %v10969_v22 }
 0x7ae   : > { %11041 = vst.msk [vmem:[%s17183_s16 + $0xc0] sm:$0xff] %vm1441_vm5, %v11005_v4 }
 0x7af   : > { %v10814_v36 = vld [vmem:[#allocation4 + $0xc8] sm:$0xff]  ;;  %10779 = vst.msk [vmem:[#allocation4 + $0xd0] sm:$0xff] %vm1441_vm5, %v10743_v27 }
 0x7b0   : > { %v10854_v21 = vmul.f32 %v17158_v9, %v10814_v36  ;;  %v10715_v36 = vld [vmem:[#allocation4 + $0x110] sm:$0xff] }
 0x7b2   : > { %v10894_v46 = vadd.f32 %v17165_v0, %v10854_v21 }
 0x7b4   : > { %vm10930_vm0 = vcmp.ge.f32.partialorder %v10894_v46, 0.0  ;;  %v10970_v16 = vmul.f32 %v17174_v5, %v10894_v46  ;;  %v10658_v43 = vpop.f32.mrf.mxu3 }
 0x7b5   : > { %v10744_v62 = vadd.f32 %v10708_v45, %v10658_v43  ;;  %v13631_v43 = vld [vmem:[%s17464_s9] ss:$0 sm:$0xff] }
 0x7b6   : > { %v11006_v32 = vsel %vm10930_vm0, %v10894_v46, %v10970_v16  ;;  %v10815_v11 = vld [vmem:[#allocation4 + $0xd0] sm:$0xff] }
 0x7b7   : > { %11042 = vst.msk [vmem:[%s17183_s16 + $0xc8] sm:$0xff] %vm1441_vm5, %v11006_v32  ;;  %v10855_v18 = vmul.f32 %v17158_v9, %v10815_v11  ;;  %v10716_v11 = vld [vmem:[#allocation4 + $0x118] sm:$0xff] }
 0x7b8   : > { %10780 = vst.msk [vmem:[#allocation4 + $0xd8] sm:$0xff] %vm1441_vm5, %v10744_v62 }
 0x7b9   : > { %v10895_v6 = vadd.f32 %v17165_v0, %v10855_v18 }
 0x7bb   : > { %vm10931_vm13 = vcmp.ge.f32.partialorder %v10895_v6, 0.0  ;;  %v10971_v19 = vmul.f32 %v17174_v5, %v10895_v6 }
 0x7bc   : > { %v10661_v2 = vpop.f32.mrf.mxu3 }
 0x7bd   : > { %v10745_v17 = vadd.f32 %v10709_v34, %v10661_v2  ;;  %v11007_v61 = vsel %vm10931_vm13, %v10895_v6, %v10971_v19  ;;  %v13632_v34 = vld [vmem:[%s17465_s10] ss:$0 sm:$0xff] }
 0x7be   : > { %11043 = vst.msk [vmem:[%s17183_s16 + $0xd0] sm:$0xff] %vm1441_vm5, %v11007_v61 }
 0x7bf   : > { %v10816_v30 = vld [vmem:[#allocation4 + $0xd8] sm:$0xff]  ;;  %10781 = vst.msk [vmem:[#allocation4 + $0xe0] sm:$0xff] %vm1441_vm5, %v10745_v17 }
 0x7c0   : > { %v10856_v39 = vmul.f32 %v17158_v9, %v10816_v30 }
 0x7c2   : > { %v10896_v37 = vadd.f32 %v17165_v0, %v10856_v39 }
 0x7c4   : > { %vm10932_vm14 = vcmp.ge.f32.partialorder %v10896_v37, 0.0  ;;  %v10972_v14 = vmul.f32 %v17174_v5, %v10896_v37  ;;  %v10663_v55 = vpop.f32.mrf.mxu3 }
 0x7c5   : > { %v10746_v8 = vadd.f32 %v10710_v44, %v10663_v55 }
 0x7c6   : > { %v11008_v31 = vsel %vm10932_vm14, %v10896_v37, %v10972_v14  ;;  %v10817_v38 = vld [vmem:[#allocation4 + $0xe0] sm:$0xff] }
 0x7c7   : > { %11044 = vst.msk [vmem:[%s17183_s16 + $0xd8] sm:$0xff] %vm1441_vm5, %v11008_v31  ;;  %v10857_v33 = vmul.f32 %v17158_v9, %v10817_v38 }
 0x7c8   : > { %10782 = vst.msk [vmem:[#allocation4 + $0xe8] sm:$0xff] %vm1441_vm5, %v10746_v8 }
 0x7c9   : > { %v10897_v10 = vadd.f32 %v17165_v0, %v10857_v33 }
 0x7cb   : > { %vm10933_vm11 = vcmp.ge.f32.partialorder %v10897_v10, 0.0  ;;  %v10973_v41 = vmul.f32 %v17174_v5, %v10897_v10 }
 0x7cc   : > { %v10666_v47 = vpop.f32.mrf.mxu3 }
 0x7cd   : > { %v10747_v13 = vadd.f32 %v10711_v63, %v10666_v47  ;;  %v11009_v26 = vsel %vm10933_vm11, %v10897_v10, %v10973_v41 }
 0x7ce   : > { %11045 = vst.msk [vmem:[%s17183_s16 + $0xe0] sm:$0xff] %vm1441_vm5, %v11009_v26 }
 0x7cf   : > { %v10818_v35 = vld [vmem:[#allocation4 + $0xe8] sm:$0xff]  ;;  %10783 = vst.msk [vmem:[#allocation4 + $0xf0] sm:$0xff] %vm1441_vm5, %v10747_v13 }
 0x7d0   : > { %v10858_v7 = vmul.f32 %v17158_v9, %v10818_v35 }
 0x7d2   : > { %v10898_v48 = vadd.f32 %v17165_v0, %v10858_v7 }
 0x7d4   : > { %vm10934_vm1 = vcmp.ge.f32.partialorder %v10898_v48, 0.0  ;;  %v10974_v50 = vmul.f32 %v17174_v5, %v10898_v48  ;;  %v10668_v12 = vpop.f32.mrf.mxu3 }
 0x7d5   : > { %v10748_v54 = vadd.f32 %v10712_v49, %v10668_v12 }
 0x7d6   : > { %v11010_v24 = vsel %vm10934_vm1, %v10898_v48, %v10974_v50  ;;  %v10819_v3 = vld [vmem:[#allocation4 + $0xf0] sm:$0xff] }
 0x7d7   : > { %11046 = vst.msk [vmem:[%s17183_s16 + $0xe8] sm:$0xff] %vm1441_vm5, %v11010_v24  ;;  %v10859_v28 = vmul.f32 %v17158_v9, %v10819_v3 }
 0x7d8   : > { %10784 = vst.msk [vmem:[#allocation4 + $0xf8] sm:$0xff] %vm1441_vm5, %v10748_v54 }
 0x7d9   : > { %v10899_v20 = vadd.f32 %v17165_v0, %v10859_v28 }
 0x7db   : > { %vm10935_vm3 = vcmp.ge.f32.partialorder %v10899_v20, 0.0  ;;  %v10975_v57 = vmul.f32 %v17174_v5, %v10899_v20 }
 0x7dc   : > { %v10671_v15 = vpop.f32.mrf.mxu3 }
 0x7dd   : > { %v10749_v40 = vadd.f32 %v10713_v56, %v10671_v15  ;;  %v11011_v60 = vsel %vm10935_vm3, %v10899_v20, %v10975_v57 }
 0x7de   : > { %11047 = vst.msk [vmem:[%s17183_s16 + $0xf0] sm:$0xff] %vm1441_vm5, %v11011_v60 }
 0x7df   : > { %v10820_v42 = vld [vmem:[#allocation4 + $0xf8] sm:$0xff]  ;;  %10785 = vst.msk [vmem:[#allocation4 + $0x100] sm:$0xff] %vm1441_vm5, %v10749_v40 }
 0x7e0   : > { %v10860_v51 = vmul.f32 %v17158_v9, %v10820_v42 }
 0x7e2   : > { %v10900_v53 = vadd.f32 %v17165_v0, %v10860_v51 }
 0x7e4   : > { %vm10936_vm4 = vcmp.ge.f32.partialorder %v10900_v53, 0.0  ;;  %v10976_v59 = vmul.f32 %v17174_v5, %v10900_v53  ;;  %v10673_v52 = vpop.f32.mrf.mxu3 }
 0x7e5   : > { %v10750_v1 = vadd.f32 %v10714_v23, %v10673_v52 }
 0x7e6   : > { %v11012_v29 = vsel %vm10936_vm4, %v10900_v53, %v10976_v59  ;;  %v10821_v22 = vld [vmem:[#allocation4 + $0x100] sm:$0xff] }
 0x7e7   : > { %11048 = vst.msk [vmem:[%s17183_s16 + $0xf8] sm:$0xff] %vm1441_vm5, %v11012_v29  ;;  %v10861_v58 = vmul.f32 %v17158_v9, %v10821_v22 }
 0x7e8   : > { %10786 = vst.msk [vmem:[#allocation4 + $0x108] sm:$0xff] %vm1441_vm5, %v10750_v1 }
 0x7e9   : > { %v10901_v25 = vadd.f32 %v17165_v0, %v10861_v58 }
 0x7eb   : > { %vm10937_vm9 = vcmp.ge.f32.partialorder %v10901_v25, 0.0  ;;  %v10977_v27 = vmul.f32 %v17174_v5, %v10901_v25 }
 0x7ec   : > { %v10676_v4 = vpop.f32.mrf.mxu3 }
 0x7ed   : > { %v10751_v21 = vadd.f32 %v10715_v36, %v10676_v4  ;;  %v11013_v46 = vsel %vm10937_vm9, %v10901_v25, %v10977_v27 }
 0x7ee   : > { %11049 = vst.msk [vmem:[%s17183_s16 + $0x100] sm:$0xff] %vm1441_vm5, %v11013_v46 }
 0x7ef   : > { %v10822_v16 = vld [vmem:[#allocation4 + $0x108] sm:$0xff]  ;;  %10787 = vst.msk [vmem:[#allocation4 + $0x110] sm:$0xff] %vm1441_vm5, %v10751_v21 }
 0x7f0   : > { %v10862_v9 = vmul.f32 %v13631_v43, %v10822_v16 }
 0x7f2   : > { %v10902_v45 = vadd.f32 %v17165_v0, %v10862_v9 }
 0x7f4   : > { %vm10938_vm6 = vcmp.ge.f32.partialorder %v10902_v45, 0.0  ;;  %v10978_v62 = vmul.f32 %v17174_v5, %v10902_v45  ;;  %v10678_v32 = vpop.f32.mrf.mxu3  ;;  %v13633_v5 = vld [vmem:[%s17466_s11] ss:$0 sm:$0xff] }
 0x7f5   : > { %v10752_v18 = vadd.f32 %v10716_v11, %v10678_v32 }
 0x7f6   : > { %v11014_v6 = vsel %vm10938_vm6, %v10902_v45, %v10978_v62  ;;  %v10823_v19 = vld [vmem:[#allocation4 + $0x110] sm:$0xff] }
 0x7f7   : > { %11050 = vst.msk [vmem:[%s17183_s16 + $0x108] sm:$0xff] %vm1441_vm5, %v11014_v6  ;;  %v10863_v2 = vmul.f32 %v13631_v43, %v10823_v19 }
 0x7f8   : > { %10788 = vst.msk [vmem:[#allocation4 + $0x118] sm:$0xff] %vm1441_vm5, %v10752_v18 }
 0x7f9   : > { %v10903_v0 = vadd.f32 %v13632_v34, %v10863_v2 }
 0x7fb   : > { %vm10939_vm7 = vcmp.ge.f32.partialorder %v10903_v0, 0.0  ;;  %v10979_v17 = vmul.f32 %v13633_v5, %v10903_v0 }
 0x7fd   : > { %v11015_v61 = vsel %vm10939_vm7, %v10903_v0, %v10979_v17 }
 0x7fe   : > { %11051 = vst.msk [vmem:[%s17183_s16 + $0x110] sm:$0xff] %vm1441_vm5, %v11015_v61 }
 0x7ff   : > { %v10824_v30 = vld [vmem:[#allocation4 + $0x118] sm:$0xff] }
 0x800   : > { %v10864_v39 = vmul.f32 %v13631_v43, %v10824_v30 }
 0x802   : > { %v10904_v37 = vadd.f32 %v13632_v34, %v10864_v39 }
 0x804   : > { %vm10940_vm8 = vcmp.ge.f32.partialorder %v10904_v37, 0.0  ;;  %v10980_v14 = vmul.f32 %v13633_v5, %v10904_v37 }
 0x806   : > { %v11016_v55 = vsel %vm10940_vm8, %v10904_v37, %v10980_v14 }
 0x807   : > { %11052 = vst.msk [vmem:[%s17183_s16 + $0x118] sm:$0xff] %vm1441_vm5, %v11016_v55 }
 0x808 PF: > { %s22_s21 = sadd.s32 1, %s13640_s21  }
 0x809   : > { %p19_p4 = scmp.ge.s32.totalorder %s22_s21, 4  }
 0x80b   :  { %21 = sbr.rel (!%p19_p4) target bundleno = 1 (0x1), region = 117 }

</bundles_post_ra>
